<compile_context>
chip_gen: v7x
topology: tpu7x:2x2x1
jax: 0.10.0
libtpu: 0.0.40
codegen_flags: <defaults>
</compile_context>

<pallas_src>
import functools
import math

import jax
import jax.numpy as jnp
from jax.experimental import pallas as pl
from jax.experimental.pallas import tpu as pltpu

EPS_LN = 1e-5
EPS_BN = 1e-5
NEG_INF = -1e9

# Row indices into the packed (NUM_VEC, D) parameter bank.
V_F1_G, V_F1_B, V_F1_B2 = 0, 1, 2
V_A_G, V_A_B = 3, 4
V_BQ, V_BK, V_BV, V_BO = 5, 6, 7, 8
V_C_G, V_C_B, V_BN_S, V_BN_B = 9, 10, 11, 12
V_F2_G, V_F2_B, V_F2_B2 = 13, 14, 15
V_FL_G, V_FL_B = 16, 17
NUM_VEC = 18
# Row indices into the packed (2, I) intermediate-bias bank.
I_F1_B1, I_F2_B1 = 0, 1


# ---------------------------------------------------------------------------
# In-kernel helpers (traced inside the Pallas body)
# ---------------------------------------------------------------------------
def _ln(x, g, b):
    mu = jnp.mean(x, axis=-1, keepdims=True)
    var = jnp.mean((x - mu) ** 2, axis=-1, keepdims=True)
    return (x - mu) * jax.lax.rsqrt(var + EPS_LN) * g + b


def _silu(x):
    return x * jax.nn.sigmoid(x)


def _ffn(x, g, b, w1, b1, w2, b2):
    """Pre-LN FFN: returns x + 0.5 * FFN(LN(x)). bf16 matmuls, f32 accumulation."""
    xn = _ln(x, g, b)
    h = jnp.dot(xn.astype(w1.dtype), w1, preferred_element_type=jnp.float32) + b1
    h = _silu(h)
    y = jnp.dot(h.astype(w2.dtype), w2, preferred_element_type=jnp.float32) + b2
    return x + 0.5 * y


# ---------------------------------------------------------------------------
# Fused kernel (Bt batch rows per grid step)
# ---------------------------------------------------------------------------
def conformer_kernel(
    x_ref, pos_ref, mask_ref, vec_ref, ivec_ref,
    f1_w1_ref, f1_w2_ref,
    wq_ref, wk_ref, wv_ref, wo_ref,
    pw1a_ref, pw1b_ref, dw_ref, pw2_ref,
    f2_w1_ref, f2_w2_ref,
    o_ref, *, num_heads, kernel_size):
    Bt, L, D = x_ref.shape
    H = num_heads
    hd = D // H
    M = Bt * L
    cdt = wq_ref.dtype          # MXU compute dtype (bf16)

    def vp(i):                  # (1, D) f32 parameter row from the packed bank
        return vec_ref[i:i + 1, :]

    def ip(i):                  # (1, I) f32 parameter row
        return ivec_ref[i:i + 1, :]

    # Row-flattened activation: (Bt, L, D) -> (Bt*L, D); all pointwise / FFN matmuls
    # operate on the full M = Bt*L rows (better MXU M utilization).
    x = x_ref[...].astype(jnp.float32).reshape(M, D)
    pos = pos_ref[0].astype(jnp.float32)                               # (L, D)

    # ---- FFN1: x + 0.5 * FFN(LN(x)) ----------------------------------------
    h = _ffn(x, vp(V_F1_G), vp(V_F1_B), f1_w1_ref[...], ip(I_F1_B1),
             f1_w2_ref[...], vp(V_F1_B2))

    # ---- Multi-head self-attention (pre-LN, residual) -----------------------
    an = _ln(h, vp(V_A_G), vp(V_A_B))                                  # (M, D)
    pos_f = jnp.concatenate([pos] * Bt, axis=0) if Bt > 1 else pos     # (M, D)
    ap = (an + pos_f).astype(cdt)
    anc = an.astype(cdt)

    # Full-width projections (1/sqrt(hd) folded into wq/bq at prepare time).
    q = jnp.dot(ap, wq_ref[...], preferred_element_type=jnp.float32) + vp(V_BQ)
    k = jnp.dot(ap, wk_ref[...], preferred_element_type=jnp.float32) + vp(V_BK)
    v = jnp.dot(anc, wv_ref[...], preferred_element_type=jnp.float32) + vp(V_BV)

    ctx_rows = []
    for r in range(Bt):
        mb = jnp.where(mask_ref[r] > 0.5, 0.0, NEG_INF)                # (1, L), key axis
        qr = q[r * L:(r + 1) * L]
        kr = k[r * L:(r + 1) * L]
        vr = v[r * L:(r + 1) * L]
        parts = []
        for hh in range(H):
            sl = slice(hh * hd, (hh + 1) * hd)                         # lane-aligned head slab
            s = jnp.einsum("qe,ke->qk", qr[:, sl].astype(cdt), kr[:, sl].astype(cdt),
                           preferred_element_type=jnp.float32)         # (L, L)
            s = s + mb
            s = s - jnp.max(s, axis=-1, keepdims=True)
            p = jnp.exp(s)                                             # fused softmax numerator
            p = p * pl.reciprocal(jnp.sum(p, axis=-1, keepdims=True), approx=True)
            parts.append(jnp.dot(p.astype(cdt), vr[:, sl].astype(cdt),
                                 preferred_element_type=jnp.float32))  # (L, hd)
        ctx_rows.append(jnp.concatenate(parts, axis=-1))               # (L, D)
    ctx = jnp.concatenate(ctx_rows, axis=0) if Bt > 1 else ctx_rows[0]  # (M, D)

    # Single full-contraction output projection.
    h = h + (jnp.dot(ctx.astype(cdt), wo_ref[...], preferred_element_type=jnp.float32)
             + vp(V_BO))

    # ---- Convolution module (residual) --------------------------------------
    cn = _ln(h, vp(V_C_G), vp(V_C_B))
    cnc = cn.astype(cdt)
    ga = jnp.dot(cnc, pw1a_ref[...], preferred_element_type=jnp.float32)
    gb = jnp.dot(cnc, pw1b_ref[...], preferred_element_type=jnp.float32)
    g = ga * jax.nn.sigmoid(gb)                                        # GLU, lane-dense halves

    dw = dw_ref[...]                                                   # (K, D)
    pad = (kernel_size - 1) // 2      # matches PyTorch padding=15 for K=31 (odd K)
    zpad = jnp.zeros((pad, D), jnp.float32) if pad > 0 else None
    conv_rows = []
    for r in range(Bt):
        hr = g[r * L:(r + 1) * L]
        hp = jnp.concatenate([zpad, hr, zpad], axis=0) if pad > 0 else hr
        acc = jnp.zeros((L, D), jnp.float32)
        # TODO(synk): taps at non-multiple-of-8 sublane offsets; pltpu.roll-based
        # shifting (XLU slot) could hide these copies for large L/D.
        for t in range(kernel_size):
            acc = acc + hp[t:t + L, :] * dw[t:t + 1, :]
        conv_rows.append(acc)
    dcv = jnp.concatenate(conv_rows, axis=0) if Bt > 1 else conv_rows[0]

    # Folded eval-mode BatchNorm + SiLU + pointwise conv 2.
    y = _silu(dcv * vp(V_BN_S) + vp(V_BN_B))
    h = h + jnp.dot(y.astype(cdt), pw2_ref[...], preferred_element_type=jnp.float32)

    # ---- FFN2 (half residual) + final LayerNorm -----------------------------
    h = _ffn(h, vp(V_F2_G), vp(V_F2_B), f2_w1_ref[...], ip(I_F2_B1),
             f2_w2_ref[...], vp(V_F2_B2))
    out = _ln(h, vp(V_FL_G), vp(V_FL_B))
    o_ref[...] = out.reshape(Bt, L, D).astype(o_ref.dtype)


# ---------------------------------------------------------------------------
# pallas_call wrapper
# ---------------------------------------------------------------------------
def _pick_rows_per_step(B, L, target_m=512):
    """Largest divisor Bt of B with Bt*L <= target_m (keeps FFN MXU M dim large)."""
    if L % 8 != 0:
        return 1
    best = 1
    for bt in range(1, B + 1):
        if B % bt == 0 and bt * L <= max(target_m, L):
            best = bt
    return best


def _pick_vmem_limit():
    """48 MiB on 128-MiB VMEM parts (v5e/v6e), 40 MiB on 64-MiB parts (v7x-class)."""
    cap = None
    try:
        cap = getattr(pltpu.get_tpu_info(), "vmem_capacity_bytes", None)
    except Exception:
        cap = None
    if cap is None:
        cap = 128 * 1024 * 1024
    return 40 * 1024 * 1024 if cap <= 64 * 1024 * 1024 else 48 * 1024 * 1024


def _weight_spec(shape, single_buffer):
    n = len(shape)
    if single_buffer:
        # Constant-index weights never change across grid steps -> single buffer.
        return pl.BlockSpec(shape, lambda b, n=n: (0,) * n,
                            pipeline_mode=pl.Buffered(1))
    return pl.BlockSpec(shape, lambda b, n=n: (0,) * n)


def conformer_block_pallas(x, pos, mask, prep, *, num_heads, kernel_size,
                           single_buffer_weights=True):
    B, L, D = x.shape
    I = prep["f1_w1"].shape[1]
    K = kernel_size
    Bt = _pick_rows_per_step(B, L)

    mask3 = mask.reshape(B, 1, L).astype(jnp.float32)

    x_spec = pl.BlockSpec((Bt, L, D), lambda b: (b, 0, 0))
    pos_spec = pl.BlockSpec((1, L, D), lambda b: (0, 0, 0))
    mask_spec = pl.BlockSpec((Bt, 1, L), lambda b: (b, 0, 0))
    w = functools.partial(_weight_spec, single_buffer=single_buffer_weights)

    in_specs = [
        x_spec, pos_spec, mask_spec,
        w((NUM_VEC, D)), w((2, I)),                       # packed vector banks
        w((D, I)), w((I, D)),                             # FFN1
        w((D, D)), w((D, D)), w((D, D)), w((D, D)),       # Wq Wk Wv Wo
        w((D, D)), w((D, D)), w((K, D)), w((D, D)),       # pw1a pw1b dw pw2
        w((D, I)), w((I, D)),                             # FFN2
    ]

    kern = functools.partial(conformer_kernel, num_heads=num_heads,
                             kernel_size=kernel_size)
    return pl.pallas_call(
        kern,
        out_shape=jax.ShapeDtypeStruct(x.shape, x.dtype),
        grid=(B // Bt,),
        in_specs=in_specs,
        out_specs=pl.BlockSpec((Bt, L, D), lambda b: (b, 0, 0)),
        compiler_params=pltpu.CompilerParams(
            dimension_semantics=("parallel",),
            vmem_limit_bytes=_pick_vmem_limit()),
    )(x, pos, mask3,
      prep["vec"], prep["ivec"],
      prep["f1_w1"], prep["f1_w2"],
      prep["wq"], prep["wk"], prep["wv"], prep["wo"],
      prep["pw1a"], prep["pw1b"], prep["dw"], prep["pw2"],
      prep["f2_w1"], prep["f2_w2"])


def conformer_block(x, pos, mask, prep, num_heads, kernel_size):
    # Prefer single-buffered constant weights (halves weight VMEM residency); fall back
    # to default double buffering if this JAX build rejects pipeline_mode on the
    # pallas_call grid path.
    try:
        return conformer_block_pallas(x, pos, mask, prep, num_heads=num_heads,
                                      kernel_size=kernel_size,
                                      single_buffer_weights=True)
    except Exception:
        return conformer_block_pallas(x, pos, mask, prep, num_heads=num_heads,
                                      kernel_size=kernel_size,
                                      single_buffer_weights=False)


# ---------------------------------------------------------------------------
# Parameter init (PyTorch-like layout) + one-time preparation (scale folding,
# bf16 weight cast, BatchNorm folding, small-vector packing)
# ---------------------------------------------------------------------------
def init_params(key, D, I, K):
    def n(k, shape):
        return jax.random.normal(k, shape, jnp.float32) * 0.02

    keys = jax.random.split(key, 12)

    def ffn_params(k1, k2):
        return dict(ln_g=jnp.ones((1, D), jnp.float32), ln_b=jnp.zeros((1, D), jnp.float32),
                    w1=n(k1, (D, I)), b1=jnp.zeros((1, I), jnp.float32),
                    w2=n(k2, (I, D)), b2=jnp.zeros((1, D), jnp.float32))

    attn_params = dict(
        ln_g=jnp.ones((1, D), jnp.float32), ln_b=jnp.zeros((1, D), jnp.float32),
        wq=n(keys[2], (D, D)), bq=jnp.zeros((1, D), jnp.float32),
        wk=n(keys[3], (D, D)), bk=jnp.zeros((1, D), jnp.float32),
        wv=n(keys[4], (D, D)), bv=jnp.zeros((1, D), jnp.float32),
        wo=n(keys[5], (D, D)), bo=jnp.zeros((1, D), jnp.float32),
    )

    conv_params = dict(
        ln_g=jnp.ones((1, D), jnp.float32), ln_b=jnp.zeros((1, D), jnp.float32),
        pw1=n(keys[6], (D, 2 * D)),          # pointwise conv1 (D -> 2D), no bias
        dw=n(keys[7], (K, D)),               # depthwise conv weight[d, 0, k] -> dw[k, d]
        bn_g=jnp.ones((1, D), jnp.float32), bn_b=jnp.zeros((1, D), jnp.float32),
        bn_m=jnp.zeros((1, D), jnp.float32), bn_v=jnp.ones((1, D), jnp.float32),
        pw2=n(keys[8], (D, D)),              # pointwise conv2 (D -> D), no bias
    )

    return dict(
        ffn1=ffn_params(keys[0], keys[1]),
        attn=attn_params,
        conv=conv_params,
        ffn2=ffn_params(keys[9], keys[10]),
        final_ln_g=jnp.ones((1, D), jnp.float32),
        final_ln_b=jnp.zeros((1, D), jnp.float32),
    )


def prepare_params(p, num_heads, compute_dtype=jnp.bfloat16):
    """One-time host-side prep: fold the attention scale into Wq/bq, fold BatchNorm,
    split pw1 into two lane-dense halves, pack small vectors into banks, cast matmul
    weights to bf16 (MXU operands); keep all elementwise params in f32."""
    a, c, f1, f2 = p["attn"], p["conv"], p["ffn1"], p["ffn2"]
    D = a["wq"].shape[0]
    hd = D // num_heads
    scale = 1.0 / math.sqrt(hd)

    bn_scale = c["bn_g"] * jax.lax.rsqrt(c["bn_v"] + EPS_BN)
    bn_shift = c["bn_b"] - c["bn_m"] * bn_scale

    vec = jnp.concatenate([
        f1["ln_g"], f1["ln_b"], f1["b2"],
        a["ln_g"], a["ln_b"],
        a["bq"] * scale, a["bk"], a["bv"], a["bo"],
        c["ln_g"], c["ln_b"], bn_scale, bn_shift,
        f2["ln_g"], f2["ln_b"], f2["b2"],
        p["final_ln_g"], p["final_ln_b"],
    ], axis=0).astype(jnp.float32)                               # (NUM_VEC, D)
    ivec = jnp.concatenate([f1["b1"], f2["b1"]], axis=0).astype(jnp.float32)  # (2, I)

    return dict(
        vec=vec, ivec=ivec,
        f1_w1=f1["w1"].astype(compute_dtype), f1_w2=f1["w2"].astype(compute_dtype),
        wq=(a["wq"] * scale).astype(compute_dtype),
        wk=a["wk"].astype(compute_dtype),
        wv=a["wv"].astype(compute_dtype),
        wo=a["wo"].astype(compute_dtype),
        pw1a=c["pw1"][:, :D].astype(compute_dtype),              # GLU value half
        pw1b=c["pw1"][:, D:].astype(compute_dtype),              # GLU gate half
        dw=c["dw"].astype(jnp.float32),
        pw2=c["pw2"].astype(compute_dtype),
        f2_w1=f2["w1"].astype(compute_dtype), f2_w2=f2["w2"].astype(compute_dtype),
    )


if __name__ == "__main__":
    B, L, D, I, H, K = 2, 8, 32, 64, 4, 31

    key = jax.random.PRNGKey(0)
    kx, kp, kparam = jax.random.split(key, 3)
    x = jax.random.normal(kx, (B, L, D), jnp.float32)
    pos = jax.random.normal(kp, (1, L, D), jnp.float32)
    mask = jnp.ones((B, L), jnp.float32).at[1, 6:].set(0.0)

    params = init_params(kparam, D, I, K)
    prep = prepare_params(params, num_heads=H)

    out = conformer_block(x, pos, mask, prep, num_heads=H, kernel_size=K)
    out = jax.block_until_ready(out)

    assert out.shape == (B, L, D)
    assert bool(jnp.all(jnp.isfinite(out)))
    print("KERNEL_OK")
</pallas_src>

<mosaic_0001>
module attributes {stable_mosaic.version = 11 : i64} {
  func.func @conformer_kernel(%arg0: i32, %arg1: memref<2x8x32xf32, #tpu.memory_space<vmem>>, %arg2: memref<1x8x32xf32, #tpu.memory_space<vmem>>, %arg3: memref<2x1x8xf32, #tpu.memory_space<vmem>>, %arg4: memref<18x32xf32, #tpu.memory_space<vmem>>, %arg5: memref<2x64xf32, #tpu.memory_space<vmem>>, %arg6: memref<32x64xbf16, #tpu.memory_space<vmem>>, %arg7: memref<64x32xbf16, #tpu.memory_space<vmem>>, %arg8: memref<32x32xbf16, #tpu.memory_space<vmem>>, %arg9: memref<32x32xbf16, #tpu.memory_space<vmem>>, %arg10: memref<32x32xbf16, #tpu.memory_space<vmem>>, %arg11: memref<32x32xbf16, #tpu.memory_space<vmem>>, %arg12: memref<32x32xbf16, #tpu.memory_space<vmem>>, %arg13: memref<32x32xbf16, #tpu.memory_space<vmem>>, %arg14: memref<31x32xf32, #tpu.memory_space<vmem>>, %arg15: memref<32x32xbf16, #tpu.memory_space<vmem>>, %arg16: memref<32x64xbf16, #tpu.memory_space<vmem>>, %arg17: memref<64x32xbf16, #tpu.memory_space<vmem>>, %arg18: memref<2x8x32xf32, #tpu.memory_space<vmem>>) attributes {dimension_semantics = [#tpu.dimension_semantics<parallel>], iteration_bounds = array<i64: 1>, scalar_prefetch = 0 : i64, scratch_operands = 0 : i64, tpu.core_type = #tpu.core_type<tc>, window_params = [{transform_indices = @transform_0, window_bounds = array<i64: 2, 8, 32>}, {pipeline_mode = #tpu.pipeline_mode<synchronous>, transform_indices = @transform_1, window_bounds = array<i64: 1, 8, 32>}, {transform_indices = @transform_2, window_bounds = array<i64: 2, 1, 8>}, {pipeline_mode = #tpu.pipeline_mode<synchronous>, transform_indices = @transform_3, window_bounds = array<i64: 18, 32>}, {pipeline_mode = #tpu.pipeline_mode<synchronous>, transform_indices = @transform_4, window_bounds = array<i64: 2, 64>}, {pipeline_mode = #tpu.pipeline_mode<synchronous>, transform_indices = @transform_5, window_bounds = array<i64: 32, 64>}, {pipeline_mode = #tpu.pipeline_mode<synchronous>, transform_indices = @transform_6, window_bounds = array<i64: 64, 32>}, {pipeline_mode = #tpu.pipeline_mode<synchronous>, transform_indices = @transform_7, window_bounds = array<i64: 32, 32>}, {pipeline_mode = #tpu.pipeline_mode<synchronous>, transform_indices = @transform_8, window_bounds = array<i64: 32, 32>}, {pipeline_mode = #tpu.pipeline_mode<synchronous>, transform_indices = @transform_9, window_bounds = array<i64: 32, 32>}, {pipeline_mode = #tpu.pipeline_mode<synchronous>, transform_indices = @transform_10, window_bounds = array<i64: 32, 32>}, {pipeline_mode = #tpu.pipeline_mode<synchronous>, transform_indices = @transform_11, window_bounds = array<i64: 32, 32>}, {pipeline_mode = #tpu.pipeline_mode<synchronous>, transform_indices = @transform_12, window_bounds = array<i64: 32, 32>}, {pipeline_mode = #tpu.pipeline_mode<synchronous>, transform_indices = @transform_13, window_bounds = array<i64: 31, 32>}, {pipeline_mode = #tpu.pipeline_mode<synchronous>, transform_indices = @transform_14, window_bounds = array<i64: 32, 32>}, {pipeline_mode = #tpu.pipeline_mode<synchronous>, transform_indices = @transform_15, window_bounds = array<i64: 32, 64>}, {pipeline_mode = #tpu.pipeline_mode<synchronous>, transform_indices = @transform_16, window_bounds = array<i64: 64, 32>}, {transform_indices = @transform_17, window_bounds = array<i64: 2, 8, 32>}]} {
    %c0 = arith.constant 0 : index
    %c0_0 = arith.constant 0 : index
    %c0_1 = arith.constant 0 : index
    %0 = vector.load %arg1[%c0, %c0_0, %c0_1] : memref<2x8x32xf32, #tpu.memory_space<vmem>>, vector<2x8x32xf32>
    %1 = vector.shape_cast %0 : vector<2x8x32xf32> to vector<16x32xf32>
    %c0_2 = arith.constant 0 : index
    %c0_3 = arith.constant 0 : index
    %c0_4 = arith.constant 0 : index
    %2 = vector.load %arg2[%c0_2, %c0_3, %c0_4] : memref<1x8x32xf32, #tpu.memory_space<vmem>>, vector<1x8x32xf32>
    %3 = vector.shape_cast %2 : vector<1x8x32xf32> to vector<8x32xf32>
    %c0_5 = arith.constant 0 : index
    %c0_6 = arith.constant 0 : index
    %4 = vector.load %arg4[%c0_5, %c0_6] : memref<18x32xf32, #tpu.memory_space<vmem>>, vector<1x32xf32>
    %c1 = arith.constant 1 : index
    %c0_7 = arith.constant 0 : index
    %5 = vector.load %arg4[%c1, %c0_7] : memref<18x32xf32, #tpu.memory_space<vmem>>, vector<1x32xf32>
    %c0_8 = arith.constant 0 : index
    %c0_9 = arith.constant 0 : index
    %6 = vector.load %arg6[%c0_8, %c0_9] : memref<32x64xbf16, #tpu.memory_space<vmem>>, vector<32x64xbf16>
    %c0_10 = arith.constant 0 : index
    %c0_11 = arith.constant 0 : index
    %7 = vector.load %arg5[%c0_10, %c0_11] : memref<2x64xf32, #tpu.memory_space<vmem>>, vector<1x64xf32>
    %c0_12 = arith.constant 0 : index
    %c0_13 = arith.constant 0 : index
    %8 = vector.load %arg7[%c0_12, %c0_13] : memref<64x32xbf16, #tpu.memory_space<vmem>>, vector<64x32xbf16>
    %c2 = arith.constant 2 : index
    %c0_14 = arith.constant 0 : index
    %9 = vector.load %arg4[%c2, %c0_14] : memref<18x32xf32, #tpu.memory_space<vmem>>, vector<1x32xf32>
    %cst = arith.constant dense<0.000000e+00> : vector<16xf32>
    %10 = vector.multi_reduction <add>, %1, %cst [1] : vector<16x32xf32> to vector<16xf32>
    %11 = vector.shape_cast %10 : vector<16xf32> to vector<16x1xf32>
    %cst_15 = arith.constant 3.200000e+01 : f32
    %12 = vector.broadcast %cst_15 : f32 to vector<16x1xf32>
    %13 = arith.divf %11, %12 : vector<16x1xf32>
    %14 = vector.broadcast %13 : vector<16x1xf32> to vector<16x32xf32>
    %15 = arith.subf %1, %14 : vector<16x32xf32>
    %16 = arith.mulf %15, %15 : vector<16x32xf32>
    %cst_16 = arith.constant dense<0.000000e+00> : vector<16xf32>
    %17 = vector.multi_reduction <add>, %16, %cst_16 [1] : vector<16x32xf32> to vector<16xf32>
    %18 = vector.shape_cast %17 : vector<16xf32> to vector<16x1xf32>
    %cst_17 = arith.constant 3.200000e+01 : f32
    %19 = vector.broadcast %cst_17 : f32 to vector<16x1xf32>
    %20 = arith.divf %18, %19 : vector<16x1xf32>
    %21 = vector.broadcast %13 : vector<16x1xf32> to vector<16x32xf32>
    %22 = arith.subf %1, %21 : vector<16x32xf32>
    %cst_18 = arith.constant 9.99999974E-6 : f32
    %23 = vector.broadcast %cst_18 : f32 to vector<16x1xf32>
    %24 = arith.addf %20, %23 : vector<16x1xf32>
    %25 = math.rsqrt %24 : vector<16x1xf32>
    %26 = vector.broadcast %25 : vector<16x1xf32> to vector<16x32xf32>
    %27 = arith.mulf %22, %26 : vector<16x32xf32>
    %28 = vector.broadcast %4 : vector<1x32xf32> to vector<16x32xf32>
    %29 = arith.mulf %27, %28 : vector<16x32xf32>
    %30 = vector.broadcast %5 : vector<1x32xf32> to vector<16x32xf32>
    %31 = arith.addf %29, %30 : vector<16x32xf32>
    %32 = arith.truncf %31 : vector<16x32xf32> to vector<16x32xbf16>
    %cst_19 = arith.constant dense<0.000000e+00> : vector<16x64xf32>
    %33 = tpu.matmul %32, %6, %cst_19 {dimension_numbers = #tpu.dot_dimension_numbers<[1], [0], [0], [1], [0, 0, 1, 1], [], []>} : vector<16x32xbf16>, vector<32x64xbf16>, vector<16x64xf32> -> vector<16x64xf32>
    %34 = vector.broadcast %7 : vector<1x64xf32> to vector<16x64xf32>
    %35 = arith.addf %33, %34 : vector<16x64xf32>
    %36 = arith.negf %35 : vector<16x64xf32>
    %37 = math.exp %36 : vector<16x64xf32>
    %cst_20 = arith.constant 1.000000e+00 : f32
    %38 = vector.broadcast %cst_20 : f32 to vector<16x64xf32>
    %39 = arith.addf %38, %37 : vector<16x64xf32>
    %40 = arith.divf %38, %39 : vector<16x64xf32>
    %41 = arith.mulf %35, %40 : vector<16x64xf32>
    %42 = arith.truncf %41 : vector<16x64xf32> to vector<16x64xbf16>
    %cst_21 = arith.constant dense<0.000000e+00> : vector<16x32xf32>
    %43 = tpu.matmul %42, %8, %cst_21 {dimension_numbers = #tpu.dot_dimension_numbers<[1], [0], [0], [1], [0, 0, 1, 1], [], []>} : vector<16x64xbf16>, vector<64x32xbf16>, vector<16x32xf32> -> vector<16x32xf32>
    %44 = vector.broadcast %9 : vector<1x32xf32> to vector<16x32xf32>
    %45 = arith.addf %43, %44 : vector<16x32xf32>
    %cst_22 = arith.constant 5.000000e-01 : f32
    %46 = vector.broadcast %cst_22 : f32 to vector<16x32xf32>
    %47 = arith.mulf %46, %45 : vector<16x32xf32>
    %48 = arith.addf %1, %47 : vector<16x32xf32>
    %c3 = arith.constant 3 : index
    %c0_23 = arith.constant 0 : index
    %49 = vector.load %arg4[%c3, %c0_23] : memref<18x32xf32, #tpu.memory_space<vmem>>, vector<1x32xf32>
    %c4 = arith.constant 4 : index
    %c0_24 = arith.constant 0 : index
    %50 = vector.load %arg4[%c4, %c0_24] : memref<18x32xf32, #tpu.memory_space<vmem>>, vector<1x32xf32>
    %cst_25 = arith.constant dense<0.000000e+00> : vector<16xf32>
    %51 = vector.multi_reduction <add>, %48, %cst_25 [1] : vector<16x32xf32> to vector<16xf32>
    %52 = vector.shape_cast %51 : vector<16xf32> to vector<16x1xf32>
    %cst_26 = arith.constant 3.200000e+01 : f32
    %53 = vector.broadcast %cst_26 : f32 to vector<16x1xf32>
    %54 = arith.divf %52, %53 : vector<16x1xf32>
    %55 = vector.broadcast %54 : vector<16x1xf32> to vector<16x32xf32>
    %56 = arith.subf %48, %55 : vector<16x32xf32>
    %57 = arith.mulf %56, %56 : vector<16x32xf32>
    %cst_27 = arith.constant dense<0.000000e+00> : vector<16xf32>
    %58 = vector.multi_reduction <add>, %57, %cst_27 [1] : vector<16x32xf32> to vector<16xf32>
    %59 = vector.shape_cast %58 : vector<16xf32> to vector<16x1xf32>
    %cst_28 = arith.constant 3.200000e+01 : f32
    %60 = vector.broadcast %cst_28 : f32 to vector<16x1xf32>
    %61 = arith.divf %59, %60 : vector<16x1xf32>
    %62 = vector.broadcast %54 : vector<16x1xf32> to vector<16x32xf32>
    %63 = arith.subf %48, %62 : vector<16x32xf32>
    %cst_29 = arith.constant 9.99999974E-6 : f32
    %64 = vector.broadcast %cst_29 : f32 to vector<16x1xf32>
    %65 = arith.addf %61, %64 : vector<16x1xf32>
    %66 = math.rsqrt %65 : vector<16x1xf32>
    %67 = vector.broadcast %66 : vector<16x1xf32> to vector<16x32xf32>
    %68 = arith.mulf %63, %67 : vector<16x32xf32>
    %69 = vector.broadcast %49 : vector<1x32xf32> to vector<16x32xf32>
    %70 = arith.mulf %68, %69 : vector<16x32xf32>
    %71 = vector.broadcast %50 : vector<1x32xf32> to vector<16x32xf32>
    %72 = arith.addf %70, %71 : vector<16x32xf32>
    %73 = tpu.concatenate %3, %3 in 0 : vector<8x32xf32>, vector<8x32xf32> -> vector<16x32xf32>
    %74 = arith.addf %72, %73 : vector<16x32xf32>
    %75 = arith.truncf %74 : vector<16x32xf32> to vector<16x32xbf16>
    %76 = arith.truncf %72 : vector<16x32xf32> to vector<16x32xbf16>
    %c0_30 = arith.constant 0 : index
    %c0_31 = arith.constant 0 : index
    %77 = vector.load %arg8[%c0_30, %c0_31] : memref<32x32xbf16, #tpu.memory_space<vmem>>, vector<32x32xbf16>
    %cst_32 = arith.constant dense<0.000000e+00> : vector<16x32xf32>
    %78 = tpu.matmul %75, %77, %cst_32 {dimension_numbers = #tpu.dot_dimension_numbers<[1], [0], [0], [1], [0, 0, 1, 1], [], []>} : vector<16x32xbf16>, vector<32x32xbf16>, vector<16x32xf32> -> vector<16x32xf32>
    %c5 = arith.constant 5 : index
    %c0_33 = arith.constant 0 : index
    %79 = vector.load %arg4[%c5, %c0_33] : memref<18x32xf32, #tpu.memory_space<vmem>>, vector<1x32xf32>
    %80 = vector.broadcast %79 : vector<1x32xf32> to vector<16x32xf32>
    %81 = arith.addf %78, %80 : vector<16x32xf32>
    %c0_34 = arith.constant 0 : index
    %c0_35 = arith.constant 0 : index
    %82 = vector.load %arg9[%c0_34, %c0_35] : memref<32x32xbf16, #tpu.memory_space<vmem>>, vector<32x32xbf16>
    %cst_36 = arith.constant dense<0.000000e+00> : vector<16x32xf32>
    %83 = tpu.matmul %75, %82, %cst_36 {dimension_numbers = #tpu.dot_dimension_numbers<[1], [0], [0], [1], [0, 0, 1, 1], [], []>} : vector<16x32xbf16>, vector<32x32xbf16>, vector<16x32xf32> -> vector<16x32xf32>
    %c6 = arith.constant 6 : index
    %c0_37 = arith.constant 0 : index
    %84 = vector.load %arg4[%c6, %c0_37] : memref<18x32xf32, #tpu.memory_space<vmem>>, vector<1x32xf32>
    %85 = vector.broadcast %84 : vector<1x32xf32> to vector<16x32xf32>
    %86 = arith.addf %83, %85 : vector<16x32xf32>
    %c0_38 = arith.constant 0 : index
    %c0_39 = arith.constant 0 : index
    %87 = vector.load %arg10[%c0_38, %c0_39] : memref<32x32xbf16, #tpu.memory_space<vmem>>, vector<32x32xbf16>
    %cst_40 = arith.constant dense<0.000000e+00> : vector<16x32xf32>
    %88 = tpu.matmul %76, %87, %cst_40 {dimension_numbers = #tpu.dot_dimension_numbers<[1], [0], [0], [1], [0, 0, 1, 1], [], []>} : vector<16x32xbf16>, vector<32x32xbf16>, vector<16x32xf32> -> vector<16x32xf32>
    %c7 = arith.constant 7 : index
    %c0_41 = arith.constant 0 : index
    %89 = vector.load %arg4[%c7, %c0_41] : memref<18x32xf32, #tpu.memory_space<vmem>>, vector<1x32xf32>
    %90 = vector.broadcast %89 : vector<1x32xf32> to vector<16x32xf32>
    %91 = arith.addf %88, %90 : vector<16x32xf32>
    %c0_42 = arith.constant 0 : index
    %c0_43 = arith.constant 0 : index
    %c0_44 = arith.constant 0 : index
    %92 = vector.load %arg3[%c0_42, %c0_43, %c0_44] : memref<2x1x8xf32, #tpu.memory_space<vmem>>, vector<1x1x8xf32>
    %93 = vector.shape_cast %92 : vector<1x1x8xf32> to vector<1x8xf32>
    %cst_45 = arith.constant 5.000000e-01 : f32
    %94 = vector.broadcast %cst_45 : f32 to vector<1x8xf32>
    %95 = arith.cmpf ogt, %93, %94 : vector<1x8xf32>
    %cst_46 = arith.constant 0.000000e+00 : f32
    %cst_47 = arith.constant -1.000000e+09 : f32
    %96 = vector.broadcast %cst_46 : f32 to vector<1x8xf32>
    %97 = vector.broadcast %cst_47 : f32 to vector<1x8xf32>
    %98 = arith.select %95, %96, %97 : vector<1x8xi1>, vector<1x8xf32>
    %99 = vector.extract_strided_slice %81 {offsets = [0, 0], sizes = [8, 32], strides = [1, 1]} : vector<16x32xf32> to vector<8x32xf32>
    %100 = vector.extract_strided_slice %86 {offsets = [0, 0], sizes = [8, 32], strides = [1, 1]} : vector<16x32xf32> to vector<8x32xf32>
    %101 = vector.extract_strided_slice %91 {offsets = [0, 0], sizes = [8, 32], strides = [1, 1]} : vector<16x32xf32> to vector<8x32xf32>
    %102 = vector.extract_strided_slice %99 {offsets = [0, 0], sizes = [8, 8], strides = [1, 1]} : vector<8x32xf32> to vector<8x8xf32>
    %103 = arith.truncf %102 : vector<8x8xf32> to vector<8x8xbf16>
    %104 = vector.extract_strided_slice %100 {offsets = [0, 0], sizes = [8, 8], strides = [1, 1]} : vector<8x32xf32> to vector<8x8xf32>
    %105 = arith.truncf %104 : vector<8x8xf32> to vector<8x8xbf16>
    "tpu.trace_start"() <{level = 10 : i32, message = "qe,ke->qk"}> : () -> ()
    %cst_48 = arith.constant dense<0.000000e+00> : vector<8x8xf32>
    %106 = tpu.matmul %103, %105, %cst_48 {dimension_numbers = #tpu.dot_dimension_numbers<[1], [1], [0], [0], [0, 0, 1, 0], [], []>} : vector<8x8xbf16>, vector<8x8xbf16>, vector<8x8xf32> -> vector<8x8xf32>
    "tpu.trace_stop"() : () -> ()
    %107 = vector.broadcast %98 : vector<1x8xf32> to vector<8x8xf32>
    %108 = arith.addf %106, %107 : vector<8x8xf32>
    %cst_49 = arith.constant dense<0xFF800000> : vector<8xf32>
    %109 = vector.multi_reduction <maximumf>, %108, %cst_49 [1] : vector<8x8xf32> to vector<8xf32>
    %110 = vector.shape_cast %109 : vector<8xf32> to vector<8x1xf32>
    %111 = vector.broadcast %110 : vector<8x1xf32> to vector<8x8xf32>
    %112 = arith.subf %108, %111 : vector<8x8xf32>
    %113 = math.exp %112 : vector<8x8xf32>
    %cst_50 = arith.constant dense<0.000000e+00> : vector<8xf32>
    %114 = vector.multi_reduction <add>, %113, %cst_50 [1] : vector<8x8xf32> to vector<8xf32>
    %115 = vector.shape_cast %114 : vector<8xf32> to vector<8x1xf32>
    %116 = tpu.reciprocal %115 {approx = true} : vector<8x1xf32> -> vector<8x1xf32>
    %117 = vector.broadcast %116 : vector<8x1xf32> to vector<8x8xf32>
    %118 = arith.mulf %113, %117 : vector<8x8xf32>
    %119 = arith.truncf %118 : vector<8x8xf32> to vector<8x8xbf16>
    %120 = vector.extract_strided_slice %101 {offsets = [0, 0], sizes = [8, 8], strides = [1, 1]} : vector<8x32xf32> to vector<8x8xf32>
    %121 = arith.truncf %120 : vector<8x8xf32> to vector<8x8xbf16>
    %cst_51 = arith.constant dense<0.000000e+00> : vector<8x8xf32>
    %122 = tpu.matmul %119, %121, %cst_51 {dimension_numbers = #tpu.dot_dimension_numbers<[1], [0], [0], [1], [0, 0, 1, 1], [], []>} : vector<8x8xbf16>, vector<8x8xbf16>, vector<8x8xf32> -> vector<8x8xf32>
    %123 = vector.extract_strided_slice %99 {offsets = [0, 8], sizes = [8, 8], strides = [1, 1]} : vector<8x32xf32> to vector<8x8xf32>
    %124 = arith.truncf %123 : vector<8x8xf32> to vector<8x8xbf16>
    %125 = vector.extract_strided_slice %100 {offsets = [0, 8], sizes = [8, 8], strides = [1, 1]} : vector<8x32xf32> to vector<8x8xf32>
    %126 = arith.truncf %125 : vector<8x8xf32> to vector<8x8xbf16>
    "tpu.trace_start"() <{level = 10 : i32, message = "qe,ke->qk"}> : () -> ()
    %cst_52 = arith.constant dense<0.000000e+00> : vector<8x8xf32>
    %127 = tpu.matmul %124, %126, %cst_52 {dimension_numbers = #tpu.dot_dimension_numbers<[1], [1], [0], [0], [0, 0, 1, 0], [], []>} : vector<8x8xbf16>, vector<8x8xbf16>, vector<8x8xf32> -> vector<8x8xf32>
    "tpu.trace_stop"() : () -> ()
    %128 = vector.broadcast %98 : vector<1x8xf32> to vector<8x8xf32>
    %129 = arith.addf %127, %128 : vector<8x8xf32>
    %cst_53 = arith.constant dense<0xFF800000> : vector<8xf32>
    %130 = vector.multi_reduction <maximumf>, %129, %cst_53 [1] : vector<8x8xf32> to vector<8xf32>
    %131 = vector.shape_cast %130 : vector<8xf32> to vector<8x1xf32>
    %132 = vector.broadcast %131 : vector<8x1xf32> to vector<8x8xf32>
    %133 = arith.subf %129, %132 : vector<8x8xf32>
    %134 = math.exp %133 : vector<8x8xf32>
    %cst_54 = arith.constant dense<0.000000e+00> : vector<8xf32>
    %135 = vector.multi_reduction <add>, %134, %cst_54 [1] : vector<8x8xf32> to vector<8xf32>
    %136 = vector.shape_cast %135 : vector<8xf32> to vector<8x1xf32>
    %137 = tpu.reciprocal %136 {approx = true} : vector<8x1xf32> -> vector<8x1xf32>
    %138 = vector.broadcast %137 : vector<8x1xf32> to vector<8x8xf32>
    %139 = arith.mulf %134, %138 : vector<8x8xf32>
    %140 = arith.truncf %139 : vector<8x8xf32> to vector<8x8xbf16>
    %141 = vector.extract_strided_slice %101 {offsets = [0, 8], sizes = [8, 8], strides = [1, 1]} : vector<8x32xf32> to vector<8x8xf32>
    %142 = arith.truncf %141 : vector<8x8xf32> to vector<8x8xbf16>
    %cst_55 = arith.constant dense<0.000000e+00> : vector<8x8xf32>
    %143 = tpu.matmul %140, %142, %cst_55 {dimension_numbers = #tpu.dot_dimension_numbers<[1], [0], [0], [1], [0, 0, 1, 1], [], []>} : vector<8x8xbf16>, vector<8x8xbf16>, vector<8x8xf32> -> vector<8x8xf32>
    %144 = vector.extract_strided_slice %99 {offsets = [0, 16], sizes = [8, 8], strides = [1, 1]} : vector<8x32xf32> to vector<8x8xf32>
    %145 = arith.truncf %144 : vector<8x8xf32> to vector<8x8xbf16>
    %146 = vector.extract_strided_slice %100 {offsets = [0, 16], sizes = [8, 8], strides = [1, 1]} : vector<8x32xf32> to vector<8x8xf32>
    %147 = arith.truncf %146 : vector<8x8xf32> to vector<8x8xbf16>
    "tpu.trace_start"() <{level = 10 : i32, message = "qe,ke->qk"}> : () -> ()
    %cst_56 = arith.constant dense<0.000000e+00> : vector<8x8xf32>
    %148 = tpu.matmul %145, %147, %cst_56 {dimension_numbers = #tpu.dot_dimension_numbers<[1], [1], [0], [0], [0, 0, 1, 0], [], []>} : vector<8x8xbf16>, vector<8x8xbf16>, vector<8x8xf32> -> vector<8x8xf32>
    "tpu.trace_stop"() : () -> ()
    %149 = vector.broadcast %98 : vector<1x8xf32> to vector<8x8xf32>
    %150 = arith.addf %148, %149 : vector<8x8xf32>
    %cst_57 = arith.constant dense<0xFF800000> : vector<8xf32>
    %151 = vector.multi_reduction <maximumf>, %150, %cst_57 [1] : vector<8x8xf32> to vector<8xf32>
    %152 = vector.shape_cast %151 : vector<8xf32> to vector<8x1xf32>
    %153 = vector.broadcast %152 : vector<8x1xf32> to vector<8x8xf32>
    %154 = arith.subf %150, %153 : vector<8x8xf32>
    %155 = math.exp %154 : vector<8x8xf32>
    %cst_58 = arith.constant dense<0.000000e+00> : vector<8xf32>
    %156 = vector.multi_reduction <add>, %155, %cst_58 [1] : vector<8x8xf32> to vector<8xf32>
    %157 = vector.shape_cast %156 : vector<8xf32> to vector<8x1xf32>
    %158 = tpu.reciprocal %157 {approx = true} : vector<8x1xf32> -> vector<8x1xf32>
    %159 = vector.broadcast %158 : vector<8x1xf32> to vector<8x8xf32>
    %160 = arith.mulf %155, %159 : vector<8x8xf32>
    %161 = arith.truncf %160 : vector<8x8xf32> to vector<8x8xbf16>
    %162 = vector.extract_strided_slice %101 {offsets = [0, 16], sizes = [8, 8], strides = [1, 1]} : vector<8x32xf32> to vector<8x8xf32>
    %163 = arith.truncf %162 : vector<8x8xf32> to vector<8x8xbf16>
    %cst_59 = arith.constant dense<0.000000e+00> : vector<8x8xf32>
    %164 = tpu.matmul %161, %163, %cst_59 {dimension_numbers = #tpu.dot_dimension_numbers<[1], [0], [0], [1], [0, 0, 1, 1], [], []>} : vector<8x8xbf16>, vector<8x8xbf16>, vector<8x8xf32> -> vector<8x8xf32>
    %165 = vector.extract_strided_slice %99 {offsets = [0, 24], sizes = [8, 8], strides = [1, 1]} : vector<8x32xf32> to vector<8x8xf32>
    %166 = arith.truncf %165 : vector<8x8xf32> to vector<8x8xbf16>
    %167 = vector.extract_strided_slice %100 {offsets = [0, 24], sizes = [8, 8], strides = [1, 1]} : vector<8x32xf32> to vector<8x8xf32>
    %168 = arith.truncf %167 : vector<8x8xf32> to vector<8x8xbf16>
    "tpu.trace_start"() <{level = 10 : i32, message = "qe,ke->qk"}> : () -> ()
    %cst_60 = arith.constant dense<0.000000e+00> : vector<8x8xf32>
    %169 = tpu.matmul %166, %168, %cst_60 {dimension_numbers = #tpu.dot_dimension_numbers<[1], [1], [0], [0], [0, 0, 1, 0], [], []>} : vector<8x8xbf16>, vector<8x8xbf16>, vector<8x8xf32> -> vector<8x8xf32>
    "tpu.trace_stop"() : () -> ()
    %170 = vector.broadcast %98 : vector<1x8xf32> to vector<8x8xf32>
    %171 = arith.addf %169, %170 : vector<8x8xf32>
    %cst_61 = arith.constant dense<0xFF800000> : vector<8xf32>
    %172 = vector.multi_reduction <maximumf>, %171, %cst_61 [1] : vector<8x8xf32> to vector<8xf32>
    %173 = vector.shape_cast %172 : vector<8xf32> to vector<8x1xf32>
    %174 = vector.broadcast %173 : vector<8x1xf32> to vector<8x8xf32>
    %175 = arith.subf %171, %174 : vector<8x8xf32>
    %176 = math.exp %175 : vector<8x8xf32>
    %cst_62 = arith.constant dense<0.000000e+00> : vector<8xf32>
    %177 = vector.multi_reduction <add>, %176, %cst_62 [1] : vector<8x8xf32> to vector<8xf32>
    %178 = vector.shape_cast %177 : vector<8xf32> to vector<8x1xf32>
    %179 = tpu.reciprocal %178 {approx = true} : vector<8x1xf32> -> vector<8x1xf32>
    %180 = vector.broadcast %179 : vector<8x1xf32> to vector<8x8xf32>
    %181 = arith.mulf %176, %180 : vector<8x8xf32>
    %182 = arith.truncf %181 : vector<8x8xf32> to vector<8x8xbf16>
    %183 = vector.extract_strided_slice %101 {offsets = [0, 24], sizes = [8, 8], strides = [1, 1]} : vector<8x32xf32> to vector<8x8xf32>
    %184 = arith.truncf %183 : vector<8x8xf32> to vector<8x8xbf16>
    %cst_63 = arith.constant dense<0.000000e+00> : vector<8x8xf32>
    %185 = tpu.matmul %182, %184, %cst_63 {dimension_numbers = #tpu.dot_dimension_numbers<[1], [0], [0], [1], [0, 0, 1, 1], [], []>} : vector<8x8xbf16>, vector<8x8xbf16>, vector<8x8xf32> -> vector<8x8xf32>
    %186 = tpu.concatenate %122, %143, %164, %185 in 1 : vector<8x8xf32>, vector<8x8xf32>, vector<8x8xf32>, vector<8x8xf32> -> vector<8x32xf32>
    %c1_64 = arith.constant 1 : index
    %c0_65 = arith.constant 0 : index
    %c0_66 = arith.constant 0 : index
    %187 = vector.load %arg3[%c1_64, %c0_65, %c0_66] : memref<2x1x8xf32, #tpu.memory_space<vmem>>, vector<1x1x8xf32>
    %188 = vector.shape_cast %187 : vector<1x1x8xf32> to vector<1x8xf32>
    %cst_67 = arith.constant 5.000000e-01 : f32
    %189 = vector.broadcast %cst_67 : f32 to vector<1x8xf32>
    %190 = arith.cmpf ogt, %188, %189 : vector<1x8xf32>
    %cst_68 = arith.constant 0.000000e+00 : f32
    %cst_69 = arith.constant -1.000000e+09 : f32
    %191 = vector.broadcast %cst_68 : f32 to vector<1x8xf32>
    %192 = vector.broadcast %cst_69 : f32 to vector<1x8xf32>
    %193 = arith.select %190, %191, %192 : vector<1x8xi1>, vector<1x8xf32>
    %194 = vector.extract_strided_slice %81 {offsets = [8, 0], sizes = [8, 32], strides = [1, 1]} : vector<16x32xf32> to vector<8x32xf32>
    %195 = vector.extract_strided_slice %86 {offsets = [8, 0], sizes = [8, 32], strides = [1, 1]} : vector<16x32xf32> to vector<8x32xf32>
    %196 = vector.extract_strided_slice %91 {offsets = [8, 0], sizes = [8, 32], strides = [1, 1]} : vector<16x32xf32> to vector<8x32xf32>
    %197 = vector.extract_strided_slice %194 {offsets = [0, 0], sizes = [8, 8], strides = [1, 1]} : vector<8x32xf32> to vector<8x8xf32>
    %198 = arith.truncf %197 : vector<8x8xf32> to vector<8x8xbf16>
    %199 = vector.extract_strided_slice %195 {offsets = [0, 0], sizes = [8, 8], strides = [1, 1]} : vector<8x32xf32> to vector<8x8xf32>
    %200 = arith.truncf %199 : vector<8x8xf32> to vector<8x8xbf16>
    "tpu.trace_start"() <{level = 10 : i32, message = "qe,ke->qk"}> : () -> ()
    %cst_70 = arith.constant dense<0.000000e+00> : vector<8x8xf32>
    %201 = tpu.matmul %198, %200, %cst_70 {dimension_numbers = #tpu.dot_dimension_numbers<[1], [1], [0], [0], [0, 0, 1, 0], [], []>} : vector<8x8xbf16>, vector<8x8xbf16>, vector<8x8xf32> -> vector<8x8xf32>
    "tpu.trace_stop"() : () -> ()
    %202 = vector.broadcast %193 : vector<1x8xf32> to vector<8x8xf32>
    %203 = arith.addf %201, %202 : vector<8x8xf32>
    %cst_71 = arith.constant dense<0xFF800000> : vector<8xf32>
    %204 = vector.multi_reduction <maximumf>, %203, %cst_71 [1] : vector<8x8xf32> to vector<8xf32>
    %205 = vector.shape_cast %204 : vector<8xf32> to vector<8x1xf32>
    %206 = vector.broadcast %205 : vector<8x1xf32> to vector<8x8xf32>
    %207 = arith.subf %203, %206 : vector<8x8xf32>
    %208 = math.exp %207 : vector<8x8xf32>
    %cst_72 = arith.constant dense<0.000000e+00> : vector<8xf32>
    %209 = vector.multi_reduction <add>, %208, %cst_72 [1] : vector<8x8xf32> to vector<8xf32>
    %210 = vector.shape_cast %209 : vector<8xf32> to vector<8x1xf32>
    %211 = tpu.reciprocal %210 {approx = true} : vector<8x1xf32> -> vector<8x1xf32>
    %212 = vector.broadcast %211 : vector<8x1xf32> to vector<8x8xf32>
    %213 = arith.mulf %208, %212 : vector<8x8xf32>
    %214 = arith.truncf %213 : vector<8x8xf32> to vector<8x8xbf16>
    %215 = vector.extract_strided_slice %196 {offsets = [0, 0], sizes = [8, 8], strides = [1, 1]} : vector<8x32xf32> to vector<8x8xf32>
    %216 = arith.truncf %215 : vector<8x8xf32> to vector<8x8xbf16>
    %cst_73 = arith.constant dense<0.000000e+00> : vector<8x8xf32>
    %217 = tpu.matmul %214, %216, %cst_73 {dimension_numbers = #tpu.dot_dimension_numbers<[1], [0], [0], [1], [0, 0, 1, 1], [], []>} : vector<8x8xbf16>, vector<8x8xbf16>, vector<8x8xf32> -> vector<8x8xf32>
    %218 = vector.extract_strided_slice %194 {offsets = [0, 8], sizes = [8, 8], strides = [1, 1]} : vector<8x32xf32> to vector<8x8xf32>
    %219 = arith.truncf %218 : vector<8x8xf32> to vector<8x8xbf16>
    %220 = vector.extract_strided_slice %195 {offsets = [0, 8], sizes = [8, 8], strides = [1, 1]} : vector<8x32xf32> to vector<8x8xf32>
    %221 = arith.truncf %220 : vector<8x8xf32> to vector<8x8xbf16>
    "tpu.trace_start"() <{level = 10 : i32, message = "qe,ke->qk"}> : () -> ()
    %cst_74 = arith.constant dense<0.000000e+00> : vector<8x8xf32>
    %222 = tpu.matmul %219, %221, %cst_74 {dimension_numbers = #tpu.dot_dimension_numbers<[1], [1], [0], [0], [0, 0, 1, 0], [], []>} : vector<8x8xbf16>, vector<8x8xbf16>, vector<8x8xf32> -> vector<8x8xf32>
    "tpu.trace_stop"() : () -> ()
    %223 = vector.broadcast %193 : vector<1x8xf32> to vector<8x8xf32>
    %224 = arith.addf %222, %223 : vector<8x8xf32>
    %cst_75 = arith.constant dense<0xFF800000> : vector<8xf32>
    %225 = vector.multi_reduction <maximumf>, %224, %cst_75 [1] : vector<8x8xf32> to vector<8xf32>
    %226 = vector.shape_cast %225 : vector<8xf32> to vector<8x1xf32>
    %227 = vector.broadcast %226 : vector<8x1xf32> to vector<8x8xf32>
    %228 = arith.subf %224, %227 : vector<8x8xf32>
    %229 = math.exp %228 : vector<8x8xf32>
    %cst_76 = arith.constant dense<0.000000e+00> : vector<8xf32>
    %230 = vector.multi_reduction <add>, %229, %cst_76 [1] : vector<8x8xf32> to vector<8xf32>
    %231 = vector.shape_cast %230 : vector<8xf32> to vector<8x1xf32>
    %232 = tpu.reciprocal %231 {approx = true} : vector<8x1xf32> -> vector<8x1xf32>
    %233 = vector.broadcast %232 : vector<8x1xf32> to vector<8x8xf32>
    %234 = arith.mulf %229, %233 : vector<8x8xf32>
    %235 = arith.truncf %234 : vector<8x8xf32> to vector<8x8xbf16>
    %236 = vector.extract_strided_slice %196 {offsets = [0, 8], sizes = [8, 8], strides = [1, 1]} : vector<8x32xf32> to vector<8x8xf32>
    %237 = arith.truncf %236 : vector<8x8xf32> to vector<8x8xbf16>
    %cst_77 = arith.constant dense<0.000000e+00> : vector<8x8xf32>
    %238 = tpu.matmul %235, %237, %cst_77 {dimension_numbers = #tpu.dot_dimension_numbers<[1], [0], [0], [1], [0, 0, 1, 1], [], []>} : vector<8x8xbf16>, vector<8x8xbf16>, vector<8x8xf32> -> vector<8x8xf32>
    %239 = vector.extract_strided_slice %194 {offsets = [0, 16], sizes = [8, 8], strides = [1, 1]} : vector<8x32xf32> to vector<8x8xf32>
    %240 = arith.truncf %239 : vector<8x8xf32> to vector<8x8xbf16>
    %241 = vector.extract_strided_slice %195 {offsets = [0, 16], sizes = [8, 8], strides = [1, 1]} : vector<8x32xf32> to vector<8x8xf32>
    %242 = arith.truncf %241 : vector<8x8xf32> to vector<8x8xbf16>
    "tpu.trace_start"() <{level = 10 : i32, message = "qe,ke->qk"}> : () -> ()
    %cst_78 = arith.constant dense<0.000000e+00> : vector<8x8xf32>
    %243 = tpu.matmul %240, %242, %cst_78 {dimension_numbers = #tpu.dot_dimension_numbers<[1], [1], [0], [0], [0, 0, 1, 0], [], []>} : vector<8x8xbf16>, vector<8x8xbf16>, vector<8x8xf32> -> vector<8x8xf32>
    "tpu.trace_stop"() : () -> ()
    %244 = vector.broadcast %193 : vector<1x8xf32> to vector<8x8xf32>
    %245 = arith.addf %243, %244 : vector<8x8xf32>
    %cst_79 = arith.constant dense<0xFF800000> : vector<8xf32>
    %246 = vector.multi_reduction <maximumf>, %245, %cst_79 [1] : vector<8x8xf32> to vector<8xf32>
    %247 = vector.shape_cast %246 : vector<8xf32> to vector<8x1xf32>
    %248 = vector.broadcast %247 : vector<8x1xf32> to vector<8x8xf32>
    %249 = arith.subf %245, %248 : vector<8x8xf32>
    %250 = math.exp %249 : vector<8x8xf32>
    %cst_80 = arith.constant dense<0.000000e+00> : vector<8xf32>
    %251 = vector.multi_reduction <add>, %250, %cst_80 [1] : vector<8x8xf32> to vector<8xf32>
    %252 = vector.shape_cast %251 : vector<8xf32> to vector<8x1xf32>
    %253 = tpu.reciprocal %252 {approx = true} : vector<8x1xf32> -> vector<8x1xf32>
    %254 = vector.broadcast %253 : vector<8x1xf32> to vector<8x8xf32>
    %255 = arith.mulf %250, %254 : vector<8x8xf32>
    %256 = arith.truncf %255 : vector<8x8xf32> to vector<8x8xbf16>
    %257 = vector.extract_strided_slice %196 {offsets = [0, 16], sizes = [8, 8], strides = [1, 1]} : vector<8x32xf32> to vector<8x8xf32>
    %258 = arith.truncf %257 : vector<8x8xf32> to vector<8x8xbf16>
    %cst_81 = arith.constant dense<0.000000e+00> : vector<8x8xf32>
    %259 = tpu.matmul %256, %258, %cst_81 {dimension_numbers = #tpu.dot_dimension_numbers<[1], [0], [0], [1], [0, 0, 1, 1], [], []>} : vector<8x8xbf16>, vector<8x8xbf16>, vector<8x8xf32> -> vector<8x8xf32>
    %260 = vector.extract_strided_slice %194 {offsets = [0, 24], sizes = [8, 8], strides = [1, 1]} : vector<8x32xf32> to vector<8x8xf32>
    %261 = arith.truncf %260 : vector<8x8xf32> to vector<8x8xbf16>
    %262 = vector.extract_strided_slice %195 {offsets = [0, 24], sizes = [8, 8], strides = [1, 1]} : vector<8x32xf32> to vector<8x8xf32>
    %263 = arith.truncf %262 : vector<8x8xf32> to vector<8x8xbf16>
    "tpu.trace_start"() <{level = 10 : i32, message = "qe,ke->qk"}> : () -> ()
    %cst_82 = arith.constant dense<0.000000e+00> : vector<8x8xf32>
    %264 = tpu.matmul %261, %263, %cst_82 {dimension_numbers = #tpu.dot_dimension_numbers<[1], [1], [0], [0], [0, 0, 1, 0], [], []>} : vector<8x8xbf16>, vector<8x8xbf16>, vector<8x8xf32> -> vector<8x8xf32>
    "tpu.trace_stop"() : () -> ()
    %265 = vector.broadcast %193 : vector<1x8xf32> to vector<8x8xf32>
    %266 = arith.addf %264, %265 : vector<8x8xf32>
    %cst_83 = arith.constant dense<0xFF800000> : vector<8xf32>
    %267 = vector.multi_reduction <maximumf>, %266, %cst_83 [1] : vector<8x8xf32> to vector<8xf32>
    %268 = vector.shape_cast %267 : vector<8xf32> to vector<8x1xf32>
    %269 = vector.broadcast %268 : vector<8x1xf32> to vector<8x8xf32>
    %270 = arith.subf %266, %269 : vector<8x8xf32>
    %271 = math.exp %270 : vector<8x8xf32>
    %cst_84 = arith.constant dense<0.000000e+00> : vector<8xf32>
    %272 = vector.multi_reduction <add>, %271, %cst_84 [1] : vector<8x8xf32> to vector<8xf32>
    %273 = vector.shape_cast %272 : vector<8xf32> to vector<8x1xf32>
    %274 = tpu.reciprocal %273 {approx = true} : vector<8x1xf32> -> vector<8x1xf32>
    %275 = vector.broadcast %274 : vector<8x1xf32> to vector<8x8xf32>
    %276 = arith.mulf %271, %275 : vector<8x8xf32>
    %277 = arith.truncf %276 : vector<8x8xf32> to vector<8x8xbf16>
    %278 = vector.extract_strided_slice %196 {offsets = [0, 24], sizes = [8, 8], strides = [1, 1]} : vector<8x32xf32> to vector<8x8xf32>
    %279 = arith.truncf %278 : vector<8x8xf32> to vector<8x8xbf16>
    %cst_85 = arith.constant dense<0.000000e+00> : vector<8x8xf32>
    %280 = tpu.matmul %277, %279, %cst_85 {dimension_numbers = #tpu.dot_dimension_numbers<[1], [0], [0], [1], [0, 0, 1, 1], [], []>} : vector<8x8xbf16>, vector<8x8xbf16>, vector<8x8xf32> -> vector<8x8xf32>
    %281 = tpu.concatenate %217, %238, %259, %280 in 1 : vector<8x8xf32>, vector<8x8xf32>, vector<8x8xf32>, vector<8x8xf32> -> vector<8x32xf32>
    %282 = tpu.concatenate %186, %281 in 0 : vector<8x32xf32>, vector<8x32xf32> -> vector<16x32xf32>
    %283 = arith.truncf %282 : vector<16x32xf32> to vector<16x32xbf16>
    %c0_86 = arith.constant 0 : index
    %c0_87 = arith.constant 0 : index
    %284 = vector.load %arg11[%c0_86, %c0_87] : memref<32x32xbf16, #tpu.memory_space<vmem>>, vector<32x32xbf16>
    %cst_88 = arith.constant dense<0.000000e+00> : vector<16x32xf32>
    %285 = tpu.matmul %283, %284, %cst_88 {dimension_numbers = #tpu.dot_dimension_numbers<[1], [0], [0], [1], [0, 0, 1, 1], [], []>} : vector<16x32xbf16>, vector<32x32xbf16>, vector<16x32xf32> -> vector<16x32xf32>
    %c8 = arith.constant 8 : index
    %c0_89 = arith.constant 0 : index
    %286 = vector.load %arg4[%c8, %c0_89] : memref<18x32xf32, #tpu.memory_space<vmem>>, vector<1x32xf32>
    %287 = vector.broadcast %286 : vector<1x32xf32> to vector<16x32xf32>
    %288 = arith.addf %285, %287 : vector<16x32xf32>
    %289 = arith.addf %48, %288 : vector<16x32xf32>
    %c9 = arith.constant 9 : index
    %c0_90 = arith.constant 0 : index
    %290 = vector.load %arg4[%c9, %c0_90] : memref<18x32xf32, #tpu.memory_space<vmem>>, vector<1x32xf32>
    %c10 = arith.constant 10 : index
    %c0_91 = arith.constant 0 : index
    %291 = vector.load %arg4[%c10, %c0_91] : memref<18x32xf32, #tpu.memory_space<vmem>>, vector<1x32xf32>
    %cst_92 = arith.constant dense<0.000000e+00> : vector<16xf32>
    %292 = vector.multi_reduction <add>, %289, %cst_92 [1] : vector<16x32xf32> to vector<16xf32>
    %293 = vector.shape_cast %292 : vector<16xf32> to vector<16x1xf32>
    %cst_93 = arith.constant 3.200000e+01 : f32
    %294 = vector.broadcast %cst_93 : f32 to vector<16x1xf32>
    %295 = arith.divf %293, %294 : vector<16x1xf32>
    %296 = vector.broadcast %295 : vector<16x1xf32> to vector<16x32xf32>
    %297 = arith.subf %289, %296 : vector<16x32xf32>
    %298 = arith.mulf %297, %297 : vector<16x32xf32>
    %cst_94 = arith.constant dense<0.000000e+00> : vector<16xf32>
    %299 = vector.multi_reduction <add>, %298, %cst_94 [1] : vector<16x32xf32> to vector<16xf32>
    %300 = vector.shape_cast %299 : vector<16xf32> to vector<16x1xf32>
    %cst_95 = arith.constant 3.200000e+01 : f32
    %301 = vector.broadcast %cst_95 : f32 to vector<16x1xf32>
    %302 = arith.divf %300, %301 : vector<16x1xf32>
    %303 = vector.broadcast %295 : vector<16x1xf32> to vector<16x32xf32>
    %304 = arith.subf %289, %303 : vector<16x32xf32>
    %cst_96 = arith.constant 9.99999974E-6 : f32
    %305 = vector.broadcast %cst_96 : f32 to vector<16x1xf32>
    %306 = arith.addf %302, %305 : vector<16x1xf32>
    %307 = math.rsqrt %306 : vector<16x1xf32>
    %308 = vector.broadcast %307 : vector<16x1xf32> to vector<16x32xf32>
    %309 = arith.mulf %304, %308 : vector<16x32xf32>
    %310 = vector.broadcast %290 : vector<1x32xf32> to vector<16x32xf32>
    %311 = arith.mulf %309, %310 : vector<16x32xf32>
    %312 = vector.broadcast %291 : vector<1x32xf32> to vector<16x32xf32>
    %313 = arith.addf %311, %312 : vector<16x32xf32>
    %314 = arith.truncf %313 : vector<16x32xf32> to vector<16x32xbf16>
    %c0_97 = arith.constant 0 : index
    %c0_98 = arith.constant 0 : index
    %315 = vector.load %arg12[%c0_97, %c0_98] : memref<32x32xbf16, #tpu.memory_space<vmem>>, vector<32x32xbf16>
    %cst_99 = arith.constant dense<0.000000e+00> : vector<16x32xf32>
    %316 = tpu.matmul %314, %315, %cst_99 {dimension_numbers = #tpu.dot_dimension_numbers<[1], [0], [0], [1], [0, 0, 1, 1], [], []>} : vector<16x32xbf16>, vector<32x32xbf16>, vector<16x32xf32> -> vector<16x32xf32>
    %c0_100 = arith.constant 0 : index
    %c0_101 = arith.constant 0 : index
    %317 = vector.load %arg13[%c0_100, %c0_101] : memref<32x32xbf16, #tpu.memory_space<vmem>>, vector<32x32xbf16>
    %cst_102 = arith.constant dense<0.000000e+00> : vector<16x32xf32>
    %318 = tpu.matmul %314, %317, %cst_102 {dimension_numbers = #tpu.dot_dimension_numbers<[1], [0], [0], [1], [0, 0, 1, 1], [], []>} : vector<16x32xbf16>, vector<32x32xbf16>, vector<16x32xf32> -> vector<16x32xf32>
    %319 = arith.negf %318 : vector<16x32xf32>
    %320 = math.exp %319 : vector<16x32xf32>
    %cst_103 = arith.constant 1.000000e+00 : f32
    %321 = vector.broadcast %cst_103 : f32 to vector<16x32xf32>
    %322 = arith.addf %321, %320 : vector<16x32xf32>
    %323 = arith.divf %321, %322 : vector<16x32xf32>
    %324 = arith.mulf %316, %323 : vector<16x32xf32>
    %c0_104 = arith.constant 0 : index
    %c0_105 = arith.constant 0 : index
    %325 = vector.load %arg14[%c0_104, %c0_105] : memref<31x32xf32, #tpu.memory_space<vmem>>, vector<31x32xf32>
    %cst_106 = arith.constant 0.000000e+00 : f32
    %326 = vector.broadcast %cst_106 : f32 to vector<15x32xf32>
    %327 = vector.extract_strided_slice %324 {offsets = [0, 0], sizes = [8, 32], strides = [1, 1]} : vector<16x32xf32> to vector<8x32xf32>
    %328 = tpu.concatenate %326, %327, %326 in 0 : vector<15x32xf32>, vector<8x32xf32>, vector<15x32xf32> -> vector<38x32xf32>
    %cst_107 = arith.constant 0.000000e+00 : f32
    %329 = vector.broadcast %cst_107 : f32 to vector<8x32xf32>
    %330 = vector.extract_strided_slice %328 {offsets = [0, 0], sizes = [8, 32], strides = [1, 1]} : vector<38x32xf32> to vector<8x32xf32>
    %331 = vector.extract_strided_slice %325 {offsets = [0, 0], sizes = [1, 32], strides = [1, 1]} : vector<31x32xf32> to vector<1x32xf32>
    %332 = vector.broadcast %331 : vector<1x32xf32> to vector<8x32xf32>
    %333 = arith.mulf %330, %332 : vector<8x32xf32>
    %334 = arith.addf %329, %333 : vector<8x32xf32>
    %335 = vector.extract_strided_slice %328 {offsets = [1, 0], sizes = [8, 32], strides = [1, 1]} : vector<38x32xf32> to vector<8x32xf32>
    %336 = vector.extract_strided_slice %325 {offsets = [1, 0], sizes = [1, 32], strides = [1, 1]} : vector<31x32xf32> to vector<1x32xf32>
    %337 = vector.broadcast %336 : vector<1x32xf32> to vector<8x32xf32>
    %338 = arith.mulf %335, %337 : vector<8x32xf32>
    %339 = arith.addf %334, %338 : vector<8x32xf32>
    %340 = vector.extract_strided_slice %328 {offsets = [2, 0], sizes = [8, 32], strides = [1, 1]} : vector<38x32xf32> to vector<8x32xf32>
    %341 = vector.extract_strided_slice %325 {offsets = [2, 0], sizes = [1, 32], strides = [1, 1]} : vector<31x32xf32> to vector<1x32xf32>
    %342 = vector.broadcast %341 : vector<1x32xf32> to vector<8x32xf32>
    %343 = arith.mulf %340, %342 : vector<8x32xf32>
    %344 = arith.addf %339, %343 : vector<8x32xf32>
    %345 = vector.extract_strided_slice %328 {offsets = [3, 0], sizes = [8, 32], strides = [1, 1]} : vector<38x32xf32> to vector<8x32xf32>
    %346 = vector.extract_strided_slice %325 {offsets = [3, 0], sizes = [1, 32], strides = [1, 1]} : vector<31x32xf32> to vector<1x32xf32>
    %347 = vector.broadcast %346 : vector<1x32xf32> to vector<8x32xf32>
    %348 = arith.mulf %345, %347 : vector<8x32xf32>
    %349 = arith.addf %344, %348 : vector<8x32xf32>
    %350 = vector.extract_strided_slice %328 {offsets = [4, 0], sizes = [8, 32], strides = [1, 1]} : vector<38x32xf32> to vector<8x32xf32>
    %351 = vector.extract_strided_slice %325 {offsets = [4, 0], sizes = [1, 32], strides = [1, 1]} : vector<31x32xf32> to vector<1x32xf32>
    %352 = vector.broadcast %351 : vector<1x32xf32> to vector<8x32xf32>
    %353 = arith.mulf %350, %352 : vector<8x32xf32>
    %354 = arith.addf %349, %353 : vector<8x32xf32>
    %355 = vector.extract_strided_slice %328 {offsets = [5, 0], sizes = [8, 32], strides = [1, 1]} : vector<38x32xf32> to vector<8x32xf32>
    %356 = vector.extract_strided_slice %325 {offsets = [5, 0], sizes = [1, 32], strides = [1, 1]} : vector<31x32xf32> to vector<1x32xf32>
    %357 = vector.broadcast %356 : vector<1x32xf32> to vector<8x32xf32>
    %358 = arith.mulf %355, %357 : vector<8x32xf32>
    %359 = arith.addf %354, %358 : vector<8x32xf32>
    %360 = vector.extract_strided_slice %328 {offsets = [6, 0], sizes = [8, 32], strides = [1, 1]} : vector<38x32xf32> to vector<8x32xf32>
    %361 = vector.extract_strided_slice %325 {offsets = [6, 0], sizes = [1, 32], strides = [1, 1]} : vector<31x32xf32> to vector<1x32xf32>
    %362 = vector.broadcast %361 : vector<1x32xf32> to vector<8x32xf32>
    %363 = arith.mulf %360, %362 : vector<8x32xf32>
    %364 = arith.addf %359, %363 : vector<8x32xf32>
    %365 = vector.extract_strided_slice %328 {offsets = [7, 0], sizes = [8, 32], strides = [1, 1]} : vector<38x32xf32> to vector<8x32xf32>
    %366 = vector.extract_strided_slice %325 {offsets = [7, 0], sizes = [1, 32], strides = [1, 1]} : vector<31x32xf32> to vector<1x32xf32>
    %367 = vector.broadcast %366 : vector<1x32xf32> to vector<8x32xf32>
    %368 = arith.mulf %365, %367 : vector<8x32xf32>
    %369 = arith.addf %364, %368 : vector<8x32xf32>
    %370 = vector.extract_strided_slice %328 {offsets = [8, 0], sizes = [8, 32], strides = [1, 1]} : vector<38x32xf32> to vector<8x32xf32>
    %371 = vector.extract_strided_slice %325 {offsets = [8, 0], sizes = [1, 32], strides = [1, 1]} : vector<31x32xf32> to vector<1x32xf32>
    %372 = vector.broadcast %371 : vector<1x32xf32> to vector<8x32xf32>
    %373 = arith.mulf %370, %372 : vector<8x32xf32>
    %374 = arith.addf %369, %373 : vector<8x32xf32>
    %375 = vector.extract_strided_slice %328 {offsets = [9, 0], sizes = [8, 32], strides = [1, 1]} : vector<38x32xf32> to vector<8x32xf32>
    %376 = vector.extract_strided_slice %325 {offsets = [9, 0], sizes = [1, 32], strides = [1, 1]} : vector<31x32xf32> to vector<1x32xf32>
    %377 = vector.broadcast %376 : vector<1x32xf32> to vector<8x32xf32>
    %378 = arith.mulf %375, %377 : vector<8x32xf32>
    %379 = arith.addf %374, %378 : vector<8x32xf32>
    %380 = vector.extract_strided_slice %328 {offsets = [10, 0], sizes = [8, 32], strides = [1, 1]} : vector<38x32xf32> to vector<8x32xf32>
    %381 = vector.extract_strided_slice %325 {offsets = [10, 0], sizes = [1, 32], strides = [1, 1]} : vector<31x32xf32> to vector<1x32xf32>
    %382 = vector.broadcast %381 : vector<1x32xf32> to vector<8x32xf32>
    %383 = arith.mulf %380, %382 : vector<8x32xf32>
    %384 = arith.addf %379, %383 : vector<8x32xf32>
    %385 = vector.extract_strided_slice %328 {offsets = [11, 0], sizes = [8, 32], strides = [1, 1]} : vector<38x32xf32> to vector<8x32xf32>
    %386 = vector.extract_strided_slice %325 {offsets = [11, 0], sizes = [1, 32], strides = [1, 1]} : vector<31x32xf32> to vector<1x32xf32>
    %387 = vector.broadcast %386 : vector<1x32xf32> to vector<8x32xf32>
    %388 = arith.mulf %385, %387 : vector<8x32xf32>
    %389 = arith.addf %384, %388 : vector<8x32xf32>
    %390 = vector.extract_strided_slice %328 {offsets = [12, 0], sizes = [8, 32], strides = [1, 1]} : vector<38x32xf32> to vector<8x32xf32>
    %391 = vector.extract_strided_slice %325 {offsets = [12, 0], sizes = [1, 32], strides = [1, 1]} : vector<31x32xf32> to vector<1x32xf32>
    %392 = vector.broadcast %391 : vector<1x32xf32> to vector<8x32xf32>
    %393 = arith.mulf %390, %392 : vector<8x32xf32>
    %394 = arith.addf %389, %393 : vector<8x32xf32>
    %395 = vector.extract_strided_slice %328 {offsets = [13, 0], sizes = [8, 32], strides = [1, 1]} : vector<38x32xf32> to vector<8x32xf32>
    %396 = vector.extract_strided_slice %325 {offsets = [13, 0], sizes = [1, 32], strides = [1, 1]} : vector<31x32xf32> to vector<1x32xf32>
    %397 = vector.broadcast %396 : vector<1x32xf32> to vector<8x32xf32>
    %398 = arith.mulf %395, %397 : vector<8x32xf32>
    %399 = arith.addf %394, %398 : vector<8x32xf32>
    %400 = vector.extract_strided_slice %328 {offsets = [14, 0], sizes = [8, 32], strides = [1, 1]} : vector<38x32xf32> to vector<8x32xf32>
    %401 = vector.extract_strided_slice %325 {offsets = [14, 0], sizes = [1, 32], strides = [1, 1]} : vector<31x32xf32> to vector<1x32xf32>
    %402 = vector.broadcast %401 : vector<1x32xf32> to vector<8x32xf32>
    %403 = arith.mulf %400, %402 : vector<8x32xf32>
    %404 = arith.addf %399, %403 : vector<8x32xf32>
    %405 = vector.extract_strided_slice %328 {offsets = [15, 0], sizes = [8, 32], strides = [1, 1]} : vector<38x32xf32> to vector<8x32xf32>
    %406 = vector.extract_strided_slice %325 {offsets = [15, 0], sizes = [1, 32], strides = [1, 1]} : vector<31x32xf32> to vector<1x32xf32>
    %407 = vector.broadcast %406 : vector<1x32xf32> to vector<8x32xf32>
    %408 = arith.mulf %405, %407 : vector<8x32xf32>
    %409 = arith.addf %404, %408 : vector<8x32xf32>
    %410 = vector.extract_strided_slice %328 {offsets = [16, 0], sizes = [8, 32], strides = [1, 1]} : vector<38x32xf32> to vector<8x32xf32>
    %411 = vector.extract_strided_slice %325 {offsets = [16, 0], sizes = [1, 32], strides = [1, 1]} : vector<31x32xf32> to vector<1x32xf32>
    %412 = vector.broadcast %411 : vector<1x32xf32> to vector<8x32xf32>
    %413 = arith.mulf %410, %412 : vector<8x32xf32>
    %414 = arith.addf %409, %413 : vector<8x32xf32>
    %415 = vector.extract_strided_slice %328 {offsets = [17, 0], sizes = [8, 32], strides = [1, 1]} : vector<38x32xf32> to vector<8x32xf32>
    %416 = vector.extract_strided_slice %325 {offsets = [17, 0], sizes = [1, 32], strides = [1, 1]} : vector<31x32xf32> to vector<1x32xf32>
    %417 = vector.broadcast %416 : vector<1x32xf32> to vector<8x32xf32>
    %418 = arith.mulf %415, %417 : vector<8x32xf32>
    %419 = arith.addf %414, %418 : vector<8x32xf32>
    %420 = vector.extract_strided_slice %328 {offsets = [18, 0], sizes = [8, 32], strides = [1, 1]} : vector<38x32xf32> to vector<8x32xf32>
    %421 = vector.extract_strided_slice %325 {offsets = [18, 0], sizes = [1, 32], strides = [1, 1]} : vector<31x32xf32> to vector<1x32xf32>
    %422 = vector.broadcast %421 : vector<1x32xf32> to vector<8x32xf32>
    %423 = arith.mulf %420, %422 : vector<8x32xf32>
    %424 = arith.addf %419, %423 : vector<8x32xf32>
    %425 = vector.extract_strided_slice %328 {offsets = [19, 0], sizes = [8, 32], strides = [1, 1]} : vector<38x32xf32> to vector<8x32xf32>
    %426 = vector.extract_strided_slice %325 {offsets = [19, 0], sizes = [1, 32], strides = [1, 1]} : vector<31x32xf32> to vector<1x32xf32>
    %427 = vector.broadcast %426 : vector<1x32xf32> to vector<8x32xf32>
    %428 = arith.mulf %425, %427 : vector<8x32xf32>
    %429 = arith.addf %424, %428 : vector<8x32xf32>
    %430 = vector.extract_strided_slice %328 {offsets = [20, 0], sizes = [8, 32], strides = [1, 1]} : vector<38x32xf32> to vector<8x32xf32>
    %431 = vector.extract_strided_slice %325 {offsets = [20, 0], sizes = [1, 32], strides = [1, 1]} : vector<31x32xf32> to vector<1x32xf32>
    %432 = vector.broadcast %431 : vector<1x32xf32> to vector<8x32xf32>
    %433 = arith.mulf %430, %432 : vector<8x32xf32>
    %434 = arith.addf %429, %433 : vector<8x32xf32>
    %435 = vector.extract_strided_slice %328 {offsets = [21, 0], sizes = [8, 32], strides = [1, 1]} : vector<38x32xf32> to vector<8x32xf32>
    %436 = vector.extract_strided_slice %325 {offsets = [21, 0], sizes = [1, 32], strides = [1, 1]} : vector<31x32xf32> to vector<1x32xf32>
    %437 = vector.broadcast %436 : vector<1x32xf32> to vector<8x32xf32>
    %438 = arith.mulf %435, %437 : vector<8x32xf32>
    %439 = arith.addf %434, %438 : vector<8x32xf32>
    %440 = vector.extract_strided_slice %328 {offsets = [22, 0], sizes = [8, 32], strides = [1, 1]} : vector<38x32xf32> to vector<8x32xf32>
    %441 = vector.extract_strided_slice %325 {offsets = [22, 0], sizes = [1, 32], strides = [1, 1]} : vector<31x32xf32> to vector<1x32xf32>
    %442 = vector.broadcast %441 : vector<1x32xf32> to vector<8x32xf32>
    %443 = arith.mulf %440, %442 : vector<8x32xf32>
    %444 = arith.addf %439, %443 : vector<8x32xf32>
    %445 = vector.extract_strided_slice %328 {offsets = [23, 0], sizes = [8, 32], strides = [1, 1]} : vector<38x32xf32> to vector<8x32xf32>
    %446 = vector.extract_strided_slice %325 {offsets = [23, 0], sizes = [1, 32], strides = [1, 1]} : vector<31x32xf32> to vector<1x32xf32>
    %447 = vector.broadcast %446 : vector<1x32xf32> to vector<8x32xf32>
    %448 = arith.mulf %445, %447 : vector<8x32xf32>
    %449 = arith.addf %444, %448 : vector<8x32xf32>
    %450 = vector.extract_strided_slice %328 {offsets = [24, 0], sizes = [8, 32], strides = [1, 1]} : vector<38x32xf32> to vector<8x32xf32>
    %451 = vector.extract_strided_slice %325 {offsets = [24, 0], sizes = [1, 32], strides = [1, 1]} : vector<31x32xf32> to vector<1x32xf32>
    %452 = vector.broadcast %451 : vector<1x32xf32> to vector<8x32xf32>
    %453 = arith.mulf %450, %452 : vector<8x32xf32>
    %454 = arith.addf %449, %453 : vector<8x32xf32>
    %455 = vector.extract_strided_slice %328 {offsets = [25, 0], sizes = [8, 32], strides = [1, 1]} : vector<38x32xf32> to vector<8x32xf32>
    %456 = vector.extract_strided_slice %325 {offsets = [25, 0], sizes = [1, 32], strides = [1, 1]} : vector<31x32xf32> to vector<1x32xf32>
    %457 = vector.broadcast %456 : vector<1x32xf32> to vector<8x32xf32>
    %458 = arith.mulf %455, %457 : vector<8x32xf32>
    %459 = arith.addf %454, %458 : vector<8x32xf32>
    %460 = vector.extract_strided_slice %328 {offsets = [26, 0], sizes = [8, 32], strides = [1, 1]} : vector<38x32xf32> to vector<8x32xf32>
    %461 = vector.extract_strided_slice %325 {offsets = [26, 0], sizes = [1, 32], strides = [1, 1]} : vector<31x32xf32> to vector<1x32xf32>
    %462 = vector.broadcast %461 : vector<1x32xf32> to vector<8x32xf32>
    %463 = arith.mulf %460, %462 : vector<8x32xf32>
    %464 = arith.addf %459, %463 : vector<8x32xf32>
    %465 = vector.extract_strided_slice %328 {offsets = [27, 0], sizes = [8, 32], strides = [1, 1]} : vector<38x32xf32> to vector<8x32xf32>
    %466 = vector.extract_strided_slice %325 {offsets = [27, 0], sizes = [1, 32], strides = [1, 1]} : vector<31x32xf32> to vector<1x32xf32>
    %467 = vector.broadcast %466 : vector<1x32xf32> to vector<8x32xf32>
    %468 = arith.mulf %465, %467 : vector<8x32xf32>
    %469 = arith.addf %464, %468 : vector<8x32xf32>
    %470 = vector.extract_strided_slice %328 {offsets = [28, 0], sizes = [8, 32], strides = [1, 1]} : vector<38x32xf32> to vector<8x32xf32>
    %471 = vector.extract_strided_slice %325 {offsets = [28, 0], sizes = [1, 32], strides = [1, 1]} : vector<31x32xf32> to vector<1x32xf32>
    %472 = vector.broadcast %471 : vector<1x32xf32> to vector<8x32xf32>
    %473 = arith.mulf %470, %472 : vector<8x32xf32>
    %474 = arith.addf %469, %473 : vector<8x32xf32>
    %475 = vector.extract_strided_slice %328 {offsets = [29, 0], sizes = [8, 32], strides = [1, 1]} : vector<38x32xf32> to vector<8x32xf32>
    %476 = vector.extract_strided_slice %325 {offsets = [29, 0], sizes = [1, 32], strides = [1, 1]} : vector<31x32xf32> to vector<1x32xf32>
    %477 = vector.broadcast %476 : vector<1x32xf32> to vector<8x32xf32>
    %478 = arith.mulf %475, %477 : vector<8x32xf32>
    %479 = arith.addf %474, %478 : vector<8x32xf32>
    %480 = vector.extract_strided_slice %328 {offsets = [30, 0], sizes = [8, 32], strides = [1, 1]} : vector<38x32xf32> to vector<8x32xf32>
    %481 = vector.extract_strided_slice %325 {offsets = [30, 0], sizes = [1, 32], strides = [1, 1]} : vector<31x32xf32> to vector<1x32xf32>
    %482 = vector.broadcast %481 : vector<1x32xf32> to vector<8x32xf32>
    %483 = arith.mulf %480, %482 : vector<8x32xf32>
    %484 = arith.addf %479, %483 : vector<8x32xf32>
    %485 = vector.extract_strided_slice %324 {offsets = [8, 0], sizes = [8, 32], strides = [1, 1]} : vector<16x32xf32> to vector<8x32xf32>
    %486 = tpu.concatenate %326, %485, %326 in 0 : vector<15x32xf32>, vector<8x32xf32>, vector<15x32xf32> -> vector<38x32xf32>
    %cst_108 = arith.constant 0.000000e+00 : f32
    %487 = vector.broadcast %cst_108 : f32 to vector<8x32xf32>
    %488 = vector.extract_strided_slice %486 {offsets = [0, 0], sizes = [8, 32], strides = [1, 1]} : vector<38x32xf32> to vector<8x32xf32>
    %489 = vector.extract_strided_slice %325 {offsets = [0, 0], sizes = [1, 32], strides = [1, 1]} : vector<31x32xf32> to vector<1x32xf32>
    %490 = vector.broadcast %489 : vector<1x32xf32> to vector<8x32xf32>
    %491 = arith.mulf %488, %490 : vector<8x32xf32>
    %492 = arith.addf %487, %491 : vector<8x32xf32>
    %493 = vector.extract_strided_slice %486 {offsets = [1, 0], sizes = [8, 32], strides = [1, 1]} : vector<38x32xf32> to vector<8x32xf32>
    %494 = vector.extract_strided_slice %325 {offsets = [1, 0], sizes = [1, 32], strides = [1, 1]} : vector<31x32xf32> to vector<1x32xf32>
    %495 = vector.broadcast %494 : vector<1x32xf32> to vector<8x32xf32>
    %496 = arith.mulf %493, %495 : vector<8x32xf32>
    %497 = arith.addf %492, %496 : vector<8x32xf32>
    %498 = vector.extract_strided_slice %486 {offsets = [2, 0], sizes = [8, 32], strides = [1, 1]} : vector<38x32xf32> to vector<8x32xf32>
    %499 = vector.extract_strided_slice %325 {offsets = [2, 0], sizes = [1, 32], strides = [1, 1]} : vector<31x32xf32> to vector<1x32xf32>
    %500 = vector.broadcast %499 : vector<1x32xf32> to vector<8x32xf32>
    %501 = arith.mulf %498, %500 : vector<8x32xf32>
    %502 = arith.addf %497, %501 : vector<8x32xf32>
    %503 = vector.extract_strided_slice %486 {offsets = [3, 0], sizes = [8, 32], strides = [1, 1]} : vector<38x32xf32> to vector<8x32xf32>
    %504 = vector.extract_strided_slice %325 {offsets = [3, 0], sizes = [1, 32], strides = [1, 1]} : vector<31x32xf32> to vector<1x32xf32>
    %505 = vector.broadcast %504 : vector<1x32xf32> to vector<8x32xf32>
    %506 = arith.mulf %503, %505 : vector<8x32xf32>
    %507 = arith.addf %502, %506 : vector<8x32xf32>
    %508 = vector.extract_strided_slice %486 {offsets = [4, 0], sizes = [8, 32], strides = [1, 1]} : vector<38x32xf32> to vector<8x32xf32>
    %509 = vector.extract_strided_slice %325 {offsets = [4, 0], sizes = [1, 32], strides = [1, 1]} : vector<31x32xf32> to vector<1x32xf32>
    %510 = vector.broadcast %509 : vector<1x32xf32> to vector<8x32xf32>
    %511 = arith.mulf %508, %510 : vector<8x32xf32>
    %512 = arith.addf %507, %511 : vector<8x32xf32>
    %513 = vector.extract_strided_slice %486 {offsets = [5, 0], sizes = [8, 32], strides = [1, 1]} : vector<38x32xf32> to vector<8x32xf32>
    %514 = vector.extract_strided_slice %325 {offsets = [5, 0], sizes = [1, 32], strides = [1, 1]} : vector<31x32xf32> to vector<1x32xf32>
    %515 = vector.broadcast %514 : vector<1x32xf32> to vector<8x32xf32>
    %516 = arith.mulf %513, %515 : vector<8x32xf32>
    %517 = arith.addf %512, %516 : vector<8x32xf32>
    %518 = vector.extract_strided_slice %486 {offsets = [6, 0], sizes = [8, 32], strides = [1, 1]} : vector<38x32xf32> to vector<8x32xf32>
    %519 = vector.extract_strided_slice %325 {offsets = [6, 0], sizes = [1, 32], strides = [1, 1]} : vector<31x32xf32> to vector<1x32xf32>
    %520 = vector.broadcast %519 : vector<1x32xf32> to vector<8x32xf32>
    %521 = arith.mulf %518, %520 : vector<8x32xf32>
    %522 = arith.addf %517, %521 : vector<8x32xf32>
    %523 = vector.extract_strided_slice %486 {offsets = [7, 0], sizes = [8, 32], strides = [1, 1]} : vector<38x32xf32> to vector<8x32xf32>
    %524 = vector.extract_strided_slice %325 {offsets = [7, 0], sizes = [1, 32], strides = [1, 1]} : vector<31x32xf32> to vector<1x32xf32>
    %525 = vector.broadcast %524 : vector<1x32xf32> to vector<8x32xf32>
    %526 = arith.mulf %523, %525 : vector<8x32xf32>
    %527 = arith.addf %522, %526 : vector<8x32xf32>
    %528 = vector.extract_strided_slice %486 {offsets = [8, 0], sizes = [8, 32], strides = [1, 1]} : vector<38x32xf32> to vector<8x32xf32>
    %529 = vector.extract_strided_slice %325 {offsets = [8, 0], sizes = [1, 32], strides = [1, 1]} : vector<31x32xf32> to vector<1x32xf32>
    %530 = vector.broadcast %529 : vector<1x32xf32> to vector<8x32xf32>
    %531 = arith.mulf %528, %530 : vector<8x32xf32>
    %532 = arith.addf %527, %531 : vector<8x32xf32>
    %533 = vector.extract_strided_slice %486 {offsets = [9, 0], sizes = [8, 32], strides = [1, 1]} : vector<38x32xf32> to vector<8x32xf32>
    %534 = vector.extract_strided_slice %325 {offsets = [9, 0], sizes = [1, 32], strides = [1, 1]} : vector<31x32xf32> to vector<1x32xf32>
    %535 = vector.broadcast %534 : vector<1x32xf32> to vector<8x32xf32>
    %536 = arith.mulf %533, %535 : vector<8x32xf32>
    %537 = arith.addf %532, %536 : vector<8x32xf32>
    %538 = vector.extract_strided_slice %486 {offsets = [10, 0], sizes = [8, 32], strides = [1, 1]} : vector<38x32xf32> to vector<8x32xf32>
    %539 = vector.extract_strided_slice %325 {offsets = [10, 0], sizes = [1, 32], strides = [1, 1]} : vector<31x32xf32> to vector<1x32xf32>
    %540 = vector.broadcast %539 : vector<1x32xf32> to vector<8x32xf32>
    %541 = arith.mulf %538, %540 : vector<8x32xf32>
    %542 = arith.addf %537, %541 : vector<8x32xf32>
    %543 = vector.extract_strided_slice %486 {offsets = [11, 0], sizes = [8, 32], strides = [1, 1]} : vector<38x32xf32> to vector<8x32xf32>
    %544 = vector.extract_strided_slice %325 {offsets = [11, 0], sizes = [1, 32], strides = [1, 1]} : vector<31x32xf32> to vector<1x32xf32>
    %545 = vector.broadcast %544 : vector<1x32xf32> to vector<8x32xf32>
    %546 = arith.mulf %543, %545 : vector<8x32xf32>
    %547 = arith.addf %542, %546 : vector<8x32xf32>
    %548 = vector.extract_strided_slice %486 {offsets = [12, 0], sizes = [8, 32], strides = [1, 1]} : vector<38x32xf32> to vector<8x32xf32>
    %549 = vector.extract_strided_slice %325 {offsets = [12, 0], sizes = [1, 32], strides = [1, 1]} : vector<31x32xf32> to vector<1x32xf32>
    %550 = vector.broadcast %549 : vector<1x32xf32> to vector<8x32xf32>
    %551 = arith.mulf %548, %550 : vector<8x32xf32>
    %552 = arith.addf %547, %551 : vector<8x32xf32>
    %553 = vector.extract_strided_slice %486 {offsets = [13, 0], sizes = [8, 32], strides = [1, 1]} : vector<38x32xf32> to vector<8x32xf32>
    %554 = vector.extract_strided_slice %325 {offsets = [13, 0], sizes = [1, 32], strides = [1, 1]} : vector<31x32xf32> to vector<1x32xf32>
    %555 = vector.broadcast %554 : vector<1x32xf32> to vector<8x32xf32>
    %556 = arith.mulf %553, %555 : vector<8x32xf32>
    %557 = arith.addf %552, %556 : vector<8x32xf32>
    %558 = vector.extract_strided_slice %486 {offsets = [14, 0], sizes = [8, 32], strides = [1, 1]} : vector<38x32xf32> to vector<8x32xf32>
    %559 = vector.extract_strided_slice %325 {offsets = [14, 0], sizes = [1, 32], strides = [1, 1]} : vector<31x32xf32> to vector<1x32xf32>
    %560 = vector.broadcast %559 : vector<1x32xf32> to vector<8x32xf32>
    %561 = arith.mulf %558, %560 : vector<8x32xf32>
    %562 = arith.addf %557, %561 : vector<8x32xf32>
    %563 = vector.extract_strided_slice %486 {offsets = [15, 0], sizes = [8, 32], strides = [1, 1]} : vector<38x32xf32> to vector<8x32xf32>
    %564 = vector.extract_strided_slice %325 {offsets = [15, 0], sizes = [1, 32], strides = [1, 1]} : vector<31x32xf32> to vector<1x32xf32>
    %565 = vector.broadcast %564 : vector<1x32xf32> to vector<8x32xf32>
    %566 = arith.mulf %563, %565 : vector<8x32xf32>
    %567 = arith.addf %562, %566 : vector<8x32xf32>
    %568 = vector.extract_strided_slice %486 {offsets = [16, 0], sizes = [8, 32], strides = [1, 1]} : vector<38x32xf32> to vector<8x32xf32>
    %569 = vector.extract_strided_slice %325 {offsets = [16, 0], sizes = [1, 32], strides = [1, 1]} : vector<31x32xf32> to vector<1x32xf32>
    %570 = vector.broadcast %569 : vector<1x32xf32> to vector<8x32xf32>
    %571 = arith.mulf %568, %570 : vector<8x32xf32>
    %572 = arith.addf %567, %571 : vector<8x32xf32>
    %573 = vector.extract_strided_slice %486 {offsets = [17, 0], sizes = [8, 32], strides = [1, 1]} : vector<38x32xf32> to vector<8x32xf32>
    %574 = vector.extract_strided_slice %325 {offsets = [17, 0], sizes = [1, 32], strides = [1, 1]} : vector<31x32xf32> to vector<1x32xf32>
    %575 = vector.broadcast %574 : vector<1x32xf32> to vector<8x32xf32>
    %576 = arith.mulf %573, %575 : vector<8x32xf32>
    %577 = arith.addf %572, %576 : vector<8x32xf32>
    %578 = vector.extract_strided_slice %486 {offsets = [18, 0], sizes = [8, 32], strides = [1, 1]} : vector<38x32xf32> to vector<8x32xf32>
    %579 = vector.extract_strided_slice %325 {offsets = [18, 0], sizes = [1, 32], strides = [1, 1]} : vector<31x32xf32> to vector<1x32xf32>
    %580 = vector.broadcast %579 : vector<1x32xf32> to vector<8x32xf32>
    %581 = arith.mulf %578, %580 : vector<8x32xf32>
    %582 = arith.addf %577, %581 : vector<8x32xf32>
    %583 = vector.extract_strided_slice %486 {offsets = [19, 0], sizes = [8, 32], strides = [1, 1]} : vector<38x32xf32> to vector<8x32xf32>
    %584 = vector.extract_strided_slice %325 {offsets = [19, 0], sizes = [1, 32], strides = [1, 1]} : vector<31x32xf32> to vector<1x32xf32>
    %585 = vector.broadcast %584 : vector<1x32xf32> to vector<8x32xf32>
    %586 = arith.mulf %583, %585 : vector<8x32xf32>
    %587 = arith.addf %582, %586 : vector<8x32xf32>
    %588 = vector.extract_strided_slice %486 {offsets = [20, 0], sizes = [8, 32], strides = [1, 1]} : vector<38x32xf32> to vector<8x32xf32>
    %589 = vector.extract_strided_slice %325 {offsets = [20, 0], sizes = [1, 32], strides = [1, 1]} : vector<31x32xf32> to vector<1x32xf32>
    %590 = vector.broadcast %589 : vector<1x32xf32> to vector<8x32xf32>
    %591 = arith.mulf %588, %590 : vector<8x32xf32>
    %592 = arith.addf %587, %591 : vector<8x32xf32>
    %593 = vector.extract_strided_slice %486 {offsets = [21, 0], sizes = [8, 32], strides = [1, 1]} : vector<38x32xf32> to vector<8x32xf32>
    %594 = vector.extract_strided_slice %325 {offsets = [21, 0], sizes = [1, 32], strides = [1, 1]} : vector<31x32xf32> to vector<1x32xf32>
    %595 = vector.broadcast %594 : vector<1x32xf32> to vector<8x32xf32>
    %596 = arith.mulf %593, %595 : vector<8x32xf32>
    %597 = arith.addf %592, %596 : vector<8x32xf32>
    %598 = vector.extract_strided_slice %486 {offsets = [22, 0], sizes = [8, 32], strides = [1, 1]} : vector<38x32xf32> to vector<8x32xf32>
    %599 = vector.extract_strided_slice %325 {offsets = [22, 0], sizes = [1, 32], strides = [1, 1]} : vector<31x32xf32> to vector<1x32xf32>
    %600 = vector.broadcast %599 : vector<1x32xf32> to vector<8x32xf32>
    %601 = arith.mulf %598, %600 : vector<8x32xf32>
    %602 = arith.addf %597, %601 : vector<8x32xf32>
    %603 = vector.extract_strided_slice %486 {offsets = [23, 0], sizes = [8, 32], strides = [1, 1]} : vector<38x32xf32> to vector<8x32xf32>
    %604 = vector.extract_strided_slice %325 {offsets = [23, 0], sizes = [1, 32], strides = [1, 1]} : vector<31x32xf32> to vector<1x32xf32>
    %605 = vector.broadcast %604 : vector<1x32xf32> to vector<8x32xf32>
    %606 = arith.mulf %603, %605 : vector<8x32xf32>
    %607 = arith.addf %602, %606 : vector<8x32xf32>
    %608 = vector.extract_strided_slice %486 {offsets = [24, 0], sizes = [8, 32], strides = [1, 1]} : vector<38x32xf32> to vector<8x32xf32>
    %609 = vector.extract_strided_slice %325 {offsets = [24, 0], sizes = [1, 32], strides = [1, 1]} : vector<31x32xf32> to vector<1x32xf32>
    %610 = vector.broadcast %609 : vector<1x32xf32> to vector<8x32xf32>
    %611 = arith.mulf %608, %610 : vector<8x32xf32>
    %612 = arith.addf %607, %611 : vector<8x32xf32>
    %613 = vector.extract_strided_slice %486 {offsets = [25, 0], sizes = [8, 32], strides = [1, 1]} : vector<38x32xf32> to vector<8x32xf32>
    %614 = vector.extract_strided_slice %325 {offsets = [25, 0], sizes = [1, 32], strides = [1, 1]} : vector<31x32xf32> to vector<1x32xf32>
    %615 = vector.broadcast %614 : vector<1x32xf32> to vector<8x32xf32>
    %616 = arith.mulf %613, %615 : vector<8x32xf32>
    %617 = arith.addf %612, %616 : vector<8x32xf32>
    %618 = vector.extract_strided_slice %486 {offsets = [26, 0], sizes = [8, 32], strides = [1, 1]} : vector<38x32xf32> to vector<8x32xf32>
    %619 = vector.extract_strided_slice %325 {offsets = [26, 0], sizes = [1, 32], strides = [1, 1]} : vector<31x32xf32> to vector<1x32xf32>
    %620 = vector.broadcast %619 : vector<1x32xf32> to vector<8x32xf32>
    %621 = arith.mulf %618, %620 : vector<8x32xf32>
    %622 = arith.addf %617, %621 : vector<8x32xf32>
    %623 = vector.extract_strided_slice %486 {offsets = [27, 0], sizes = [8, 32], strides = [1, 1]} : vector<38x32xf32> to vector<8x32xf32>
    %624 = vector.extract_strided_slice %325 {offsets = [27, 0], sizes = [1, 32], strides = [1, 1]} : vector<31x32xf32> to vector<1x32xf32>
    %625 = vector.broadcast %624 : vector<1x32xf32> to vector<8x32xf32>
    %626 = arith.mulf %623, %625 : vector<8x32xf32>
    %627 = arith.addf %622, %626 : vector<8x32xf32>
    %628 = vector.extract_strided_slice %486 {offsets = [28, 0], sizes = [8, 32], strides = [1, 1]} : vector<38x32xf32> to vector<8x32xf32>
    %629 = vector.extract_strided_slice %325 {offsets = [28, 0], sizes = [1, 32], strides = [1, 1]} : vector<31x32xf32> to vector<1x32xf32>
    %630 = vector.broadcast %629 : vector<1x32xf32> to vector<8x32xf32>
    %631 = arith.mulf %628, %630 : vector<8x32xf32>
    %632 = arith.addf %627, %631 : vector<8x32xf32>
    %633 = vector.extract_strided_slice %486 {offsets = [29, 0], sizes = [8, 32], strides = [1, 1]} : vector<38x32xf32> to vector<8x32xf32>
    %634 = vector.extract_strided_slice %325 {offsets = [29, 0], sizes = [1, 32], strides = [1, 1]} : vector<31x32xf32> to vector<1x32xf32>
    %635 = vector.broadcast %634 : vector<1x32xf32> to vector<8x32xf32>
    %636 = arith.mulf %633, %635 : vector<8x32xf32>
    %637 = arith.addf %632, %636 : vector<8x32xf32>
    %638 = vector.extract_strided_slice %486 {offsets = [30, 0], sizes = [8, 32], strides = [1, 1]} : vector<38x32xf32> to vector<8x32xf32>
    %639 = vector.extract_strided_slice %325 {offsets = [30, 0], sizes = [1, 32], strides = [1, 1]} : vector<31x32xf32> to vector<1x32xf32>
    %640 = vector.broadcast %639 : vector<1x32xf32> to vector<8x32xf32>
    %641 = arith.mulf %638, %640 : vector<8x32xf32>
    %642 = arith.addf %637, %641 : vector<8x32xf32>
    %643 = tpu.concatenate %484, %642 in 0 : vector<8x32xf32>, vector<8x32xf32> -> vector<16x32xf32>
    %c11 = arith.constant 11 : index
    %c0_109 = arith.constant 0 : index
    %644 = vector.load %arg4[%c11, %c0_109] : memref<18x32xf32, #tpu.memory_space<vmem>>, vector<1x32xf32>
    %645 = vector.broadcast %644 : vector<1x32xf32> to vector<16x32xf32>
    %646 = arith.mulf %643, %645 : vector<16x32xf32>
    %c12 = arith.constant 12 : index
    %c0_110 = arith.constant 0 : index
    %647 = vector.load %arg4[%c12, %c0_110] : memref<18x32xf32, #tpu.memory_space<vmem>>, vector<1x32xf32>
    %648 = vector.broadcast %647 : vector<1x32xf32> to vector<16x32xf32>
    %649 = arith.addf %646, %648 : vector<16x32xf32>
    %650 = arith.negf %649 : vector<16x32xf32>
    %651 = math.exp %650 : vector<16x32xf32>
    %cst_111 = arith.constant 1.000000e+00 : f32
    %652 = vector.broadcast %cst_111 : f32 to vector<16x32xf32>
    %653 = arith.addf %652, %651 : vector<16x32xf32>
    %654 = arith.divf %652, %653 : vector<16x32xf32>
    %655 = arith.mulf %649, %654 : vector<16x32xf32>
    %656 = arith.truncf %655 : vector<16x32xf32> to vector<16x32xbf16>
    %c0_112 = arith.constant 0 : index
    %c0_113 = arith.constant 0 : index
    %657 = vector.load %arg15[%c0_112, %c0_113] : memref<32x32xbf16, #tpu.memory_space<vmem>>, vector<32x32xbf16>
    %cst_114 = arith.constant dense<0.000000e+00> : vector<16x32xf32>
    %658 = tpu.matmul %656, %657, %cst_114 {dimension_numbers = #tpu.dot_dimension_numbers<[1], [0], [0], [1], [0, 0, 1, 1], [], []>} : vector<16x32xbf16>, vector<32x32xbf16>, vector<16x32xf32> -> vector<16x32xf32>
    %659 = arith.addf %289, %658 : vector<16x32xf32>
    %c13 = arith.constant 13 : index
    %c0_115 = arith.constant 0 : index
    %660 = vector.load %arg4[%c13, %c0_115] : memref<18x32xf32, #tpu.memory_space<vmem>>, vector<1x32xf32>
    %c14 = arith.constant 14 : index
    %c0_116 = arith.constant 0 : index
    %661 = vector.load %arg4[%c14, %c0_116] : memref<18x32xf32, #tpu.memory_space<vmem>>, vector<1x32xf32>
    %c0_117 = arith.constant 0 : index
    %c0_118 = arith.constant 0 : index
    %662 = vector.load %arg16[%c0_117, %c0_118] : memref<32x64xbf16, #tpu.memory_space<vmem>>, vector<32x64xbf16>
    %c1_119 = arith.constant 1 : index
    %c0_120 = arith.constant 0 : index
    %663 = vector.load %arg5[%c1_119, %c0_120] : memref<2x64xf32, #tpu.memory_space<vmem>>, vector<1x64xf32>
    %c0_121 = arith.constant 0 : index
    %c0_122 = arith.constant 0 : index
    %664 = vector.load %arg17[%c0_121, %c0_122] : memref<64x32xbf16, #tpu.memory_space<vmem>>, vector<64x32xbf16>
    %c15 = arith.constant 15 : index
    %c0_123 = arith.constant 0 : index
    %665 = vector.load %arg4[%c15, %c0_123] : memref<18x32xf32, #tpu.memory_space<vmem>>, vector<1x32xf32>
    %cst_124 = arith.constant dense<0.000000e+00> : vector<16xf32>
    %666 = vector.multi_reduction <add>, %659, %cst_124 [1] : vector<16x32xf32> to vector<16xf32>
    %667 = vector.shape_cast %666 : vector<16xf32> to vector<16x1xf32>
    %cst_125 = arith.constant 3.200000e+01 : f32
    %668 = vector.broadcast %cst_125 : f32 to vector<16x1xf32>
    %669 = arith.divf %667, %668 : vector<16x1xf32>
    %670 = vector.broadcast %669 : vector<16x1xf32> to vector<16x32xf32>
    %671 = arith.subf %659, %670 : vector<16x32xf32>
    %672 = arith.mulf %671, %671 : vector<16x32xf32>
    %cst_126 = arith.constant dense<0.000000e+00> : vector<16xf32>
    %673 = vector.multi_reduction <add>, %672, %cst_126 [1] : vector<16x32xf32> to vector<16xf32>
    %674 = vector.shape_cast %673 : vector<16xf32> to vector<16x1xf32>
    %cst_127 = arith.constant 3.200000e+01 : f32
    %675 = vector.broadcast %cst_127 : f32 to vector<16x1xf32>
    %676 = arith.divf %674, %675 : vector<16x1xf32>
    %677 = vector.broadcast %669 : vector<16x1xf32> to vector<16x32xf32>
    %678 = arith.subf %659, %677 : vector<16x32xf32>
    %cst_128 = arith.constant 9.99999974E-6 : f32
    %679 = vector.broadcast %cst_128 : f32 to vector<16x1xf32>
    %680 = arith.addf %676, %679 : vector<16x1xf32>
    %681 = math.rsqrt %680 : vector<16x1xf32>
    %682 = vector.broadcast %681 : vector<16x1xf32> to vector<16x32xf32>
    %683 = arith.mulf %678, %682 : vector<16x32xf32>
    %684 = vector.broadcast %660 : vector<1x32xf32> to vector<16x32xf32>
    %685 = arith.mulf %683, %684 : vector<16x32xf32>
    %686 = vector.broadcast %661 : vector<1x32xf32> to vector<16x32xf32>
    %687 = arith.addf %685, %686 : vector<16x32xf32>
    %688 = arith.truncf %687 : vector<16x32xf32> to vector<16x32xbf16>
    %cst_129 = arith.constant dense<0.000000e+00> : vector<16x64xf32>
    %689 = tpu.matmul %688, %662, %cst_129 {dimension_numbers = #tpu.dot_dimension_numbers<[1], [0], [0], [1], [0, 0, 1, 1], [], []>} : vector<16x32xbf16>, vector<32x64xbf16>, vector<16x64xf32> -> vector<16x64xf32>
    %690 = vector.broadcast %663 : vector<1x64xf32> to vector<16x64xf32>
    %691 = arith.addf %689, %690 : vector<16x64xf32>
    %692 = arith.negf %691 : vector<16x64xf32>
    %693 = math.exp %692 : vector<16x64xf32>
    %cst_130 = arith.constant 1.000000e+00 : f32
    %694 = vector.broadcast %cst_130 : f32 to vector<16x64xf32>
    %695 = arith.addf %694, %693 : vector<16x64xf32>
    %696 = arith.divf %694, %695 : vector<16x64xf32>
    %697 = arith.mulf %691, %696 : vector<16x64xf32>
    %698 = arith.truncf %697 : vector<16x64xf32> to vector<16x64xbf16>
    %cst_131 = arith.constant dense<0.000000e+00> : vector<16x32xf32>
    %699 = tpu.matmul %698, %664, %cst_131 {dimension_numbers = #tpu.dot_dimension_numbers<[1], [0], [0], [1], [0, 0, 1, 1], [], []>} : vector<16x64xbf16>, vector<64x32xbf16>, vector<16x32xf32> -> vector<16x32xf32>
    %700 = vector.broadcast %665 : vector<1x32xf32> to vector<16x32xf32>
    %701 = arith.addf %699, %700 : vector<16x32xf32>
    %cst_132 = arith.constant 5.000000e-01 : f32
    %702 = vector.broadcast %cst_132 : f32 to vector<16x32xf32>
    %703 = arith.mulf %702, %701 : vector<16x32xf32>
    %704 = arith.addf %659, %703 : vector<16x32xf32>
    %c16 = arith.constant 16 : index
    %c0_133 = arith.constant 0 : index
    %705 = vector.load %arg4[%c16, %c0_133] : memref<18x32xf32, #tpu.memory_space<vmem>>, vector<1x32xf32>
    %c17 = arith.constant 17 : index
    %c0_134 = arith.constant 0 : index
    %706 = vector.load %arg4[%c17, %c0_134] : memref<18x32xf32, #tpu.memory_space<vmem>>, vector<1x32xf32>
    %cst_135 = arith.constant dense<0.000000e+00> : vector<16xf32>
    %707 = vector.multi_reduction <add>, %704, %cst_135 [1] : vector<16x32xf32> to vector<16xf32>
    %708 = vector.shape_cast %707 : vector<16xf32> to vector<16x1xf32>
    %cst_136 = arith.constant 3.200000e+01 : f32
    %709 = vector.broadcast %cst_136 : f32 to vector<16x1xf32>
    %710 = arith.divf %708, %709 : vector<16x1xf32>
    %711 = vector.broadcast %710 : vector<16x1xf32> to vector<16x32xf32>
    %712 = arith.subf %704, %711 : vector<16x32xf32>
    %713 = arith.mulf %712, %712 : vector<16x32xf32>
    %cst_137 = arith.constant dense<0.000000e+00> : vector<16xf32>
    %714 = vector.multi_reduction <add>, %713, %cst_137 [1] : vector<16x32xf32> to vector<16xf32>
    %715 = vector.shape_cast %714 : vector<16xf32> to vector<16x1xf32>
    %cst_138 = arith.constant 3.200000e+01 : f32
    %716 = vector.broadcast %cst_138 : f32 to vector<16x1xf32>
    %717 = arith.divf %715, %716 : vector<16x1xf32>
    %718 = vector.broadcast %710 : vector<16x1xf32> to vector<16x32xf32>
    %719 = arith.subf %704, %718 : vector<16x32xf32>
    %cst_139 = arith.constant 9.99999974E-6 : f32
    %720 = vector.broadcast %cst_139 : f32 to vector<16x1xf32>
    %721 = arith.addf %717, %720 : vector<16x1xf32>
    %722 = math.rsqrt %721 : vector<16x1xf32>
    %723 = vector.broadcast %722 : vector<16x1xf32> to vector<16x32xf32>
    %724 = arith.mulf %719, %723 : vector<16x32xf32>
    %725 = vector.broadcast %705 : vector<1x32xf32> to vector<16x32xf32>
    %726 = arith.mulf %724, %725 : vector<16x32xf32>
    %727 = vector.broadcast %706 : vector<1x32xf32> to vector<16x32xf32>
    %728 = arith.addf %726, %727 : vector<16x32xf32>
    %729 = vector.shape_cast %728 : vector<16x32xf32> to vector<2x8x32xf32>
    %c0_140 = arith.constant 0 : index
    %c0_141 = arith.constant 0 : index
    %c0_142 = arith.constant 0 : index
    %730 = vector.load %arg18[%c0_140, %c0_141, %c0_142] : memref<2x8x32xf32, #tpu.memory_space<vmem>>, vector<2x8x32xf32>
    tpu.vector_store %arg18[%c0_140, %c0_141, %c0_142], %729 {strides = array<i32>} : memref<2x8x32xf32, #tpu.memory_space<vmem>>, vector<2x8x32xf32>,
    return
  }
  func.func @transform_0(%arg0: i32) -> (i32, i32, i32) {
    %c0_i32 = arith.constant 0 : i32
    %c0_i32_0 = arith.constant 0 : i32
    %c0_i32_1 = arith.constant 0 : i32
    return %arg0, %c0_i32, %c0_i32_0 : i32, i32, i32
  }
  func.func @transform_1(%arg0: i32) -> (i32, i32, i32) {
    %c0_i32 = arith.constant 0 : i32
    %c0_i32_0 = arith.constant 0 : i32
    %c0_i32_1 = arith.constant 0 : i32
    %c0_i32_2 = arith.constant 0 : i32
    return %c0_i32, %c0_i32_0, %c0_i32_1 : i32, i32, i32
  }
  func.func @transform_2(%arg0: i32) -> (i32, i32, i32) {
    %c0_i32 = arith.constant 0 : i32
    %c0_i32_0 = arith.constant 0 : i32
    %c0_i32_1 = arith.constant 0 : i32
    return %arg0, %c0_i32, %c0_i32_0 : i32, i32, i32
  }
  func.func @transform_3(%arg0: i32) -> (i32, i32) {
    %c0_i32 = arith.constant 0 : i32
    %c0_i32_0 = arith.constant 0 : i32
    %c0_i32_1 = arith.constant 0 : i32
    return %c0_i32, %c0_i32_0 : i32, i32
  }
  func.func @transform_4(%arg0: i32) -> (i32, i32) {
    %c0_i32 = arith.constant 0 : i32
    %c0_i32_0 = arith.constant 0 : i32
    %c0_i32_1 = arith.constant 0 : i32
    return %c0_i32, %c0_i32_0 : i32, i32
  }
  func.func @transform_5(%arg0: i32) -> (i32, i32) {
    %c0_i32 = arith.constant 0 : i32
    %c0_i32_0 = arith.constant 0 : i32
    %c0_i32_1 = arith.constant 0 : i32
    return %c0_i32, %c0_i32_0 : i32, i32
  }
  func.func @transform_6(%arg0: i32) -> (i32, i32) {
    %c0_i32 = arith.constant 0 : i32
    %c0_i32_0 = arith.constant 0 : i32
    %c0_i32_1 = arith.constant 0 : i32
    return %c0_i32, %c0_i32_0 : i32, i32
  }
  func.func @transform_7(%arg0: i32) -> (i32, i32) {
    %c0_i32 = arith.constant 0 : i32
    %c0_i32_0 = arith.constant 0 : i32
    %c0_i32_1 = arith.constant 0 : i32
    return %c0_i32, %c0_i32_0 : i32, i32
  }
  func.func @transform_8(%arg0: i32) -> (i32, i32) {
    %c0_i32 = arith.constant 0 : i32
    %c0_i32_0 = arith.constant 0 : i32
    %c0_i32_1 = arith.constant 0 : i32
    return %c0_i32, %c0_i32_0 : i32, i32
  }
  func.func @transform_9(%arg0: i32) -> (i32, i32) {
    %c0_i32 = arith.constant 0 : i32
    %c0_i32_0 = arith.constant 0 : i32
    %c0_i32_1 = arith.constant 0 : i32
    return %c0_i32, %c0_i32_0 : i32, i32
  }
  func.func @transform_10(%arg0: i32) -> (i32, i32) {
    %c0_i32 = arith.constant 0 : i32
    %c0_i32_0 = arith.constant 0 : i32
    %c0_i32_1 = arith.constant 0 : i32
    return %c0_i32, %c0_i32_0 : i32, i32
  }
  func.func @transform_11(%arg0: i32) -> (i32, i32) {
    %c0_i32 = arith.constant 0 : i32
    %c0_i32_0 = arith.constant 0 : i32
    %c0_i32_1 = arith.constant 0 : i32
    return %c0_i32, %c0_i32_0 : i32, i32
  }
  func.func @transform_12(%arg0: i32) -> (i32, i32) {
    %c0_i32 = arith.constant 0 : i32
    %c0_i32_0 = arith.constant 0 : i32
    %c0_i32_1 = arith.constant 0 : i32
    return %c0_i32, %c0_i32_0 : i32, i32
  }
  func.func @transform_13(%arg0: i32) -> (i32, i32) {
    %c0_i32 = arith.constant 0 : i32
    %c0_i32_0 = arith.constant 0 : i32
    %c0_i32_1 = arith.constant 0 : i32
    return %c0_i32, %c0_i32_0 : i32, i32
  }
  func.func @transform_14(%arg0: i32) -> (i32, i32) {
    %c0_i32 = arith.constant 0 : i32
    %c0_i32_0 = arith.constant 0 : i32
    %c0_i32_1 = arith.constant 0 : i32
    return %c0_i32, %c0_i32_0 : i32, i32
  }
  func.func @transform_15(%arg0: i32) -> (i32, i32) {
    %c0_i32 = arith.constant 0 : i32
    %c0_i32_0 = arith.constant 0 : i32
    %c0_i32_1 = arith.constant 0 : i32
    return %c0_i32, %c0_i32_0 : i32, i32
  }
  func.func @transform_16(%arg0: i32) -> (i32, i32) {
    %c0_i32 = arith.constant 0 : i32
    %c0_i32_0 = arith.constant 0 : i32
    %c0_i32_1 = arith.constant 0 : i32
    return %c0_i32, %c0_i32_0 : i32, i32
  }
  func.func @transform_17(%arg0: i32) -> (i32, i32, i32) {
    %c0_i32 = arith.constant 0 : i32
    %c0_i32_0 = arith.constant 0 : i32
    %c0_i32_1 = arith.constant 0 : i32
    return %arg0, %c0_i32, %c0_i32_0 : i32, i32, i32
  }
}

module attributes {stable_mosaic.version = 11 : i64} {
  func.func @conformer_kernel(%arg0: i32, %arg1: memref<2x8x32xf32, #tpu.memory_space<vmem>>, %arg2: memref<1x8x32xf32, #tpu.memory_space<vmem>>, %arg3: memref<2x1x8xf32, #tpu.memory_space<vmem>>, %arg4: memref<18x32xf32, #tpu.memory_space<vmem>>, %arg5: memref<2x64xf32, #tpu.memory_space<vmem>>, %arg6: memref<32x64xbf16, #tpu.memory_space<vmem>>, %arg7: memref<64x32xbf16, #tpu.memory_space<vmem>>, %arg8: memref<32x32xbf16, #tpu.memory_space<vmem>>, %arg9: memref<32x32xbf16, #tpu.memory_space<vmem>>, %arg10: memref<32x32xbf16, #tpu.memory_space<vmem>>, %arg11: memref<32x32xbf16, #tpu.memory_space<vmem>>, %arg12: memref<32x32xbf16, #tpu.memory_space<vmem>>, %arg13: memref<32x32xbf16, #tpu.memory_space<vmem>>, %arg14: memref<31x32xf32, #tpu.memory_space<vmem>>, %arg15: memref<32x32xbf16, #tpu.memory_space<vmem>>, %arg16: memref<32x64xbf16, #tpu.memory_space<vmem>>, %arg17: memref<64x32xbf16, #tpu.memory_space<vmem>>, %arg18: memref<2x8x32xf32, #tpu.memory_space<vmem>>) attributes {dimension_semantics = [#tpu.dimension_semantics<parallel>], iteration_bounds = array<i64: 1>, scalar_prefetch = 0 : i64, scratch_operands = 0 : i64, tpu.core_type = #tpu.core_type<tc>, window_params = [{transform_indices = @transform_0, window_bounds = array<i64: 2, 8, 32>}, {pipeline_mode = #tpu.pipeline_mode<synchronous>, transform_indices = @transform_1, window_bounds = array<i64: 1, 8, 32>}, {transform_indices = @transform_2, window_bounds = array<i64: 2, 1, 8>}, {pipeline_mode = #tpu.pipeline_mode<synchronous>, transform_indices = @transform_3, window_bounds = array<i64: 18, 32>}, {pipeline_mode = #tpu.pipeline_mode<synchronous>, transform_indices = @transform_4, window_bounds = array<i64: 2, 64>}, {pipeline_mode = #tpu.pipeline_mode<synchronous>, transform_indices = @transform_5, window_bounds = array<i64: 32, 64>}, {pipeline_mode = #tpu.pipeline_mode<synchronous>, transform_indices = @transform_6, window_bounds = array<i64: 64, 32>}, {pipeline_mode = #tpu.pipeline_mode<synchronous>, transform_indices = @transform_7, window_bounds = array<i64: 32, 32>}, {pipeline_mode = #tpu.pipeline_mode<synchronous>, transform_indices = @transform_8, window_bounds = array<i64: 32, 32>}, {pipeline_mode = #tpu.pipeline_mode<synchronous>, transform_indices = @transform_9, window_bounds = array<i64: 32, 32>}, {pipeline_mode = #tpu.pipeline_mode<synchronous>, transform_indices = @transform_10, window_bounds = array<i64: 32, 32>}, {pipeline_mode = #tpu.pipeline_mode<synchronous>, transform_indices = @transform_11, window_bounds = array<i64: 32, 32>}, {pipeline_mode = #tpu.pipeline_mode<synchronous>, transform_indices = @transform_12, window_bounds = array<i64: 32, 32>}, {pipeline_mode = #tpu.pipeline_mode<synchronous>, transform_indices = @transform_13, window_bounds = array<i64: 31, 32>}, {pipeline_mode = #tpu.pipeline_mode<synchronous>, transform_indices = @transform_14, window_bounds = array<i64: 32, 32>}, {pipeline_mode = #tpu.pipeline_mode<synchronous>, transform_indices = @transform_15, window_bounds = array<i64: 32, 64>}, {pipeline_mode = #tpu.pipeline_mode<synchronous>, transform_indices = @transform_16, window_bounds = array<i64: 64, 32>}, {transform_indices = @transform_17, window_bounds = array<i64: 2, 8, 32>}]} {
    %c0 = arith.constant 0 : index
    %c0_0 = arith.constant 0 : index
    %c0_1 = arith.constant 0 : index
    %0 = vector.load %arg1[%c0, %c0_0, %c0_1] : memref<2x8x32xf32, #tpu.memory_space<vmem>>, vector<2x8x32xf32>
    %1 = vector.shape_cast %0 : vector<2x8x32xf32> to vector<16x32xf32>
    %c0_2 = arith.constant 0 : index
    %c0_3 = arith.constant 0 : index
    %c0_4 = arith.constant 0 : index
    %2 = vector.load %arg2[%c0_2, %c0_3, %c0_4] : memref<1x8x32xf32, #tpu.memory_space<vmem>>, vector<1x8x32xf32>
    %3 = vector.shape_cast %2 : vector<1x8x32xf32> to vector<8x32xf32>
    %c0_5 = arith.constant 0 : index
    %c0_6 = arith.constant 0 : index
    %4 = vector.load %arg4[%c0_5, %c0_6] : memref<18x32xf32, #tpu.memory_space<vmem>>, vector<1x32xf32>
    %c1 = arith.constant 1 : index
    %c0_7 = arith.constant 0 : index
    %5 = vector.load %arg4[%c1, %c0_7] : memref<18x32xf32, #tpu.memory_space<vmem>>, vector<1x32xf32>
    %c0_8 = arith.constant 0 : index
    %c0_9 = arith.constant 0 : index
    %6 = vector.load %arg6[%c0_8, %c0_9] : memref<32x64xbf16, #tpu.memory_space<vmem>>, vector<32x64xbf16>
    %c0_10 = arith.constant 0 : index
    %c0_11 = arith.constant 0 : index
    %7 = vector.load %arg5[%c0_10, %c0_11] : memref<2x64xf32, #tpu.memory_space<vmem>>, vector<1x64xf32>
    %c0_12 = arith.constant 0 : index
    %c0_13 = arith.constant 0 : index
    %8 = vector.load %arg7[%c0_12, %c0_13] : memref<64x32xbf16, #tpu.memory_space<vmem>>, vector<64x32xbf16>
    %c2 = arith.constant 2 : index
    %c0_14 = arith.constant 0 : index
    %9 = vector.load %arg4[%c2, %c0_14] : memref<18x32xf32, #tpu.memory_space<vmem>>, vector<1x32xf32>
    %cst = arith.constant dense<0.000000e+00> : vector<16xf32>
    %10 = vector.multi_reduction <add>, %1, %cst [1] : vector<16x32xf32> to vector<16xf32>
    %11 = vector.shape_cast %10 : vector<16xf32> to vector<16x1xf32>
    %cst_15 = arith.constant 3.200000e+01 : f32
    %12 = vector.broadcast %cst_15 : f32 to vector<16x1xf32>
    %13 = arith.divf %11, %12 : vector<16x1xf32>
    %14 = vector.broadcast %13 : vector<16x1xf32> to vector<16x32xf32>
    %15 = arith.subf %1, %14 : vector<16x32xf32>
    %16 = arith.mulf %15, %15 : vector<16x32xf32>
    %cst_16 = arith.constant dense<0.000000e+00> : vector<16xf32>
    %17 = vector.multi_reduction <add>, %16, %cst_16 [1] : vector<16x32xf32> to vector<16xf32>
    %18 = vector.shape_cast %17 : vector<16xf32> to vector<16x1xf32>
    %cst_17 = arith.constant 3.200000e+01 : f32
    %19 = vector.broadcast %cst_17 : f32 to vector<16x1xf32>
    %20 = arith.divf %18, %19 : vector<16x1xf32>
    %21 = vector.broadcast %13 : vector<16x1xf32> to vector<16x32xf32>
    %22 = arith.subf %1, %21 : vector<16x32xf32>
    %cst_18 = arith.constant 9.99999974E-6 : f32
    %23 = vector.broadcast %cst_18 : f32 to vector<16x1xf32>
    %24 = arith.addf %20, %23 : vector<16x1xf32>
    %25 = math.rsqrt %24 : vector<16x1xf32>
    %26 = vector.broadcast %25 : vector<16x1xf32> to vector<16x32xf32>
    %27 = arith.mulf %22, %26 : vector<16x32xf32>
    %28 = vector.broadcast %4 : vector<1x32xf32> to vector<16x32xf32>
    %29 = arith.mulf %27, %28 : vector<16x32xf32>
    %30 = vector.broadcast %5 : vector<1x32xf32> to vector<16x32xf32>
    %31 = arith.addf %29, %30 : vector<16x32xf32>
    %32 = arith.truncf %31 : vector<16x32xf32> to vector<16x32xbf16>
    %cst_19 = arith.constant dense<0.000000e+00> : vector<16x64xf32>
    %33 = tpu.matmul %32, %6, %cst_19 {dimension_numbers = #tpu.dot_dimension_numbers<[1], [0], [0], [1], [0, 0, 1, 1], [], []>} : vector<16x32xbf16>, vector<32x64xbf16>, vector<16x64xf32> -> vector<16x64xf32>
    %34 = vector.broadcast %7 : vector<1x64xf32> to vector<16x64xf32>
    %35 = arith.addf %33, %34 : vector<16x64xf32>
    %36 = arith.negf %35 : vector<16x64xf32>
    %37 = math.exp %36 : vector<16x64xf32>
    %cst_20 = arith.constant 1.000000e+00 : f32
    %38 = vector.broadcast %cst_20 : f32 to vector<16x64xf32>
    %39 = arith.addf %38, %37 : vector<16x64xf32>
    %40 = arith.divf %38, %39 : vector<16x64xf32>
    %41 = arith.mulf %35, %40 : vector<16x64xf32>
    %42 = arith.truncf %41 : vector<16x64xf32> to vector<16x64xbf16>
    %cst_21 = arith.constant dense<0.000000e+00> : vector<16x32xf32>
    %43 = tpu.matmul %42, %8, %cst_21 {dimension_numbers = #tpu.dot_dimension_numbers<[1], [0], [0], [1], [0, 0, 1, 1], [], []>} : vector<16x64xbf16>, vector<64x32xbf16>, vector<16x32xf32> -> vector<16x32xf32>
    %44 = vector.broadcast %9 : vector<1x32xf32> to vector<16x32xf32>
    %45 = arith.addf %43, %44 : vector<16x32xf32>
    %cst_22 = arith.constant 5.000000e-01 : f32
    %46 = vector.broadcast %cst_22 : f32 to vector<16x32xf32>
    %47 = arith.mulf %46, %45 : vector<16x32xf32>
    %48 = arith.addf %1, %47 : vector<16x32xf32>
    %c3 = arith.constant 3 : index
    %c0_23 = arith.constant 0 : index
    %49 = vector.load %arg4[%c3, %c0_23] : memref<18x32xf32, #tpu.memory_space<vmem>>, vector<1x32xf32>
    %c4 = arith.constant 4 : index
    %c0_24 = arith.constant 0 : index
    %50 = vector.load %arg4[%c4, %c0_24] : memref<18x32xf32, #tpu.memory_space<vmem>>, vector<1x32xf32>
    %cst_25 = arith.constant dense<0.000000e+00> : vector<16xf32>
    %51 = vector.multi_reduction <add>, %48, %cst_25 [1] : vector<16x32xf32> to vector<16xf32>
    %52 = vector.shape_cast %51 : vector<16xf32> to vector<16x1xf32>
    %cst_26 = arith.constant 3.200000e+01 : f32
    %53 = vector.broadcast %cst_26 : f32 to vector<16x1xf32>
    %54 = arith.divf %52, %53 : vector<16x1xf32>
    %55 = vector.broadcast %54 : vector<16x1xf32> to vector<16x32xf32>
    %56 = arith.subf %48, %55 : vector<16x32xf32>
    %57 = arith.mulf %56, %56 : vector<16x32xf32>
    %cst_27 = arith.constant dense<0.000000e+00> : vector<16xf32>
    %58 = vector.multi_reduction <add>, %57, %cst_27 [1] : vector<16x32xf32> to vector<16xf32>
    %59 = vector.shape_cast %58 : vector<16xf32> to vector<16x1xf32>
    %cst_28 = arith.constant 3.200000e+01 : f32
    %60 = vector.broadcast %cst_28 : f32 to vector<16x1xf32>
    %61 = arith.divf %59, %60 : vector<16x1xf32>
    %62 = vector.broadcast %54 : vector<16x1xf32> to vector<16x32xf32>
    %63 = arith.subf %48, %62 : vector<16x32xf32>
    %cst_29 = arith.constant 9.99999974E-6 : f32
    %64 = vector.broadcast %cst_29 : f32 to vector<16x1xf32>
    %65 = arith.addf %61, %64 : vector<16x1xf32>
    %66 = math.rsqrt %65 : vector<16x1xf32>
    %67 = vector.broadcast %66 : vector<16x1xf32> to vector<16x32xf32>
    %68 = arith.mulf %63, %67 : vector<16x32xf32>
    %69 = vector.broadcast %49 : vector<1x32xf32> to vector<16x32xf32>
    %70 = arith.mulf %68, %69 : vector<16x32xf32>
    %71 = vector.broadcast %50 : vector<1x32xf32> to vector<16x32xf32>
    %72 = arith.addf %70, %71 : vector<16x32xf32>
    %73 = tpu.concatenate %3, %3 in 0 : vector<8x32xf32>, vector<8x32xf32> -> vector<16x32xf32>
    %74 = arith.addf %72, %73 : vector<16x32xf32>
    %75 = arith.truncf %74 : vector<16x32xf32> to vector<16x32xbf16>
    %76 = arith.truncf %72 : vector<16x32xf32> to vector<16x32xbf16>
    %c0_30 = arith.constant 0 : index
    %c0_31 = arith.constant 0 : index
    %77 = vector.load %arg8[%c0_30, %c0_31] : memref<32x32xbf16, #tpu.memory_space<vmem>>, vector<32x32xbf16>
    %cst_32 = arith.constant dense<0.000000e+00> : vector<16x32xf32>
    %78 = tpu.matmul %75, %77, %cst_32 {dimension_numbers = #tpu.dot_dimension_numbers<[1], [0], [0], [1], [0, 0, 1, 1], [], []>} : vector<16x32xbf16>, vector<32x32xbf16>, vector<16x32xf32> -> vector<16x32xf32>
    %c5 = arith.constant 5 : index
    %c0_33 = arith.constant 0 : index
    %79 = vector.load %arg4[%c5, %c0_33] : memref<18x32xf32, #tpu.memory_space<vmem>>, vector<1x32xf32>
    %80 = vector.broadcast %79 : vector<1x32xf32> to vector<16x32xf32>
    %81 = arith.addf %78, %80 : vector<16x32xf32>
    %c0_34 = arith.constant 0 : index
    %c0_35 = arith.constant 0 : index
    %82 = vector.load %arg9[%c0_34, %c0_35] : memref<32x32xbf16, #tpu.memory_space<vmem>>, vector<32x32xbf16>
    %cst_36 = arith.constant dense<0.000000e+00> : vector<16x32xf32>
    %83 = tpu.matmul %75, %82, %cst_36 {dimension_numbers = #tpu.dot_dimension_numbers<[1], [0], [0], [1], [0, 0, 1, 1], [], []>} : vector<16x32xbf16>, vector<32x32xbf16>, vector<16x32xf32> -> vector<16x32xf32>
    %c6 = arith.constant 6 : index
    %c0_37 = arith.constant 0 : index
    %84 = vector.load %arg4[%c6, %c0_37] : memref<18x32xf32, #tpu.memory_space<vmem>>, vector<1x32xf32>
    %85 = vector.broadcast %84 : vector<1x32xf32> to vector<16x32xf32>
    %86 = arith.addf %83, %85 : vector<16x32xf32>
    %c0_38 = arith.constant 0 : index
    %c0_39 = arith.constant 0 : index
    %87 = vector.load %arg10[%c0_38, %c0_39] : memref<32x32xbf16, #tpu.memory_space<vmem>>, vector<32x32xbf16>
    %cst_40 = arith.constant dense<0.000000e+00> : vector<16x32xf32>
    %88 = tpu.matmul %76, %87, %cst_40 {dimension_numbers = #tpu.dot_dimension_numbers<[1], [0], [0], [1], [0, 0, 1, 1], [], []>} : vector<16x32xbf16>, vector<32x32xbf16>, vector<16x32xf32> -> vector<16x32xf32>
    %c7 = arith.constant 7 : index
    %c0_41 = arith.constant 0 : index
    %89 = vector.load %arg4[%c7, %c0_41] : memref<18x32xf32, #tpu.memory_space<vmem>>, vector<1x32xf32>
    %90 = vector.broadcast %89 : vector<1x32xf32> to vector<16x32xf32>
    %91 = arith.addf %88, %90 : vector<16x32xf32>
    %c0_42 = arith.constant 0 : index
    %c0_43 = arith.constant 0 : index
    %c0_44 = arith.constant 0 : index
    %92 = vector.load %arg3[%c0_42, %c0_43, %c0_44] : memref<2x1x8xf32, #tpu.memory_space<vmem>>, vector<1x1x8xf32>
    %93 = vector.shape_cast %92 : vector<1x1x8xf32> to vector<1x8xf32>
    %cst_45 = arith.constant 5.000000e-01 : f32
    %94 = vector.broadcast %cst_45 : f32 to vector<1x8xf32>
    %95 = arith.cmpf ogt, %93, %94 : vector<1x8xf32>
    %cst_46 = arith.constant 0.000000e+00 : f32
    %cst_47 = arith.constant -1.000000e+09 : f32
    %96 = vector.broadcast %cst_46 : f32 to vector<1x8xf32>
    %97 = vector.broadcast %cst_47 : f32 to vector<1x8xf32>
    %98 = arith.select %95, %96, %97 : vector<1x8xi1>, vector<1x8xf32>
    %99 = vector.extract_strided_slice %81 {offsets = [0, 0], sizes = [8, 32], strides = [1, 1]} : vector<16x32xf32> to vector<8x32xf32>
    %100 = vector.extract_strided_slice %86 {offsets = [0, 0], sizes = [8, 32], strides = [1, 1]} : vector<16x32xf32> to vector<8x32xf32>
    %101 = vector.extract_strided_slice %91 {offsets = [0, 0], sizes = [8, 32], strides = [1, 1]} : vector<16x32xf32> to vector<8x32xf32>
    %102 = vector.extract_strided_slice %99 {offsets = [0, 0], sizes = [8, 8], strides = [1, 1]} : vector<8x32xf32> to vector<8x8xf32>
    %103 = arith.truncf %102 : vector<8x8xf32> to vector<8x8xbf16>
    %104 = vector.extract_strided_slice %100 {offsets = [0, 0], sizes = [8, 8], strides = [1, 1]} : vector<8x32xf32> to vector<8x8xf32>
    %105 = arith.truncf %104 : vector<8x8xf32> to vector<8x8xbf16>
    "tpu.trace_start"() <{level = 10 : i32, message = "qe,ke->qk"}> : () -> ()
    %cst_48 = arith.constant dense<0.000000e+00> : vector<8x8xf32>
    %106 = tpu.matmul %103, %105, %cst_48 {dimension_numbers = #tpu.dot_dimension_numbers<[1], [1], [0], [0], [0, 0, 1, 0], [], []>} : vector<8x8xbf16>, vector<8x8xbf16>, vector<8x8xf32> -> vector<8x8xf32>
    "tpu.trace_stop"() : () -> ()
    %107 = vector.broadcast %98 : vector<1x8xf32> to vector<8x8xf32>
    %108 = arith.addf %106, %107 : vector<8x8xf32>
    %cst_49 = arith.constant dense<0xFF800000> : vector<8xf32>
    %109 = vector.multi_reduction <maximumf>, %108, %cst_49 [1] : vector<8x8xf32> to vector<8xf32>
    %110 = vector.shape_cast %109 : vector<8xf32> to vector<8x1xf32>
    %111 = vector.broadcast %110 : vector<8x1xf32> to vector<8x8xf32>
    %112 = arith.subf %108, %111 : vector<8x8xf32>
    %113 = math.exp %112 : vector<8x8xf32>
    %cst_50 = arith.constant dense<0.000000e+00> : vector<8xf32>
    %114 = vector.multi_reduction <add>, %113, %cst_50 [1] : vector<8x8xf32> to vector<8xf32>
    %115 = vector.shape_cast %114 : vector<8xf32> to vector<8x1xf32>
    %116 = tpu.reciprocal %115 {approx = true} : vector<8x1xf32> -> vector<8x1xf32>
    %117 = vector.broadcast %116 : vector<8x1xf32> to vector<8x8xf32>
    %118 = arith.mulf %113, %117 : vector<8x8xf32>
    %119 = arith.truncf %118 : vector<8x8xf32> to vector<8x8xbf16>
    %120 = vector.extract_strided_slice %101 {offsets = [0, 0], sizes = [8, 8], strides = [1, 1]} : vector<8x32xf32> to vector<8x8xf32>
    %121 = arith.truncf %120 : vector<8x8xf32> to vector<8x8xbf16>
    %cst_51 = arith.constant dense<0.000000e+00> : vector<8x8xf32>
    %122 = tpu.matmul %119, %121, %cst_51 {dimension_numbers = #tpu.dot_dimension_numbers<[1], [0], [0], [1], [0, 0, 1, 1], [], []>} : vector<8x8xbf16>, vector<8x8xbf16>, vector<8x8xf32> -> vector<8x8xf32>
    %123 = vector.extract_strided_slice %99 {offsets = [0, 8], sizes = [8, 8], strides = [1, 1]} : vector<8x32xf32> to vector<8x8xf32>
    %124 = arith.truncf %123 : vector<8x8xf32> to vector<8x8xbf16>
    %125 = vector.extract_strided_slice %100 {offsets = [0, 8], sizes = [8, 8], strides = [1, 1]} : vector<8x32xf32> to vector<8x8xf32>
    %126 = arith.truncf %125 : vector<8x8xf32> to vector<8x8xbf16>
    "tpu.trace_start"() <{level = 10 : i32, message = "qe,ke->qk"}> : () -> ()
    %cst_52 = arith.constant dense<0.000000e+00> : vector<8x8xf32>
    %127 = tpu.matmul %124, %126, %cst_52 {dimension_numbers = #tpu.dot_dimension_numbers<[1], [1], [0], [0], [0, 0, 1, 0], [], []>} : vector<8x8xbf16>, vector<8x8xbf16>, vector<8x8xf32> -> vector<8x8xf32>
    "tpu.trace_stop"() : () -> ()
    %128 = vector.broadcast %98 : vector<1x8xf32> to vector<8x8xf32>
    %129 = arith.addf %127, %128 : vector<8x8xf32>
    %cst_53 = arith.constant dense<0xFF800000> : vector<8xf32>
    %130 = vector.multi_reduction <maximumf>, %129, %cst_53 [1] : vector<8x8xf32> to vector<8xf32>
    %131 = vector.shape_cast %130 : vector<8xf32> to vector<8x1xf32>
    %132 = vector.broadcast %131 : vector<8x1xf32> to vector<8x8xf32>
    %133 = arith.subf %129, %132 : vector<8x8xf32>
    %134 = math.exp %133 : vector<8x8xf32>
    %cst_54 = arith.constant dense<0.000000e+00> : vector<8xf32>
    %135 = vector.multi_reduction <add>, %134, %cst_54 [1] : vector<8x8xf32> to vector<8xf32>
    %136 = vector.shape_cast %135 : vector<8xf32> to vector<8x1xf32>
    %137 = tpu.reciprocal %136 {approx = true} : vector<8x1xf32> -> vector<8x1xf32>
    %138 = vector.broadcast %137 : vector<8x1xf32> to vector<8x8xf32>
    %139 = arith.mulf %134, %138 : vector<8x8xf32>
    %140 = arith.truncf %139 : vector<8x8xf32> to vector<8x8xbf16>
    %141 = vector.extract_strided_slice %101 {offsets = [0, 8], sizes = [8, 8], strides = [1, 1]} : vector<8x32xf32> to vector<8x8xf32>
    %142 = arith.truncf %141 : vector<8x8xf32> to vector<8x8xbf16>
    %cst_55 = arith.constant dense<0.000000e+00> : vector<8x8xf32>
    %143 = tpu.matmul %140, %142, %cst_55 {dimension_numbers = #tpu.dot_dimension_numbers<[1], [0], [0], [1], [0, 0, 1, 1], [], []>} : vector<8x8xbf16>, vector<8x8xbf16>, vector<8x8xf32> -> vector<8x8xf32>
    %144 = vector.extract_strided_slice %99 {offsets = [0, 16], sizes = [8, 8], strides = [1, 1]} : vector<8x32xf32> to vector<8x8xf32>
    %145 = arith.truncf %144 : vector<8x8xf32> to vector<8x8xbf16>
    %146 = vector.extract_strided_slice %100 {offsets = [0, 16], sizes = [8, 8], strides = [1, 1]} : vector<8x32xf32> to vector<8x8xf32>
    %147 = arith.truncf %146 : vector<8x8xf32> to vector<8x8xbf16>
    "tpu.trace_start"() <{level = 10 : i32, message = "qe,ke->qk"}> : () -> ()
    %cst_56 = arith.constant dense<0.000000e+00> : vector<8x8xf32>
    %148 = tpu.matmul %145, %147, %cst_56 {dimension_numbers = #tpu.dot_dimension_numbers<[1], [1], [0], [0], [0, 0, 1, 0], [], []>} : vector<8x8xbf16>, vector<8x8xbf16>, vector<8x8xf32> -> vector<8x8xf32>
    "tpu.trace_stop"() : () -> ()
    %149 = vector.broadcast %98 : vector<1x8xf32> to vector<8x8xf32>
    %150 = arith.addf %148, %149 : vector<8x8xf32>
    %cst_57 = arith.constant dense<0xFF800000> : vector<8xf32>
    %151 = vector.multi_reduction <maximumf>, %150, %cst_57 [1] : vector<8x8xf32> to vector<8xf32>
    %152 = vector.shape_cast %151 : vector<8xf32> to vector<8x1xf32>
    %153 = vector.broadcast %152 : vector<8x1xf32> to vector<8x8xf32>
    %154 = arith.subf %150, %153 : vector<8x8xf32>
    %155 = math.exp %154 : vector<8x8xf32>
    %cst_58 = arith.constant dense<0.000000e+00> : vector<8xf32>
    %156 = vector.multi_reduction <add>, %155, %cst_58 [1] : vector<8x8xf32> to vector<8xf32>
    %157 = vector.shape_cast %156 : vector<8xf32> to vector<8x1xf32>
    %158 = tpu.reciprocal %157 {approx = true} : vector<8x1xf32> -> vector<8x1xf32>
    %159 = vector.broadcast %158 : vector<8x1xf32> to vector<8x8xf32>
    %160 = arith.mulf %155, %159 : vector<8x8xf32>
    %161 = arith.truncf %160 : vector<8x8xf32> to vector<8x8xbf16>
    %162 = vector.extract_strided_slice %101 {offsets = [0, 16], sizes = [8, 8], strides = [1, 1]} : vector<8x32xf32> to vector<8x8xf32>
    %163 = arith.truncf %162 : vector<8x8xf32> to vector<8x8xbf16>
    %cst_59 = arith.constant dense<0.000000e+00> : vector<8x8xf32>
    %164 = tpu.matmul %161, %163, %cst_59 {dimension_numbers = #tpu.dot_dimension_numbers<[1], [0], [0], [1], [0, 0, 1, 1], [], []>} : vector<8x8xbf16>, vector<8x8xbf16>, vector<8x8xf32> -> vector<8x8xf32>
    %165 = vector.extract_strided_slice %99 {offsets = [0, 24], sizes = [8, 8], strides = [1, 1]} : vector<8x32xf32> to vector<8x8xf32>
    %166 = arith.truncf %165 : vector<8x8xf32> to vector<8x8xbf16>
    %167 = vector.extract_strided_slice %100 {offsets = [0, 24], sizes = [8, 8], strides = [1, 1]} : vector<8x32xf32> to vector<8x8xf32>
    %168 = arith.truncf %167 : vector<8x8xf32> to vector<8x8xbf16>
    "tpu.trace_start"() <{level = 10 : i32, message = "qe,ke->qk"}> : () -> ()
    %cst_60 = arith.constant dense<0.000000e+00> : vector<8x8xf32>
    %169 = tpu.matmul %166, %168, %cst_60 {dimension_numbers = #tpu.dot_dimension_numbers<[1], [1], [0], [0], [0, 0, 1, 0], [], []>} : vector<8x8xbf16>, vector<8x8xbf16>, vector<8x8xf32> -> vector<8x8xf32>
    "tpu.trace_stop"() : () -> ()
    %170 = vector.broadcast %98 : vector<1x8xf32> to vector<8x8xf32>
    %171 = arith.addf %169, %170 : vector<8x8xf32>
    %cst_61 = arith.constant dense<0xFF800000> : vector<8xf32>
    %172 = vector.multi_reduction <maximumf>, %171, %cst_61 [1] : vector<8x8xf32> to vector<8xf32>
    %173 = vector.shape_cast %172 : vector<8xf32> to vector<8x1xf32>
    %174 = vector.broadcast %173 : vector<8x1xf32> to vector<8x8xf32>
    %175 = arith.subf %171, %174 : vector<8x8xf32>
    %176 = math.exp %175 : vector<8x8xf32>
    %cst_62 = arith.constant dense<0.000000e+00> : vector<8xf32>
    %177 = vector.multi_reduction <add>, %176, %cst_62 [1] : vector<8x8xf32> to vector<8xf32>
    %178 = vector.shape_cast %177 : vector<8xf32> to vector<8x1xf32>
    %179 = tpu.reciprocal %178 {approx = true} : vector<8x1xf32> -> vector<8x1xf32>
    %180 = vector.broadcast %179 : vector<8x1xf32> to vector<8x8xf32>
    %181 = arith.mulf %176, %180 : vector<8x8xf32>
    %182 = arith.truncf %181 : vector<8x8xf32> to vector<8x8xbf16>
    %183 = vector.extract_strided_slice %101 {offsets = [0, 24], sizes = [8, 8], strides = [1, 1]} : vector<8x32xf32> to vector<8x8xf32>
    %184 = arith.truncf %183 : vector<8x8xf32> to vector<8x8xbf16>
    %cst_63 = arith.constant dense<0.000000e+00> : vector<8x8xf32>
    %185 = tpu.matmul %182, %184, %cst_63 {dimension_numbers = #tpu.dot_dimension_numbers<[1], [0], [0], [1], [0, 0, 1, 1], [], []>} : vector<8x8xbf16>, vector<8x8xbf16>, vector<8x8xf32> -> vector<8x8xf32>
    %186 = tpu.concatenate %122, %143, %164, %185 in 1 : vector<8x8xf32>, vector<8x8xf32>, vector<8x8xf32>, vector<8x8xf32> -> vector<8x32xf32>
    %c1_64 = arith.constant 1 : index
    %c0_65 = arith.constant 0 : index
    %c0_66 = arith.constant 0 : index
    %187 = vector.load %arg3[%c1_64, %c0_65, %c0_66] : memref<2x1x8xf32, #tpu.memory_space<vmem>>, vector<1x1x8xf32>
    %188 = vector.shape_cast %187 : vector<1x1x8xf32> to vector<1x8xf32>
    %cst_67 = arith.constant 5.000000e-01 : f32
    %189 = vector.broadcast %cst_67 : f32 to vector<1x8xf32>
    %190 = arith.cmpf ogt, %188, %189 : vector<1x8xf32>
    %cst_68 = arith.constant 0.000000e+00 : f32
    %cst_69 = arith.constant -1.000000e+09 : f32
    %191 = vector.broadcast %cst_68 : f32 to vector<1x8xf32>
    %192 = vector.broadcast %cst_69 : f32 to vector<1x8xf32>
    %193 = arith.select %190, %191, %192 : vector<1x8xi1>, vector<1x8xf32>
    %194 = vector.extract_strided_slice %81 {offsets = [8, 0], sizes = [8, 32], strides = [1, 1]} : vector<16x32xf32> to vector<8x32xf32>
    %195 = vector.extract_strided_slice %86 {offsets = [8, 0], sizes = [8, 32], strides = [1, 1]} : vector<16x32xf32> to vector<8x32xf32>
    %196 = vector.extract_strided_slice %91 {offsets = [8, 0], sizes = [8, 32], strides = [1, 1]} : vector<16x32xf32> to vector<8x32xf32>
    %197 = vector.extract_strided_slice %194 {offsets = [0, 0], sizes = [8, 8], strides = [1, 1]} : vector<8x32xf32> to vector<8x8xf32>
    %198 = arith.truncf %197 : vector<8x8xf32> to vector<8x8xbf16>
    %199 = vector.extract_strided_slice %195 {offsets = [0, 0], sizes = [8, 8], strides = [1, 1]} : vector<8x32xf32> to vector<8x8xf32>
    %200 = arith.truncf %199 : vector<8x8xf32> to vector<8x8xbf16>
    "tpu.trace_start"() <{level = 10 : i32, message = "qe,ke->qk"}> : () -> ()
    %cst_70 = arith.constant dense<0.000000e+00> : vector<8x8xf32>
    %201 = tpu.matmul %198, %200, %cst_70 {dimension_numbers = #tpu.dot_dimension_numbers<[1], [1], [0], [0], [0, 0, 1, 0], [], []>} : vector<8x8xbf16>, vector<8x8xbf16>, vector<8x8xf32> -> vector<8x8xf32>
    "tpu.trace_stop"() : () -> ()
    %202 = vector.broadcast %193 : vector<1x8xf32> to vector<8x8xf32>
    %203 = arith.addf %201, %202 : vector<8x8xf32>
    %cst_71 = arith.constant dense<0xFF800000> : vector<8xf32>
    %204 = vector.multi_reduction <maximumf>, %203, %cst_71 [1] : vector<8x8xf32> to vector<8xf32>
    %205 = vector.shape_cast %204 : vector<8xf32> to vector<8x1xf32>
    %206 = vector.broadcast %205 : vector<8x1xf32> to vector<8x8xf32>
    %207 = arith.subf %203, %206 : vector<8x8xf32>
    %208 = math.exp %207 : vector<8x8xf32>
    %cst_72 = arith.constant dense<0.000000e+00> : vector<8xf32>
    %209 = vector.multi_reduction <add>, %208, %cst_72 [1] : vector<8x8xf32> to vector<8xf32>
    %210 = vector.shape_cast %209 : vector<8xf32> to vector<8x1xf32>
    %211 = tpu.reciprocal %210 {approx = true} : vector<8x1xf32> -> vector<8x1xf32>
    %212 = vector.broadcast %211 : vector<8x1xf32> to vector<8x8xf32>
    %213 = arith.mulf %208, %212 : vector<8x8xf32>
    %214 = arith.truncf %213 : vector<8x8xf32> to vector<8x8xbf16>
    %215 = vector.extract_strided_slice %196 {offsets = [0, 0], sizes = [8, 8], strides = [1, 1]} : vector<8x32xf32> to vector<8x8xf32>
    %216 = arith.truncf %215 : vector<8x8xf32> to vector<8x8xbf16>
    %cst_73 = arith.constant dense<0.000000e+00> : vector<8x8xf32>
    %217 = tpu.matmul %214, %216, %cst_73 {dimension_numbers = #tpu.dot_dimension_numbers<[1], [0], [0], [1], [0, 0, 1, 1], [], []>} : vector<8x8xbf16>, vector<8x8xbf16>, vector<8x8xf32> -> vector<8x8xf32>
    %218 = vector.extract_strided_slice %194 {offsets = [0, 8], sizes = [8, 8], strides = [1, 1]} : vector<8x32xf32> to vector<8x8xf32>
    %219 = arith.truncf %218 : vector<8x8xf32> to vector<8x8xbf16>
    %220 = vector.extract_strided_slice %195 {offsets = [0, 8], sizes = [8, 8], strides = [1, 1]} : vector<8x32xf32> to vector<8x8xf32>
    %221 = arith.truncf %220 : vector<8x8xf32> to vector<8x8xbf16>
    "tpu.trace_start"() <{level = 10 : i32, message = "qe,ke->qk"}> : () -> ()
    %cst_74 = arith.constant dense<0.000000e+00> : vector<8x8xf32>
    %222 = tpu.matmul %219, %221, %cst_74 {dimension_numbers = #tpu.dot_dimension_numbers<[1], [1], [0], [0], [0, 0, 1, 0], [], []>} : vector<8x8xbf16>, vector<8x8xbf16>, vector<8x8xf32> -> vector<8x8xf32>
    "tpu.trace_stop"() : () -> ()
    %223 = vector.broadcast %193 : vector<1x8xf32> to vector<8x8xf32>
    %224 = arith.addf %222, %223 : vector<8x8xf32>
    %cst_75 = arith.constant dense<0xFF800000> : vector<8xf32>
    %225 = vector.multi_reduction <maximumf>, %224, %cst_75 [1] : vector<8x8xf32> to vector<8xf32>
    %226 = vector.shape_cast %225 : vector<8xf32> to vector<8x1xf32>
    %227 = vector.broadcast %226 : vector<8x1xf32> to vector<8x8xf32>
    %228 = arith.subf %224, %227 : vector<8x8xf32>
    %229 = math.exp %228 : vector<8x8xf32>
    %cst_76 = arith.constant dense<0.000000e+00> : vector<8xf32>
    %230 = vector.multi_reduction <add>, %229, %cst_76 [1] : vector<8x8xf32> to vector<8xf32>
    %231 = vector.shape_cast %230 : vector<8xf32> to vector<8x1xf32>
    %232 = tpu.reciprocal %231 {approx = true} : vector<8x1xf32> -> vector<8x1xf32>
    %233 = vector.broadcast %232 : vector<8x1xf32> to vector<8x8xf32>
    %234 = arith.mulf %229, %233 : vector<8x8xf32>
    %235 = arith.truncf %234 : vector<8x8xf32> to vector<8x8xbf16>
    %236 = vector.extract_strided_slice %196 {offsets = [0, 8], sizes = [8, 8], strides = [1, 1]} : vector<8x32xf32> to vector<8x8xf32>
    %237 = arith.truncf %236 : vector<8x8xf32> to vector<8x8xbf16>
    %cst_77 = arith.constant dense<0.000000e+00> : vector<8x8xf32>
    %238 = tpu.matmul %235, %237, %cst_77 {dimension_numbers = #tpu.dot_dimension_numbers<[1], [0], [0], [1], [0, 0, 1, 1], [], []>} : vector<8x8xbf16>, vector<8x8xbf16>, vector<8x8xf32> -> vector<8x8xf32>
    %239 = vector.extract_strided_slice %194 {offsets = [0, 16], sizes = [8, 8], strides = [1, 1]} : vector<8x32xf32> to vector<8x8xf32>
    %240 = arith.truncf %239 : vector<8x8xf32> to vector<8x8xbf16>
    %241 = vector.extract_strided_slice %195 {offsets = [0, 16], sizes = [8, 8], strides = [1, 1]} : vector<8x32xf32> to vector<8x8xf32>
    %242 = arith.truncf %241 : vector<8x8xf32> to vector<8x8xbf16>
    "tpu.trace_start"() <{level = 10 : i32, message = "qe,ke->qk"}> : () -> ()
    %cst_78 = arith.constant dense<0.000000e+00> : vector<8x8xf32>
    %243 = tpu.matmul %240, %242, %cst_78 {dimension_numbers = #tpu.dot_dimension_numbers<[1], [1], [0], [0], [0, 0, 1, 0], [], []>} : vector<8x8xbf16>, vector<8x8xbf16>, vector<8x8xf32> -> vector<8x8xf32>
    "tpu.trace_stop"() : () -> ()
    %244 = vector.broadcast %193 : vector<1x8xf32> to vector<8x8xf32>
    %245 = arith.addf %243, %244 : vector<8x8xf32>
    %cst_79 = arith.constant dense<0xFF800000> : vector<8xf32>
    %246 = vector.multi_reduction <maximumf>, %245, %cst_79 [1] : vector<8x8xf32> to vector<8xf32>
    %247 = vector.shape_cast %246 : vector<8xf32> to vector<8x1xf32>
    %248 = vector.broadcast %247 : vector<8x1xf32> to vector<8x8xf32>
    %249 = arith.subf %245, %248 : vector<8x8xf32>
    %250 = math.exp %249 : vector<8x8xf32>
    %cst_80 = arith.constant dense<0.000000e+00> : vector<8xf32>
    %251 = vector.multi_reduction <add>, %250, %cst_80 [1] : vector<8x8xf32> to vector<8xf32>
    %252 = vector.shape_cast %251 : vector<8xf32> to vector<8x1xf32>
    %253 = tpu.reciprocal %252 {approx = true} : vector<8x1xf32> -> vector<8x1xf32>
    %254 = vector.broadcast %253 : vector<8x1xf32> to vector<8x8xf32>
    %255 = arith.mulf %250, %254 : vector<8x8xf32>
    %256 = arith.truncf %255 : vector<8x8xf32> to vector<8x8xbf16>
    %257 = vector.extract_strided_slice %196 {offsets = [0, 16], sizes = [8, 8], strides = [1, 1]} : vector<8x32xf32> to vector<8x8xf32>
    %258 = arith.truncf %257 : vector<8x8xf32> to vector<8x8xbf16>
    %cst_81 = arith.constant dense<0.000000e+00> : vector<8x8xf32>
    %259 = tpu.matmul %256, %258, %cst_81 {dimension_numbers = #tpu.dot_dimension_numbers<[1], [0], [0], [1], [0, 0, 1, 1], [], []>} : vector<8x8xbf16>, vector<8x8xbf16>, vector<8x8xf32> -> vector<8x8xf32>
    %260 = vector.extract_strided_slice %194 {offsets = [0, 24], sizes = [8, 8], strides = [1, 1]} : vector<8x32xf32> to vector<8x8xf32>
    %261 = arith.truncf %260 : vector<8x8xf32> to vector<8x8xbf16>
    %262 = vector.extract_strided_slice %195 {offsets = [0, 24], sizes = [8, 8], strides = [1, 1]} : vector<8x32xf32> to vector<8x8xf32>
    %263 = arith.truncf %262 : vector<8x8xf32> to vector<8x8xbf16>
    "tpu.trace_start"() <{level = 10 : i32, message = "qe,ke->qk"}> : () -> ()
    %cst_82 = arith.constant dense<0.000000e+00> : vector<8x8xf32>
    %264 = tpu.matmul %261, %263, %cst_82 {dimension_numbers = #tpu.dot_dimension_numbers<[1], [1], [0], [0], [0, 0, 1, 0], [], []>} : vector<8x8xbf16>, vector<8x8xbf16>, vector<8x8xf32> -> vector<8x8xf32>
    "tpu.trace_stop"() : () -> ()
    %265 = vector.broadcast %193 : vector<1x8xf32> to vector<8x8xf32>
    %266 = arith.addf %264, %265 : vector<8x8xf32>
    %cst_83 = arith.constant dense<0xFF800000> : vector<8xf32>
    %267 = vector.multi_reduction <maximumf>, %266, %cst_83 [1] : vector<8x8xf32> to vector<8xf32>
    %268 = vector.shape_cast %267 : vector<8xf32> to vector<8x1xf32>
    %269 = vector.broadcast %268 : vector<8x1xf32> to vector<8x8xf32>
    %270 = arith.subf %266, %269 : vector<8x8xf32>
    %271 = math.exp %270 : vector<8x8xf32>
    %cst_84 = arith.constant dense<0.000000e+00> : vector<8xf32>
    %272 = vector.multi_reduction <add>, %271, %cst_84 [1] : vector<8x8xf32> to vector<8xf32>
    %273 = vector.shape_cast %272 : vector<8xf32> to vector<8x1xf32>
    %274 = tpu.reciprocal %273 {approx = true} : vector<8x1xf32> -> vector<8x1xf32>
    %275 = vector.broadcast %274 : vector<8x1xf32> to vector<8x8xf32>
    %276 = arith.mulf %271, %275 : vector<8x8xf32>
    %277 = arith.truncf %276 : vector<8x8xf32> to vector<8x8xbf16>
    %278 = vector.extract_strided_slice %196 {offsets = [0, 24], sizes = [8, 8], strides = [1, 1]} : vector<8x32xf32> to vector<8x8xf32>
    %279 = arith.truncf %278 : vector<8x8xf32> to vector<8x8xbf16>
    %cst_85 = arith.constant dense<0.000000e+00> : vector<8x8xf32>
    %280 = tpu.matmul %277, %279, %cst_85 {dimension_numbers = #tpu.dot_dimension_numbers<[1], [0], [0], [1], [0, 0, 1, 1], [], []>} : vector<8x8xbf16>, vector<8x8xbf16>, vector<8x8xf32> -> vector<8x8xf32>
    %281 = tpu.concatenate %217, %238, %259, %280 in 1 : vector<8x8xf32>, vector<8x8xf32>, vector<8x8xf32>, vector<8x8xf32> -> vector<8x32xf32>
    %282 = tpu.concatenate %186, %281 in 0 : vector<8x32xf32>, vector<8x32xf32> -> vector<16x32xf32>
    %283 = arith.truncf %282 : vector<16x32xf32> to vector<16x32xbf16>
    %c0_86 = arith.constant 0 : index
    %c0_87 = arith.constant 0 : index
    %284 = vector.load %arg11[%c0_86, %c0_87] : memref<32x32xbf16, #tpu.memory_space<vmem>>, vector<32x32xbf16>
    %cst_88 = arith.constant dense<0.000000e+00> : vector<16x32xf32>
    %285 = tpu.matmul %283, %284, %cst_88 {dimension_numbers = #tpu.dot_dimension_numbers<[1], [0], [0], [1], [0, 0, 1, 1], [], []>} : vector<16x32xbf16>, vector<32x32xbf16>, vector<16x32xf32> -> vector<16x32xf32>
    %c8 = arith.constant 8 : index
    %c0_89 = arith.constant 0 : index
    %286 = vector.load %arg4[%c8, %c0_89] : memref<18x32xf32, #tpu.memory_space<vmem>>, vector<1x32xf32>
    %287 = vector.broadcast %286 : vector<1x32xf32> to vector<16x32xf32>
    %288 = arith.addf %285, %287 : vector<16x32xf32>
    %289 = arith.addf %48, %288 : vector<16x32xf32>
    %c9 = arith.constant 9 : index
    %c0_90 = arith.constant 0 : index
    %290 = vector.load %arg4[%c9, %c0_90] : memref<18x32xf32, #tpu.memory_space<vmem>>, vector<1x32xf32>
    %c10 = arith.constant 10 : index
    %c0_91 = arith.constant 0 : index
    %291 = vector.load %arg4[%c10, %c0_91] : memref<18x32xf32, #tpu.memory_space<vmem>>, vector<1x32xf32>
    %cst_92 = arith.constant dense<0.000000e+00> : vector<16xf32>
    %292 = vector.multi_reduction <add>, %289, %cst_92 [1] : vector<16x32xf32> to vector<16xf32>
    %293 = vector.shape_cast %292 : vector<16xf32> to vector<16x1xf32>
    %cst_93 = arith.constant 3.200000e+01 : f32
    %294 = vector.broadcast %cst_93 : f32 to vector<16x1xf32>
    %295 = arith.divf %293, %294 : vector<16x1xf32>
    %296 = vector.broadcast %295 : vector<16x1xf32> to vector<16x32xf32>
    %297 = arith.subf %289, %296 : vector<16x32xf32>
    %298 = arith.mulf %297, %297 : vector<16x32xf32>
    %cst_94 = arith.constant dense<0.000000e+00> : vector<16xf32>
    %299 = vector.multi_reduction <add>, %298, %cst_94 [1] : vector<16x32xf32> to vector<16xf32>
    %300 = vector.shape_cast %299 : vector<16xf32> to vector<16x1xf32>
    %cst_95 = arith.constant 3.200000e+01 : f32
    %301 = vector.broadcast %cst_95 : f32 to vector<16x1xf32>
    %302 = arith.divf %300, %301 : vector<16x1xf32>
    %303 = vector.broadcast %295 : vector<16x1xf32> to vector<16x32xf32>
    %304 = arith.subf %289, %303 : vector<16x32xf32>
    %cst_96 = arith.constant 9.99999974E-6 : f32
    %305 = vector.broadcast %cst_96 : f32 to vector<16x1xf32>
    %306 = arith.addf %302, %305 : vector<16x1xf32>
    %307 = math.rsqrt %306 : vector<16x1xf32>
    %308 = vector.broadcast %307 : vector<16x1xf32> to vector<16x32xf32>
    %309 = arith.mulf %304, %308 : vector<16x32xf32>
    %310 = vector.broadcast %290 : vector<1x32xf32> to vector<16x32xf32>
    %311 = arith.mulf %309, %310 : vector<16x32xf32>
    %312 = vector.broadcast %291 : vector<1x32xf32> to vector<16x32xf32>
    %313 = arith.addf %311, %312 : vector<16x32xf32>
    %314 = arith.truncf %313 : vector<16x32xf32> to vector<16x32xbf16>
    %c0_97 = arith.constant 0 : index
    %c0_98 = arith.constant 0 : index
    %315 = vector.load %arg12[%c0_97, %c0_98] : memref<32x32xbf16, #tpu.memory_space<vmem>>, vector<32x32xbf16>
    %cst_99 = arith.constant dense<0.000000e+00> : vector<16x32xf32>
    %316 = tpu.matmul %314, %315, %cst_99 {dimension_numbers = #tpu.dot_dimension_numbers<[1], [0], [0], [1], [0, 0, 1, 1], [], []>} : vector<16x32xbf16>, vector<32x32xbf16>, vector<16x32xf32> -> vector<16x32xf32>
    %c0_100 = arith.constant 0 : index
    %c0_101 = arith.constant 0 : index
    %317 = vector.load %arg13[%c0_100, %c0_101] : memref<32x32xbf16, #tpu.memory_space<vmem>>, vector<32x32xbf16>
    %cst_102 = arith.constant dense<0.000000e+00> : vector<16x32xf32>
    %318 = tpu.matmul %314, %317, %cst_102 {dimension_numbers = #tpu.dot_dimension_numbers<[1], [0], [0], [1], [0, 0, 1, 1], [], []>} : vector<16x32xbf16>, vector<32x32xbf16>, vector<16x32xf32> -> vector<16x32xf32>
    %319 = arith.negf %318 : vector<16x32xf32>
    %320 = math.exp %319 : vector<16x32xf32>
    %cst_103 = arith.constant 1.000000e+00 : f32
    %321 = vector.broadcast %cst_103 : f32 to vector<16x32xf32>
    %322 = arith.addf %321, %320 : vector<16x32xf32>
    %323 = arith.divf %321, %322 : vector<16x32xf32>
    %324 = arith.mulf %316, %323 : vector<16x32xf32>
    %c0_104 = arith.constant 0 : index
    %c0_105 = arith.constant 0 : index
    %325 = vector.load %arg14[%c0_104, %c0_105] : memref<31x32xf32, #tpu.memory_space<vmem>>, vector<31x32xf32>
    %cst_106 = arith.constant 0.000000e+00 : f32
    %326 = vector.broadcast %cst_106 : f32 to vector<15x32xf32>
    %327 = vector.extract_strided_slice %324 {offsets = [0, 0], sizes = [8, 32], strides = [1, 1]} : vector<16x32xf32> to vector<8x32xf32>
    %328 = tpu.concatenate %326, %327, %326 in 0 : vector<15x32xf32>, vector<8x32xf32>, vector<15x32xf32> -> vector<38x32xf32>
    %cst_107 = arith.constant 0.000000e+00 : f32
    %329 = vector.broadcast %cst_107 : f32 to vector<8x32xf32>
    %330 = vector.extract_strided_slice %328 {offsets = [0, 0], sizes = [8, 32], strides = [1, 1]} : vector<38x32xf32> to vector<8x32xf32>
    %331 = vector.extract_strided_slice %325 {offsets = [0, 0], sizes = [1, 32], strides = [1, 1]} : vector<31x32xf32> to vector<1x32xf32>
    %332 = vector.broadcast %331 : vector<1x32xf32> to vector<8x32xf32>
    %333 = arith.mulf %330, %332 : vector<8x32xf32>
    %334 = arith.addf %329, %333 : vector<8x32xf32>
    %335 = vector.extract_strided_slice %328 {offsets = [1, 0], sizes = [8, 32], strides = [1, 1]} : vector<38x32xf32> to vector<8x32xf32>
    %336 = vector.extract_strided_slice %325 {offsets = [1, 0], sizes = [1, 32], strides = [1, 1]} : vector<31x32xf32> to vector<1x32xf32>
    %337 = vector.broadcast %336 : vector<1x32xf32> to vector<8x32xf32>
    %338 = arith.mulf %335, %337 : vector<8x32xf32>
    %339 = arith.addf %334, %338 : vector<8x32xf32>
    %340 = vector.extract_strided_slice %328 {offsets = [2, 0], sizes = [8, 32], strides = [1, 1]} : vector<38x32xf32> to vector<8x32xf32>
    %341 = vector.extract_strided_slice %325 {offsets = [2, 0], sizes = [1, 32], strides = [1, 1]} : vector<31x32xf32> to vector<1x32xf32>
    %342 = vector.broadcast %341 : vector<1x32xf32> to vector<8x32xf32>
    %343 = arith.mulf %340, %342 : vector<8x32xf32>
    %344 = arith.addf %339, %343 : vector<8x32xf32>
    %345 = vector.extract_strided_slice %328 {offsets = [3, 0], sizes = [8, 32], strides = [1, 1]} : vector<38x32xf32> to vector<8x32xf32>
    %346 = vector.extract_strided_slice %325 {offsets = [3, 0], sizes = [1, 32], strides = [1, 1]} : vector<31x32xf32> to vector<1x32xf32>
    %347 = vector.broadcast %346 : vector<1x32xf32> to vector<8x32xf32>
    %348 = arith.mulf %345, %347 : vector<8x32xf32>
    %349 = arith.addf %344, %348 : vector<8x32xf32>
    %350 = vector.extract_strided_slice %328 {offsets = [4, 0], sizes = [8, 32], strides = [1, 1]} : vector<38x32xf32> to vector<8x32xf32>
    %351 = vector.extract_strided_slice %325 {offsets = [4, 0], sizes = [1, 32], strides = [1, 1]} : vector<31x32xf32> to vector<1x32xf32>
    %352 = vector.broadcast %351 : vector<1x32xf32> to vector<8x32xf32>
    %353 = arith.mulf %350, %352 : vector<8x32xf32>
    %354 = arith.addf %349, %353 : vector<8x32xf32>
    %355 = vector.extract_strided_slice %328 {offsets = [5, 0], sizes = [8, 32], strides = [1, 1]} : vector<38x32xf32> to vector<8x32xf32>
    %356 = vector.extract_strided_slice %325 {offsets = [5, 0], sizes = [1, 32], strides = [1, 1]} : vector<31x32xf32> to vector<1x32xf32>
    %357 = vector.broadcast %356 : vector<1x32xf32> to vector<8x32xf32>
    %358 = arith.mulf %355, %357 : vector<8x32xf32>
    %359 = arith.addf %354, %358 : vector<8x32xf32>
    %360 = vector.extract_strided_slice %328 {offsets = [6, 0], sizes = [8, 32], strides = [1, 1]} : vector<38x32xf32> to vector<8x32xf32>
    %361 = vector.extract_strided_slice %325 {offsets = [6, 0], sizes = [1, 32], strides = [1, 1]} : vector<31x32xf32> to vector<1x32xf32>
    %362 = vector.broadcast %361 : vector<1x32xf32> to vector<8x32xf32>
    %363 = arith.mulf %360, %362 : vector<8x32xf32>
    %364 = arith.addf %359, %363 : vector<8x32xf32>
    %365 = vector.extract_strided_slice %328 {offsets = [7, 0], sizes = [8, 32], strides = [1, 1]} : vector<38x32xf32> to vector<8x32xf32>
    %366 = vector.extract_strided_slice %325 {offsets = [7, 0], sizes = [1, 32], strides = [1, 1]} : vector<31x32xf32> to vector<1x32xf32>
    %367 = vector.broadcast %366 : vector<1x32xf32> to vector<8x32xf32>
    %368 = arith.mulf %365, %367 : vector<8x32xf32>
    %369 = arith.addf %364, %368 : vector<8x32xf32>
    %370 = vector.extract_strided_slice %328 {offsets = [8, 0], sizes = [8, 32], strides = [1, 1]} : vector<38x32xf32> to vector<8x32xf32>
    %371 = vector.extract_strided_slice %325 {offsets = [8, 0], sizes = [1, 32], strides = [1, 1]} : vector<31x32xf32> to vector<1x32xf32>
    %372 = vector.broadcast %371 : vector<1x32xf32> to vector<8x32xf32>
    %373 = arith.mulf %370, %372 : vector<8x32xf32>
    %374 = arith.addf %369, %373 : vector<8x32xf32>
    %375 = vector.extract_strided_slice %328 {offsets = [9, 0], sizes = [8, 32], strides = [1, 1]} : vector<38x32xf32> to vector<8x32xf32>
    %376 = vector.extract_strided_slice %325 {offsets = [9, 0], sizes = [1, 32], strides = [1, 1]} : vector<31x32xf32> to vector<1x32xf32>
    %377 = vector.broadcast %376 : vector<1x32xf32> to vector<8x32xf32>
    %378 = arith.mulf %375, %377 : vector<8x32xf32>
    %379 = arith.addf %374, %378 : vector<8x32xf32>
    %380 = vector.extract_strided_slice %328 {offsets = [10, 0], sizes = [8, 32], strides = [1, 1]} : vector<38x32xf32> to vector<8x32xf32>
    %381 = vector.extract_strided_slice %325 {offsets = [10, 0], sizes = [1, 32], strides = [1, 1]} : vector<31x32xf32> to vector<1x32xf32>
    %382 = vector.broadcast %381 : vector<1x32xf32> to vector<8x32xf32>
    %383 = arith.mulf %380, %382 : vector<8x32xf32>
    %384 = arith.addf %379, %383 : vector<8x32xf32>
    %385 = vector.extract_strided_slice %328 {offsets = [11, 0], sizes = [8, 32], strides = [1, 1]} : vector<38x32xf32> to vector<8x32xf32>
    %386 = vector.extract_strided_slice %325 {offsets = [11, 0], sizes = [1, 32], strides = [1, 1]} : vector<31x32xf32> to vector<1x32xf32>
    %387 = vector.broadcast %386 : vector<1x32xf32> to vector<8x32xf32>
    %388 = arith.mulf %385, %387 : vector<8x32xf32>
    %389 = arith.addf %384, %388 : vector<8x32xf32>
    %390 = vector.extract_strided_slice %328 {offsets = [12, 0], sizes = [8, 32], strides = [1, 1]} : vector<38x32xf32> to vector<8x32xf32>
    %391 = vector.extract_strided_slice %325 {offsets = [12, 0], sizes = [1, 32], strides = [1, 1]} : vector<31x32xf32> to vector<1x32xf32>
    %392 = vector.broadcast %391 : vector<1x32xf32> to vector<8x32xf32>
    %393 = arith.mulf %390, %392 : vector<8x32xf32>
    %394 = arith.addf %389, %393 : vector<8x32xf32>
    %395 = vector.extract_strided_slice %328 {offsets = [13, 0], sizes = [8, 32], strides = [1, 1]} : vector<38x32xf32> to vector<8x32xf32>
    %396 = vector.extract_strided_slice %325 {offsets = [13, 0], sizes = [1, 32], strides = [1, 1]} : vector<31x32xf32> to vector<1x32xf32>
    %397 = vector.broadcast %396 : vector<1x32xf32> to vector<8x32xf32>
    %398 = arith.mulf %395, %397 : vector<8x32xf32>
    %399 = arith.addf %394, %398 : vector<8x32xf32>
    %400 = vector.extract_strided_slice %328 {offsets = [14, 0], sizes = [8, 32], strides = [1, 1]} : vector<38x32xf32> to vector<8x32xf32>
    %401 = vector.extract_strided_slice %325 {offsets = [14, 0], sizes = [1, 32], strides = [1, 1]} : vector<31x32xf32> to vector<1x32xf32>
    %402 = vector.broadcast %401 : vector<1x32xf32> to vector<8x32xf32>
    %403 = arith.mulf %400, %402 : vector<8x32xf32>
    %404 = arith.addf %399, %403 : vector<8x32xf32>
    %405 = vector.extract_strided_slice %328 {offsets = [15, 0], sizes = [8, 32], strides = [1, 1]} : vector<38x32xf32> to vector<8x32xf32>
    %406 = vector.extract_strided_slice %325 {offsets = [15, 0], sizes = [1, 32], strides = [1, 1]} : vector<31x32xf32> to vector<1x32xf32>
    %407 = vector.broadcast %406 : vector<1x32xf32> to vector<8x32xf32>
    %408 = arith.mulf %405, %407 : vector<8x32xf32>
    %409 = arith.addf %404, %408 : vector<8x32xf32>
    %410 = vector.extract_strided_slice %328 {offsets = [16, 0], sizes = [8, 32], strides = [1, 1]} : vector<38x32xf32> to vector<8x32xf32>
    %411 = vector.extract_strided_slice %325 {offsets = [16, 0], sizes = [1, 32], strides = [1, 1]} : vector<31x32xf32> to vector<1x32xf32>
    %412 = vector.broadcast %411 : vector<1x32xf32> to vector<8x32xf32>
    %413 = arith.mulf %410, %412 : vector<8x32xf32>
    %414 = arith.addf %409, %413 : vector<8x32xf32>
    %415 = vector.extract_strided_slice %328 {offsets = [17, 0], sizes = [8, 32], strides = [1, 1]} : vector<38x32xf32> to vector<8x32xf32>
    %416 = vector.extract_strided_slice %325 {offsets = [17, 0], sizes = [1, 32], strides = [1, 1]} : vector<31x32xf32> to vector<1x32xf32>
    %417 = vector.broadcast %416 : vector<1x32xf32> to vector<8x32xf32>
    %418 = arith.mulf %415, %417 : vector<8x32xf32>
    %419 = arith.addf %414, %418 : vector<8x32xf32>
    %420 = vector.extract_strided_slice %328 {offsets = [18, 0], sizes = [8, 32], strides = [1, 1]} : vector<38x32xf32> to vector<8x32xf32>
    %421 = vector.extract_strided_slice %325 {offsets = [18, 0], sizes = [1, 32], strides = [1, 1]} : vector<31x32xf32> to vector<1x32xf32>
    %422 = vector.broadcast %421 : vector<1x32xf32> to vector<8x32xf32>
    %423 = arith.mulf %420, %422 : vector<8x32xf32>
    %424 = arith.addf %419, %423 : vector<8x32xf32>
    %425 = vector.extract_strided_slice %328 {offsets = [19, 0], sizes = [8, 32], strides = [1, 1]} : vector<38x32xf32> to vector<8x32xf32>
    %426 = vector.extract_strided_slice %325 {offsets = [19, 0], sizes = [1, 32], strides = [1, 1]} : vector<31x32xf32> to vector<1x32xf32>
    %427 = vector.broadcast %426 : vector<1x32xf32> to vector<8x32xf32>
    %428 = arith.mulf %425, %427 : vector<8x32xf32>
    %429 = arith.addf %424, %428 : vector<8x32xf32>
    %430 = vector.extract_strided_slice %328 {offsets = [20, 0], sizes = [8, 32], strides = [1, 1]} : vector<38x32xf32> to vector<8x32xf32>
    %431 = vector.extract_strided_slice %325 {offsets = [20, 0], sizes = [1, 32], strides = [1, 1]} : vector<31x32xf32> to vector<1x32xf32>
    %432 = vector.broadcast %431 : vector<1x32xf32> to vector<8x32xf32>
    %433 = arith.mulf %430, %432 : vector<8x32xf32>
    %434 = arith.addf %429, %433 : vector<8x32xf32>
    %435 = vector.extract_strided_slice %328 {offsets = [21, 0], sizes = [8, 32], strides = [1, 1]} : vector<38x32xf32> to vector<8x32xf32>
    %436 = vector.extract_strided_slice %325 {offsets = [21, 0], sizes = [1, 32], strides = [1, 1]} : vector<31x32xf32> to vector<1x32xf32>
    %437 = vector.broadcast %436 : vector<1x32xf32> to vector<8x32xf32>
    %438 = arith.mulf %435, %437 : vector<8x32xf32>
    %439 = arith.addf %434, %438 : vector<8x32xf32>
    %440 = vector.extract_strided_slice %328 {offsets = [22, 0], sizes = [8, 32], strides = [1, 1]} : vector<38x32xf32> to vector<8x32xf32>
    %441 = vector.extract_strided_slice %325 {offsets = [22, 0], sizes = [1, 32], strides = [1, 1]} : vector<31x32xf32> to vector<1x32xf32>
    %442 = vector.broadcast %441 : vector<1x32xf32> to vector<8x32xf32>
    %443 = arith.mulf %440, %442 : vector<8x32xf32>
    %444 = arith.addf %439, %443 : vector<8x32xf32>
    %445 = vector.extract_strided_slice %328 {offsets = [23, 0], sizes = [8, 32], strides = [1, 1]} : vector<38x32xf32> to vector<8x32xf32>
    %446 = vector.extract_strided_slice %325 {offsets = [23, 0], sizes = [1, 32], strides = [1, 1]} : vector<31x32xf32> to vector<1x32xf32>
    %447 = vector.broadcast %446 : vector<1x32xf32> to vector<8x32xf32>
    %448 = arith.mulf %445, %447 : vector<8x32xf32>
    %449 = arith.addf %444, %448 : vector<8x32xf32>
    %450 = vector.extract_strided_slice %328 {offsets = [24, 0], sizes = [8, 32], strides = [1, 1]} : vector<38x32xf32> to vector<8x32xf32>
    %451 = vector.extract_strided_slice %325 {offsets = [24, 0], sizes = [1, 32], strides = [1, 1]} : vector<31x32xf32> to vector<1x32xf32>
    %452 = vector.broadcast %451 : vector<1x32xf32> to vector<8x32xf32>
    %453 = arith.mulf %450, %452 : vector<8x32xf32>
    %454 = arith.addf %449, %453 : vector<8x32xf32>
    %455 = vector.extract_strided_slice %328 {offsets = [25, 0], sizes = [8, 32], strides = [1, 1]} : vector<38x32xf32> to vector<8x32xf32>
    %456 = vector.extract_strided_slice %325 {offsets = [25, 0], sizes = [1, 32], strides = [1, 1]} : vector<31x32xf32> to vector<1x32xf32>
    %457 = vector.broadcast %456 : vector<1x32xf32> to vector<8x32xf32>
    %458 = arith.mulf %455, %457 : vector<8x32xf32>
    %459 = arith.addf %454, %458 : vector<8x32xf32>
    %460 = vector.extract_strided_slice %328 {offsets = [26, 0], sizes = [8, 32], strides = [1, 1]} : vector<38x32xf32> to vector<8x32xf32>
    %461 = vector.extract_strided_slice %325 {offsets = [26, 0], sizes = [1, 32], strides = [1, 1]} : vector<31x32xf32> to vector<1x32xf32>
    %462 = vector.broadcast %461 : vector<1x32xf32> to vector<8x32xf32>
    %463 = arith.mulf %460, %462 : vector<8x32xf32>
    %464 = arith.addf %459, %463 : vector<8x32xf32>
    %465 = vector.extract_strided_slice %328 {offsets = [27, 0], sizes = [8, 32], strides = [1, 1]} : vector<38x32xf32> to vector<8x32xf32>
    %466 = vector.extract_strided_slice %325 {offsets = [27, 0], sizes = [1, 32], strides = [1, 1]} : vector<31x32xf32> to vector<1x32xf32>
    %467 = vector.broadcast %466 : vector<1x32xf32> to vector<8x32xf32>
    %468 = arith.mulf %465, %467 : vector<8x32xf32>
    %469 = arith.addf %464, %468 : vector<8x32xf32>
    %470 = vector.extract_strided_slice %328 {offsets = [28, 0], sizes = [8, 32], strides = [1, 1]} : vector<38x32xf32> to vector<8x32xf32>
    %471 = vector.extract_strided_slice %325 {offsets = [28, 0], sizes = [1, 32], strides = [1, 1]} : vector<31x32xf32> to vector<1x32xf32>
    %472 = vector.broadcast %471 : vector<1x32xf32> to vector<8x32xf32>
    %473 = arith.mulf %470, %472 : vector<8x32xf32>
    %474 = arith.addf %469, %473 : vector<8x32xf32>
    %475 = vector.extract_strided_slice %328 {offsets = [29, 0], sizes = [8, 32], strides = [1, 1]} : vector<38x32xf32> to vector<8x32xf32>
    %476 = vector.extract_strided_slice %325 {offsets = [29, 0], sizes = [1, 32], strides = [1, 1]} : vector<31x32xf32> to vector<1x32xf32>
    %477 = vector.broadcast %476 : vector<1x32xf32> to vector<8x32xf32>
    %478 = arith.mulf %475, %477 : vector<8x32xf32>
    %479 = arith.addf %474, %478 : vector<8x32xf32>
    %480 = vector.extract_strided_slice %328 {offsets = [30, 0], sizes = [8, 32], strides = [1, 1]} : vector<38x32xf32> to vector<8x32xf32>
    %481 = vector.extract_strided_slice %325 {offsets = [30, 0], sizes = [1, 32], strides = [1, 1]} : vector<31x32xf32> to vector<1x32xf32>
    %482 = vector.broadcast %481 : vector<1x32xf32> to vector<8x32xf32>
    %483 = arith.mulf %480, %482 : vector<8x32xf32>
    %484 = arith.addf %479, %483 : vector<8x32xf32>
    %485 = vector.extract_strided_slice %324 {offsets = [8, 0], sizes = [8, 32], strides = [1, 1]} : vector<16x32xf32> to vector<8x32xf32>
    %486 = tpu.concatenate %326, %485, %326 in 0 : vector<15x32xf32>, vector<8x32xf32>, vector<15x32xf32> -> vector<38x32xf32>
    %cst_108 = arith.constant 0.000000e+00 : f32
    %487 = vector.broadcast %cst_108 : f32 to vector<8x32xf32>
    %488 = vector.extract_strided_slice %486 {offsets = [0, 0], sizes = [8, 32], strides = [1, 1]} : vector<38x32xf32> to vector<8x32xf32>
    %489 = vector.extract_strided_slice %325 {offsets = [0, 0], sizes = [1, 32], strides = [1, 1]} : vector<31x32xf32> to vector<1x32xf32>
    %490 = vector.broadcast %489 : vector<1x32xf32> to vector<8x32xf32>
    %491 = arith.mulf %488, %490 : vector<8x32xf32>
    %492 = arith.addf %487, %491 : vector<8x32xf32>
    %493 = vector.extract_strided_slice %486 {offsets = [1, 0], sizes = [8, 32], strides = [1, 1]} : vector<38x32xf32> to vector<8x32xf32>
    %494 = vector.extract_strided_slice %325 {offsets = [1, 0], sizes = [1, 32], strides = [1, 1]} : vector<31x32xf32> to vector<1x32xf32>
    %495 = vector.broadcast %494 : vector<1x32xf32> to vector<8x32xf32>
    %496 = arith.mulf %493, %495 : vector<8x32xf32>
    %497 = arith.addf %492, %496 : vector<8x32xf32>
    %498 = vector.extract_strided_slice %486 {offsets = [2, 0], sizes = [8, 32], strides = [1, 1]} : vector<38x32xf32> to vector<8x32xf32>
    %499 = vector.extract_strided_slice %325 {offsets = [2, 0], sizes = [1, 32], strides = [1, 1]} : vector<31x32xf32> to vector<1x32xf32>
    %500 = vector.broadcast %499 : vector<1x32xf32> to vector<8x32xf32>
    %501 = arith.mulf %498, %500 : vector<8x32xf32>
    %502 = arith.addf %497, %501 : vector<8x32xf32>
    %503 = vector.extract_strided_slice %486 {offsets = [3, 0], sizes = [8, 32], strides = [1, 1]} : vector<38x32xf32> to vector<8x32xf32>
    %504 = vector.extract_strided_slice %325 {offsets = [3, 0], sizes = [1, 32], strides = [1, 1]} : vector<31x32xf32> to vector<1x32xf32>
    %505 = vector.broadcast %504 : vector<1x32xf32> to vector<8x32xf32>
    %506 = arith.mulf %503, %505 : vector<8x32xf32>
    %507 = arith.addf %502, %506 : vector<8x32xf32>
    %508 = vector.extract_strided_slice %486 {offsets = [4, 0], sizes = [8, 32], strides = [1, 1]} : vector<38x32xf32> to vector<8x32xf32>
    %509 = vector.extract_strided_slice %325 {offsets = [4, 0], sizes = [1, 32], strides = [1, 1]} : vector<31x32xf32> to vector<1x32xf32>
    %510 = vector.broadcast %509 : vector<1x32xf32> to vector<8x32xf32>
    %511 = arith.mulf %508, %510 : vector<8x32xf32>
    %512 = arith.addf %507, %511 : vector<8x32xf32>
    %513 = vector.extract_strided_slice %486 {offsets = [5, 0], sizes = [8, 32], strides = [1, 1]} : vector<38x32xf32> to vector<8x32xf32>
    %514 = vector.extract_strided_slice %325 {offsets = [5, 0], sizes = [1, 32], strides = [1, 1]} : vector<31x32xf32> to vector<1x32xf32>
    %515 = vector.broadcast %514 : vector<1x32xf32> to vector<8x32xf32>
    %516 = arith.mulf %513, %515 : vector<8x32xf32>
    %517 = arith.addf %512, %516 : vector<8x32xf32>
    %518 = vector.extract_strided_slice %486 {offsets = [6, 0], sizes = [8, 32], strides = [1, 1]} : vector<38x32xf32> to vector<8x32xf32>
    %519 = vector.extract_strided_slice %325 {offsets = [6, 0], sizes = [1, 32], strides = [1, 1]} : vector<31x32xf32> to vector<1x32xf32>
    %520 = vector.broadcast %519 : vector<1x32xf32> to vector<8x32xf32>
    %521 = arith.mulf %518, %520 : vector<8x32xf32>
    %522 = arith.addf %517, %521 : vector<8x32xf32>
    %523 = vector.extract_strided_slice %486 {offsets = [7, 0], sizes = [8, 32], strides = [1, 1]} : vector<38x32xf32> to vector<8x32xf32>
    %524 = vector.extract_strided_slice %325 {offsets = [7, 0], sizes = [1, 32], strides = [1, 1]} : vector<31x32xf32> to vector<1x32xf32>
    %525 = vector.broadcast %524 : vector<1x32xf32> to vector<8x32xf32>
    %526 = arith.mulf %523, %525 : vector<8x32xf32>
    %527 = arith.addf %522, %526 : vector<8x32xf32>
    %528 = vector.extract_strided_slice %486 {offsets = [8, 0], sizes = [8, 32], strides = [1, 1]} : vector<38x32xf32> to vector<8x32xf32>
    %529 = vector.extract_strided_slice %325 {offsets = [8, 0], sizes = [1, 32], strides = [1, 1]} : vector<31x32xf32> to vector<1x32xf32>
    %530 = vector.broadcast %529 : vector<1x32xf32> to vector<8x32xf32>
    %531 = arith.mulf %528, %530 : vector<8x32xf32>
    %532 = arith.addf %527, %531 : vector<8x32xf32>
    %533 = vector.extract_strided_slice %486 {offsets = [9, 0], sizes = [8, 32], strides = [1, 1]} : vector<38x32xf32> to vector<8x32xf32>
    %534 = vector.extract_strided_slice %325 {offsets = [9, 0], sizes = [1, 32], strides = [1, 1]} : vector<31x32xf32> to vector<1x32xf32>
    %535 = vector.broadcast %534 : vector<1x32xf32> to vector<8x32xf32>
    %536 = arith.mulf %533, %535 : vector<8x32xf32>
    %537 = arith.addf %532, %536 : vector<8x32xf32>
    %538 = vector.extract_strided_slice %486 {offsets = [10, 0], sizes = [8, 32], strides = [1, 1]} : vector<38x32xf32> to vector<8x32xf32>
    %539 = vector.extract_strided_slice %325 {offsets = [10, 0], sizes = [1, 32], strides = [1, 1]} : vector<31x32xf32> to vector<1x32xf32>
    %540 = vector.broadcast %539 : vector<1x32xf32> to vector<8x32xf32>
    %541 = arith.mulf %538, %540 : vector<8x32xf32>
    %542 = arith.addf %537, %541 : vector<8x32xf32>
    %543 = vector.extract_strided_slice %486 {offsets = [11, 0], sizes = [8, 32], strides = [1, 1]} : vector<38x32xf32> to vector<8x32xf32>
    %544 = vector.extract_strided_slice %325 {offsets = [11, 0], sizes = [1, 32], strides = [1, 1]} : vector<31x32xf32> to vector<1x32xf32>
    %545 = vector.broadcast %544 : vector<1x32xf32> to vector<8x32xf32>
    %546 = arith.mulf %543, %545 : vector<8x32xf32>
    %547 = arith.addf %542, %546 : vector<8x32xf32>
    %548 = vector.extract_strided_slice %486 {offsets = [12, 0], sizes = [8, 32], strides = [1, 1]} : vector<38x32xf32> to vector<8x32xf32>
    %549 = vector.extract_strided_slice %325 {offsets = [12, 0], sizes = [1, 32], strides = [1, 1]} : vector<31x32xf32> to vector<1x32xf32>
    %550 = vector.broadcast %549 : vector<1x32xf32> to vector<8x32xf32>
    %551 = arith.mulf %548, %550 : vector<8x32xf32>
    %552 = arith.addf %547, %551 : vector<8x32xf32>
    %553 = vector.extract_strided_slice %486 {offsets = [13, 0], sizes = [8, 32], strides = [1, 1]} : vector<38x32xf32> to vector<8x32xf32>
    %554 = vector.extract_strided_slice %325 {offsets = [13, 0], sizes = [1, 32], strides = [1, 1]} : vector<31x32xf32> to vector<1x32xf32>
    %555 = vector.broadcast %554 : vector<1x32xf32> to vector<8x32xf32>
    %556 = arith.mulf %553, %555 : vector<8x32xf32>
    %557 = arith.addf %552, %556 : vector<8x32xf32>
    %558 = vector.extract_strided_slice %486 {offsets = [14, 0], sizes = [8, 32], strides = [1, 1]} : vector<38x32xf32> to vector<8x32xf32>
    %559 = vector.extract_strided_slice %325 {offsets = [14, 0], sizes = [1, 32], strides = [1, 1]} : vector<31x32xf32> to vector<1x32xf32>
    %560 = vector.broadcast %559 : vector<1x32xf32> to vector<8x32xf32>
    %561 = arith.mulf %558, %560 : vector<8x32xf32>
    %562 = arith.addf %557, %561 : vector<8x32xf32>
    %563 = vector.extract_strided_slice %486 {offsets = [15, 0], sizes = [8, 32], strides = [1, 1]} : vector<38x32xf32> to vector<8x32xf32>
    %564 = vector.extract_strided_slice %325 {offsets = [15, 0], sizes = [1, 32], strides = [1, 1]} : vector<31x32xf32> to vector<1x32xf32>
    %565 = vector.broadcast %564 : vector<1x32xf32> to vector<8x32xf32>
    %566 = arith.mulf %563, %565 : vector<8x32xf32>
    %567 = arith.addf %562, %566 : vector<8x32xf32>
    %568 = vector.extract_strided_slice %486 {offsets = [16, 0], sizes = [8, 32], strides = [1, 1]} : vector<38x32xf32> to vector<8x32xf32>
    %569 = vector.extract_strided_slice %325 {offsets = [16, 0], sizes = [1, 32], strides = [1, 1]} : vector<31x32xf32> to vector<1x32xf32>
    %570 = vector.broadcast %569 : vector<1x32xf32> to vector<8x32xf32>
    %571 = arith.mulf %568, %570 : vector<8x32xf32>
    %572 = arith.addf %567, %571 : vector<8x32xf32>
    %573 = vector.extract_strided_slice %486 {offsets = [17, 0], sizes = [8, 32], strides = [1, 1]} : vector<38x32xf32> to vector<8x32xf32>
    %574 = vector.extract_strided_slice %325 {offsets = [17, 0], sizes = [1, 32], strides = [1, 1]} : vector<31x32xf32> to vector<1x32xf32>
    %575 = vector.broadcast %574 : vector<1x32xf32> to vector<8x32xf32>
    %576 = arith.mulf %573, %575 : vector<8x32xf32>
    %577 = arith.addf %572, %576 : vector<8x32xf32>
    %578 = vector.extract_strided_slice %486 {offsets = [18, 0], sizes = [8, 32], strides = [1, 1]} : vector<38x32xf32> to vector<8x32xf32>
    %579 = vector.extract_strided_slice %325 {offsets = [18, 0], sizes = [1, 32], strides = [1, 1]} : vector<31x32xf32> to vector<1x32xf32>
    %580 = vector.broadcast %579 : vector<1x32xf32> to vector<8x32xf32>
    %581 = arith.mulf %578, %580 : vector<8x32xf32>
    %582 = arith.addf %577, %581 : vector<8x32xf32>
    %583 = vector.extract_strided_slice %486 {offsets = [19, 0], sizes = [8, 32], strides = [1, 1]} : vector<38x32xf32> to vector<8x32xf32>
    %584 = vector.extract_strided_slice %325 {offsets = [19, 0], sizes = [1, 32], strides = [1, 1]} : vector<31x32xf32> to vector<1x32xf32>
    %585 = vector.broadcast %584 : vector<1x32xf32> to vector<8x32xf32>
    %586 = arith.mulf %583, %585 : vector<8x32xf32>
    %587 = arith.addf %582, %586 : vector<8x32xf32>
    %588 = vector.extract_strided_slice %486 {offsets = [20, 0], sizes = [8, 32], strides = [1, 1]} : vector<38x32xf32> to vector<8x32xf32>
    %589 = vector.extract_strided_slice %325 {offsets = [20, 0], sizes = [1, 32], strides = [1, 1]} : vector<31x32xf32> to vector<1x32xf32>
    %590 = vector.broadcast %589 : vector<1x32xf32> to vector<8x32xf32>
    %591 = arith.mulf %588, %590 : vector<8x32xf32>
    %592 = arith.addf %587, %591 : vector<8x32xf32>
    %593 = vector.extract_strided_slice %486 {offsets = [21, 0], sizes = [8, 32], strides = [1, 1]} : vector<38x32xf32> to vector<8x32xf32>
    %594 = vector.extract_strided_slice %325 {offsets = [21, 0], sizes = [1, 32], strides = [1, 1]} : vector<31x32xf32> to vector<1x32xf32>
    %595 = vector.broadcast %594 : vector<1x32xf32> to vector<8x32xf32>
    %596 = arith.mulf %593, %595 : vector<8x32xf32>
    %597 = arith.addf %592, %596 : vector<8x32xf32>
    %598 = vector.extract_strided_slice %486 {offsets = [22, 0], sizes = [8, 32], strides = [1, 1]} : vector<38x32xf32> to vector<8x32xf32>
    %599 = vector.extract_strided_slice %325 {offsets = [22, 0], sizes = [1, 32], strides = [1, 1]} : vector<31x32xf32> to vector<1x32xf32>
    %600 = vector.broadcast %599 : vector<1x32xf32> to vector<8x32xf32>
    %601 = arith.mulf %598, %600 : vector<8x32xf32>
    %602 = arith.addf %597, %601 : vector<8x32xf32>
    %603 = vector.extract_strided_slice %486 {offsets = [23, 0], sizes = [8, 32], strides = [1, 1]} : vector<38x32xf32> to vector<8x32xf32>
    %604 = vector.extract_strided_slice %325 {offsets = [23, 0], sizes = [1, 32], strides = [1, 1]} : vector<31x32xf32> to vector<1x32xf32>
    %605 = vector.broadcast %604 : vector<1x32xf32> to vector<8x32xf32>
    %606 = arith.mulf %603, %605 : vector<8x32xf32>
    %607 = arith.addf %602, %606 : vector<8x32xf32>
    %608 = vector.extract_strided_slice %486 {offsets = [24, 0], sizes = [8, 32], strides = [1, 1]} : vector<38x32xf32> to vector<8x32xf32>
    %609 = vector.extract_strided_slice %325 {offsets = [24, 0], sizes = [1, 32], strides = [1, 1]} : vector<31x32xf32> to vector<1x32xf32>
    %610 = vector.broadcast %609 : vector<1x32xf32> to vector<8x32xf32>
    %611 = arith.mulf %608, %610 : vector<8x32xf32>
    %612 = arith.addf %607, %611 : vector<8x32xf32>
    %613 = vector.extract_strided_slice %486 {offsets = [25, 0], sizes = [8, 32], strides = [1, 1]} : vector<38x32xf32> to vector<8x32xf32>
    %614 = vector.extract_strided_slice %325 {offsets = [25, 0], sizes = [1, 32], strides = [1, 1]} : vector<31x32xf32> to vector<1x32xf32>
    %615 = vector.broadcast %614 : vector<1x32xf32> to vector<8x32xf32>
    %616 = arith.mulf %613, %615 : vector<8x32xf32>
    %617 = arith.addf %612, %616 : vector<8x32xf32>
    %618 = vector.extract_strided_slice %486 {offsets = [26, 0], sizes = [8, 32], strides = [1, 1]} : vector<38x32xf32> to vector<8x32xf32>
    %619 = vector.extract_strided_slice %325 {offsets = [26, 0], sizes = [1, 32], strides = [1, 1]} : vector<31x32xf32> to vector<1x32xf32>
    %620 = vector.broadcast %619 : vector<1x32xf32> to vector<8x32xf32>
    %621 = arith.mulf %618, %620 : vector<8x32xf32>
    %622 = arith.addf %617, %621 : vector<8x32xf32>
    %623 = vector.extract_strided_slice %486 {offsets = [27, 0], sizes = [8, 32], strides = [1, 1]} : vector<38x32xf32> to vector<8x32xf32>
    %624 = vector.extract_strided_slice %325 {offsets = [27, 0], sizes = [1, 32], strides = [1, 1]} : vector<31x32xf32> to vector<1x32xf32>
    %625 = vector.broadcast %624 : vector<1x32xf32> to vector<8x32xf32>
    %626 = arith.mulf %623, %625 : vector<8x32xf32>
    %627 = arith.addf %622, %626 : vector<8x32xf32>
    %628 = vector.extract_strided_slice %486 {offsets = [28, 0], sizes = [8, 32], strides = [1, 1]} : vector<38x32xf32> to vector<8x32xf32>
    %629 = vector.extract_strided_slice %325 {offsets = [28, 0], sizes = [1, 32], strides = [1, 1]} : vector<31x32xf32> to vector<1x32xf32>
    %630 = vector.broadcast %629 : vector<1x32xf32> to vector<8x32xf32>
    %631 = arith.mulf %628, %630 : vector<8x32xf32>
    %632 = arith.addf %627, %631 : vector<8x32xf32>
    %633 = vector.extract_strided_slice %486 {offsets = [29, 0], sizes = [8, 32], strides = [1, 1]} : vector<38x32xf32> to vector<8x32xf32>
    %634 = vector.extract_strided_slice %325 {offsets = [29, 0], sizes = [1, 32], strides = [1, 1]} : vector<31x32xf32> to vector<1x32xf32>
    %635 = vector.broadcast %634 : vector<1x32xf32> to vector<8x32xf32>
    %636 = arith.mulf %633, %635 : vector<8x32xf32>
    %637 = arith.addf %632, %636 : vector<8x32xf32>
    %638 = vector.extract_strided_slice %486 {offsets = [30, 0], sizes = [8, 32], strides = [1, 1]} : vector<38x32xf32> to vector<8x32xf32>
    %639 = vector.extract_strided_slice %325 {offsets = [30, 0], sizes = [1, 32], strides = [1, 1]} : vector<31x32xf32> to vector<1x32xf32>
    %640 = vector.broadcast %639 : vector<1x32xf32> to vector<8x32xf32>
    %641 = arith.mulf %638, %640 : vector<8x32xf32>
    %642 = arith.addf %637, %641 : vector<8x32xf32>
    %643 = tpu.concatenate %484, %642 in 0 : vector<8x32xf32>, vector<8x32xf32> -> vector<16x32xf32>
    %c11 = arith.constant 11 : index
    %c0_109 = arith.constant 0 : index
    %644 = vector.load %arg4[%c11, %c0_109] : memref<18x32xf32, #tpu.memory_space<vmem>>, vector<1x32xf32>
    %645 = vector.broadcast %644 : vector<1x32xf32> to vector<16x32xf32>
    %646 = arith.mulf %643, %645 : vector<16x32xf32>
    %c12 = arith.constant 12 : index
    %c0_110 = arith.constant 0 : index
    %647 = vector.load %arg4[%c12, %c0_110] : memref<18x32xf32, #tpu.memory_space<vmem>>, vector<1x32xf32>
    %648 = vector.broadcast %647 : vector<1x32xf32> to vector<16x32xf32>
    %649 = arith.addf %646, %648 : vector<16x32xf32>
    %650 = arith.negf %649 : vector<16x32xf32>
    %651 = math.exp %650 : vector<16x32xf32>
    %cst_111 = arith.constant 1.000000e+00 : f32
    %652 = vector.broadcast %cst_111 : f32 to vector<16x32xf32>
    %653 = arith.addf %652, %651 : vector<16x32xf32>
    %654 = arith.divf %652, %653 : vector<16x32xf32>
    %655 = arith.mulf %649, %654 : vector<16x32xf32>
    %656 = arith.truncf %655 : vector<16x32xf32> to vector<16x32xbf16>
    %c0_112 = arith.constant 0 : index
    %c0_113 = arith.constant 0 : index
    %657 = vector.load %arg15[%c0_112, %c0_113] : memref<32x32xbf16, #tpu.memory_space<vmem>>, vector<32x32xbf16>
    %cst_114 = arith.constant dense<0.000000e+00> : vector<16x32xf32>
    %658 = tpu.matmul %656, %657, %cst_114 {dimension_numbers = #tpu.dot_dimension_numbers<[1], [0], [0], [1], [0, 0, 1, 1], [], []>} : vector<16x32xbf16>, vector<32x32xbf16>, vector<16x32xf32> -> vector<16x32xf32>
    %659 = arith.addf %289, %658 : vector<16x32xf32>
    %c13 = arith.constant 13 : index
    %c0_115 = arith.constant 0 : index
    %660 = vector.load %arg4[%c13, %c0_115] : memref<18x32xf32, #tpu.memory_space<vmem>>, vector<1x32xf32>
    %c14 = arith.constant 14 : index
    %c0_116 = arith.constant 0 : index
    %661 = vector.load %arg4[%c14, %c0_116] : memref<18x32xf32, #tpu.memory_space<vmem>>, vector<1x32xf32>
    %c0_117 = arith.constant 0 : index
    %c0_118 = arith.constant 0 : index
    %662 = vector.load %arg16[%c0_117, %c0_118] : memref<32x64xbf16, #tpu.memory_space<vmem>>, vector<32x64xbf16>
    %c1_119 = arith.constant 1 : index
    %c0_120 = arith.constant 0 : index
    %663 = vector.load %arg5[%c1_119, %c0_120] : memref<2x64xf32, #tpu.memory_space<vmem>>, vector<1x64xf32>
    %c0_121 = arith.constant 0 : index
    %c0_122 = arith.constant 0 : index
    %664 = vector.load %arg17[%c0_121, %c0_122] : memref<64x32xbf16, #tpu.memory_space<vmem>>, vector<64x32xbf16>
    %c15 = arith.constant 15 : index
    %c0_123 = arith.constant 0 : index
    %665 = vector.load %arg4[%c15, %c0_123] : memref<18x32xf32, #tpu.memory_space<vmem>>, vector<1x32xf32>
    %cst_124 = arith.constant dense<0.000000e+00> : vector<16xf32>
    %666 = vector.multi_reduction <add>, %659, %cst_124 [1] : vector<16x32xf32> to vector<16xf32>
    %667 = vector.shape_cast %666 : vector<16xf32> to vector<16x1xf32>
    %cst_125 = arith.constant 3.200000e+01 : f32
    %668 = vector.broadcast %cst_125 : f32 to vector<16x1xf32>
    %669 = arith.divf %667, %668 : vector<16x1xf32>
    %670 = vector.broadcast %669 : vector<16x1xf32> to vector<16x32xf32>
    %671 = arith.subf %659, %670 : vector<16x32xf32>
    %672 = arith.mulf %671, %671 : vector<16x32xf32>
    %cst_126 = arith.constant dense<0.000000e+00> : vector<16xf32>
    %673 = vector.multi_reduction <add>, %672, %cst_126 [1] : vector<16x32xf32> to vector<16xf32>
    %674 = vector.shape_cast %673 : vector<16xf32> to vector<16x1xf32>
    %cst_127 = arith.constant 3.200000e+01 : f32
    %675 = vector.broadcast %cst_127 : f32 to vector<16x1xf32>
    %676 = arith.divf %674, %675 : vector<16x1xf32>
    %677 = vector.broadcast %669 : vector<16x1xf32> to vector<16x32xf32>
    %678 = arith.subf %659, %677 : vector<16x32xf32>
    %cst_128 = arith.constant 9.99999974E-6 : f32
    %679 = vector.broadcast %cst_128 : f32 to vector<16x1xf32>
    %680 = arith.addf %676, %679 : vector<16x1xf32>
    %681 = math.rsqrt %680 : vector<16x1xf32>
    %682 = vector.broadcast %681 : vector<16x1xf32> to vector<16x32xf32>
    %683 = arith.mulf %678, %682 : vector<16x32xf32>
    %684 = vector.broadcast %660 : vector<1x32xf32> to vector<16x32xf32>
    %685 = arith.mulf %683, %684 : vector<16x32xf32>
    %686 = vector.broadcast %661 : vector<1x32xf32> to vector<16x32xf32>
    %687 = arith.addf %685, %686 : vector<16x32xf32>
    %688 = arith.truncf %687 : vector<16x32xf32> to vector<16x32xbf16>
    %cst_129 = arith.constant dense<0.000000e+00> : vector<16x64xf32>
    %689 = tpu.matmul %688, %662, %cst_129 {dimension_numbers = #tpu.dot_dimension_numbers<[1], [0], [0], [1], [0, 0, 1, 1], [], []>} : vector<16x32xbf16>, vector<32x64xbf16>, vector<16x64xf32> -> vector<16x64xf32>
    %690 = vector.broadcast %663 : vector<1x64xf32> to vector<16x64xf32>
    %691 = arith.addf %689, %690 : vector<16x64xf32>
    %692 = arith.negf %691 : vector<16x64xf32>
    %693 = math.exp %692 : vector<16x64xf32>
    %cst_130 = arith.constant 1.000000e+00 : f32
    %694 = vector.broadcast %cst_130 : f32 to vector<16x64xf32>
    %695 = arith.addf %694, %693 : vector<16x64xf32>
    %696 = arith.divf %694, %695 : vector<16x64xf32>
    %697 = arith.mulf %691, %696 : vector<16x64xf32>
    %698 = arith.truncf %697 : vector<16x64xf32> to vector<16x64xbf16>
    %cst_131 = arith.constant dense<0.000000e+00> : vector<16x32xf32>
    %699 = tpu.matmul %698, %664, %cst_131 {dimension_numbers = #tpu.dot_dimension_numbers<[1], [0], [0], [1], [0, 0, 1, 1], [], []>} : vector<16x64xbf16>, vector<64x32xbf16>, vector<16x32xf32> -> vector<16x32xf32>
    %700 = vector.broadcast %665 : vector<1x32xf32> to vector<16x32xf32>
    %701 = arith.addf %699, %700 : vector<16x32xf32>
    %cst_132 = arith.constant 5.000000e-01 : f32
    %702 = vector.broadcast %cst_132 : f32 to vector<16x32xf32>
    %703 = arith.mulf %702, %701 : vector<16x32xf32>
    %704 = arith.addf %659, %703 : vector<16x32xf32>
    %c16 = arith.constant 16 : index
    %c0_133 = arith.constant 0 : index
    %705 = vector.load %arg4[%c16, %c0_133] : memref<18x32xf32, #tpu.memory_space<vmem>>, vector<1x32xf32>
    %c17 = arith.constant 17 : index
    %c0_134 = arith.constant 0 : index
    %706 = vector.load %arg4[%c17, %c0_134] : memref<18x32xf32, #tpu.memory_space<vmem>>, vector<1x32xf32>
    %cst_135 = arith.constant dense<0.000000e+00> : vector<16xf32>
    %707 = vector.multi_reduction <add>, %704, %cst_135 [1] : vector<16x32xf32> to vector<16xf32>
    %708 = vector.shape_cast %707 : vector<16xf32> to vector<16x1xf32>
    %cst_136 = arith.constant 3.200000e+01 : f32
    %709 = vector.broadcast %cst_136 : f32 to vector<16x1xf32>
    %710 = arith.divf %708, %709 : vector<16x1xf32>
    %711 = vector.broadcast %710 : vector<16x1xf32> to vector<16x32xf32>
    %712 = arith.subf %704, %711 : vector<16x32xf32>
    %713 = arith.mulf %712, %712 : vector<16x32xf32>
    %cst_137 = arith.constant dense<0.000000e+00> : vector<16xf32>
    %714 = vector.multi_reduction <add>, %713, %cst_137 [1] : vector<16x32xf32> to vector<16xf32>
    %715 = vector.shape_cast %714 : vector<16xf32> to vector<16x1xf32>
    %cst_138 = arith.constant 3.200000e+01 : f32
    %716 = vector.broadcast %cst_138 : f32 to vector<16x1xf32>
    %717 = arith.divf %715, %716 : vector<16x1xf32>
    %718 = vector.broadcast %710 : vector<16x1xf32> to vector<16x32xf32>
    %719 = arith.subf %704, %718 : vector<16x32xf32>
    %cst_139 = arith.constant 9.99999974E-6 : f32
    %720 = vector.broadcast %cst_139 : f32 to vector<16x1xf32>
    %721 = arith.addf %717, %720 : vector<16x1xf32>
    %722 = math.rsqrt %721 : vector<16x1xf32>
    %723 = vector.broadcast %722 : vector<16x1xf32> to vector<16x32xf32>
    %724 = arith.mulf %719, %723 : vector<16x32xf32>
    %725 = vector.broadcast %705 : vector<1x32xf32> to vector<16x32xf32>
    %726 = arith.mulf %724, %725 : vector<16x32xf32>
    %727 = vector.broadcast %706 : vector<1x32xf32> to vector<16x32xf32>
    %728 = arith.addf %726, %727 : vector<16x32xf32>
    %729 = vector.shape_cast %728 : vector<16x32xf32> to vector<2x8x32xf32>
    %c0_140 = arith.constant 0 : index
    %c0_141 = arith.constant 0 : index
    %c0_142 = arith.constant 0 : index
    %730 = vector.load %arg18[%c0_140, %c0_141, %c0_142] : memref<2x8x32xf32, #tpu.memory_space<vmem>>, vector<2x8x32xf32>
    tpu.vector_store %arg18[%c0_140, %c0_141, %c0_142], %729 {strides = array<i32>} : memref<2x8x32xf32, #tpu.memory_space<vmem>>, vector<2x8x32xf32>,
    return
  }
  func.func @transform_0(%arg0: i32) -> (i32, i32, i32) {
    %c0_i32 = arith.constant 0 : i32
    %c0_i32_0 = arith.constant 0 : i32
    %c0_i32_1 = arith.constant 0 : i32
    return %arg0, %c0_i32, %c0_i32_0 : i32, i32, i32
  }
  func.func @transform_1(%arg0: i32) -> (i32, i32, i32) {
    %c0_i32 = arith.constant 0 : i32
    %c0_i32_0 = arith.constant 0 : i32
    %c0_i32_1 = arith.constant 0 : i32
    %c0_i32_2 = arith.constant 0 : i32
    return %c0_i32, %c0_i32_0, %c0_i32_1 : i32, i32, i32
  }
  func.func @transform_2(%arg0: i32) -> (i32, i32, i32) {
    %c0_i32 = arith.constant 0 : i32
    %c0_i32_0 = arith.constant 0 : i32
    %c0_i32_1 = arith.constant 0 : i32
    return %arg0, %c0_i32, %c0_i32_0 : i32, i32, i32
  }
  func.func @transform_3(%arg0: i32) -> (i32, i32) {
    %c0_i32 = arith.constant 0 : i32
    %c0_i32_0 = arith.constant 0 : i32
    %c0_i32_1 = arith.constant 0 : i32
    return %c0_i32, %c0_i32_0 : i32, i32
  }
  func.func @transform_4(%arg0: i32) -> (i32, i32) {
    %c0_i32 = arith.constant 0 : i32
    %c0_i32_0 = arith.constant 0 : i32
    %c0_i32_1 = arith.constant 0 : i32
    return %c0_i32, %c0_i32_0 : i32, i32
  }
  func.func @transform_5(%arg0: i32) -> (i32, i32) {
    %c0_i32 = arith.constant 0 : i32
    %c0_i32_0 = arith.constant 0 : i32
    %c0_i32_1 = arith.constant 0 : i32
    return %c0_i32, %c0_i32_0 : i32, i32
  }
  func.func @transform_6(%arg0: i32) -> (i32, i32) {
    %c0_i32 = arith.constant 0 : i32
    %c0_i32_0 = arith.constant 0 : i32
    %c0_i32_1 = arith.constant 0 : i32
    return %c0_i32, %c0_i32_0 : i32, i32
  }
  func.func @transform_7(%arg0: i32) -> (i32, i32) {
    %c0_i32 = arith.constant 0 : i32
    %c0_i32_0 = arith.constant 0 : i32
    %c0_i32_1 = arith.constant 0 : i32
    return %c0_i32, %c0_i32_0 : i32, i32
  }
  func.func @transform_8(%arg0: i32) -> (i32, i32) {
    %c0_i32 = arith.constant 0 : i32
    %c0_i32_0 = arith.constant 0 : i32
    %c0_i32_1 = arith.constant 0 : i32
    return %c0_i32, %c0_i32_0 : i32, i32
  }
  func.func @transform_9(%arg0: i32) -> (i32, i32) {
    %c0_i32 = arith.constant 0 : i32
    %c0_i32_0 = arith.constant 0 : i32
    %c0_i32_1 = arith.constant 0 : i32
    return %c0_i32, %c0_i32_0 : i32, i32
  }
  func.func @transform_10(%arg0: i32) -> (i32, i32) {
    %c0_i32 = arith.constant 0 : i32
    %c0_i32_0 = arith.constant 0 : i32
    %c0_i32_1 = arith.constant 0 : i32
    return %c0_i32, %c0_i32_0 : i32, i32
  }
  func.func @transform_11(%arg0: i32) -> (i32, i32) {
    %c0_i32 = arith.constant 0 : i32
    %c0_i32_0 = arith.constant 0 : i32
    %c0_i32_1 = arith.constant 0 : i32
    return %c0_i32, %c0_i32_0 : i32, i32
  }
  func.func @transform_12(%arg0: i32) -> (i32, i32) {
    %c0_i32 = arith.constant 0 : i32
    %c0_i32_0 = arith.constant 0 : i32
    %c0_i32_1 = arith.constant 0 : i32
    return %c0_i32, %c0_i32_0 : i32, i32
  }
  func.func @transform_13(%arg0: i32) -> (i32, i32) {
    %c0_i32 = arith.constant 0 : i32
    %c0_i32_0 = arith.constant 0 : i32
    %c0_i32_1 = arith.constant 0 : i32
    return %c0_i32, %c0_i32_0 : i32, i32
  }
  func.func @transform_14(%arg0: i32) -> (i32, i32) {
    %c0_i32 = arith.constant 0 : i32
    %c0_i32_0 = arith.constant 0 : i32
    %c0_i32_1 = arith.constant 0 : i32
    return %c0_i32, %c0_i32_0 : i32, i32
  }
  func.func @transform_15(%arg0: i32) -> (i32, i32) {
    %c0_i32 = arith.constant 0 : i32
    %c0_i32_0 = arith.constant 0 : i32
    %c0_i32_1 = arith.constant 0 : i32
    return %c0_i32, %c0_i32_0 : i32, i32
  }
  func.func @transform_16(%arg0: i32) -> (i32, i32) {
    %c0_i32 = arith.constant 0 : i32
    %c0_i32_0 = arith.constant 0 : i32
    %c0_i32_1 = arith.constant 0 : i32
    return %c0_i32, %c0_i32_0 : i32, i32
  }
  func.func @transform_17(%arg0: i32) -> (i32, i32, i32) {
    %c0_i32 = arith.constant 0 : i32
    %c0_i32_0 = arith.constant 0 : i32
    %c0_i32_1 = arith.constant 0 : i32
    return %arg0, %c0_i32, %c0_i32_0 : i32, i32, i32
  }
}

</mosaic_0001>

<bundles_post_ra>
// kernel: tpu_custom_call.1
= control target key start
LH: loop header
LB: loop body
LE: loop exit
PB: predicated region body
PF: predicated region fallthrough
CT: control target
= control target key end

     0   :  { %s4508_s0 = inlined_call_operand.vmem [shape: f32[2,8,32], index: 0, kind: input, shape index: {}]   ;;  %s4509_s1 = inlined_call_operand.vmem [shape: f32[1,8,32], index: 1, kind: input, shape index: {}]   ;;  %s4510_s2 = inlined_call_operand.hbm [shape: f32[2,1,8], index: 2, kind: input, shape index: {}]   ;;  %s4511_s3 = inlined_call_operand.vmem [shape: f32[18,32], index: 3, kind: input, shape index: {}]   ;;  %s4512_s4 = inlined_call_operand.hbm [shape: f32[2,64], index: 4, kind: input, shape index: {}]   ;;  %s4513_s5 = inlined_call_operand.hbm [shape: bf16[32,64], index: 5, kind: input, shape index: {}]   ;;  %s4514_s6 = inlined_call_operand.vmem [shape: bf16[64,32], index: 6, kind: input, shape index: {}]   ;;  %s4515_s7 = inlined_call_operand.hbm [shape: bf16[32,32], index: 7, kind: input, shape index: {}]   ;;  %s4516_s8 = inlined_call_operand.hbm [shape: bf16[32,32], index: 8, kind: input, shape index: {}]   ;;  %s4517_s9 = inlined_call_operand.vmem [shape: bf16[32,32], index: 9, kind: input, shape index: {}]   ;;  %s4518_s10 = inlined_call_operand.hbm [shape: bf16[32,32], index: 10, kind: input, shape index: {}]   ;;  %s4519_s11 = inlined_call_operand.hbm [shape: bf16[32,32], index: 11, kind: input, shape index: {}]   ;;  %s4520_s12 = inlined_call_operand.hbm [shape: bf16[32,32], index: 12, kind: input, shape index: {}]   ;;  %s4521_s13 = inlined_call_operand.vmem [shape: f32[31,32], index: 13, kind: input, shape index: {}]   ;;  %s4522_s14 = inlined_call_operand.vmem [shape: bf16[32,32], index: 14, kind: input, shape index: {}]   ;;  %s4523_s15 = inlined_call_operand.hbm [shape: bf16[32,64], index: 15, kind: input, shape index: {}]   ;;  %s4524_s16 = inlined_call_operand.vmem [shape: bf16[64,32], index: 16, kind: input, shape index: {}]   ;;  %s4525_s17 = inlined_call_operand.hbm [shape: f32[2,8,32], index: 17, kind: output, shape index: {}]  }
   0x1   :  { %4556 = sst [smem:[#allocation41_spill]] %s4508_s0 }
   0x2   :  { %4557 = sst [smem:[#allocation42_spill]] %s4509_s1 }
   0x3   :  { %22 = vsyncpa [#allocation3], 0 }
   0x4   :  { %23 = vsyncpa [#allocation6], 0 }
   0x5   :  { %24 = vsyncpa [#allocation9], 0 }
   0x6   :  { %25 = vsyncpa [#allocation12], 0 }
   0x7   :  { %26 = vsyncpa [#allocation15], 0 }
   0x8   :  { %27 = vsyncpa [#allocation4], 0  ;;  %s3416_s24 = smov [#allocation5]   ;;  %s3184_s28 = scalar_lea.hbm %s4512_s4, 32 }
   0x9   :  { %s52_s25 = sshll.u32 %s3416_s24, 4  ;;  %p3185_p0 = scmp.ne.s32.totalorder %s4512_s4, %s3184_s28  ;;  %s53_s25 = int_to_ptr.vmem [resolvable:$true] %s52_s25 }
   0xa   :  { %p3188_p1 = scmp.lt.u32.totalorder %s3184_s28, %s4512_s4 }
   0xc   :  { %p3190_p2 = pnand %p3188_p1, %p3185_p0 }
   0xe   :  { %3193 = shalt.err (!%p3190_p2)
}
   0xf   :  { %s3194_s19 = scalar_lea.vmem %s53_s25, 32  ;;  %p3199_p4 = scmp.lt.s32.totalorder %s53_s25, %s53_s25 }
  0x10   :  { %p3195_p3 = scmp.ne.s32.totalorder %s53_s25, %s3194_s19  ;;  %p3200_p5 = scmp.lt.s32.totalorder %s3194_s19, %s3194_s19 }
  0x12   :  { %p3201_p6 = por %p3200_p5, %p3199_p4 }
  0x14   :  { %p3202_p7 = pnand %p3201_p6, %p3195_p3 }
  0x16   :  { %3205 = shalt.err (!%p3202_p7)
}
  0x17   :  { %55 = dma.hbm_to_vmem [thread:$0]  %s4512_s4, 32, %s53_s25, [#allocation6]  }
  0x18   :  { %s3417_s21 = smov [#allocation8]   ;;  %s3418_s23 = smov [#allocation11]  }
  0x19   :  { %s75_s22 = sshll.u32 %s3417_s21, 4  ;;  %s101_s24 = sshll.u32 %s3418_s23, 4  ;;  %s76_s22 = int_to_ptr.vmem [resolvable:$true] %s75_s22  ;;  %s102_s24 = int_to_ptr.vmem [resolvable:$true] %s101_s24 }
  0x1a   :  { %s3206_s28 = scalar_lea.hbm %s4515_s7, 256 }
  0x1b   :  { %p3207_p8 = scmp.ne.s32.totalorder %s4515_s7, %s3206_s28  ;;  %p3210_p9 = scmp.lt.u32.totalorder %s3206_s28, %s4515_s7 }
  0x1d   :  { %p3212_p10 = pnand %p3210_p9, %p3207_p8 }
  0x1f   :  { %3215 = shalt.err (!%p3212_p10)
}
  0x20   :  { %s3216_s4 = scalar_lea.vmem %s76_s22, 256  ;;  %p3221_p12 = scmp.lt.s32.totalorder %s76_s22, %s76_s22 }
  0x21   :  { %p3217_p11 = scmp.ne.s32.totalorder %s76_s22, %s3216_s4  ;;  %p3222_p13 = scmp.lt.s32.totalorder %s3216_s4, %s3216_s4 }
  0x23   :  { %p3223_p0 = por %p3222_p13, %p3221_p12 }
  0x25   :  { %p3224_p1 = pnand %p3223_p0, %p3217_p11 }
  0x27   :  { %3227 = shalt.err (!%p3224_p1)
}
  0x28   :  { %s3419_s25 = smov 64   ;;  %s3420_s19 = smov 4  }
  0x29   :  { %81 = dma.hbm_to_vmem [thread:$0]  %s4515_s7, 256, %s76_s22, [#allocation9], %s3419_s25, %s3419_s25, %s3420_s19  }
  0x2a   :  { %s3228_s26 = scalar_lea.hbm %s4518_s10, 256 }
  0x2b   :  { %p3229_p2 = scmp.ne.s32.totalorder %s4518_s10, %s3228_s26  ;;  %p3232_p3 = scmp.lt.u32.totalorder %s3228_s26, %s4518_s10 }
  0x2d   :  { %p3234_p4 = pnand %p3232_p3, %p3229_p2 }
  0x2f   :  { %3237 = shalt.err (!%p3234_p4)
}
  0x30   :  { %s3238_s30 = scalar_lea.vmem %s102_s24, 256  ;;  %p3243_p6 = scmp.lt.s32.totalorder %s102_s24, %s102_s24 }
  0x31   :  { %p3239_p5 = scmp.ne.s32.totalorder %s102_s24, %s3238_s30  ;;  %p3244_p7 = scmp.lt.s32.totalorder %s3238_s30, %s3238_s30 }
  0x33   :  { %p3245_p8 = por %p3244_p7, %p3243_p6 }
  0x35   :  { %p3246_p9 = pnand %p3245_p8, %p3239_p5 }
  0x37   :  { %3249 = shalt.err (!%p3246_p9)
}
  0x38   :  { %107 = dma.hbm_to_vmem [thread:$0]  %s4518_s10, 256, %s102_s24, [#allocation12], %s3419_s25, %s3419_s25, %s3420_s19  }
  0x39   :  { %s3421_s18 = smov [#allocation14]   ;;  %s3422_s1 = smov [#allocation2]  }
  0x3a   :  { %s125_s4 = sshll.u32 %s3421_s18, 4  ;;  %s37_s20 = sshll.u32 %s3422_s1, 4  ;;  %s126_s4 = int_to_ptr.vmem [resolvable:$true] %s125_s4  ;;  %s38_s20 = int_to_ptr.vmem [resolvable:$true] %s37_s20 }
  0x3b   :  { %s3250_s26 = scalar_lea.hbm %s4520_s12, 256 }
  0x3c   :  { %p3251_p10 = scmp.ne.s32.totalorder %s4520_s12, %s3250_s26  ;;  %p3254_p11 = scmp.lt.u32.totalorder %s3250_s26, %s4520_s12 }
  0x3e   :  { %p3256_p12 = pnand %p3254_p11, %p3251_p10 }
  0x40   :  { %3259 = shalt.err (!%p3256_p12)
}
  0x41   :  { %s3260_s10 = scalar_lea.vmem %s126_s4, 256  ;;  %p3265_p0 = scmp.lt.s32.totalorder %s126_s4, %s126_s4 }
  0x42   :  { %p3261_p13 = scmp.ne.s32.totalorder %s126_s4, %s3260_s10  ;;  %p3266_p1 = scmp.lt.s32.totalorder %s3260_s10, %s3260_s10 }
  0x44   :  { %p3267_p2 = por %p3266_p1, %p3265_p0 }
  0x46   :  { %p3268_p3 = pnand %p3267_p2, %p3261_p13 }
  0x48   :  { %3271 = shalt.err (!%p3268_p3)
}
  0x49   :  { %131 = dma.hbm_to_vmem [thread:$0]  %s4520_s12, 256, %s126_s4, [#allocation15], %s3419_s25, %s3419_s25, %s3420_s19  }
  0x4a   :  { %s3272_s18 = scalar_lea.hbm %s4510_s2, 32 }
  0x4b   :  { %p3273_p4 = scmp.ne.s32.totalorder %s4510_s2, %s3272_s18  ;;  %p3276_p5 = scmp.lt.u32.totalorder %s3272_s18, %s4510_s2 }
  0x4d   :  { %p3278_p6 = pnand %p3276_p5, %p3273_p4 }
  0x4f   :  { %3281 = shalt.err (!%p3278_p6)
}
  0x50   :  { %s3282_s27 = scalar_lea.vmem %s38_s20, 32  ;;  %p3287_p8 = scmp.lt.s32.totalorder %s38_s20, %s38_s20 }
  0x51   :  { %p3283_p7 = scmp.ne.s32.totalorder %s38_s20, %s3282_s27  ;;  %p3288_p9 = scmp.lt.s32.totalorder %s3282_s27, %s3282_s27 }
  0x53   :  { %p3289_p10 = por %p3288_p9, %p3287_p8 }
  0x55   :  { %p3290_p11 = pnand %p3289_p10, %p3283_p7 }
  0x57   :  { %3293 = shalt.err (!%p3290_p11)
}
  0x58   :  { %s3423_s12 = smov 16   ;;  %s3424_s4 = smov 1  }
  0x59   :  { %43 = dma.hbm_to_vmem [thread:$0]  %s4510_s2, 32, %s38_s20, [#allocation3], %s3423_s12, %s3423_s12, %s3424_s4  }
  0x5a   :  { %s3425_s0 = smov [#allocation7]   ;;  %s3426_s24 = smov [#allocation10]  }
  0x5b   :  { %s61_s10 = sshll.u32 %s3425_s0, 4  ;;  %s87_s30 = sshll.u32 %s3426_s24, 4  ;;  %s62_s10 = int_to_ptr.vmem [resolvable:$true] %s61_s10  ;;  %s88_s30 = int_to_ptr.vmem [resolvable:$true] %s87_s30 }
  0x5c   :  { %s3294_s18 = scalar_lea.hbm %s4513_s5, 256 }
  0x5d   :  { %p3295_p12 = scmp.ne.s32.totalorder %s4513_s5, %s3294_s18  ;;  %p3298_p13 = scmp.lt.u32.totalorder %s3294_s18, %s4513_s5 }
  0x5f   :  { %p3300_p0 = pnand %p3298_p13, %p3295_p12 }
  0x61   :  { %3303 = shalt.err (!%p3300_p0)
}
  0x62   :  { %s3304_s2 = scalar_lea.vmem %s62_s10, 256  ;;  %p3309_p2 = scmp.lt.s32.totalorder %s62_s10, %s62_s10 }
  0x63   :  { %p3305_p1 = scmp.ne.s32.totalorder %s62_s10, %s3304_s2  ;;  %p3310_p3 = scmp.lt.s32.totalorder %s3304_s2, %s3304_s2 }
  0x65   :  { %p3311_p4 = por %p3310_p3, %p3309_p2 }
  0x67   :  { %p3312_p5 = pnand %p3311_p4, %p3305_p1 }
  0x69   :  { %3315 = shalt.err (!%p3312_p5)
}
  0x6a   :  { %67 = dma.hbm_to_vmem [thread:$0]  %s4513_s5, 256, %s62_s10, [#allocation6], %s3419_s25, %s3419_s25, %s3420_s19  }
  0x6b   :  { %s3316_s29 = scalar_lea.hbm %s4516_s8, 256 }
  0x6c   :  { %p3317_p6 = scmp.ne.s32.totalorder %s4516_s8, %s3316_s29  ;;  %p3320_p7 = scmp.lt.u32.totalorder %s3316_s29, %s4516_s8 }
  0x6e   :  { %p3322_p8 = pnand %p3320_p7, %p3317_p6 }
  0x70   :  { %3325 = shalt.err (!%p3322_p8)
}
  0x71   :  { %s3326_s18 = scalar_lea.vmem %s88_s30, 256  ;;  %p3331_p10 = scmp.lt.s32.totalorder %s88_s30, %s88_s30 }
  0x72   :  { %p3327_p9 = scmp.ne.s32.totalorder %s88_s30, %s3326_s18  ;;  %p3332_p11 = scmp.lt.s32.totalorder %s3326_s18, %s3326_s18 }
  0x74   :  { %p3333_p12 = por %p3332_p11, %p3331_p10 }
  0x76   :  { %p3334_p13 = pnand %p3333_p12, %p3327_p9 }
  0x78   :  { %3337 = shalt.err (!%p3334_p13)
}
  0x79   :  { %93 = dma.hbm_to_vmem [thread:$0]  %s4516_s8, 256, %s88_s30, [#allocation9], %s3419_s25, %s3419_s25, %s3420_s19  }
  0x7a   :  { %s3427_s1 = smov [#allocation13]   ;;  %s3428_s23 = smov [#allocation16]  }
  0x7b   :  { %s113_s21 = sshll.u32 %s3427_s1, 4  ;;  %s141_s26 = sshll.u32 %s3428_s23, 4  ;;  %s114_s21 = int_to_ptr.vmem [resolvable:$true] %s113_s21  ;;  %s142_s26 = int_to_ptr.vmem [resolvable:$true] %s141_s26 }
  0x7c   :  { %s3338_s27 = scalar_lea.hbm %s4519_s11, 256 }
  0x7d   :  { %p3339_p0 = scmp.ne.s32.totalorder %s4519_s11, %s3338_s27  ;;  %p3342_p1 = scmp.lt.u32.totalorder %s3338_s27, %s4519_s11 }
  0x7f   :  { %p3344_p2 = pnand %p3342_p1, %p3339_p0 }
  0x81   :  { %3347 = shalt.err (!%p3344_p2)
}
  0x82   :  { %s3348_s8 = scalar_lea.vmem %s114_s21, 256  ;;  %p3353_p4 = scmp.lt.s32.totalorder %s114_s21, %s114_s21 }
  0x83   :  { %p3349_p3 = scmp.ne.s32.totalorder %s114_s21, %s3348_s8  ;;  %p3354_p5 = scmp.lt.s32.totalorder %s3348_s8, %s3348_s8 }
  0x85   :  { %p3355_p6 = por %p3354_p5, %p3353_p4 }
  0x87   :  { %p3356_p7 = pnand %p3355_p6, %p3349_p3 }
  0x89   :  { %3359 = shalt.err (!%p3356_p7)
}
  0x8a   :  { %119 = dma.hbm_to_vmem [thread:$0]  %s4519_s11, 256, %s114_s21, [#allocation12], %s3419_s25, %s3419_s25, %s3420_s19  }
  0x8b   :  { %s3360_s18 = scalar_lea.hbm %s4523_s15, 256 }
  0x8c   :  { %p3361_p8 = scmp.ne.s32.totalorder %s4523_s15, %s3360_s18  ;;  %p3364_p9 = scmp.lt.u32.totalorder %s3360_s18, %s4523_s15 }
  0x8e   :  { %p3366_p10 = pnand %p3364_p9, %p3361_p8 }
  0x90   :  { %3369 = shalt.err (!%p3366_p10)
}
  0x91   :  { %s3370_s2 = scalar_lea.vmem %s142_s26, 256  ;;  %p3375_p12 = scmp.lt.s32.totalorder %s142_s26, %s142_s26 }
  0x92   :  { %p3371_p11 = scmp.ne.s32.totalorder %s142_s26, %s3370_s2  ;;  %p3376_p13 = scmp.lt.s32.totalorder %s3370_s2, %s3370_s2 }
  0x94   :  { %p3377_p0 = por %p3376_p13, %p3375_p12 }
  0x96   :  { %p3378_p1 = pnand %p3377_p0, %p3371_p11 }
  0x98   :  { %3381 = shalt.err (!%p3378_p1)
}
  0x99   :  { %147 = dma.hbm_to_vmem [thread:$0]  %s4523_s15, 256, %s142_s26, [#allocation15], %s3419_s25, %s3419_s25, %s3420_s19  }
  0x9a   :  { %3404 = dma.done.wait [#allocation3], 32  }
  0x9b   :  { %3405 = vsyncadd [#allocation3], 4294967264 }
  0x9c   :  { %3406 = dma.done.wait [#allocation6], 288  }
  0x9d   :  { %3407 = vsyncadd [#allocation6], 4294967008 }
  0x9e   :  { %3408 = dma.done.wait [#allocation9], 512  }
  0x9f   :  { %3409 = vsyncadd [#allocation9], 4294966784 }
  0xa0   :  { %3410 = dma.done.wait [#allocation12], 512  }
  0xa1   :  { %3411 = vsyncadd [#allocation12], 4294966784 }
  0xa2   :  { %3412 = dma.done.wait [#allocation15], 512  }
  0xa3   :  { %3413 = vsyncadd [#allocation15], 4294966784  ;;  %vm197_vm0 = vcmask 261120   ;;  %s4558_s4 = sld [smem:[#allocation41_spill]]  ;;  %v3074_v14 = vld [vmem:[#allocation7] sm:$0xff]   ;;  %v4527_v15 = vmov 0.0  }
  0xa4   :  { %2844 = vmatprep.subr.bf16.mxu0 %v4527_v15  ;;  %2852 = vmatprep.subr.bf16.mxu1 %v4527_v15  ;;  %v3075_v16 = vld [vmem:[#allocation7 + $0x8] sm:$0xff]   ;;  %vm3430_vm1 = vmmov 0   ;;  %v2694_v25 = vld [vmem:[%s4511_s3] ss:$0 sm:$0xff]  ;;  %v2695_v29 = vld [vmem:[%s4511_s3 + $0x1] ss:$0 sm:$0xff] }
  0xa5   :  { %2845 = vmatpush3.bf16.msra.mxu0 %v3074_v14  ;;  %2848 = vmatprep.mubr.msk.bf16.mxu0 %vm3430_vm1, %v4527_v15  ;;  %v3076_v34 = vld [vmem:[%s4514_s6] sm:$0xff]   ;;  %v3077_v35 = vld [vmem:[%s4514_s6 + $0x8] sm:$0xff]   ;;  %v3078_v36 = vld [vmem:[%s4514_s6 + $0x10] sm:$0xff]   ;;  %vm341_vm2 = vcmask 523264   ;;  %s4559_s29 = sld [smem:[#allocation42_spill]]  ;;  %vm700_vm3 = vcmask 1043456  }
  0xa6   :  { %2846 = vmatprep.subr.bf16.mxu0 %v4527_v15  ;;  %2860 = vmatprep.mubr.msk.bf16.mxu1 %vm3430_vm1, %v4527_v15  ;;  %v3079_v37 = vld [vmem:[%s4514_s6 + $0x18] sm:$0xff]   ;;  %v2696_v38 = vld [vmem:[#allocation5] ss:$0 sm:$0xff]  ;;  %s3431_s0 = smov 120   ;;  %vm637_vm4 = vcmask 64512   ;;  %s3432_s24 = smov 112  }
  0xa7   :  { %2853 = vmatpush3.bf16.msra.mxu1 %v3076_v34  ;;  %v2702_v56 = vld [vmem:[%s4511_s3 + $0x2] ss:$0 sm:$0xff]  ;;  %s3433_s7 = smov 104   ;;  %s3435_s22 = smov 8   ;;  %vm1090_vm7 = vcmask 130048   ;;  %vm1092_vm8 = vcmask 195584  }
  0xa8   :  { %2854 = vmatprep.subr.bf16.mxu1 %v4527_v15  ;;  %s3436_s18 = smov 24   ;;  %vm1806_vm9 = vcmask 1046528   ;;  %vm1836_vm10 = vcmask 1045504   ;;  %vm1850_vm11 = vcmask 1044480   ;;  %vm1877_vm12 = vcmask 1042432   ;;  %s3437_s27 = smov [#allocation17]  }
  0xa9   :  { %v3663_v0 = vld [vmem:[%s4558_s4] sm:$0xff]  ;;  %v3668_v1 = vld [vmem:[%s4558_s4 + $0x8] sm:$0xff]  ;;  %2847 = vmatpush3.bf16.msra.mxu0 %v3075_v16  ;;  %vm1891_vm13 = vcmask 1041408   ;;  %vm1905_vm14 = vcmask 1040384   ;;  %s2678_s4 = sshll.u32 %s3437_s27, 4  ;;  %s2679_s4 = int_to_ptr.vmem [resolvable:$true] %s2678_s4 }
  0xaa   :  { %v198_v2 = vsel %vm197_vm0, %v3663_v0, 0.0  ;;  %v201_v3 = vsel %vm197_vm0, %v3668_v1, 0.0  ;;  %2864 = vmatprep.subr.bf16.mxu0 %v4527_v15  ;;  %v3080_v16 = vld [vmem:[%s4517_s9] sm:$0xff]   ;;  %s3382_s28 = scalar_lea.vmem %s2679_s4, 256  ;;  %p3387_p3 = scmp.lt.s32.totalorder %s2679_s4, %s2679_s4 }
  0xab   :  { %199 = vadd.xlane.f32.xlu0 %v198_v2  ;;  %2855 = vmatpush3.bf16.msra.mxu1 %v3077_v35  ;;  %v180_v35 = vld [vmem:[%s4559_s29] sm:$0xff]  ;;  %p3383_p2 = scmp.ne.s32.totalorder %s2679_s4, %s3382_s28  ;;  %p3388_p4 = scmp.lt.s32.totalorder %s3382_s28, %s3382_s28 }
  0xac   :  { %2856 = vmatprep.subr.bf16.mxu1 %v4527_v15 }
  0xad   :  { %p3389_p5 = por %p3388_p4, %p3387_p3 }
  0xaf   :  { %202 = vadd.xlane.f32.xlu0 %v201_v3  ;;  %2857 = vmatpush3.bf16.msra.mxu1 %v3078_v36  ;;  %p3390_p6 = pnand %p3389_p5, %p3383_p2 }
  0xb0   :  { %2858 = vmatprep.subr.bf16.mxu1 %v4527_v15 }
  0xb3   :  { %2859 = vmatpush3.bf16.msra.mxu1 %v3079_v37 }
  0xb4   :  { %2880 = vmatprep.subr.bf16.mxu1 %v4527_v15 }
 0x138   :  { %v200_v4 = vpop.xlane.xlu0 %199 }
 0x139   :  { %v205_v5 = vmul.f32 0.03125, %v200_v4 }
 0x13b   :  { %v207_v6 = vsub.f32 %v3663_v0, %v205_v5 }
 0x13c   :  { %v203_v7 = vpop.xlane.xlu0 %202 }
 0x13d   :  { %v206_v8 = vmul.f32 0.03125, %v203_v7  ;;  %v209_v9 = vmul.f32 %v207_v6, %v207_v6 }
 0x13f   :  { %v208_v10 = vsub.f32 %v3668_v1, %v206_v8  ;;  %v211_v11 = vsel %vm197_vm0, %v209_v9, 0.0 }
 0x140   :  { %212 = vadd.xlane.f32.xlu1 %v211_v11 }
 0x141   :  { %v210_v12 = vmul.f32 %v208_v10, %v208_v10 }
 0x143   :  { %v214_v13 = vsel %vm197_vm0, %v210_v12, 0.0 }
 0x144   :  { %215 = vadd.xlane.f32.xlu1 %v214_v13 }
 0x1cd   :  { %v213_v17 = vpop.xlane.xlu1 %212 }
 0x1ce   :  { %v217_v18 = vmul.f32 0.03125, %v213_v17  ;;  %v3081_v17 = vld [vmem:[#allocation8] sm:$0xff]  }
 0x1d0   :  { %v219_v19 = vadd.f32 1e-05, %v217_v18  ;;  %v3082_v18 = vld [vmem:[%s4517_s9 + $0x8] sm:$0xff]  }
 0x1d1   :  { %v216_v20 = vpop.xlane.xlu1 %215 }
 0x1d2   :  { %3100 = vrsqrt.f32 %v219_v19  ;;  %v218_v21 = vmul.f32 0.03125, %v216_v20  ;;  %v3083_v19 = vld [vmem:[#allocation8 + $0x8] sm:$0xff]  }
 0x1d4   :  { %v220_v22 = vadd.f32 1e-05, %v218_v21 }
 0x1d6   :  { %3102 = vrsqrt.f32 %v220_v22 }
 0x1dc   :  { %v3101_v23 = vpop.eup %3100 }
 0x1dd   :  { %v223_v24 = vmul.f32 %v3101_v23, %v207_v6 }
 0x1df   :  { %v229_v28 = vmul.f32 %v2694_v25, %v223_v24 }
 0x1e0   :  { %v3103_v26 = vpop.eup %3102 }
 0x1e1   :  { %v224_v27 = vmul.f32 %v3103_v26, %v208_v10  ;;  %v235_v31 = vadd.f32 %v2695_v29, %v229_v28 }
 0x1e3   :  { %v230_v30 = vmul.f32 %v2694_v25, %v224_v27  ;;  %v2708_v27 = vld [vmem:[%s4511_s3 + $0x3] ss:$0 sm:$0xff] }
 0x1e5   :  { %v236_v32 = vadd.f32 %v2695_v29, %v230_v30  ;;  %v2709_v30 = vld [vmem:[%s4511_s3 + $0x4] ss:$0 sm:$0xff] }
 0x1e7   :  { %v237_v33 = vpack.c.bf16 %v236_v32, %v235_v31 }
 0x1e9   :  { %2849 = vmatmul.mubr.msk.bf16.vlgmr.msra.gmra.mrb[0].mxu0 %vm197_vm0, %v237_v33 }
 0x1ea   :  { %2868 = vmatprep.mubr.msk.bf16.mxu0 %vm3430_vm1, %v4527_v15  ;;  %2865 = vmatpush3.bf16.msra.mxu0 %v3081_v17 }
 0x1eb   :  { %2866 = vmatprep.subr.bf16.mxu0 %v4527_v15 }
 0x1ee   :  { %2867 = vmatpush3.bf16.msra.mxu0 %v3083_v19 }
 0x1ef   :  { %2872 = vmatprep.subr.bf16.mxu0 %v4527_v15 }
 0x2bc   :  { %v291_v39 = vpop.f32.mrb[0].mxu0 }
 0x2bd   :  { %v292_v40 = vadd.f32 %v2696_v38, %v291_v39  ;;  %v2850_v41 = vpop.f32.mrb[1].mxu0 }
 0x2be   :  { %v294_v42 = vpop.f32.mrb[2].mxu0 }
 0x2bf   :  { %v2700_v43 = vmul.f32 -1.442695, %v292_v40  ;;  %v295_v44 = vadd.f32 %v2696_v38, %v294_v42  ;;  %v2851_v45 = vpop.f32.mrb[3].mxu0  ;;  %v3085_v42 = vld [vmem:[#allocation10 + $0x8] sm:$0xff]  }
 0x2c0   :  { %v2710_v45 = vld [vmem:[%s4511_s3 + $0x5] ss:$0 sm:$0xff] }
 0x2c1   :  { %3104 = vpow2.f32 %v2700_v43  ;;  %v2701_v46 = vmul.f32 -1.442695, %v295_v44  ;;  %v2718_v43 = vld [vmem:[%s4511_s3 + $0x7] ss:$0 sm:$0xff] }
 0x2c3   :  { %3106 = vpow2.f32 %v2701_v46 }
 0x2cb   :  { %v3105_v47 = vpop.eup %3104 }
 0x2cc   :  { %v304_v48 = vadd.f32 1.0, %v3105_v47 }
 0x2cd   :  { %v3107_v49 = vpop.eup %3106 }
 0x2ce   :  { %3108 = vrcp.f32 %v304_v48  ;;  %v305_v50 = vadd.f32 1.0, %v3107_v49 }
 0x2d0   :  { %3110 = vrcp.f32 %v305_v50 }
 0x2d8   :  { %v3109_v51 = vpop.eup %3108 }
 0x2d9   :  { %v310_v53 = vmul.f32 %v3109_v51, %v292_v40  ;;  %v3084_v40 = vld [vmem:[#allocation10] sm:$0xff]  }
 0x2da   :  { %v3111_v52 = vpop.eup %3110 }
 0x2db   :  { %v311_v54 = vmul.f32 %v3111_v52, %v295_v44 }
 0x2dd   :  { %v312_v55 = vpack.c.bf16 %v311_v54, %v310_v53 }
 0x2df   :  { %2861 = vmatmul.mubr.msk.bf16.vlgmr.msra.gmra.mrb[0].mxu1 %vm341_vm2, %v312_v55 }
 0x2e0   :  { %2884 = vmatprep.mubr.msk.bf16.mxu1 %vm3430_vm1, %v4527_v15  ;;  %2881 = vmatpush3.bf16.msra.mxu1 %v3080_v16 }
 0x2e1   :  { %2882 = vmatprep.subr.bf16.mxu1 %v4527_v15 }
 0x2e4   :  { %2883 = vmatpush3.bf16.msra.mxu1 %v3082_v18 }
 0x2e5   :  { %2894 = vmatprep.subr.bf16.mxu1 %v4527_v15 }
 0x3b2   :  { %v379_v57 = vpop.f32.mrb[0].mxu1 }
 0x3b3   :  { %v380_v58 = vadd.f32 %v2702_v56, %v379_v57  ;;  %v2862_v59 = vpop.f32.mrb[1].mxu1 }
 0x3b4   :  { %v382_v60 = vpop.f32.mrb[2].mxu1  ;;  %v2714_v59 = vld [vmem:[%s4511_s3 + $0x6] ss:$0 sm:$0xff] }
 0x3b5   :  { %v386_v61 = vmul.f32 0.5, %v380_v58  ;;  %v383_v62 = vadd.f32 %v2702_v56, %v382_v60  ;;  %v2863_v63 = vpop.f32.mrb[3].mxu1 }
 0x3b7   :  { %v3718_v2 = vadd.f32 %v386_v61, %v3663_v0  ;;  %v387_v3 = vmul.f32 0.5, %v383_v62 }
 0x3b9   :  { %v3721_v4 = vadd.f32 %v387_v3, %v3668_v1  ;;  %v392_v5 = vsel %vm197_vm0, %v3718_v2, 0.0 }
 0x3ba   :  { %393 = vadd.xlane.f32.xlu0 %v392_v5 }
 0x3bb   :  { %v395_v6 = vsel %vm197_vm0, %v3721_v4, 0.0 }
 0x3bc   :  { %396 = vadd.xlane.f32.xlu1 %v395_v6 }
 0x447   :  { %v394_v7 = vpop.xlane.xlu0 %393 }
 0x448   :  { %v398_v8 = vmul.f32 0.03125, %v394_v7 }
 0x449   :  { %v397_v9 = vpop.xlane.xlu1 %396 }
 0x44a   :  { %v400_v10 = vsub.f32 %v3718_v2, %v398_v8  ;;  %v399_v11 = vmul.f32 0.03125, %v397_v9 }
 0x44c   :  { %v401_v0 = vsub.f32 %v3721_v4, %v399_v11  ;;  %v402_v12 = vmul.f32 %v400_v10, %v400_v10 }
 0x44e   :  { %v404_v1 = vsel %vm197_vm0, %v402_v12, 0.0  ;;  %v403_v13 = vmul.f32 %v401_v0, %v401_v0 }
 0x44f   :  { %405 = vadd.xlane.f32.xlu0 %v404_v1 }
 0x450   :  { %v407_v14 = vsel %vm197_vm0, %v403_v13, 0.0 }
 0x451   :  { %408 = vadd.xlane.f32.xlu1 %v407_v14 }
 0x4dc   :  { %v406_v20 = vpop.xlane.xlu0 %405 }
 0x4dd   :  { %v410_v21 = vmul.f32 0.03125, %v406_v20 }
 0x4de   :  { %v409_v22 = vpop.xlane.xlu1 %408 }
 0x4df   :  { %v412_v23 = vadd.f32 1e-05, %v410_v21  ;;  %v411_v24 = vmul.f32 0.03125, %v409_v22 }
 0x4e1   :  { %3112 = vrsqrt.f32 %v412_v23  ;;  %v413_v25 = vadd.f32 1e-05, %v411_v24 }
 0x4e3   :  { %3114 = vrsqrt.f32 %v413_v25 }
 0x4eb   :  { %v3113_v26 = vpop.eup %3112 }
 0x4ec   :  { %v416_v28 = vmul.f32 %v3113_v26, %v400_v10 }
 0x4ed   :  { %v3115_v29 = vpop.eup %3114 }
 0x4ee   :  { %v422_v31 = vmul.f32 %v2708_v27, %v416_v28  ;;  %v417_v32 = vmul.f32 %v3115_v29, %v401_v0  ;;  %v632_v29 = vlaneseq }
 0x4f0   :  { %v423_v33 = vmul.f32 %v2708_v27, %v417_v32  ;;  %v428_v34 = vadd.f32 %v2709_v30, %v422_v31  ;;  %v3829_v31 = vshrl.u32 %v632_v29, 7 }
 0x4f2   :  { %v429_v36 = vadd.f32 %v2709_v30, %v423_v33  ;;  %v430_v38 = vadd.f32 %v428_v34, %v180_v35  ;;  %v626_v30 = vld [vmem:[#allocation2] sm:$0x1]  ;;  %v3832_v32 = vsub.s32 0, %v3829_v31  ;;  %v3434_v33 = vmov -1e+09  }
 0x4f3   :  { %vm627_vm5 = vcmp.gt.f32.partialorder %v626_v30, 0.5 }
 0x4f4   :  { %v433_v37 = vpack.c.bf16 %v429_v36, %v428_v34  ;;  %v431_v39 = vadd.f32 %v429_v36, %v180_v35  ;;  %v628_v34 = vsel %vm627_vm5, 0.0, %v3434_v33 }
 0x4f5   :  { %v635_v35 = vrot.slane %v628_v34, %v3832_v32 }
 0x4f6   :  { %2885 = vmatmul.mubr.msk.bf16.vlgmr.msra.gmra.mrb[4].mxu1 %vm197_vm0, %v433_v37  ;;  %v432_v41 = vpack.c.bf16 %v431_v39, %v430_v38 }
 0x4f7   :  { %2896 = vmatprep.mubr.msk.bf16.mxu1 %vm3430_vm1, %v4527_v15 }
 0x4f8   :  { %2869 = vmatmul.mubr.msk.bf16.vlgmr.msra.gmra.mrb[4].mxu0 %vm197_vm0, %v432_v41 }
 0x4f9   :  { %2873 = vmatpush3.bf16.msra.mxu0 %v3084_v40  ;;  %2876 = vmatprep.mubr.msk.bf16.mxu0 %vm3430_vm1, %v4527_v15 }
 0x4fa   :  { %2874 = vmatprep.subr.bf16.mxu0 %v4527_v15 }
 0x4fd   :  { %2875 = vmatpush3.bf16.msra.mxu0 %v3085_v42 }
 0x4fe   :  { %2888 = vmatprep.subr.bf16.mxu0 %v4527_v15 }
 0x500   :  { %2877 = vmatmul.mubr.msk.bf16.vlgmr.msra.gmra.mrb[8].mxu0 %vm197_vm0, %v432_v41 }
 0x501   :  { %2890 = vmatprep.mubr.msk.bf16.mxu0 %vm3430_vm1, %v4527_v15 }
 0x5c9   :  { %v619_v44 = vpop.f32.mrb[4].mxu1 }
 0x5ca   :  { %v620_v46 = vadd.f32 %v2718_v43, %v619_v44  ;;  %v2886_v47 = vpop.f32.mrb[5].mxu1 }
 0x5cb   :  { %v492_v48 = vpop.f32.mrb[4].mxu0  ;;  %v622_v49 = vpop.f32.mrb[6].mxu1 }
 0x5cc   :  { %v3767_v50 = vpack.c.bf16 %v620_v46, %v620_v46  ;;  %v493_v51 = vadd.f32 %v2710_v45, %v492_v48  ;;  %v3769_v52 = vadd.f32 %v2718_v43, %v622_v49  ;;  %v2870_v53 = vpop.f32.mrb[5].mxu0  ;;  %v2887_v54 = vpop.f32.mrb[7].mxu1 }
 0x5cd   :  { %v495_v55 = vpop.f32.mrb[6].mxu0 }
 0x5ce   :  { %v629_v56 = vpack.c.bf16 %v493_v51, %v493_v51  ;;  %v2871_v57 = vpop.f32.mrb[7].mxu0  ;;  %v702_v58 = vsel %vm700_vm3, %v3767_v50, 0  ;;  %v496_v8 = vadd.f32 %v2710_v45, %v495_v55 }
 0x5cf   :  { %2895 = vmatpush3.bf16.msra.mxu1 %v702_v58 }
 0x5d0   :  { %745 = vrot.lane.b32.xlu1 %v629_v56, %s3431_s0  ;;  %2906 = vmatprep.subr.bf16.mxu1 %v4527_v15  ;;  %v1098_v10 = vpack.c.bf16 %v496_v8, %v496_v8 }
 0x5d3   :  { %v554_v60 = vpop.f32.mrb[8].mxu0 }
 0x5d4   :  { %v555_v61 = vadd.f32 %v2714_v59, %v554_v60  ;;  %v2878_v62 = vpop.f32.mrb[9].mxu0 }
 0x5d5   :  { %v557_v63 = vpop.f32.mrb[10].mxu0 }
 0x5d6   :  { %v630_v3 = vpack.c.bf16 %v555_v61, %v555_v61  ;;  %v2879_v5 = vpop.f32.mrb[11].mxu0  ;;  %v558_v7 = vadd.f32 %v2714_v59, %v557_v63 }
 0x5d8   :  { %859 = vrot.lane.b32.xlu1 %v630_v3, %s3432_s24  ;;  %748 = vrot.lane.b32.xlu0 %v630_v3, %s3431_s0  ;;  %v642_v6 = vsel %vm637_vm4, %v630_v3, 0  ;;  %v1099_v9 = vpack.c.bf16 %v558_v7, %v558_v7 }
 0x5d9   :  { %2889 = vmatpush3.bf16.xpose.msra.mxu0 %v642_v6 }
 0x5da   :  { %2900 = vmatprep.subr.bf16.mxu0 %v4527_v15  ;;  %v1110_v19 = vsel %vm637_vm4, %v1099_v9, 0 }
 0x5dc   :  { %857 = vrot.lane.b32.xlu1 %v629_v56, %s3432_s24  ;;  %969 = vrot.lane.b32.xlu0 %v630_v3, %s3433_s7 }
 0x5e0   :  { %967 = vrot.lane.b32.xlu1 %v629_v56, %s3433_s7  ;;  %2891 = vmatmul.mubr.msk.bf16.vlgmr.msra.gmra.mrb[12].mxu0 %vm637_vm4, %v629_v56  ;;  %v1095_v56 = vld [vmem:[#allocation2 + $0x1] sm:$0x1] }
 0x5e1   :  { %1215 = vrot.lane.b32.xlu0 %v1099_v9, %s3431_s0  ;;  %2902 = vmatprep.mubr.msk.bf16.mxu0 %vm3430_vm1, %v4527_v15  ;;  %vm1096_vm6 = vcmp.gt.f32.partialorder %v1095_v56, 0.5 }
 0x5e2   :  { %v1097_v61 = vsel %vm1096_vm6, 0.0, %v3434_v33 }
 0x5e3   :  { %v1104_v3 = vrot.slane %v1097_v61, %v3832_v32 }
 0x5e4   :  { %1212 = vrot.lane.b32.xlu1 %v1098_v10, %s3431_s0 }
 0x5e5   :  { %1326 = vrot.lane.b32.xlu0 %v1099_v9, %s3432_s24 }
 0x5e8   :  { %1324 = vrot.lane.b32.xlu1 %v1098_v10, %s3432_s24 }
 0x5e9   :  { %1436 = vrot.lane.b32.xlu0 %v1099_v9, %s3433_s7 }
 0x5ec   :  { %1434 = vrot.lane.b32.xlu1 %v1098_v10, %s3433_s7 }
 0x642   :  { %v746_v12 = vpop.permute.xlu1 %745 }
 0x64a   :  { %v749_v11 = vpop.permute.xlu0 %748  ;;  %v860_v1 = vpop.permute.xlu1 %859 }
 0x64b   :  { %v754_v0 = vsel %vm637_vm4, %v749_v11, 0  ;;  %v865_v13 = vsel %vm637_vm4, %v860_v1, 0 }
 0x64c   :  { %2901 = vmatpush3.bf16.xpose.msra.mxu0 %v754_v0 }
 0x64d   :  { %2912 = vmatprep.subr.bf16.mxu0 %v4527_v15 }
 0x64e   :  { %v970_v14 = vpop.permute.xlu0 %969  ;;  %v858_v16 = vpop.permute.xlu1 %857 }
 0x64f   :  { %v975_v17 = vsel %vm637_vm4, %v970_v14, 0 }
 0x652   :  { %v968_v18 = vpop.permute.xlu1 %967 }
 0x653   :  { %2903 = vmatmul.mubr.msk.bf16.vlgmr.msra.gmra.mrb[16].mxu0 %vm637_vm4, %v746_v12  ;;  %v1216_v20 = vpop.permute.xlu0 %1215 }
 0x654   :  { %2913 = vmatpush3.bf16.xpose.msra.mxu0 %v865_v13  ;;  %2914 = vmatprep.mubr.msk.bf16.mxu0 %vm3430_vm1, %v4527_v15  ;;  %v1221_v21 = vsel %vm637_vm4, %v1216_v20, 0 }
 0x655   :  { %2924 = vmatprep.subr.bf16.mxu0 %v4527_v15 }
 0x656   :  { %v1213_v23 = vpop.permute.xlu1 %1212 }
 0x657   :  { %v1327_v22 = vpop.permute.xlu0 %1326 }
 0x658   :  { %v1332_v24 = vsel %vm637_vm4, %v1327_v22, 0 }
 0x65a   :  { %v1325_v26 = vpop.permute.xlu1 %1324 }
 0x65b   :  { %2915 = vmatmul.mubr.msk.bf16.vlgmr.msra.gmra.mrb[20].mxu0 %vm637_vm4, %v858_v16  ;;  %v1437_v25 = vpop.permute.xlu0 %1436 }
 0x65c   :  { %2925 = vmatpush3.bf16.xpose.msra.mxu0 %v975_v17  ;;  %2926 = vmatprep.mubr.msk.bf16.mxu0 %vm3430_vm1, %v4527_v15  ;;  %v1442_v27 = vsel %vm637_vm4, %v1437_v25, 0 }
 0x65d   :  { %2936 = vmatprep.subr.bf16.mxu0 %v4527_v15 }
 0x65e   :  { %v1435_v28 = vpop.permute.xlu1 %1434 }
 0x663   :  { %2927 = vmatmul.mubr.msk.bf16.vlgmr.msra.gmra.mrb[24].mxu0 %vm637_vm4, %v968_v18 }
 0x664   :  { %2937 = vmatpush3.bf16.xpose.msra.mxu0 %v1110_v19  ;;  %2938 = vmatprep.mubr.msk.bf16.mxu0 %vm3430_vm1, %v4527_v15 }
 0x665   :  { %2948 = vmatprep.subr.bf16.mxu0 %v4527_v15 }
 0x66b   :  { %2939 = vmatmul.mubr.msk.bf16.vlgmr.msra.gmra.mrb[28].mxu0 %vm637_vm4, %v1098_v10 }
 0x66c   :  { %2949 = vmatpush3.bf16.xpose.msra.mxu0 %v1221_v21  ;;  %2950 = vmatprep.mubr.msk.bf16.mxu0 %vm3430_vm1, %v4527_v15 }
 0x66d   :  { %2960 = vmatprep.subr.bf16.mxu0 %v4527_v15 }
 0x673   :  { %2951 = vmatmul.mubr.msk.bf16.vlgmr.msra.gmra.mrb[32].mxu0 %vm637_vm4, %v1213_v23 }
 0x674   :  { %2961 = vmatpush3.bf16.xpose.msra.mxu0 %v1332_v24  ;;  %2962 = vmatprep.mubr.msk.bf16.mxu0 %vm3430_vm1, %v4527_v15 }
 0x675   :  { %2972 = vmatprep.subr.bf16.mxu0 %v4527_v15 }
 0x67b   :  { %2963 = vmatmul.mubr.msk.bf16.vlgmr.msra.gmra.mrb[36].mxu0 %vm637_vm4, %v1325_v26 }
 0x67c   :  { %2973 = vmatpush3.bf16.xpose.msra.mxu0 %v1442_v27  ;;  %2974 = vmatprep.mubr.msk.bf16.mxu0 %vm3430_vm1, %v4527_v15 }
 0x67d   :  { %2984 = vmatprep.subr.bf16.mxu0 %v4527_v15 }
 0x683   :  { %2975 = vmatmul.mubr.msk.bf16.vlgmr.msra.gmra.mrb[40].mxu0 %vm637_vm4, %v1435_v28 }
 0x684   :  { %2988 = vmatprep.mubr.msk.bf16.mxu0 %vm3430_vm1, %v4527_v15 }
 0x6b3   :  { %v678_v36 = vpop.f32.mrb[12].mxu0 }
 0x6b4   :  { %v679_v37 = vadd.f32 %v678_v36, %v635_v35  ;;  %v2892_v38 = vpop.f32.mrb[13].mxu0 }
 0x6b5   :  { %v681_v39 = vpop.f32.mrb[14].mxu0 }
 0x6b6   :  { %v2893_v40 = vpop.f32.mrb[15].mxu0  ;;  %v684_v41 = vsel %vm637_vm4, %v679_v37, -inf }
 0x6b7   :  { %685 = vmax.xlane.f32.xlu0 %v684_v41 }
 0x726   :  { %v790_v42 = vpop.f32.mrb[16].mxu0 }
 0x727   :  { %v3836_v43 = vadd.f32 %v790_v42, %v635_v35  ;;  %v2904_v44 = vpop.f32.mrb[17].mxu0 }
 0x728   :  { %v793_v45 = vpop.f32.mrb[18].mxu0 }
 0x729   :  { %v2905_v46 = vpop.f32.mrb[19].mxu0  ;;  %v796_v47 = vsel %vm637_vm4, %v3836_v43, -inf }
 0x72a   :  { %797 = vmax.xlane.f32.xlu1 %v796_v47 }
 0x72e   :  { %v901_v48 = vpop.f32.mrb[20].mxu0 }
 0x72f   :  { %v902_v49 = vadd.f32 %v901_v48, %v635_v35  ;;  %v2916_v51 = vpop.f32.mrb[21].mxu0 }
 0x730   :  { %v904_v53 = vpop.f32.mrb[22].mxu0 }
 0x731   :  { %v2917_v54 = vpop.f32.mrb[23].mxu0  ;;  %v907_v55 = vsel %vm637_vm4, %v902_v49, -inf }
 0x732   :  { %908 = vmax.xlane.f32.xlu0 %v907_v55 }
 0x736   :  { %v1011_v57 = vpop.f32.mrb[24].mxu0 }
 0x737   :  { %v1012_v58 = vadd.f32 %v1011_v57, %v635_v35  ;;  %v2928_v59 = vpop.f32.mrb[25].mxu0 }
 0x738   :  { %v1014_v60 = vpop.f32.mrb[26].mxu0  ;;  %v3877_v59 = vpack.c.bf16 %v3769_v52, %v3769_v52 }
 0x739   :  { %v2929_v62 = vpop.f32.mrb[27].mxu0  ;;  %v1017_v63 = vsel %vm637_vm4, %v1012_v58, -inf }
 0x73a   :  { %1018 = vmax.xlane.f32.xlu0 %v1017_v63 }
 0x73e   :  { %v1146_v5 = vpop.f32.mrb[28].mxu0 }
 0x73f   :  { %v1147_v6 = vadd.f32 %v1146_v5, %v1104_v3  ;;  %v2940_v7 = vpop.f32.mrb[29].mxu0 }
 0x740   :  { %v1149_v8 = vpop.f32.mrb[30].mxu0 }
 0x741   :  { %v2941_v9 = vpop.f32.mrb[31].mxu0  ;;  %v1152_v10 = vsel %vm637_vm4, %v1147_v6, -inf }
 0x742   :  { %1153 = vmax.xlane.f32.xlu0 %v1152_v10 }
 0x744   :  { %v686_v11 = vpop.xlane.xlu0 %685 }
 0x745   :  { %v687_v0 = vsub.f32 %v679_v37, %v686_v11 }
 0x746   :  { %v1257_v12 = vpop.f32.mrb[32].mxu0 }
 0x747   :  { %v688_v1 = vmul.f32 1.442695, %v687_v0  ;;  %v3844_v13 = vadd.f32 %v1257_v12, %v1104_v3  ;;  %v2952_v14 = vpop.f32.mrb[33].mxu0 }
 0x748   :  { %v1260_v16 = vpop.f32.mrb[34].mxu0 }
 0x749   :  { %3116 = vpow2.f32 %v688_v1  ;;  %v2953_v17 = vpop.f32.mrb[35].mxu0  ;;  %v1263_v18 = vsel %vm637_vm4, %v3844_v13, -inf }
 0x74a   :  { %1264 = vmax.xlane.f32.xlu1 %v1263_v18 }
 0x74e   :  { %v1368_v19 = vpop.f32.mrb[36].mxu0 }
 0x74f   :  { %v3848_v20 = vadd.f32 %v1368_v19, %v1104_v3  ;;  %v2964_v21 = vpop.f32.mrb[37].mxu0 }
 0x750   :  { %v1371_v22 = vpop.f32.mrb[38].mxu0 }
 0x751   :  { %v2965_v23 = vpop.f32.mrb[39].mxu0  ;;  %v1374_v24 = vsel %vm637_vm4, %v3848_v20, -inf }
 0x752   :  { %1375 = vmax.xlane.f32.xlu0 %v1374_v24 }
 0x753   :  { %v3117_v25 = vpop.eup %3116 }
 0x754   :  { %v690_v26 = vsel %vm637_vm4, %v3117_v25, 0.0 }
 0x756   :  { %691 = vadd.xlane.f32.xlu0 %v690_v26  ;;  %v1478_v27 = vpop.f32.mrb[40].mxu0 }
 0x757   :  { %v1479_v28 = vadd.f32 %v1478_v27, %v1104_v3  ;;  %v2976_v29 = vpop.f32.mrb[41].mxu0 }
 0x758   :  { %v1481_v30 = vpop.f32.mrb[42].mxu0 }
 0x759   :  { %v2977_v33 = vpop.f32.mrb[43].mxu0  ;;  %v1484_v34 = vsel %vm637_vm4, %v1479_v28, -inf }
 0x75a   :  { %1485 = vmax.xlane.f32.xlu1 %v1484_v34 }
 0x76b   :  { %809 = vrot.lane.b32.xlu1 %v3767_v50, %s3431_s0 }
 0x76c   :  { %919 = vrot.lane.b32.xlu0 %v3767_v50, %s3432_s24 }
 0x7b7   :  { %v798_v35 = vpop.xlane.xlu1 %797 }
 0x7b8   :  { %v799_v36 = vsub.f32 %v3836_v43, %v798_v35  ;;  %v1169_v35 = vsel %vm700_vm3, %v3877_v59, 0 }
 0x7ba   :  { %v800_v37 = vmul.f32 1.442695, %v799_v36 }
 0x7bc   :  { %3118 = vpow2.f32 %v800_v37 }
 0x7bf   :  { %v909_v38 = vpop.xlane.xlu0 %908 }
 0x7c0   :  { %v910_v39 = vsub.f32 %v902_v49, %v909_v38 }
 0x7c2   :  { %v911_v40 = vmul.f32 1.442695, %v910_v39 }
 0x7c4   :  { %3120 = vpow2.f32 %v911_v40 }
 0x7c6   :  { %v3859_v41 = vpop.eup %3118 }
 0x7c7   :  { %v1019_v42 = vpop.xlane.xlu0 %1018  ;;  %v802_v44 = vsel %vm637_vm4, %v3859_v41, 0.0 }
 0x7c8   :  { %v1020_v45 = vsub.f32 %v1012_v58, %v1019_v42  ;;  %803 = vadd.xlane.f32.xlu1 %v802_v44 }
 0x7ca   :  { %v1021_v46 = vmul.f32 1.442695, %v1020_v45 }
 0x7cc   :  { %3122 = vpow2.f32 %v1021_v46 }
 0x7ce   :  { %v3863_v47 = vpop.eup %3120 }
 0x7cf   :  { %v1154_v48 = vpop.xlane.xlu0 %1153  ;;  %v913_v43 = vsel %vm637_vm4, %v3863_v47, 0.0 }
 0x7d0   :  { %v1155_v51 = vsub.f32 %v1147_v6, %v1154_v48  ;;  %914 = vadd.xlane.f32.xlu0 %v913_v43 }
 0x7d2   :  { %v1156_v49 = vmul.f32 1.442695, %v1155_v51 }
 0x7d4   :  { %3124 = vpow2.f32 %v1156_v49 }
 0x7d6   :  { %v3867_v53 = vpop.eup %3122 }
 0x7d7   :  { %v1023_v54 = vsel %vm637_vm4, %v3867_v53, 0.0  ;;  %v1265_v60 = vpop.xlane.xlu1 %1264 }
 0x7d8   :  { %1024 = vadd.xlane.f32.xlu1 %v1023_v54  ;;  %v1266_v8 = vsub.f32 %v3844_v13, %v1265_v60 }
 0x7da   :  { %v1267_v9 = vmul.f32 1.442695, %v1266_v8 }
 0x7de   :  { %v3871_v55 = vpop.eup %3124 }
 0x7df   :  { %v1376_v56 = vpop.xlane.xlu0 %1375  ;;  %v1158_v57 = vsel %vm637_vm4, %v3871_v55, 0.0 }
 0x7e0   :  { %1159 = vadd.xlane.f32.xlu0 %v1158_v57  ;;  %v1377_v52 = vsub.f32 %v3848_v20, %v1376_v56 }
 0x7e2   :  { %v1378_v7 = vmul.f32 1.442695, %v1377_v52 }
 0x7e3   :  { %v692_v58 = vpop.xlane.xlu0 %691 }
 0x7e4   :  { %3126 = vrcp.f32 %v692_v58 }
 0x7e5   :  { %3128 = vpow2.f32 %v1378_v7 }
 0x7e6   :  { %3130 = vpow2.f32 %v1267_v9 }
 0x7e7   :  { %v1486_v61 = vpop.xlane.xlu1 %1485  ;;  %v920_v17 = vpop.permute.xlu0 %919 }
 0x7e8   :  { %v1487_v10 = vsub.f32 %v1479_v28, %v1486_v61  ;;  %v925_v22 = vsel %vm700_vm3, %v920_v17, 0  ;;  %v3086_v17 = vld [vmem:[#allocation11] sm:$0xff]  }
 0x7e9   :  { %1276 = vrot.lane.b32.xlu1 %v3877_v59, %s3431_s0  ;;  %2985 = vmatpush3.bf16.msra.mxu0 %v3086_v17 }
 0x7ea   :  { %v1488_v11 = vmul.f32 1.442695, %v1487_v10  ;;  %2986 = vmatprep.subr.bf16.mxu0 %v4527_v15 }
 0x7eb   :  { %v810_v3 = vpop.permute.xlu1 %809 }
 0x7ec   :  { %v815_v6 = vsel %vm700_vm3, %v810_v3, 0  ;;  %3132 = vpow2.f32 %v1488_v11 }
 0x7ee   :  { %v3127_v62 = vpop.eup %3126 }
 0x7ef   :  { %v694_v63 = vmul.f32 %v3127_v62, %v3117_v25  ;;  %v3890_v0 = vpop.eup %3128 }
 0x7f0   :  { %v1380_v12 = vsel %vm637_vm4, %v3890_v0, 0.0 }
 0x7f1   :  { %v695_v5 = vpack.c.bf16 %v694_v63, %v694_v63 }
 0x7f3   :  { %2897 = vmatmul.mubr.msk.bf16.vlgmr.msra.gmra.mrb[8].mxu1 %vm637_vm4, %v695_v5 }
 0x7f4   :  { %2907 = vmatpush3.bf16.msra.mxu1 %v815_v6  ;;  %2908 = vmatprep.mubr.msk.bf16.mxu1 %vm3430_vm1, %v4527_v15 }
 0x7f5   :  { %2918 = vmatprep.subr.bf16.mxu1 %v4527_v15 }
 0x7f6   :  { %1029 = vrot.lane.b32.xlu0 %v3767_v50, %s3433_s7  ;;  %v3131_v50 = vpop.eup %3130 }
 0x7f7   :  { %v1269_v1 = vsel %vm637_vm4, %v3131_v50, 0.0  ;;  %v3895_v14 = vpop.eup %3132 }
 0x7f8   :  { %v1490_v13 = vsel %vm637_vm4, %v3895_v14, 0.0 }
 0x80d   :  { %1381 = vadd.xlane.f32.xlu1 %v1380_v12 }
 0x815   :  { %1270 = vadd.xlane.f32.xlu0 %v1269_v1 }
 0x819   :  { %1491 = vadd.xlane.f32.xlu0 %v1490_v13 }
 0x81e   :  { %1496 = vrot.lane.b32.xlu1 %v3877_v59, %s3433_s7 }
 0x82f   :  { %1386 = vrot.lane.b32.xlu0 %v3877_v59, %s3432_s24 }
 0x855   :  { %v804_v16 = vpop.xlane.xlu1 %803 }
 0x856   :  { %3134 = vrcp.f32 %v804_v16 }
 0x85d   :  { %v915_v18 = vpop.xlane.xlu0 %914 }
 0x85e   :  { %3136 = vrcp.f32 %v915_v18 }
 0x860   :  { %v3135_v19 = vpop.eup %3134 }
 0x861   :  { %v806_v20 = vmul.f32 %v3135_v19, %v3859_v41 }
 0x863   :  { %v807_v21 = vpack.c.bf16 %v806_v20, %v806_v20 }
 0x865   :  { %2909 = vmatmul.mubr.msk.bf16.vlgmr.msra.gmra.mrb[12].mxu1 %vm637_vm4, %v807_v21  ;;  %v1025_v23 = vpop.xlane.xlu1 %1024 }
 0x866   :  { %2919 = vmatpush3.bf16.msra.mxu1 %v925_v22  ;;  %3138 = vrcp.f32 %v1025_v23  ;;  %2920 = vmatprep.mubr.msk.bf16.mxu1 %vm3430_vm1, %v4527_v15  ;;  %v3087_v23 = vld [vmem:[#allocation11 + $0x8] sm:$0xff]  }
 0x867   :  { %2930 = vmatprep.subr.bf16.mxu1 %v4527_v15  ;;  %2987 = vmatpush3.bf16.msra.mxu0 %v3087_v23 }
 0x868   :  { %v3137_v24 = vpop.eup %3136  ;;  %3000 = vmatprep.subr.bf16.mxu0 %v4527_v15 }
 0x869   :  { %v917_v25 = vmul.f32 %v3137_v24, %v3863_v47  ;;  %v1277_v38 = vpop.permute.xlu1 %1276 }
 0x86a   :  { %v1282_v40 = vsel %vm700_vm3, %v1277_v38, 0 }
 0x86b   :  { %v918_v26 = vpack.c.bf16 %v917_v25, %v917_v25 }
 0x86d   :  { %v1160_v27 = vpop.xlane.xlu0 %1159  ;;  %2921 = vmatmul.mubr.msk.bf16.vlgmr.msra.gmra.mrb[16].mxu1 %vm637_vm4, %v918_v26 }
 0x86e   :  { %3140 = vrcp.f32 %v1160_v27  ;;  %2932 = vmatprep.mubr.msk.bf16.mxu1 %vm3430_vm1, %v4527_v15 }
 0x870   :  { %v3139_v28 = vpop.eup %3138 }
 0x871   :  { %v1027_v29 = vmul.f32 %v3139_v28, %v3867_v53  ;;  %v1030_v30 = vpop.permute.xlu0 %1029 }
 0x872   :  { %v1035_v33 = vsel %vm700_vm3, %v1030_v30, 0 }
 0x873   :  { %2931 = vmatpush3.bf16.msra.mxu1 %v1035_v33  ;;  %v1028_v34 = vpack.c.bf16 %v1027_v29, %v1027_v29 }
 0x874   :  { %2942 = vmatprep.subr.bf16.mxu1 %v4527_v15 }
 0x876   :  { %2933 = vmatmul.mubr.msk.bf16.vlgmr.msra.gmra.mrb[20].mxu1 %vm637_vm4, %v1028_v34 }
 0x877   :  { %2943 = vmatpush3.bf16.msra.mxu1 %v1169_v35  ;;  %2944 = vmatprep.mubr.msk.bf16.mxu1 %vm3430_vm1, %v4527_v15 }
 0x878   :  { %v3141_v36 = vpop.eup %3140  ;;  %2954 = vmatprep.subr.bf16.mxu1 %v4527_v15 }
 0x879   :  { %v1162_v37 = vmul.f32 %v3141_v36, %v3871_v55 }
 0x87b   :  { %v1163_v39 = vpack.c.bf16 %v1162_v37, %v1162_v37 }
 0x87e   :  { %2945 = vmatmul.mubr.msk.bf16.vlgmr.msra.gmra.mrb[24].mxu1 %vm637_vm4, %v1163_v39 }
 0x87f   :  { %2955 = vmatpush3.bf16.msra.mxu1 %v1282_v40  ;;  %2956 = vmatprep.mubr.msk.bf16.mxu1 %vm3430_vm1, %v4527_v15 }
 0x880   :  { %2966 = vmatprep.subr.bf16.mxu1 %v4527_v15 }
 0x89a   :  { %v1382_v42 = vpop.xlane.xlu1 %1381 }
 0x89e   :  { %v1497_v53 = vpop.permute.xlu1 %1496 }
 0x89f   :  { %v1502_v56 = vsel %vm700_vm3, %v1497_v53, 0  ;;  %v2738_v53 = vld [vmem:[%s4511_s3 + $0x8] ss:$0 sm:$0xff] }
 0x8a2   :  { %v1271_v41 = vpop.xlane.xlu0 %1270 }
 0x8a3   :  { %3142 = vrcp.f32 %v1271_v41 }
 0x8a4   :  { %3144 = vrcp.f32 %v1382_v42 }
 0x8a6   :  { %v1492_v44 = vpop.xlane.xlu0 %1491 }
 0x8a7   :  { %3146 = vrcp.f32 %v1492_v44 }
 0x8aa   :  { %v1387_v47 = vpop.permute.xlu0 %1386 }
 0x8ab   :  { %v1392_v51 = vsel %vm700_vm3, %v1387_v47, 0 }
 0x8ad   :  { %v3143_v45 = vpop.eup %3142 }
 0x8ae   :  { %v1273_v46 = vmul.f32 %v3143_v45, %v3131_v50  ;;  %v3145_v43 = vpop.eup %3144 }
 0x8af   :  { %v1384_v49 = vmul.f32 %v3145_v43, %v3890_v0 }
 0x8b0   :  { %v1274_v48 = vpack.c.bf16 %v1273_v46, %v1273_v46 }
 0x8b1   :  { %v1385_v54 = vpack.c.bf16 %v1384_v49, %v1384_v49  ;;  %v3147_v55 = vpop.eup %3146 }
 0x8b2   :  { %2957 = vmatmul.mubr.msk.bf16.vlgmr.msra.gmra.mrb[28].mxu1 %vm637_vm4, %v1274_v48  ;;  %v1494_v57 = vmul.f32 %v3147_v55, %v3895_v14 }
 0x8b3   :  { %2967 = vmatpush3.bf16.msra.mxu1 %v1392_v51  ;;  %2968 = vmatprep.mubr.msk.bf16.mxu1 %vm3430_vm1, %v4527_v15 }
 0x8b4   :  { %2978 = vmatprep.subr.bf16.mxu1 %v4527_v15  ;;  %v1495_v58 = vpack.c.bf16 %v1494_v57, %v1494_v57 }
 0x8ba   :  { %2969 = vmatmul.mubr.msk.bf16.vlgmr.msra.gmra.mrb[32].mxu1 %vm637_vm4, %v1385_v54 }
 0x8bb   :  { %2979 = vmatpush3.bf16.msra.mxu1 %v1502_v56  ;;  %2980 = vmatprep.mubr.msk.bf16.mxu1 %vm3430_vm1, %v4527_v15 }
 0x8bc   :  { %2992 = vmatprep.subr.bf16.mxu1 %v4527_v15 }
 0x8c2   :  { %2981 = vmatmul.mubr.msk.bf16.vlgmr.msra.gmra.mrb[36].mxu1 %vm637_vm4, %v1495_v58 }
 0x8c3   :  { %2996 = vmatprep.mubr.msk.bf16.mxu1 %vm3430_vm1, %v4527_v15 }
 0x8c6   :  { %v738_v59 = vpop.f32.mrb[8].mxu1 }
 0x8c7   :  { %v2898_v60 = vpop.f32.mrb[9].mxu1 }
 0x8c8   :  { %v741_v61 = vpop.f32.mrb[10].mxu1 }
 0x8c9   :  { %v2899_v62 = vpop.f32.mrb[11].mxu1 }
 0x938   :  { %v851_v63 = vpop.f32.mrb[12].mxu1 }
 0x939   :  { %v2910_v3 = vpop.f32.mrb[13].mxu1 }
 0x93a   :  { %v854_v5 = vpop.f32.mrb[14].mxu1 }
 0x93b   :  { %v2911_v6 = vpop.f32.mrb[15].mxu1 }
 0x940   :  { %v961_v52 = vpop.f32.mrb[16].mxu1 }
 0x941   :  { %v2922_v7 = vpop.f32.mrb[17].mxu1 }
 0x942   :  { %v964_v8 = vpop.f32.mrb[18].mxu1 }
 0x943   :  { %v2923_v9 = vpop.f32.mrb[19].mxu1 }
 0x949   :  { %v1071_v10 = vpop.f32.mrb[20].mxu1 }
 0x94a   :  { %v2934_v11 = vpop.f32.mrb[21].mxu1 }
 0x94b   :  { %v1074_v0 = vpop.f32.mrb[22].mxu1  ;;  %v3088_v11 = vld [vmem:[#allocation13] sm:$0xff]  }
 0x94c   :  { %v2935_v12 = vpop.f32.mrb[23].mxu1  ;;  %v3089_v0 = vld [vmem:[#allocation14] sm:$0xff]   ;;  %2993 = vmatpush3.bf16.msra.mxu1 %v3088_v11 }
 0x94d   :  { %v3090_v12 = vld [vmem:[#allocation13 + $0x8] sm:$0xff]   ;;  %2994 = vmatprep.subr.bf16.mxu1 %v4527_v15 }
 0x950   :  { %2995 = vmatpush3.bf16.msra.mxu1 %v3090_v12 }
 0x951   :  { %v1205_v50 = vpop.f32.mrb[24].mxu1  ;;  %3008 = vmatprep.subr.bf16.mxu1 %v4527_v15 }
 0x952   :  { %v2946_v1 = vpop.f32.mrb[25].mxu1 }
 0x953   :  { %v1208_v14 = vpop.f32.mrb[26].mxu1 }
 0x954   :  { %v2947_v13 = vpop.f32.mrb[27].mxu1 }
 0x985   :  { %v1318_v16 = vpop.f32.mrb[28].mxu1 }
 0x986   :  { %v3059_v18 = vpack.i.bf16 %v1318_v16, %v851_v63  ;;  %v2958_v19 = vpop.f32.mrb[29].mxu1 }
 0x987   :  { %v1321_v20 = vpop.f32.mrb[30].mxu1 }
 0x988   :  { %3060 = vrot.lane.b32.xlu1 %v3059_v18, %s3435_s22  ;;  %v2959_v21 = vpop.f32.mrb[31].mxu1 }
 0x989   :  { %v2742_v21 = vld [vmem:[%s4511_s3 + $0x9] ss:$0 sm:$0xff] }
 0x98d   :  { %v1428_v22 = vpop.f32.mrb[32].mxu1 }
 0x98e   :  { %v3064_v24 = vpack.i.bf16 %v1428_v22, %v961_v52  ;;  %v2970_v25 = vpop.f32.mrb[33].mxu1 }
 0x98f   :  { %v1431_v26 = vpop.f32.mrb[34].mxu1  ;;  %v2743_v25 = vld [vmem:[%s4511_s3 + $0xa] ss:$0 sm:$0xff] }
 0x990   :  { %3065 = vrot.lane.b32.xlu1 %v3064_v24, %s3423_s12  ;;  %v2971_v27 = vpop.f32.mrb[35].mxu1 }
 0x995   :  { %v1538_v28 = vpop.f32.mrb[36].mxu1 }
 0x996   :  { %v3069_v29 = vpack.i.bf16 %v1538_v28, %v1071_v10  ;;  %v2982_v30 = vpop.f32.mrb[37].mxu1 }
 0x997   :  { %v1541_v33 = vpop.f32.mrb[38].mxu1  ;;  %v3092_v30 = vld [vmem:[%s4522_s14] sm:$0xff]  }
 0x998   :  { %3070 = vrot.lane.b32.xlu1 %v3069_v29, %s3436_s18  ;;  %v2983_v34 = vpop.f32.mrb[39].mxu1  ;;  %v3093_v33 = vld [vmem:[%s4522_s14 + $0x8] sm:$0xff]  }
 0x9fa   :  { %v3061_v35 = vpop.permute.xlu1 %3060 }
 0x9fb   :  { %v3063_v37 = vunpack.i.h.bf16 %v3061_v35  ;;  %v3062_v38 = vunpack.i.l.bf16 %v3061_v35 }
 0x9fd   :  { %v1556_v42 = vsel %vm637_vm4, %v1205_v50, %v3063_v37  ;;  %v1089_v44 = vsel %vm637_vm4, %v738_v59, %v3062_v38  ;;  %v3091_v50 = vld [vmem:[#allocation14 + $0x8] sm:$0xff]  }
 0xa02   :  { %v3066_v36 = vpop.permute.xlu1 %3065 }
 0xa03   :  { %v3068_v39 = vunpack.i.h.bf16 %v3066_v36  ;;  %v3067_v40 = vunpack.i.l.bf16 %v3066_v36 }
 0xa05   :  { %v1091_v47 = vsel %vm1090_vm7, %v1089_v44, %v3067_v40  ;;  %v1557_v48 = vsel %vm1090_vm7, %v1556_v42, %v3068_v39 }
 0xa0a   :  { %v3071_v41 = vpop.permute.xlu1 %3070 }
 0xa0b   :  { %v3073_v45 = vunpack.i.h.bf16 %v3071_v41  ;;  %v3072_v46 = vunpack.i.l.bf16 %v3071_v41 }
 0xa0d   :  { %v1093_v43 = vsel %vm1092_vm8, %v1091_v47, %v3072_v46  ;;  %v1558_v51 = vsel %vm1092_vm8, %v1557_v48, %v3073_v45  ;;  %v3994_v48 = vsub.s32 1, %v3829_v31 }
 0xa0e   :  { %v1559_v49 = vpack.c.bf16 %v1558_v51, %v1093_v43  ;;  %v3997_v43 = vsub.s32 2, %v3829_v31  ;;  %v4000_v51 = vsub.s32 3, %v3829_v31 }
 0xa10   :  { %2989 = vmatmul.mubr.msk.bf16.vlgmr.msra.gmra.mrb[44].mxu0 %vm197_vm0, %v1559_v49  ;;  %4562 = vst [vmem:[#allocation26_spill] sm:$0xff] %v3997_v43  ;;  %4563 = vst [vmem:[#allocation27_spill] sm:$0xff] %v4000_v51  ;;  %v1799_v49 = vld [vmem:[%s4521_s13] sm:$0xff] }
 0xa11   :  { %3004 = vmatprep.mubr.msk.bf16.mxu0 %vm3430_vm1, %v4527_v15  ;;  %3001 = vmatpush3.bf16.msra.mxu0 %v3089_v0 }
 0xa12   :  { %3002 = vmatprep.subr.bf16.mxu0 %v4527_v15 }
 0xa15   :  { %3003 = vmatpush3.bf16.msra.mxu0 %v3091_v50 }
 0xa16   :  { %3016 = vmatprep.subr.bf16.mxu0 %v4527_v15 }
 0xae3   :  { %v1618_v54 = vpop.f32.mrb[44].mxu0 }
 0xae4   :  { %v1619_v55 = vadd.f32 %v2738_v53, %v1618_v54  ;;  %v2990_v56 = vpop.f32.mrb[45].mxu0  ;;  %v4006_v54 = vsub.s32 4, %v3829_v31 }
 0xae5   :  { %v1621_v57 = vpop.f32.mrb[46].mxu0  ;;  %v4012_v56 = vsub.s32 6, %v3829_v31 }
 0xae6   :  { %v3956_v58 = vadd.f32 %v1619_v55, %v3718_v2  ;;  %v1622_v59 = vadd.f32 %v2738_v53, %v1621_v57  ;;  %v2991_v60 = vpop.f32.mrb[47].mxu0  ;;  %4564 = vst [vmem:[#allocation28_spill] sm:$0xff] %v4006_v54  ;;  %v4009_v55 = vsub.s32 5, %v3829_v31  ;;  %v4015_v57 = vsub.s32 7, %v3829_v31  ;;  %v1800_v31 = vld [vmem:[%s4521_s13 + $0x8] sm:$0xff] }
 0xae7   :  { %4566 = vst [vmem:[#allocation30_spill] sm:$0xff] %v4012_v56  ;;  %v4021_v60 = vrot.slane %v1799_v49, %v3997_v43  ;;  %v4061_v11 = vrot.slane %v1800_v31, %v3832_v32 }
 0xae8   :  { %4560 = vst [vmem:[#allocation24_spill] sm:$0xff] %v3956_v58  ;;  %v3959_v61 = vadd.f32 %v1622_v59, %v3721_v4  ;;  %v1629_v62 = vsel %vm197_vm0, %v3956_v58, 0.0  ;;  %4565 = vst [vmem:[#allocation29_spill] sm:$0xff] %v4009_v55  ;;  %v4018_v59 = vrot.slane %v1799_v49, %v3994_v48 }
 0xae9   :  { %1630 = vadd.xlane.f32.xlu1 %v1629_v62  ;;  %v4024_v62 = vrot.slane %v1799_v49, %v4000_v51 }
 0xaea   :  { %4561 = vst [vmem:[#allocation25_spill] sm:$0xff] %v3959_v61  ;;  %v1632_v63 = vsel %vm197_vm0, %v3959_v61, 0.0 }
 0xaeb   :  { %1633 = vadd.xlane.f32.xlu0 %v1632_v63  ;;  %v4027_v63 = vrot.slane %v1799_v49, %v4006_v54 }
 0xb76   :  { %v1631_v3 = vpop.xlane.xlu1 %1630 }
 0xb77   :  { %v1635_v5 = vmul.f32 0.03125, %v1631_v3  ;;  %v4030_v3 = vrot.slane %v1799_v49, %v4009_v55 }
 0xb78   :  { %v1634_v6 = vpop.xlane.xlu0 %1633 }
 0xb79   :  { %v1637_v52 = vsub.f32 %v3956_v58, %v1635_v5  ;;  %v1636_v2 = vmul.f32 0.03125, %v1634_v6  ;;  %v1801_v5 = vld [vmem:[%s4521_s13 + $0x10] sm:$0xff]  ;;  %v1812_v6 = vrot.slane %v1799_v49, %v3832_v32 }
 0xb7a   :  { %v4064_v0 = vrot.slane %v1801_v5, %v3832_v32 }
 0xb7b   :  { %v1638_v7 = vsub.f32 %v3959_v61, %v1636_v2  ;;  %v1639_v8 = vmul.f32 %v1637_v52, %v1637_v52  ;;  %v4043_v2 = vrot.slane %v1799_v49, %v4015_v57  ;;  %v4066_v50 = vmul.f32 0.0, %v1812_v6 }
 0xb7c   :  { %v4140_v6 = vrot.slane %v1800_v31, %v4015_v57 }
 0xb7d   :  { %v1641_v4 = vsel %vm197_vm0, %v1639_v8, 0.0  ;;  %v1640_v9 = vmul.f32 %v1638_v7, %v1638_v7  ;;  %v4049_v8 = vmul.f32 0.0, %v4021_v60 }
 0xb7e   :  { %1642 = vadd.xlane.f32.xlu0 %v1641_v4  ;;  %v4052_v4 = vmul.f32 0.0, %v4024_v62 }
 0xb7f   :  { %v1644_v10 = vsel %vm197_vm0, %v1640_v9, 0.0  ;;  %v4055_v9 = vmul.f32 0.0, %v4027_v63 }
 0xb80   :  { %v4575_v61 = vrot.slane %v4052_v4, 3 }
 0xb82   :  { %1645 = vadd.xlane.f32.xlu0 %v1644_v10  ;;  %v4058_v10 = vmul.f32 0.0, %v4030_v3 }
 0xc0b   :  { %v1643_v1 = vpop.xlane.xlu0 %1642 }
 0xc0c   :  { %v1647_v14 = vmul.f32 0.03125, %v1643_v1 }
 0xc0e   :  { %v1649_v13 = vadd.f32 1e-05, %v1647_v14  ;;  %v4072_v14 = vmul.f32 0.0, %v4043_v2 }
 0xc0f   :  { %v1646_v16 = vpop.xlane.xlu0 %1645 }
 0xc10   :  { %3148 = vrsqrt.f32 %v1649_v13  ;;  %v1648_v17 = vmul.f32 0.03125, %v1646_v16 }
 0xc12   :  { %v1650_v18 = vadd.f32 1e-05, %v1648_v17  ;;  %v4531_v17 = vrot.slane %v4049_v8, 2 }
 0xc14   :  { %3150 = vrsqrt.f32 %v1650_v18  ;;  %v4079_v18 = vrot.slane %v1800_v31, %v3994_v48 }
 0xc1a   :  { %v3149_v19 = vpop.eup %3148 }
 0xc1b   :  { %v1653_v20 = vmul.f32 %v3149_v19, %v1637_v52  ;;  %v4040_v52 = vrot.slane %v1799_v49, %v4012_v56 }
 0xc1d   :  { %v1659_v23 = vmul.f32 %v2742_v21, %v1653_v20  ;;  %v4069_v1 = vmul.f32 0.0, %v4040_v52 }
 0xc1e   :  { %v3151_v22 = vpop.eup %3150 }
 0xc1f   :  { %v1654_v24 = vmul.f32 %v3151_v22, %v1638_v7  ;;  %v1665_v27 = vadd.f32 %v2743_v25, %v1659_v23  ;;  %v4046_v7 = vmul.f32 0.0, %v4018_v59 }
 0xc21   :  { %v1660_v26 = vmul.f32 %v2742_v21, %v1654_v24  ;;  %v4529_v16 = vrot.slane %v4046_v7, 1 }
 0xc23   :  { %v1666_v28 = vadd.f32 %v2743_v25, %v1660_v26  ;;  %v4088_v25 = vrot.slane %v1801_v5, %v3994_v48  ;;  %v4091_v26 = vrot.slane %v1801_v5, %v3997_v43 }
 0xc25   :  { %v1667_v29 = vpack.c.bf16 %v1666_v28, %v1665_v27 }
 0xc27   :  { %2997 = vmatmul.mubr.msk.bf16.vlgmr.msra.gmra.mrb[40].mxu1 %vm197_vm0, %v1667_v29  ;;  %3005 = vmatmul.mubr.msk.bf16.vlgmr.msra.gmra.mrb[48].mxu0 %vm197_vm0, %v1667_v29  ;;  %v4096_v29 = vrot.slane %v1800_v31, %v3997_v43 }
 0xc28   :  { %3012 = vmatprep.mubr.msk.bf16.mxu1 %vm3430_vm1, %v4527_v15  ;;  %3020 = vmatprep.mubr.msk.bf16.mxu0 %vm3430_vm1, %v4527_v15 }
 0xc29   :  { %3009 = vmatpush3.bf16.msra.mxu1 %v3092_v30  ;;  %v4099_v30 = vrot.slane %v1800_v31, %v4000_v51 }
 0xc2a   :  { %3010 = vmatprep.subr.bf16.mxu1 %v4527_v15 }
 0xc2d   :  { %3011 = vmatpush3.bf16.msra.mxu1 %v3093_v33 }
 0xc2e   :  { %3024 = vmatprep.subr.bf16.mxu1 %v4527_v15 }
 0xcfa   :  { %v1721_v34 = vpop.f32.mrb[40].mxu1  ;;  %v1778_v35 = vpop.f32.mrb[48].mxu0 }
 0xcfb   :  { %v2750_v36 = vmul.f32 -1.442695, %v1778_v35  ;;  %v2998_v37 = vpop.f32.mrb[41].mxu1  ;;  %v3006_v38 = vpop.f32.mrb[49].mxu0  ;;  %v4108_v35 = vrot.slane %v1801_v5, %v4000_v51 }
 0xcfc   :  { %v1724_v39 = vpop.f32.mrb[42].mxu1  ;;  %v1781_v40 = vpop.f32.mrb[50].mxu0 }
 0xcfd   :  { %3152 = vpow2.f32 %v2750_v36  ;;  %v2751_v41 = vmul.f32 -1.442695, %v1781_v40  ;;  %v2999_v42 = vpop.f32.mrb[43].mxu1  ;;  %v3007_v44 = vpop.f32.mrb[51].mxu0  ;;  %v4111_v36 = vrot.slane %v1801_v5, %v4006_v54  ;;  %v4120_v40 = vrot.slane %v1801_v5, %v4009_v55 }
 0xcfe   :  { %v4126_v42 = vrot.slane %v1800_v31, %v4012_v56  ;;  %v4129_v44 = vmul.f32 0.0, %v4088_v25 }
 0xcff   :  { %3154 = vpow2.f32 %v2751_v41  ;;  %v4123_v41 = vrot.slane %v1800_v31, %v4009_v55  ;;  %v4162_v28 = vmul.f32 0.0, %v4120_v40 }
 0xd00   :  { %4569 = vst [vmem:[#allocation33_spill] sm:$0xff] %v4126_v42 }
 0xd01   :  { %4568 = vst [vmem:[#allocation32_spill] sm:$0xff] %v4123_v41  ;;  %4572 = vst [vmem:[#allocation36_spill] sm:$0xff] %v4162_v28 }
 0xd07   :  { %v3153_v45 = vpop.eup %3152 }
 0xd08   :  { %v1791_v46 = vadd.f32 1.0, %v3153_v45  ;;  %v4132_v45 = vmul.f32 0.0, %v4091_v26 }
 0xd09   :  { %v3155_v47 = vpop.eup %3154 }
 0xd0a   :  { %3156 = vrcp.f32 %v1791_v46  ;;  %v1792_v53 = vadd.f32 1.0, %v3155_v47  ;;  %4570 = vst [vmem:[#allocation34_spill] sm:$0xff] %v4132_v45 }
 0xd0c   :  { %3158 = vrcp.f32 %v1792_v53  ;;  %v4137_v53 = vrot.slane %v1801_v5, %v4012_v56 }
 0xd0e   :  { %v4175_v21 = vmul.f32 0.0, %v4137_v53 }
 0xd10   :  { %4573 = vst [vmem:[#allocation37_spill] sm:$0xff] %v4175_v21 }
 0xd14   :  { %v3157_v12 = vpop.eup %3156 }
 0xd15   :  { %v4074_v13 = vmul.f32 %v3157_v12, %v1721_v34  ;;  %v4105_v34 = vrot.slane %v1800_v31, %v4006_v54  ;;  %v4143_v12 = vmul.f32 0.0, %v4108_v35 }
 0xd16   :  { %v3159_v19 = vpop.eup %3158 }
 0xd17   :  { %v1804_v23 = vrot.slane %v4074_v13, 1  ;;  %v4085_v24 = vmul.f32 %v3159_v19, %v1724_v39  ;;  %4567 = vst [vmem:[#allocation31_spill] sm:$0xff] %v4105_v34  ;;  %v4146_v13 = vmul.f32 0.0, %v4111_v36  ;;  %v4149_v19 = vrot.slane %v1801_v5, %v4015_v57 }
 0xd19   :  { %v4102_v33 = vsel %vm1806_vm9, 0.0, %v1804_v23 }
 0xd1a   :  { %v1820_v37 = vmul.f32 %v4018_v59, %v4102_v33  ;;  %v1833_v38 = vmul.f32 %v4021_v60, %v4102_v33  ;;  %v1847_v39 = vmul.f32 %v4024_v62, %v4102_v33  ;;  %v1861_v49 = vmul.f32 %v4027_v63, %v4102_v33 }
 0xd1b   :  { %v1874_v15 = vmul.f32 %v4030_v3, %v4102_v33  ;;  %v1888_v57 = vmul.f32 %v4040_v52, %v4102_v33 }
 0xd1c   :  { %v1824_v46 = vrot.slane %v1820_v37, 1  ;;  %v1838_v47 = vrot.slane %v1833_v38, 2  ;;  %v4154_v37 = vld [vmem:[%s4521_s13 + $0x18] sm:$0x7f]  ;;  %v1852_v31 = vrot.slane %v1847_v39, 3  ;;  %v1865_v39 = vrot.slane %v1861_v49, 4 }
 0xd1d   :  { %4571 = vst [vmem:[#allocation35_spill] sm:$0xff] %v4154_v37  ;;  %v2108_v5 = vrot.slane %v4154_v37, %v3832_v32  ;;  %v2114_v22 = vrot.slane %v4154_v37, %v3994_v48  ;;  %v1879_v49 = vrot.slane %v1874_v15, 5  ;;  %v1893_v55 = vrot.slane %v1888_v57, 6 }
 0xd1e   :  { %v1825_v38 = vsel %vm1806_vm9, %v4529_v16, %v1824_v46  ;;  %v1839_v46 = vsel %vm1836_vm10, %v4531_v17, %v1838_v47  ;;  %v1902_v16 = vmul.f32 %v4043_v2, %v4102_v33  ;;  %v1853_v47 = vsel %vm1850_vm11, %v4575_v61, %v1852_v31 }
 0xd1f   :  { %v1827_v27 = vadd.f32 %v1825_v38, %v4066_v50  ;;  %v4178_v38 = vmul.f32 0.0, %v4149_v19  ;;  %v4576_v32 = vrot.slane %v4055_v9, 4  ;;  %v4199_v58 = vmul.f32 0.0, %v2108_v5 }
 0xd20   :  { %v1907_v54 = vrot.slane %v1902_v16, 7  ;;  %v1921_v57 = vmul.f32 %v4079_v18, %v4102_v33 }
 0xd21   :  { %v1841_v20 = vadd.f32 %v1839_v46, %v1827_v27  ;;  %4574 = vst [vmem:[#allocation38_spill] sm:$0xff] %v4178_v38  ;;  %v4190_v27 = vsel %vm1806_vm9, %v1804_v23, 0.0  ;;  %v2172_v46 = vrot.slane %v4085_v24, 1  ;;  %v1866_v48 = vsel %vm700_vm3, %v4576_v32, %v1865_v39  ;;  %4577 = vst [vmem:[#allocation39_spill] sm:$0xff] %v4199_v58 }
 0xd22   :  { %v4201_v23 = vmul.f32 0.0, %v2114_v22  ;;  %v4579_v24 = vrot.slane %v4058_v10, 5  ;;  %v1922_v16 = vmul.f32 %v4079_v18, %v4190_v27  ;;  %v4580_v22 = vrot.slane %v4069_v1, 6 }
 0xd23   :  { %v1855_v56 = vadd.f32 %v1853_v47, %v1841_v20  ;;  %v4581_v32 = vrot.slane %v4072_v14, 7  ;;  %v1935_v31 = vmul.f32 %v4096_v29, %v4190_v27  ;;  %v1973_v39 = vmul.f32 %v4123_v41, %v4102_v33 }
 0xd24   :  { %4578 = vst [vmem:[#allocation40_spill] sm:$0xff] %v4201_v23  ;;  %v1880_v20 = vsel %vm1877_vm12, %v4579_v24, %v1879_v49  ;;  %v1894_v47 = vsel %vm1891_vm13, %v4580_v22, %v1893_v55  ;;  %v1934_v24 = vmul.f32 %v4096_v29, %v4102_v33  ;;  %v1948_v55 = vmul.f32 %v4099_v30, %v4190_v27 }
 0xd25   :  { %v1868_v61 = vadd.f32 %v1866_v48, %v1855_v56  ;;  %v4213_v56 = vsel %vm1806_vm9, 0.0, %v2172_v46  ;;  %v1908_v48 = vsel %vm1905_vm14, %v4581_v32, %v1907_v54  ;;  %v1960_v22 = vmul.f32 %v4105_v34, %v4102_v33 }
 0xd26   :  { %v1961_v49 = vmul.f32 %v4105_v34, %v4190_v27  ;;  %v1925_v54 = vrot.slane %v1921_v57, 1  ;;  %v1926_v32 = vrot.slane %v1922_v16, 1  ;;  %v1974_v15 = vmul.f32 %v4123_v41, %v4190_v27 }
 0xd27   :  { %v1882_v5 = vadd.f32 %v1880_v20, %v1868_v61  ;;  %v1947_v61 = vmul.f32 %v4099_v30, %v4102_v33  ;;  %v1987_v17 = vmul.f32 %v4126_v42, %v4190_v27  ;;  %v4246_v58 = vsel %vm1806_vm9, %v2172_v46, 0.0 }
 0xd28   :  { %v1938_v57 = vrot.slane %v1934_v24, 2  ;;  %v1939_v16 = vrot.slane %v1935_v31, 2  ;;  %v1952_v43 = vrot.slane %v1948_v55, 3  ;;  %v1964_v37 = vrot.slane %v1960_v22, 4 }
 0xd29   :  { %v1896_v20 = vadd.f32 %v1894_v47, %v1882_v5  ;;  %v1915_v5 = vmul.f32 %v4061_v11, %v4102_v33  ;;  %v1986_v47 = vmul.f32 %v4126_v42, %v4102_v33  ;;  %v1951_v51 = vrot.slane %v1947_v61, 3 }
 0xd2a   :  { %v1965_v23 = vrot.slane %v1961_v49, 4  ;;  %v1978_v21 = vrot.slane %v1974_v15, 5  ;;  %v1999_v41 = vmul.f32 %v4140_v6, %v4102_v33  ;;  %v1991_v42 = vrot.slane %v1987_v17, 6 }
 0xd2b   :  { %v1910_v45 = vadd.f32 %v1908_v48, %v1896_v20  ;;  %v1927_v48 = vsel %vm1806_vm9, %v1925_v54, %v1926_v32  ;;  %v1977_v20 = vrot.slane %v1973_v39, 5  ;;  %v1990_v34 = vrot.slane %v1986_v47, 6 }
 0xd2c   :  { %v2000_v46 = vmul.f32 %v4140_v6, %v4190_v27  ;;  %v1940_v31 = vsel %vm1836_vm10, %v1938_v57, %v1939_v16  ;;  %v2182_v49 = vmul.f32 %v4213_v56, %v4021_v60  ;;  %v2188_v15 = vmul.f32 %v4213_v56, %v4024_v62 }
 0xd2d   :  { %v1916_v38 = vadd.f32 %v1915_v5, %v1910_v45  ;;  %v2176_v45 = vmul.f32 %v4213_v56, %v4018_v59  ;;  %v1953_v33 = vsel %vm1850_vm11, %v1951_v51, %v1952_v43  ;;  %v2012_v17 = vmul.f32 %v4064_v0, %v4190_v27 }
 0xd2e   :  { %v1979_v24 = vsel %vm1877_vm12, %v1977_v20, %v1978_v21  ;;  %v2184_v55 = vrot.slane %v2182_v49, 2  ;;  %v2194_v59 = vmul.f32 %v4213_v56, %v4027_v63  ;;  %v1992_v60 = vsel %vm1891_vm13, %v1990_v34, %v1991_v42 }
 0xd2f   :  { %v1929_v28 = vadd.f32 %v1927_v48, %v1916_v38  ;;  %v1966_v38 = vsel %vm700_vm3, %v1964_v37, %v1965_v23  ;;  %v2178_v61 = vrot.slane %v2176_v45, 1  ;;  %v2003_v54 = vrot.slane %v1999_v41, 7 }
 0xd30   :  { %v2004_v62 = vrot.slane %v2000_v46, 7  ;;  %v2018_v43 = vmul.f32 %v4088_v25, %v4190_v27  ;;  %v4582_v51 = vrot.slane %v4046_v7, 1  ;;  %v2190_v37 = vrot.slane %v2188_v15, 3 }
 0xd31   :  { %v1942_v39 = vadd.f32 %v1940_v31, %v1929_v28  ;;  %v2200_v21 = vmul.f32 %v4213_v56, %v4030_v3  ;;  %v2031_v63 = vmul.f32 %v4091_v26, %v4190_v27  ;;  %v2044_v34 = vmul.f32 %v4108_v35, %v4190_v27 }
 0xd32   :  { %v2179_v28 = vsel %vm1806_vm9, %v4582_v51, %v2178_v61  ;;  %v2057_v42 = vmul.f32 %v4111_v36, %v4190_v27  ;;  %v4583_v7 = vrot.slane %v4049_v8, 2  ;;  %v2196_v5 = vrot.slane %v2194_v59, 4 }
 0xd33   :  { %v1955_v22 = vadd.f32 %v1953_v33, %v1942_v39  ;;  %v2181_v41 = vadd.f32 %v2179_v28, %v4066_v50  ;;  %v2206_v3 = vmul.f32 %v4213_v56, %v4040_v52  ;;  %v2005_v57 = vsel %vm1905_vm14, %v2003_v54, %v2004_v62 }
 0xd34   :  { %v2185_v32 = vsel %vm1836_vm10, %v4583_v7, %v2184_v55  ;;  %v2070_v16 = vmul.f32 %v4120_v40, %v4190_v27  ;;  %v2022_v20 = vrot.slane %v2018_v43, 1  ;;  %v4584_v50 = vrot.slane %v4052_v4, 3 }
 0xd35   :  { %v1968_v23 = vadd.f32 %v1966_v38, %v1955_v22  ;;  %v2187_v48 = vadd.f32 %v2185_v32, %v2181_v41  ;;  %v2202_v31 = vrot.slane %v2200_v21, 5  ;;  %v2212_v8 = vmul.f32 %v4213_v56, %v4043_v2  ;;  %v4588_v21 = vld [vmem:[#allocation34_spill] sm:$0xff] }
 0xd36   :  { %v2191_v46 = vsel %vm1850_vm11, %v4584_v50, %v2190_v37  ;;  %v2035_v49 = vrot.slane %v2031_v63, 2  ;;  %v2048_v15 = vrot.slane %v2044_v34, 3  ;;  %v2061_v39 = vrot.slane %v2057_v42, 4 }
 0xd37   :  { %v1981_v47 = vadd.f32 %v1979_v24, %v1968_v23  ;;  %v2193_v52 = vadd.f32 %v2191_v46, %v2187_v48  ;;  %v2083_v33 = vmul.f32 %v4137_v53, %v4190_v27  ;;  %v4585_v38 = vrot.slane %v4055_v9, 4 }
 0xd38   :  { %v2208_v61 = vrot.slane %v2206_v3, 6  ;;  %v2074_v55 = vrot.slane %v2070_v16, 5  ;;  %v2096_v59 = vmul.f32 %v4149_v19, %v4190_v27  ;;  %v4586_v2 = vrot.slane %v4058_v10, 5 }
 0xd39   :  { %v1994_v45 = vadd.f32 %v1992_v60, %v1981_v47  ;;  %v2197_v24 = vsel %vm700_vm3, %v4585_v38, %v2196_v5  ;;  %v2214_v54 = vrot.slane %v2212_v8, 7  ;;  %v2220_v62 = vmul.f32 %v4213_v56, %v4079_v18  ;;  %v4595_v38 = vld [vmem:[#allocation36_spill] sm:$0xff] }
 0xd3a   :  { %v2199_v22 = vadd.f32 %v2197_v24, %v2193_v52  ;;  %v2203_v60 = vsel %vm1877_vm12, %v4586_v2, %v2202_v31  ;;  %v2221_v9 = vmul.f32 %v4246_v58, %v4079_v18  ;;  %v2229_v28 = vmul.f32 %v4213_v56, %v4096_v29 }
 0xd3b   :  { %v2007_v4 = vadd.f32 %v2005_v57, %v1994_v45  ;;  %v2230_v27 = vmul.f32 %v4246_v58, %v4096_v29  ;;  %v4587_v37 = vrot.slane %v4129_v44, 1  ;;  %v4589_v23 = vrot.slane %v4588_v21, 2  ;;  %v4594_v45 = vld [vmem:[#allocation31_spill] sm:$0xff] }
 0xd3c   :  { %v2205_v51 = vadd.f32 %v2203_v60, %v2199_v22  ;;  %v4590_v34 = vrot.slane %v4143_v12, 3  ;;  %v2238_v29 = vmul.f32 %v4213_v56, %v4099_v30  ;;  %v2239_v32 = vmul.f32 %v4246_v58, %v4099_v30  ;;  %v4597_v22 = vld [vmem:[#allocation32_spill] sm:$0xff] }
 0xd3d   :  { %v2013_v43 = vadd.f32 %v2012_v17, %v2007_v4  ;;  %v2024_v10 = vsel %vm1806_vm9, %v2022_v20, %v4587_v37  ;;  %v2037_v63 = vsel %vm1836_vm10, %v2035_v49, %v4589_v23  ;;  %v4591_v17 = vrot.slane %v4069_v1, 6  ;;  %v4599_v37 = vld [vmem:[#allocation37_spill] sm:$0xff] }
 0xd3e   :  { %v2050_v18 = vsel %vm1850_vm11, %v2048_v15, %v4590_v34  ;;  %v4592_v5 = vrot.slane %v4072_v14, 7  ;;  %v2218_v47 = vmul.f32 %v4213_v56, %v4061_v11  ;;  %v2224_v57 = vrot.slane %v2220_v62, 1 }
 0xd3f   :  { %v2209_v41 = vsel %vm1891_vm13, %v4591_v17, %v2208_v61  ;;  %v2026_v42 = vadd.f32 %v2024_v10, %v2013_v43  ;;  %v2225_v16 = vrot.slane %v2221_v9, 1  ;;  %v2233_v20 = vrot.slane %v2229_v28, 2 }
 0xd40   :  { %v2211_v7 = vadd.f32 %v2209_v41, %v2205_v51  ;;  %v2215_v3 = vsel %vm1905_vm14, %v4592_v5, %v2214_v54  ;;  %v2234_v50 = vrot.slane %v2230_v27, 2  ;;  %v4593_v46 = vrot.slane %v4146_v13, 4  ;;  %v4598_v51 = vld [vmem:[#allocation33_spill] sm:$0xff]  ;;  %v4603_v5 = vld [vmem:[#allocation26_spill] sm:$0xff] }
 0xd41   :  { %v2039_v1 = vadd.f32 %v2037_v63, %v2026_v42  ;;  %v2087_v8 = vrot.slane %v2083_v33, 6  ;;  %v2247_v30 = vmul.f32 %v4213_v56, %v4594_v45  ;;  %v2248_v14 = vmul.f32 %v4246_v58, %v4594_v45  ;;  %v4609_v45 = vld [vmem:[#allocation28_spill] sm:$0xff] }
 0xd42   :  { %v2217_v48 = vadd.f32 %v2215_v3, %v2211_v7  ;;  %v2063_v31 = vsel %vm700_vm3, %v2061_v39, %v4593_v46  ;;  %v2242_v11 = vrot.slane %v2238_v29, 3  ;;  %v2243_v52 = vrot.slane %v2239_v32, 3  ;;  %v4601_v7 = vld [vmem:[#allocation40_spill] sm:$0xff]  ;;  %v4602_v32 = vld [vmem:[#allocation35_spill] sm:$0xff] }
 0xd43   :  { %v2052_v49 = vadd.f32 %v2050_v18, %v2039_v1  ;;  %v4596_v24 = vrot.slane %v4595_v38, 5  ;;  %v2226_v4 = vsel %vm1806_vm9, %v2224_v57, %v2225_v16  ;;  %v2256_v39 = vmul.f32 %v4213_v56, %v4597_v22  ;;  %v4605_v16 = vld [vmem:[#allocation38_spill] sm:$0xff] }
 0xd44   :  { %v2219_v15 = vadd.f32 %v2218_v47, %v2217_v48  ;;  %v2257_v33 = vmul.f32 %v4246_v58, %v4597_v22  ;;  %v2100_v60 = vrot.slane %v2096_v59, 7  ;;  %v2235_v62 = vsel %vm1836_vm10, %v2233_v20, %v2234_v50 }
 0xd45   :  { %v2076_v61 = vsel %vm1877_vm12, %v2074_v55, %v4596_v24  ;;  %v2065_v2 = vadd.f32 %v2063_v31, %v2052_v49  ;;  %v2251_v9 = vrot.slane %v2247_v30, 4  ;;  %v2252_v43 = vrot.slane %v2248_v14, 4  ;;  %v4610_v24 = vld [vmem:[#allocation39_spill] sm:$0xff] }
 0xd46   :  { %v2228_v54 = vadd.f32 %v2226_v4, %v2219_v15  ;;  %v2265_v28 = vmul.f32 %v4213_v56, %v4598_v51  ;;  %v2266_v55 = vmul.f32 %v4246_v58, %v4598_v51  ;;  %v4600_v10 = vrot.slane %v4599_v37, 6 }
 0xd47   :  { %v2078_v27 = vadd.f32 %v2076_v61, %v2065_v2  ;;  %v2244_v34 = vsel %vm1850_vm11, %v2242_v11, %v2243_v52  ;;  %v2260_v59 = vrot.slane %v2256_v39, 5  ;;  %v2261_v18 = vrot.slane %v2257_v33, 5 }
 0xd48   :  { %v2089_v23 = vsel %vm1891_vm13, %v2087_v8, %v4600_v10  ;;  %v2237_v63 = vadd.f32 %v2235_v62, %v2228_v54  ;;  %v2274_v17 = vmul.f32 %v4213_v56, %v4140_v6  ;;  %v2275_v41 = vmul.f32 %v4246_v58, %v4140_v6  ;;  %v4607_v6 = vld [vmem:[#allocation27_spill] sm:$0xff] }
 0xd49   :  { %v2091_v42 = vadd.f32 %v2089_v23, %v2078_v27  ;;  %v2117_v29 = vrot.slane %v4601_v7, 1  ;;  %v4604_v3 = vrot.slane %v4602_v32, %v4603_v5  ;;  %v4606_v1 = vrot.slane %v4605_v16, 7  ;;  %v4613_v5 = vld [vmem:[#allocation30_spill] sm:$0xff] }
 0xd4a   :  { %v2246_v57 = vadd.f32 %v2244_v34, %v2237_v63  ;;  %v2253_v20 = vsel %vm700_vm3, %v2251_v9, %v2252_v43  ;;  %v2269_v50 = vrot.slane %v2265_v28, 6  ;;  %v2270_v56 = vrot.slane %v2266_v55, 6  ;;  %v4611_v28 = vld [vmem:[#allocation29_spill] sm:$0xff] }
 0xd4b   :  { %v4366_v47 = vmul.f32 0.0, %v4604_v3  ;;  %v2102_v48 = vsel %vm1905_vm14, %v2100_v60, %v4606_v1  ;;  %v4608_v31 = vrot.slane %v4602_v32, %v4607_v6  ;;  %v2144_v30 = vrot.slane %v4602_v32, %v4609_v45 }
 0xd4c   :  { %v2104_v46 = vadd.f32 %v2102_v48, %v2091_v42  ;;  %v2255_v14 = vadd.f32 %v2253_v20, %v2246_v57  ;;  %v2262_v49 = vsel %vm1877_vm12, %v2260_v59, %v2261_v18  ;;  %v2278_v15 = vrot.slane %v2274_v17, 7 }
 0xd4d   :  { %v4375_v8 = vmul.f32 0.0, %v4608_v31  ;;  %v2279_v11 = vrot.slane %v2275_v41, 7  ;;  %v2285_v52 = vmul.f32 %v4246_v58, %v4088_v25  ;;  %v2127_v4 = vrot.slane %v4366_v47, 2 }
 0xd4e   :  { %v2110_v61 = vadd.f32 %v4610_v24, %v2104_v46  ;;  %v2264_v22 = vadd.f32 %v2262_v49, %v2255_v14  ;;  %v2271_v39 = vsel %vm1891_vm13, %v2269_v50, %v2270_v56  ;;  %v2291_v33 = vmul.f32 %v4246_v58, %v4091_v26 }
 0xd4f   :  { %v2137_v60 = vrot.slane %v4375_v8, 3  ;;  %v2145_v62 = vmul.f32 0.0, %v2144_v30  ;;  %v2280_v9 = vsel %vm1905_vm14, %v2278_v15, %v2279_v11  ;;  %v2287_v25 = vrot.slane %v2285_v52, 1 }
 0xd50   :  { %v2120_v2 = vadd.f32 %v2117_v29, %v2110_v61  ;;  %v2273_v54 = vadd.f32 %v2271_v39, %v2264_v22  ;;  %v2297_v43 = vmul.f32 %v4246_v58, %v4108_v35  ;;  %v2154_v55 = vrot.slane %v4602_v32, %v4611_v28 }
 0xd51   :  { %v2283_v26 = vmul.f32 %v4246_v58, %v4064_v0  ;;  %v2293_v10 = vrot.slane %v2291_v33, 2  ;;  %v2303_v23 = vmul.f32 %v4246_v58, %v4111_v36  ;;  %v2147_v34 = vrot.slane %v2145_v62, 4 }
 0xd52   :  { %v2130_v51 = vadd.f32 %v2127_v4, %v2120_v2  ;;  %v2282_v27 = vadd.f32 %v2280_v9, %v2273_v54  ;;  %v4612_v59 = vrot.slane %v4129_v44, 1  ;;  %v2299_v17 = vrot.slane %v2297_v43, 3 }
 0xd53   :  { %v2309_v35 = vmul.f32 %v4246_v58, %v4120_v40  ;;  %v2155_v42 = vmul.f32 0.0, %v2154_v55  ;;  %v2164_v3 = vrot.slane %v4602_v32, %v4613_v5  ;;  %v4614_v47 = vrot.slane %v4588_v21, 2 }
 0xd54   :  { %v2284_v63 = vadd.f32 %v2283_v26, %v2282_v27  ;;  %v2288_v18 = vsel %vm1806_vm9, %v2287_v25, %v4612_v59  ;;  %v2140_v41 = vadd.f32 %v2137_v60, %v2130_v51  ;;  %v2305_v57 = vrot.slane %v2303_v23, 4 }
 0xd55   :  { %v2294_v36 = vsel %vm1836_vm10, %v2293_v10, %v4614_v47  ;;  %v2315_v44 = vmul.f32 %v4246_v58, %v4137_v53  ;;  %v4615_v48 = vrot.slane %v4143_v12, 3  ;;  %v2311_v40 = vrot.slane %v2309_v35, 5 }
 0xd56   :  { %v2290_v0 = vadd.f32 %v2288_v18, %v2284_v63  ;;  %v2321_v50 = vmul.f32 %v4246_v58, %v4149_v19  ;;  %v2150_v56 = vadd.f32 %v2147_v34, %v2140_v41  ;;  %v2157_v32 = vrot.slane %v2155_v42, 5  ;;  %v4621_v18 = vld [vmem:[#allocation24_spill] sm:$0xff]  ;;  %v4622_v42 = vld [vmem:[#allocation25_spill] sm:$0xff] }
 0xd57   :  { %v2300_v20 = vsel %vm1850_vm11, %v2299_v17, %v4615_v48  ;;  %v2165_v46 = vmul.f32 0.0, %v2164_v3  ;;  %v4616_v21 = vrot.slane %v4146_v13, 4  ;;  %v2317_v8 = vrot.slane %v2315_v44, 6 }
 0xd58   :  { %v2296_v1 = vadd.f32 %v2294_v36, %v2290_v0  ;;  %v4617_v53 = vrot.slane %v4595_v38, 5  ;;  %v2323_v30 = vrot.slane %v2321_v50, 7  ;;  %v2160_v14 = vadd.f32 %v2157_v32, %v2150_v56  ;;  %v2752_v38 = vld [vmem:[%s4511_s3 + $0xb] ss:$0 sm:$0xff] }
 0xd59   :  { %v2306_v31 = vsel %vm700_vm3, %v2305_v57, %v4616_v21  ;;  %v2167_v49 = vrot.slane %v2165_v46, 6  ;;  %v4618_v58 = vrot.slane %v4599_v37, 6  ;;  %v4619_v52 = vrot.slane %v4605_v16, 7  ;;  %v2753_v37 = vld [vmem:[%s4511_s3 + $0xc] ss:$0 sm:$0xff]  ;;  %v3094_v46 = vld [vmem:[#allocation16] sm:$0xff]  }
 0xd5a   :  { %v2302_v6 = vadd.f32 %v2300_v20, %v2296_v1  ;;  %v2312_v12 = vsel %vm1877_vm12, %v2311_v40, %v4617_v53  ;;  %3017 = vmatpush3.bf16.msra.mxu0 %v3094_v46 }
 0xd5b   :  { %v2318_v19 = vsel %vm1891_vm13, %v2317_v8, %v4618_v58  ;;  %v2324_v13 = vsel %vm1905_vm14, %v2323_v30, %v4619_v52  ;;  %v2170_v61 = vadd.f32 %v2167_v49, %v2160_v14  ;;  %v2759_v14 = vld [vmem:[%s4511_s3 + $0xd] ss:$0 sm:$0xff] }
 0xd5c   :  { %v2308_v45 = vadd.f32 %v2306_v31, %v2302_v6  ;;  %v3095_v6 = vld [vmem:[#allocation16 + $0x8] sm:$0xff]  }
 0xd5d   :  { %v2339_v2 = vmul.f32 %v2752_v38, %v2170_v61 }
 0xd5e   :  { %v2314_v15 = vadd.f32 %v2312_v12, %v2308_v45 }
 0xd5f   :  { %v2346_v62 = vadd.f32 %v2753_v37, %v2339_v2  ;;  %v3099_v2 = vld [vmem:[%s4524_s16 + $0x18] sm:$0xff]  }
 0xd60   :  { %v2320_v11 = vadd.f32 %v2318_v19, %v2314_v15 }
 0xd61   :  { %v2754_v43 = vmul.f32 -1.442695, %v2346_v62 }
 0xd62   :  { %v2326_v22 = vadd.f32 %v2324_v13, %v2320_v11  ;;  %v2760_v11 = vld [vmem:[%s4511_s3 + $0xe] ss:$0 sm:$0xff] }
 0xd63   :  { %3160 = vpow2.f32 %v2754_v43 }
 0xd64   :  { %v2327_v39 = vadd.f32 %v2326_v22, %v4610_v24 }
 0xd66   :  { %v2328_v33 = vadd.f32 %v2327_v39, %v2117_v29  ;;  %v3097_v39 = vld [vmem:[%s4524_s16 + $0x8] sm:$0xff]  }
 0xd68   :  { %v2329_v54 = vadd.f32 %v2328_v33, %v2127_v4  ;;  %v3098_v33 = vld [vmem:[%s4524_s16 + $0x10] sm:$0xff]  }
 0xd6a   :  { %v2330_v16 = vadd.f32 %v2329_v54, %v2137_v60 }
 0xd6c   :  { %v2331_v9 = vadd.f32 %v2330_v16, %v2147_v34  ;;  %v4620_v34 = vmov 0.0  }
 0xd6d   :  { %v3161_v24 = vpop.eup %3160  ;;  %3018 = vmatprep.subr.bf16.mxu0 %v4620_v34 }
 0xd6e   :  { %v2332_v25 = vadd.f32 %v2331_v9, %v2157_v32  ;;  %v2354_v7 = vadd.f32 1.0, %v3161_v24  ;;  %3019 = vmatpush3.bf16.msra.mxu0 %v3095_v6 }
 0xd70   :  { %v2333_v51 = vadd.f32 %v2332_v25, %v2167_v49 }
 0xd72   :  { %v2340_v28 = vmul.f32 %v2752_v38, %v2333_v51  ;;  %v3096_v38 = vld [vmem:[%s4524_s16] sm:$0xff]  }
 0xd74   :  { %v2347_v55 = vadd.f32 %v2753_v37, %v2340_v28  ;;  %v2761_v37 = vld [vmem:[#allocation5 + $0x1] ss:$0 sm:$0xff] }
 0xd76   :  { %v2755_v27 = vmul.f32 -1.442695, %v2347_v55 }
 0xd78   :  { %3162 = vpow2.f32 %v2755_v27 }
 0xd79   :  { %3164 = vrcp.f32 %v2354_v7 }
 0xd82   :  { %v3163_v29 = vpop.eup %3162 }
 0xd83   :  { %v2355_v26 = vadd.f32 1.0, %v3163_v29  ;;  %v3165_v10 = vpop.eup %3164 }
 0xd84   :  { %v2360_v4 = vmul.f32 %v3165_v10, %v2346_v62 }
 0xd85   :  { %3166 = vrcp.f32 %v2355_v26 }
 0xd8f   :  { %v3167_v23 = vpop.eup %3166 }
 0xd90   :  { %v2361_v60 = vmul.f32 %v3167_v23, %v2347_v55 }
 0xd92   :  { %v2362_v63 = vpack.c.bf16 %v2361_v60, %v2360_v4  ;;  %v2767_v60 = vld [vmem:[%s4511_s3 + $0xf] ss:$0 sm:$0xff] }
 0xd94   :  { %3013 = vmatmul.mubr.msk.bf16.vlgmr.msra.gmra.mrb[44].mxu1 %vm197_vm0, %v2362_v63 }
 0xd95   :  { %3032 = vmatprep.mubr.msk.bf16.mxu1 %vm3430_vm1, %v4620_v34  ;;  %3025 = vmatpush3.bf16.msra.mxu1 %v3096_v38 }
 0xd96   :  { %3026 = vmatprep.subr.bf16.mxu1 %v4620_v34 }
 0xd99   :  { %3027 = vmatpush3.bf16.msra.mxu1 %v3097_v39 }
 0xd9a   :  { %3028 = vmatprep.subr.bf16.mxu1 %v4620_v34 }
 0xd9d   :  { %3029 = vmatpush3.bf16.msra.mxu1 %v3098_v33 }
 0xd9e   :  { %3030 = vmatprep.subr.bf16.mxu1 %v4620_v34 }
 0xda1   :  { %3031 = vmatpush3.bf16.msra.mxu1 %v3099_v2 }
 0xe67   :  { %v2416_v59 = vpop.f32.mrb[44].mxu1 }
 0xe68   :  { %v4441_v17 = vadd.f32 %v2416_v59, %v4621_v18  ;;  %v3014_v35 = vpop.f32.mrb[45].mxu1 }
 0xe69   :  { %v2419_v41 = vpop.f32.mrb[46].mxu1 }
 0xe6a   :  { %v4444_v5 = vadd.f32 %v2419_v41, %v4622_v42  ;;  %v3015_v3 = vpop.f32.mrb[47].mxu1  ;;  %v2441_v0 = vsel %vm197_vm0, %v4441_v17, 0.0 }
 0xe6b   :  { %2442 = vadd.xlane.f32.xlu1 %v2441_v0 }
 0xe6c   :  { %v2444_v47 = vsel %vm197_vm0, %v4444_v5, 0.0 }
 0xe6d   :  { %2445 = vadd.xlane.f32.xlu0 %v2444_v47 }
 0xef8   :  { %v2443_v36 = vpop.xlane.xlu1 %2442 }
 0xef9   :  { %v2447_v57 = vmul.f32 0.03125, %v2443_v36 }
 0xefa   :  { %v2446_v44 = vpop.xlane.xlu0 %2445 }
 0xefb   :  { %v2449_v1 = vsub.f32 %v4441_v17, %v2447_v57  ;;  %v2448_v48 = vmul.f32 0.03125, %v2446_v44 }
 0xefd   :  { %v2450_v20 = vsub.f32 %v4444_v5, %v2448_v48  ;;  %v2451_v40 = vmul.f32 %v2449_v1, %v2449_v1 }
 0xeff   :  { %v2453_v50 = vsel %vm197_vm0, %v2451_v40, 0.0  ;;  %v2452_v56 = vmul.f32 %v2450_v20, %v2450_v20 }
 0xf00   :  { %2454 = vadd.xlane.f32.xlu1 %v2453_v50 }
 0xf01   :  { %v2456_v32 = vsel %vm197_vm0, %v2452_v56, 0.0 }
 0xf02   :  { %2457 = vadd.xlane.f32.xlu0 %v2456_v32 }
 0xf8d   :  { %v2455_v21 = vpop.xlane.xlu1 %2454 }
 0xf8e   :  { %v2459_v31 = vmul.f32 0.03125, %v2455_v21 }
 0xf8f   :  { %v2458_v8 = vpop.xlane.xlu0 %2457 }
 0xf90   :  { %v2461_v45 = vadd.f32 1e-05, %v2459_v31  ;;  %v2460_v53 = vmul.f32 0.03125, %v2458_v8 }
 0xf92   :  { %3168 = vrsqrt.f32 %v2461_v45  ;;  %v2462_v12 = vadd.f32 1e-05, %v2460_v53 }
 0xf94   :  { %3170 = vrsqrt.f32 %v2462_v12  ;;  %v2773_v12 = vld [vmem:[%s4511_s3 + $0x10] ss:$0 sm:$0xff] }
 0xf9c   :  { %v3169_v30 = vpop.eup %3168 }
 0xf9d   :  { %v2465_v49 = vmul.f32 %v3169_v30, %v2449_v1 }
 0xf9e   :  { %v3171_v15 = vpop.eup %3170 }
 0xf9f   :  { %v2471_v58 = vmul.f32 %v2759_v14, %v2465_v49  ;;  %v2466_v19 = vmul.f32 %v3171_v15, %v2450_v20  ;;  %v2774_v49 = vld [vmem:[%s4511_s3 + $0x11] ss:$0 sm:$0xff] }
 0xfa1   :  { %v2472_v52 = vmul.f32 %v2759_v14, %v2466_v19  ;;  %v2477_v13 = vadd.f32 %v2760_v11, %v2471_v58 }
 0xfa3   :  { %v2478_v61 = vadd.f32 %v2760_v11, %v2472_v52 }
 0xfa5   :  { %v2479_v22 = vpack.c.bf16 %v2478_v61, %v2477_v13 }
 0xfa7   :  { %3021 = vmatmul.mubr.msk.bf16.vlgmr.msra.gmra.mrb[52].mxu0 %vm197_vm0, %v2479_v22 }
0x107a   :  { %v2533_v54 = vpop.f32.mrb[52].mxu0 }
0x107b   :  { %v2534_v16 = vadd.f32 %v2761_v37, %v2533_v54  ;;  %v3022_v62 = vpop.f32.mrb[53].mxu0 }
0x107c   :  { %v2536_v9 = vpop.f32.mrb[54].mxu0 }
0x107d   :  { %v2765_v25 = vmul.f32 -1.442695, %v2534_v16  ;;  %v2537_v43 = vadd.f32 %v2761_v37, %v2536_v9  ;;  %v3023_v51 = vpop.f32.mrb[55].mxu0 }
0x107f   :  { %3172 = vpow2.f32 %v2765_v25  ;;  %v2766_v28 = vmul.f32 -1.442695, %v2537_v43 }
0x1081   :  { %3174 = vpow2.f32 %v2766_v28 }
0x1089   :  { %v3173_v55 = vpop.eup %3172 }
0x108a   :  { %v2546_v27 = vadd.f32 1.0, %v3173_v55 }
0x108b   :  { %v3175_v24 = vpop.eup %3174 }
0x108c   :  { %3176 = vrcp.f32 %v2546_v27  ;;  %v2547_v7 = vadd.f32 1.0, %v3175_v24 }
0x108e   :  { %3178 = vrcp.f32 %v2547_v7 }
0x1096   :  { %v3177_v29 = vpop.eup %3176 }
0x1097   :  { %v2552_v10 = vmul.f32 %v3177_v29, %v2534_v16 }
0x1098   :  { %v3179_v26 = vpop.eup %3178 }
0x1099   :  { %v2553_v23 = vmul.f32 %v3179_v26, %v2537_v43 }
0x109b   :  { %v2554_v4 = vpack.c.bf16 %v2553_v23, %v2552_v10 }
0x109d   :  { %3033 = vmatmul.mubr.msk.bf16.vlgmr.msra.gmra.mrb[48].mxu1 %vm341_vm2, %v2554_v4 }
0x1170   :  { %v2620_v63 = vpop.f32.mrb[48].mxu1 }
0x1171   :  { %v2621_v34 = vadd.f32 %v2767_v60, %v2620_v63  ;;  %v3034_v59 = vpop.f32.mrb[49].mxu1 }
0x1172   :  { %v2623_v18 = vpop.f32.mrb[50].mxu1 }
0x1173   :  { %v2627_v35 = vmul.f32 0.5, %v2621_v34  ;;  %v2624_v41 = vadd.f32 %v2767_v60, %v2623_v18  ;;  %v3035_v42 = vpop.f32.mrb[51].mxu1 }
0x1175   :  { %v2628_v3 = vmul.f32 0.5, %v2624_v41  ;;  %v2629_v0 = vadd.f32 %v2627_v35, %v4441_v17 }
0x1177   :  { %v2633_v47 = vsel %vm197_vm0, %v2629_v0, 0.0  ;;  %v2630_v36 = vadd.f32 %v2628_v3, %v4444_v5 }
0x1178   :  { %2634 = vadd.xlane.f32.xlu1 %v2633_v47 }
0x1179   :  { %v2636_v57 = vsel %vm197_vm0, %v2630_v36, 0.0 }
0x117a   :  { %2637 = vadd.xlane.f32.xlu0 %v2636_v57 }
0x1205   :  { %v2635_v44 = vpop.xlane.xlu1 %2634 }
0x1206   :  { %v2639_v1 = vmul.f32 0.03125, %v2635_v44 }
0x1207   :  { %v2638_v48 = vpop.xlane.xlu0 %2637 }
0x1208   :  { %v2641_v20 = vsub.f32 %v2629_v0, %v2639_v1  ;;  %v2640_v40 = vmul.f32 0.03125, %v2638_v48 }
0x120a   :  { %v2642_v50 = vsub.f32 %v2630_v36, %v2640_v40  ;;  %v2643_v56 = vmul.f32 %v2641_v20, %v2641_v20 }
0x120c   :  { %v2645_v32 = vsel %vm197_vm0, %v2643_v56, 0.0  ;;  %v2644_v46 = vmul.f32 %v2642_v50, %v2642_v50 }
0x120d   :  { %2646 = vadd.xlane.f32.xlu1 %v2645_v32 }
0x120e   :  { %v2648_v17 = vsel %vm197_vm0, %v2644_v46, 0.0 }
0x120f   :  { %2649 = vadd.xlane.f32.xlu0 %v2648_v17 }
0x129a   :  { %v2647_v6 = vpop.xlane.xlu1 %2646 }
0x129b   :  { %v2651_v5 = vmul.f32 0.03125, %v2647_v6 }
0x129c   :  { %v2650_v21 = vpop.xlane.xlu0 %2649 }
0x129d   :  { %v2653_v31 = vadd.f32 1e-05, %v2651_v5  ;;  %v2652_v8 = vmul.f32 0.03125, %v2650_v21 }
0x129f   :  { %3180 = vrsqrt.f32 %v2653_v31  ;;  %v2654_v45 = vadd.f32 1e-05, %v2652_v8 }
0x12a1   :  { %3182 = vrsqrt.f32 %v2654_v45 }
0x12a9   :  { %v3181_v53 = vpop.eup %3180 }
0x12aa   :  { %v2657_v30 = vmul.f32 %v3181_v53, %v2641_v20 }
0x12ab   :  { %v3183_v14 = vpop.eup %3182 }
0x12ac   :  { %v2663_v15 = vmul.f32 %v2773_v12, %v2657_v30  ;;  %v2658_v58 = vmul.f32 %v3183_v14, %v2642_v50 }
0x12ae   :  { %v2664_v19 = vmul.f32 %v2773_v12, %v2658_v58  ;;  %v2669_v11 = vadd.f32 %v2774_v49, %v2663_v15 }
0x12b0   :  { %v2670_v52 = vadd.f32 %v2774_v49, %v2664_v19  ;;  %2671 = vst.msk [vmem:[#allocation17] sm:$0xff] %vm197_vm0, %v2669_v11 }
0x12b2   :  { %2672 = vst.msk [vmem:[#allocation17 + $0x8] sm:$0xff] %vm197_vm0, %v2670_v52 }
0x12b3   :  { %3393 = shalt.err (!%p3390_p6)
}
0x12b4   :  { %s3394_s15 = scalar_lea.hbm %s4525_s17, 256 }
0x12b5   :  { %p3395_p7 = scmp.ne.s32.totalorder %s4525_s17, %s3394_s15  ;;  %p3398_p8 = scmp.lt.u32.totalorder %s3394_s15, %s4525_s17 }
0x12b7   :  { %p3400_p9 = pnand %p3398_p8, %p3395_p7 }
0x12b9   :  { %3403 = shalt.err (!%p3400_p9)
}
0x12ba   :  { %s3438_s0 = smov 128  }
0x12bb   :  { %2684 = dma.vmem_to_hbm [thread:$0]  %s2679_s4, 256, %s4525_s17, [#allocation4], %s3438_s0, %s3438_s0, %s3435_s22  }
0x12bc   :  { %3414 = dma.done.wait [#allocation4], 256  }
0x12bd   :  { %3415 = vsyncadd [#allocation4], 4294967040 }
0x12be   :  { %2688 = vsyncpa [#allocation3], 1 }
0x12bf   :  { %2689 = vsyncpa [#allocation6], 1 }
0x12c0   :  { %2690 = vsyncpa [#allocation9], 1 }
0x12c1   :  { %2691 = vsyncpa [#allocation12], 1 }
0x12c2   :  { %2692 = vsyncpa [#allocation15], 1 }
0x12c3   :  { %2693 = vsyncpa [#allocation4], 1 }

// kernel: tpu_custom_call.1
= control target key start
LH: loop header
LB: loop body
LE: loop exit
PB: predicated region body
PF: predicated region fallthrough
CT: control target
= control target key end

     0   :  { %s4508_s0 = inlined_call_operand.vmem [shape: f32[2,8,32], index: 0, kind: input, shape index: {}]   ;;  %s4509_s1 = inlined_call_operand.vmem [shape: f32[1,8,32], index: 1, kind: input, shape index: {}]   ;;  %s4510_s2 = inlined_call_operand.hbm [shape: f32[2,1,8], index: 2, kind: input, shape index: {}]   ;;  %s4511_s3 = inlined_call_operand.vmem [shape: f32[18,32], index: 3, kind: input, shape index: {}]   ;;  %s4512_s4 = inlined_call_operand.hbm [shape: f32[2,64], index: 4, kind: input, shape index: {}]   ;;  %s4513_s5 = inlined_call_operand.hbm [shape: bf16[32,64], index: 5, kind: input, shape index: {}]   ;;  %s4514_s6 = inlined_call_operand.vmem [shape: bf16[64,32], index: 6, kind: input, shape index: {}]   ;;  %s4515_s7 = inlined_call_operand.hbm [shape: bf16[32,32], index: 7, kind: input, shape index: {}]   ;;  %s4516_s8 = inlined_call_operand.hbm [shape: bf16[32,32], index: 8, kind: input, shape index: {}]   ;;  %s4517_s9 = inlined_call_operand.vmem [shape: bf16[32,32], index: 9, kind: input, shape index: {}]   ;;  %s4518_s10 = inlined_call_operand.hbm [shape: bf16[32,32], index: 10, kind: input, shape index: {}]   ;;  %s4519_s11 = inlined_call_operand.hbm [shape: bf16[32,32], index: 11, kind: input, shape index: {}]   ;;  %s4520_s12 = inlined_call_operand.hbm [shape: bf16[32,32], index: 12, kind: input, shape index: {}]   ;;  %s4521_s13 = inlined_call_operand.vmem [shape: f32[31,32], index: 13, kind: input, shape index: {}]   ;;  %s4522_s14 = inlined_call_operand.vmem [shape: bf16[32,32], index: 14, kind: input, shape index: {}]   ;;  %s4523_s15 = inlined_call_operand.hbm [shape: bf16[32,64], index: 15, kind: input, shape index: {}]   ;;  %s4524_s16 = inlined_call_operand.vmem [shape: bf16[64,32], index: 16, kind: input, shape index: {}]   ;;  %s4525_s17 = inlined_call_operand.hbm [shape: f32[2,8,32], index: 17, kind: output, shape index: {}]  }
   0x1   :  { %4556 = sst [smem:[#allocation41_spill]] %s4508_s0 }
   0x2   :  { %4557 = sst [smem:[#allocation42_spill]] %s4509_s1 }
   0x3   :  { %22 = vsyncpa [#allocation3], 0 }
   0x4   :  { %23 = vsyncpa [#allocation6], 0 }
   0x5   :  { %24 = vsyncpa [#allocation9], 0 }
   0x6   :  { %25 = vsyncpa [#allocation12], 0 }
   0x7   :  { %26 = vsyncpa [#allocation15], 0 }
   0x8   :  { %27 = vsyncpa [#allocation4], 0  ;;  %s3416_s24 = smov [#allocation5]   ;;  %s3184_s28 = scalar_lea.hbm %s4512_s4, 32 }
   0x9   :  { %s52_s25 = sshll.u32 %s3416_s24, 4  ;;  %p3185_p0 = scmp.ne.s32.totalorder %s4512_s4, %s3184_s28  ;;  %s53_s25 = int_to_ptr.vmem [resolvable:$true] %s52_s25 }
   0xa   :  { %p3188_p1 = scmp.lt.u32.totalorder %s3184_s28, %s4512_s4 }
   0xc   :  { %p3190_p2 = pnand %p3188_p1, %p3185_p0 }
   0xe   :  { %3193 = shalt.err (!%p3190_p2)
}
   0xf   :  { %s3194_s19 = scalar_lea.vmem %s53_s25, 32  ;;  %p3199_p4 = scmp.lt.s32.totalorder %s53_s25, %s53_s25 }
  0x10   :  { %p3195_p3 = scmp.ne.s32.totalorder %s53_s25, %s3194_s19  ;;  %p3200_p5 = scmp.lt.s32.totalorder %s3194_s19, %s3194_s19 }
  0x12   :  { %p3201_p6 = por %p3200_p5, %p3199_p4 }
  0x14   :  { %p3202_p7 = pnand %p3201_p6, %p3195_p3 }
  0x16   :  { %3205 = shalt.err (!%p3202_p7)
}
  0x17   :  { %55 = dma.hbm_to_vmem [thread:$0]  %s4512_s4, 32, %s53_s25, [#allocation6]  }
  0x18   :  { %s3417_s21 = smov [#allocation8]   ;;  %s3418_s23 = smov [#allocation11]  }
  0x19   :  { %s75_s22 = sshll.u32 %s3417_s21, 4  ;;  %s101_s24 = sshll.u32 %s3418_s23, 4  ;;  %s76_s22 = int_to_ptr.vmem [resolvable:$true] %s75_s22  ;;  %s102_s24 = int_to_ptr.vmem [resolvable:$true] %s101_s24 }
  0x1a   :  { %s3206_s28 = scalar_lea.hbm %s4515_s7, 256 }
  0x1b   :  { %p3207_p8 = scmp.ne.s32.totalorder %s4515_s7, %s3206_s28  ;;  %p3210_p9 = scmp.lt.u32.totalorder %s3206_s28, %s4515_s7 }
  0x1d   :  { %p3212_p10 = pnand %p3210_p9, %p3207_p8 }
  0x1f   :  { %3215 = shalt.err (!%p3212_p10)
}
  0x20   :  { %s3216_s4 = scalar_lea.vmem %s76_s22, 256  ;;  %p3221_p12 = scmp.lt.s32.totalorder %s76_s22, %s76_s22 }
  0x21   :  { %p3217_p11 = scmp.ne.s32.totalorder %s76_s22, %s3216_s4  ;;  %p3222_p13 = scmp.lt.s32.totalorder %s3216_s4, %s3216_s4 }
  0x23   :  { %p3223_p0 = por %p3222_p13, %p3221_p12 }
  0x25   :  { %p3224_p1 = pnand %p3223_p0, %p3217_p11 }
  0x27   :  { %3227 = shalt.err (!%p3224_p1)
}
  0x28   :  { %s3419_s25 = smov 64   ;;  %s3420_s19 = smov 4  }
  0x29   :  { %81 = dma.hbm_to_vmem [thread:$0]  %s4515_s7, 256, %s76_s22, [#allocation9], %s3419_s25, %s3419_s25, %s3420_s19  }
  0x2a   :  { %s3228_s26 = scalar_lea.hbm %s4518_s10, 256 }
  0x2b   :  { %p3229_p2 = scmp.ne.s32.totalorder %s4518_s10, %s3228_s26  ;;  %p3232_p3 = scmp.lt.u32.totalorder %s3228_s26, %s4518_s10 }
  0x2d   :  { %p3234_p4 = pnand %p3232_p3, %p3229_p2 }
  0x2f   :  { %3237 = shalt.err (!%p3234_p4)
}
  0x30   :  { %s3238_s30 = scalar_lea.vmem %s102_s24, 256  ;;  %p3243_p6 = scmp.lt.s32.totalorder %s102_s24, %s102_s24 }
  0x31   :  { %p3239_p5 = scmp.ne.s32.totalorder %s102_s24, %s3238_s30  ;;  %p3244_p7 = scmp.lt.s32.totalorder %s3238_s30, %s3238_s30 }
  0x33   :  { %p3245_p8 = por %p3244_p7, %p3243_p6 }
  0x35   :  { %p3246_p9 = pnand %p3245_p8, %p3239_p5 }
  0x37   :  { %3249 = shalt.err (!%p3246_p9)
}
  0x38   :  { %107 = dma.hbm_to_vmem [thread:$0]  %s4518_s10, 256, %s102_s24, [#allocation12], %s3419_s25, %s3419_s25, %s3420_s19  }
  0x39   :  { %s3421_s18 = smov [#allocation14]   ;;  %s3422_s1 = smov [#allocation2]  }
  0x3a   :  { %s125_s4 = sshll.u32 %s3421_s18, 4  ;;  %s37_s20 = sshll.u32 %s3422_s1, 4  ;;  %s126_s4 = int_to_ptr.vmem [resolvable:$true] %s125_s4  ;;  %s38_s20 = int_to_ptr.vmem [resolvable:$true] %s37_s20 }
  0x3b   :  { %s3250_s26 = scalar_lea.hbm %s4520_s12, 256 }
  0x3c   :  { %p3251_p10 = scmp.ne.s32.totalorder %s4520_s12, %s3250_s26  ;;  %p3254_p11 = scmp.lt.u32.totalorder %s3250_s26, %s4520_s12 }
  0x3e   :  { %p3256_p12 = pnand %p3254_p11, %p3251_p10 }
  0x40   :  { %3259 = shalt.err (!%p3256_p12)
}
  0x41   :  { %s3260_s10 = scalar_lea.vmem %s126_s4, 256  ;;  %p3265_p0 = scmp.lt.s32.totalorder %s126_s4, %s126_s4 }
  0x42   :  { %p3261_p13 = scmp.ne.s32.totalorder %s126_s4, %s3260_s10  ;;  %p3266_p1 = scmp.lt.s32.totalorder %s3260_s10, %s3260_s10 }
  0x44   :  { %p3267_p2 = por %p3266_p1, %p3265_p0 }
  0x46   :  { %p3268_p3 = pnand %p3267_p2, %p3261_p13 }
  0x48   :  { %3271 = shalt.err (!%p3268_p3)
}
  0x49   :  { %131 = dma.hbm_to_vmem [thread:$0]  %s4520_s12, 256, %s126_s4, [#allocation15], %s3419_s25, %s3419_s25, %s3420_s19  }
  0x4a   :  { %s3272_s18 = scalar_lea.hbm %s4510_s2, 32 }
  0x4b   :  { %p3273_p4 = scmp.ne.s32.totalorder %s4510_s2, %s3272_s18  ;;  %p3276_p5 = scmp.lt.u32.totalorder %s3272_s18, %s4510_s2 }
  0x4d   :  { %p3278_p6 = pnand %p3276_p5, %p3273_p4 }
  0x4f   :  { %3281 = shalt.err (!%p3278_p6)
}
  0x50   :  { %s3282_s27 = scalar_lea.vmem %s38_s20, 32  ;;  %p3287_p8 = scmp.lt.s32.totalorder %s38_s20, %s38_s20 }
  0x51   :  { %p3283_p7 = scmp.ne.s32.totalorder %s38_s20, %s3282_s27  ;;  %p3288_p9 = scmp.lt.s32.totalorder %s3282_s27, %s3282_s27 }
  0x53   :  { %p3289_p10 = por %p3288_p9, %p3287_p8 }
  0x55   :  { %p3290_p11 = pnand %p3289_p10, %p3283_p7 }
  0x57   :  { %3293 = shalt.err (!%p3290_p11)
}
  0x58   :  { %s3423_s12 = smov 16   ;;  %s3424_s4 = smov 1  }
  0x59   :  { %43 = dma.hbm_to_vmem [thread:$0]  %s4510_s2, 32, %s38_s20, [#allocation3], %s3423_s12, %s3423_s12, %s3424_s4  }
  0x5a   :  { %s3425_s0 = smov [#allocation7]   ;;  %s3426_s24 = smov [#allocation10]  }
  0x5b   :  { %s61_s10 = sshll.u32 %s3425_s0, 4  ;;  %s87_s30 = sshll.u32 %s3426_s24, 4  ;;  %s62_s10 = int_to_ptr.vmem [resolvable:$true] %s61_s10  ;;  %s88_s30 = int_to_ptr.vmem [resolvable:$true] %s87_s30 }
  0x5c   :  { %s3294_s18 = scalar_lea.hbm %s4513_s5, 256 }
  0x5d   :  { %p3295_p12 = scmp.ne.s32.totalorder %s4513_s5, %s3294_s18  ;;  %p3298_p13 = scmp.lt.u32.totalorder %s3294_s18, %s4513_s5 }
  0x5f   :  { %p3300_p0 = pnand %p3298_p13, %p3295_p12 }
  0x61   :  { %3303 = shalt.err (!%p3300_p0)
}
  0x62   :  { %s3304_s2 = scalar_lea.vmem %s62_s10, 256  ;;  %p3309_p2 = scmp.lt.s32.totalorder %s62_s10, %s62_s10 }
  0x63   :  { %p3305_p1 = scmp.ne.s32.totalorder %s62_s10, %s3304_s2  ;;  %p3310_p3 = scmp.lt.s32.totalorder %s3304_s2, %s3304_s2 }
  0x65   :  { %p3311_p4 = por %p3310_p3, %p3309_p2 }
  0x67   :  { %p3312_p5 = pnand %p3311_p4, %p3305_p1 }
  0x69   :  { %3315 = shalt.err (!%p3312_p5)
}
  0x6a   :  { %67 = dma.hbm_to_vmem [thread:$0]  %s4513_s5, 256, %s62_s10, [#allocation6], %s3419_s25, %s3419_s25, %s3420_s19  }
  0x6b   :  { %s3316_s29 = scalar_lea.hbm %s4516_s8, 256 }
  0x6c   :  { %p3317_p6 = scmp.ne.s32.totalorder %s4516_s8, %s3316_s29  ;;  %p3320_p7 = scmp.lt.u32.totalorder %s3316_s29, %s4516_s8 }
  0x6e   :  { %p3322_p8 = pnand %p3320_p7, %p3317_p6 }
  0x70   :  { %3325 = shalt.err (!%p3322_p8)
}
  0x71   :  { %s3326_s18 = scalar_lea.vmem %s88_s30, 256  ;;  %p3331_p10 = scmp.lt.s32.totalorder %s88_s30, %s88_s30 }
  0x72   :  { %p3327_p9 = scmp.ne.s32.totalorder %s88_s30, %s3326_s18  ;;  %p3332_p11 = scmp.lt.s32.totalorder %s3326_s18, %s3326_s18 }
  0x74   :  { %p3333_p12 = por %p3332_p11, %p3331_p10 }
  0x76   :  { %p3334_p13 = pnand %p3333_p12, %p3327_p9 }
  0x78   :  { %3337 = shalt.err (!%p3334_p13)
}
  0x79   :  { %93 = dma.hbm_to_vmem [thread:$0]  %s4516_s8, 256, %s88_s30, [#allocation9], %s3419_s25, %s3419_s25, %s3420_s19  }
  0x7a   :  { %s3427_s1 = smov [#allocation13]   ;;  %s3428_s23 = smov [#allocation16]  }
  0x7b   :  { %s113_s21 = sshll.u32 %s3427_s1, 4  ;;  %s141_s26 = sshll.u32 %s3428_s23, 4  ;;  %s114_s21 = int_to_ptr.vmem [resolvable:$true] %s113_s21  ;;  %s142_s26 = int_to_ptr.vmem [resolvable:$true] %s141_s26 }
  0x7c   :  { %s3338_s27 = scalar_lea.hbm %s4519_s11, 256 }
  0x7d   :  { %p3339_p0 = scmp.ne.s32.totalorder %s4519_s11, %s3338_s27  ;;  %p3342_p1 = scmp.lt.u32.totalorder %s3338_s27, %s4519_s11 }
  0x7f   :  { %p3344_p2 = pnand %p3342_p1, %p3339_p0 }
  0x81   :  { %3347 = shalt.err (!%p3344_p2)
}
  0x82   :  { %s3348_s8 = scalar_lea.vmem %s114_s21, 256  ;;  %p3353_p4 = scmp.lt.s32.totalorder %s114_s21, %s114_s21 }
  0x83   :  { %p3349_p3 = scmp.ne.s32.totalorder %s114_s21, %s3348_s8  ;;  %p3354_p5 = scmp.lt.s32.totalorder %s3348_s8, %s3348_s8 }
  0x85   :  { %p3355_p6 = por %p3354_p5, %p3353_p4 }
  0x87   :  { %p3356_p7 = pnand %p3355_p6, %p3349_p3 }
  0x89   :  { %3359 = shalt.err (!%p3356_p7)
}
  0x8a   :  { %119 = dma.hbm_to_vmem [thread:$0]  %s4519_s11, 256, %s114_s21, [#allocation12], %s3419_s25, %s3419_s25, %s3420_s19  }
  0x8b   :  { %s3360_s18 = scalar_lea.hbm %s4523_s15, 256 }
  0x8c   :  { %p3361_p8 = scmp.ne.s32.totalorder %s4523_s15, %s3360_s18  ;;  %p3364_p9 = scmp.lt.u32.totalorder %s3360_s18, %s4523_s15 }
  0x8e   :  { %p3366_p10 = pnand %p3364_p9, %p3361_p8 }
  0x90   :  { %3369 = shalt.err (!%p3366_p10)
}
  0x91   :  { %s3370_s2 = scalar_lea.vmem %s142_s26, 256  ;;  %p3375_p12 = scmp.lt.s32.totalorder %s142_s26, %s142_s26 }
  0x92   :  { %p3371_p11 = scmp.ne.s32.totalorder %s142_s26, %s3370_s2  ;;  %p3376_p13 = scmp.lt.s32.totalorder %s3370_s2, %s3370_s2 }
  0x94   :  { %p3377_p0 = por %p3376_p13, %p3375_p12 }
  0x96   :  { %p3378_p1 = pnand %p3377_p0, %p3371_p11 }
  0x98   :  { %3381 = shalt.err (!%p3378_p1)
}
  0x99   :  { %147 = dma.hbm_to_vmem [thread:$0]  %s4523_s15, 256, %s142_s26, [#allocation15], %s3419_s25, %s3419_s25, %s3420_s19  }
  0x9a   :  { %3404 = dma.done.wait [#allocation3], 32  }
  0x9b   :  { %3405 = vsyncadd [#allocation3], 4294967264 }
  0x9c   :  { %3406 = dma.done.wait [#allocation6], 288  }
  0x9d   :  { %3407 = vsyncadd [#allocation6], 4294967008 }
  0x9e   :  { %3408 = dma.done.wait [#allocation9], 512  }
  0x9f   :  { %3409 = vsyncadd [#allocation9], 4294966784 }
  0xa0   :  { %3410 = dma.done.wait [#allocation12], 512  }
  0xa1   :  { %3411 = vsyncadd [#allocation12], 4294966784 }
  0xa2   :  { %3412 = dma.done.wait [#allocation15], 512  }
  0xa3   :  { %3413 = vsyncadd [#allocation15], 4294966784  ;;  %vm197_vm0 = vcmask 261120   ;;  %s4558_s4 = sld [smem:[#allocation41_spill]]  ;;  %v3074_v14 = vld [vmem:[#allocation7] sm:$0xff]   ;;  %v4527_v15 = vmov 0.0  }
  0xa4   :  { %2844 = vmatprep.subr.bf16.mxu0 %v4527_v15  ;;  %2852 = vmatprep.subr.bf16.mxu1 %v4527_v15  ;;  %v3075_v16 = vld [vmem:[#allocation7 + $0x8] sm:$0xff]   ;;  %vm3430_vm1 = vmmov 0   ;;  %v2694_v25 = vld [vmem:[%s4511_s3] ss:$0 sm:$0xff]  ;;  %v2695_v29 = vld [vmem:[%s4511_s3 + $0x1] ss:$0 sm:$0xff] }
  0xa5   :  { %2845 = vmatpush3.bf16.msra.mxu0 %v3074_v14  ;;  %2848 = vmatprep.mubr.msk.bf16.mxu0 %vm3430_vm1, %v4527_v15  ;;  %v3076_v34 = vld [vmem:[%s4514_s6] sm:$0xff]   ;;  %v3077_v35 = vld [vmem:[%s4514_s6 + $0x8] sm:$0xff]   ;;  %v3078_v36 = vld [vmem:[%s4514_s6 + $0x10] sm:$0xff]   ;;  %vm341_vm2 = vcmask 523264   ;;  %s4559_s29 = sld [smem:[#allocation42_spill]]  ;;  %vm700_vm3 = vcmask 1043456  }
  0xa6   :  { %2846 = vmatprep.subr.bf16.mxu0 %v4527_v15  ;;  %2860 = vmatprep.mubr.msk.bf16.mxu1 %vm3430_vm1, %v4527_v15  ;;  %v3079_v37 = vld [vmem:[%s4514_s6 + $0x18] sm:$0xff]   ;;  %v2696_v38 = vld [vmem:[#allocation5] ss:$0 sm:$0xff]  ;;  %s3431_s0 = smov 120   ;;  %vm637_vm4 = vcmask 64512   ;;  %s3432_s24 = smov 112  }
  0xa7   :  { %2853 = vmatpush3.bf16.msra.mxu1 %v3076_v34  ;;  %v2702_v56 = vld [vmem:[%s4511_s3 + $0x2] ss:$0 sm:$0xff]  ;;  %s3433_s7 = smov 104   ;;  %s3435_s22 = smov 8   ;;  %vm1090_vm7 = vcmask 130048   ;;  %vm1092_vm8 = vcmask 195584  }
  0xa8   :  { %2854 = vmatprep.subr.bf16.mxu1 %v4527_v15  ;;  %s3436_s18 = smov 24   ;;  %vm1806_vm9 = vcmask 1046528   ;;  %vm1836_vm10 = vcmask 1045504   ;;  %vm1850_vm11 = vcmask 1044480   ;;  %vm1877_vm12 = vcmask 1042432   ;;  %s3437_s27 = smov [#allocation17]  }
  0xa9   :  { %v3663_v0 = vld [vmem:[%s4558_s4] sm:$0xff]  ;;  %v3668_v1 = vld [vmem:[%s4558_s4 + $0x8] sm:$0xff]  ;;  %2847 = vmatpush3.bf16.msra.mxu0 %v3075_v16  ;;  %vm1891_vm13 = vcmask 1041408   ;;  %vm1905_vm14 = vcmask 1040384   ;;  %s2678_s4 = sshll.u32 %s3437_s27, 4  ;;  %s2679_s4 = int_to_ptr.vmem [resolvable:$true] %s2678_s4 }
  0xaa   :  { %v198_v2 = vsel %vm197_vm0, %v3663_v0, 0.0  ;;  %v201_v3 = vsel %vm197_vm0, %v3668_v1, 0.0  ;;  %2864 = vmatprep.subr.bf16.mxu0 %v4527_v15  ;;  %v3080_v16 = vld [vmem:[%s4517_s9] sm:$0xff]   ;;  %s3382_s28 = scalar_lea.vmem %s2679_s4, 256  ;;  %p3387_p3 = scmp.lt.s32.totalorder %s2679_s4, %s2679_s4 }
  0xab   :  { %199 = vadd.xlane.f32.xlu0 %v198_v2  ;;  %2855 = vmatpush3.bf16.msra.mxu1 %v3077_v35  ;;  %v180_v35 = vld [vmem:[%s4559_s29] sm:$0xff]  ;;  %p3383_p2 = scmp.ne.s32.totalorder %s2679_s4, %s3382_s28  ;;  %p3388_p4 = scmp.lt.s32.totalorder %s3382_s28, %s3382_s28 }
  0xac   :  { %2856 = vmatprep.subr.bf16.mxu1 %v4527_v15 }
  0xad   :  { %p3389_p5 = por %p3388_p4, %p3387_p3 }
  0xaf   :  { %202 = vadd.xlane.f32.xlu0 %v201_v3  ;;  %2857 = vmatpush3.bf16.msra.mxu1 %v3078_v36  ;;  %p3390_p6 = pnand %p3389_p5, %p3383_p2 }
  0xb0   :  { %2858 = vmatprep.subr.bf16.mxu1 %v4527_v15 }
  0xb3   :  { %2859 = vmatpush3.bf16.msra.mxu1 %v3079_v37 }
  0xb4   :  { %2880 = vmatprep.subr.bf16.mxu1 %v4527_v15 }
 0x138   :  { %v200_v4 = vpop.xlane.xlu0 %199 }
 0x139   :  { %v205_v5 = vmul.f32 0.03125, %v200_v4 }
 0x13b   :  { %v207_v6 = vsub.f32 %v3663_v0, %v205_v5 }
 0x13c   :  { %v203_v7 = vpop.xlane.xlu0 %202 }
 0x13d   :  { %v206_v8 = vmul.f32 0.03125, %v203_v7  ;;  %v209_v9 = vmul.f32 %v207_v6, %v207_v6 }
 0x13f   :  { %v208_v10 = vsub.f32 %v3668_v1, %v206_v8  ;;  %v211_v11 = vsel %vm197_vm0, %v209_v9, 0.0 }
 0x140   :  { %212 = vadd.xlane.f32.xlu1 %v211_v11 }
 0x141   :  { %v210_v12 = vmul.f32 %v208_v10, %v208_v10 }
 0x143   :  { %v214_v13 = vsel %vm197_vm0, %v210_v12, 0.0 }
 0x144   :  { %215 = vadd.xlane.f32.xlu1 %v214_v13 }
 0x1cd   :  { %v213_v17 = vpop.xlane.xlu1 %212 }
 0x1ce   :  { %v217_v18 = vmul.f32 0.03125, %v213_v17  ;;  %v3081_v17 = vld [vmem:[#allocation8] sm:$0xff]  }
 0x1d0   :  { %v219_v19 = vadd.f32 1e-05, %v217_v18  ;;  %v3082_v18 = vld [vmem:[%s4517_s9 + $0x8] sm:$0xff]  }
 0x1d1   :  { %v216_v20 = vpop.xlane.xlu1 %215 }
 0x1d2   :  { %3100 = vrsqrt.f32 %v219_v19  ;;  %v218_v21 = vmul.f32 0.03125, %v216_v20  ;;  %v3083_v19 = vld [vmem:[#allocation8 + $0x8] sm:$0xff]  }
 0x1d4   :  { %v220_v22 = vadd.f32 1e-05, %v218_v21 }
 0x1d6   :  { %3102 = vrsqrt.f32 %v220_v22 }
 0x1dc   :  { %v3101_v23 = vpop.eup %3100 }
 0x1dd   :  { %v223_v24 = vmul.f32 %v3101_v23, %v207_v6 }
 0x1df   :  { %v229_v28 = vmul.f32 %v2694_v25, %v223_v24 }
 0x1e0   :  { %v3103_v26 = vpop.eup %3102 }
 0x1e1   :  { %v224_v27 = vmul.f32 %v3103_v26, %v208_v10  ;;  %v235_v31 = vadd.f32 %v2695_v29, %v229_v28 }
 0x1e3   :  { %v230_v30 = vmul.f32 %v2694_v25, %v224_v27  ;;  %v2708_v27 = vld [vmem:[%s4511_s3 + $0x3] ss:$0 sm:$0xff] }
 0x1e5   :  { %v236_v32 = vadd.f32 %v2695_v29, %v230_v30  ;;  %v2709_v30 = vld [vmem:[%s4511_s3 + $0x4] ss:$0 sm:$0xff] }
 0x1e7   :  { %v237_v33 = vpack.c.bf16 %v236_v32, %v235_v31 }
 0x1e9   :  { %2849 = vmatmul.mubr.msk.bf16.vlgmr.msra.gmra.mrb[0].mxu0 %vm197_vm0, %v237_v33 }
 0x1ea   :  { %2868 = vmatprep.mubr.msk.bf16.mxu0 %vm3430_vm1, %v4527_v15  ;;  %2865 = vmatpush3.bf16.msra.mxu0 %v3081_v17 }
 0x1eb   :  { %2866 = vmatprep.subr.bf16.mxu0 %v4527_v15 }
 0x1ee   :  { %2867 = vmatpush3.bf16.msra.mxu0 %v3083_v19 }
 0x1ef   :  { %2872 = vmatprep.subr.bf16.mxu0 %v4527_v15 }
 0x2bc   :  { %v291_v39 = vpop.f32.mrb[0].mxu0 }
 0x2bd   :  { %v292_v40 = vadd.f32 %v2696_v38, %v291_v39  ;;  %v2850_v41 = vpop.f32.mrb[1].mxu0 }
 0x2be   :  { %v294_v42 = vpop.f32.mrb[2].mxu0 }
 0x2bf   :  { %v2700_v43 = vmul.f32 -1.442695, %v292_v40  ;;  %v295_v44 = vadd.f32 %v2696_v38, %v294_v42  ;;  %v2851_v45 = vpop.f32.mrb[3].mxu0  ;;  %v3085_v42 = vld [vmem:[#allocation10 + $0x8] sm:$0xff]  }
 0x2c0   :  { %v2710_v45 = vld [vmem:[%s4511_s3 + $0x5] ss:$0 sm:$0xff] }
 0x2c1   :  { %3104 = vpow2.f32 %v2700_v43  ;;  %v2701_v46 = vmul.f32 -1.442695, %v295_v44  ;;  %v2718_v43 = vld [vmem:[%s4511_s3 + $0x7] ss:$0 sm:$0xff] }
 0x2c3   :  { %3106 = vpow2.f32 %v2701_v46 }
 0x2cb   :  { %v3105_v47 = vpop.eup %3104 }
 0x2cc   :  { %v304_v48 = vadd.f32 1.0, %v3105_v47 }
 0x2cd   :  { %v3107_v49 = vpop.eup %3106 }
 0x2ce   :  { %3108 = vrcp.f32 %v304_v48  ;;  %v305_v50 = vadd.f32 1.0, %v3107_v49 }
 0x2d0   :  { %3110 = vrcp.f32 %v305_v50 }
 0x2d8   :  { %v3109_v51 = vpop.eup %3108 }
 0x2d9   :  { %v310_v53 = vmul.f32 %v3109_v51, %v292_v40  ;;  %v3084_v40 = vld [vmem:[#allocation10] sm:$0xff]  }
 0x2da   :  { %v3111_v52 = vpop.eup %3110 }
 0x2db   :  { %v311_v54 = vmul.f32 %v3111_v52, %v295_v44 }
 0x2dd   :  { %v312_v55 = vpack.c.bf16 %v311_v54, %v310_v53 }
 0x2df   :  { %2861 = vmatmul.mubr.msk.bf16.vlgmr.msra.gmra.mrb[0].mxu1 %vm341_vm2, %v312_v55 }
 0x2e0   :  { %2884 = vmatprep.mubr.msk.bf16.mxu1 %vm3430_vm1, %v4527_v15  ;;  %2881 = vmatpush3.bf16.msra.mxu1 %v3080_v16 }
 0x2e1   :  { %2882 = vmatprep.subr.bf16.mxu1 %v4527_v15 }
 0x2e4   :  { %2883 = vmatpush3.bf16.msra.mxu1 %v3082_v18 }
 0x2e5   :  { %2894 = vmatprep.subr.bf16.mxu1 %v4527_v15 }
 0x3b2   :  { %v379_v57 = vpop.f32.mrb[0].mxu1 }
 0x3b3   :  { %v380_v58 = vadd.f32 %v2702_v56, %v379_v57  ;;  %v2862_v59 = vpop.f32.mrb[1].mxu1 }
 0x3b4   :  { %v382_v60 = vpop.f32.mrb[2].mxu1  ;;  %v2714_v59 = vld [vmem:[%s4511_s3 + $0x6] ss:$0 sm:$0xff] }
 0x3b5   :  { %v386_v61 = vmul.f32 0.5, %v380_v58  ;;  %v383_v62 = vadd.f32 %v2702_v56, %v382_v60  ;;  %v2863_v63 = vpop.f32.mrb[3].mxu1 }
 0x3b7   :  { %v3718_v2 = vadd.f32 %v386_v61, %v3663_v0  ;;  %v387_v3 = vmul.f32 0.5, %v383_v62 }
 0x3b9   :  { %v3721_v4 = vadd.f32 %v387_v3, %v3668_v1  ;;  %v392_v5 = vsel %vm197_vm0, %v3718_v2, 0.0 }
 0x3ba   :  { %393 = vadd.xlane.f32.xlu0 %v392_v5 }
 0x3bb   :  { %v395_v6 = vsel %vm197_vm0, %v3721_v4, 0.0 }
 0x3bc   :  { %396 = vadd.xlane.f32.xlu1 %v395_v6 }
 0x447   :  { %v394_v7 = vpop.xlane.xlu0 %393 }
 0x448   :  { %v398_v8 = vmul.f32 0.03125, %v394_v7 }
 0x449   :  { %v397_v9 = vpop.xlane.xlu1 %396 }
 0x44a   :  { %v400_v10 = vsub.f32 %v3718_v2, %v398_v8  ;;  %v399_v11 = vmul.f32 0.03125, %v397_v9 }
 0x44c   :  { %v401_v0 = vsub.f32 %v3721_v4, %v399_v11  ;;  %v402_v12 = vmul.f32 %v400_v10, %v400_v10 }
 0x44e   :  { %v404_v1 = vsel %vm197_vm0, %v402_v12, 0.0  ;;  %v403_v13 = vmul.f32 %v401_v0, %v401_v0 }
 0x44f   :  { %405 = vadd.xlane.f32.xlu0 %v404_v1 }
 0x450   :  { %v407_v14 = vsel %vm197_vm0, %v403_v13, 0.0 }
 0x451   :  { %408 = vadd.xlane.f32.xlu1 %v407_v14 }
 0x4dc   :  { %v406_v20 = vpop.xlane.xlu0 %405 }
 0x4dd   :  { %v410_v21 = vmul.f32 0.03125, %v406_v20 }
 0x4de   :  { %v409_v22 = vpop.xlane.xlu1 %408 }
 0x4df   :  { %v412_v23 = vadd.f32 1e-05, %v410_v21  ;;  %v411_v24 = vmul.f32 0.03125, %v409_v22 }
 0x4e1   :  { %3112 = vrsqrt.f32 %v412_v23  ;;  %v413_v25 = vadd.f32 1e-05, %v411_v24 }
 0x4e3   :  { %3114 = vrsqrt.f32 %v413_v25 }
 0x4eb   :  { %v3113_v26 = vpop.eup %3112 }
 0x4ec   :  { %v416_v28 = vmul.f32 %v3113_v26, %v400_v10 }
 0x4ed   :  { %v3115_v29 = vpop.eup %3114 }
 0x4ee   :  { %v422_v31 = vmul.f32 %v2708_v27, %v416_v28  ;;  %v417_v32 = vmul.f32 %v3115_v29, %v401_v0  ;;  %v632_v29 = vlaneseq }
 0x4f0   :  { %v423_v33 = vmul.f32 %v2708_v27, %v417_v32  ;;  %v428_v34 = vadd.f32 %v2709_v30, %v422_v31  ;;  %v3829_v31 = vshrl.u32 %v632_v29, 7 }
 0x4f2   :  { %v429_v36 = vadd.f32 %v2709_v30, %v423_v33  ;;  %v430_v38 = vadd.f32 %v428_v34, %v180_v35  ;;  %v626_v30 = vld [vmem:[#allocation2] sm:$0x1]  ;;  %v3832_v32 = vsub.s32 0, %v3829_v31  ;;  %v3434_v33 = vmov -1e+09  }
 0x4f3   :  { %vm627_vm5 = vcmp.gt.f32.partialorder %v626_v30, 0.5 }
 0x4f4   :  { %v433_v37 = vpack.c.bf16 %v429_v36, %v428_v34  ;;  %v431_v39 = vadd.f32 %v429_v36, %v180_v35  ;;  %v628_v34 = vsel %vm627_vm5, 0.0, %v3434_v33 }
 0x4f5   :  { %v635_v35 = vrot.slane %v628_v34, %v3832_v32 }
 0x4f6   :  { %2885 = vmatmul.mubr.msk.bf16.vlgmr.msra.gmra.mrb[4].mxu1 %vm197_vm0, %v433_v37  ;;  %v432_v41 = vpack.c.bf16 %v431_v39, %v430_v38 }
 0x4f7   :  { %2896 = vmatprep.mubr.msk.bf16.mxu1 %vm3430_vm1, %v4527_v15 }
 0x4f8   :  { %2869 = vmatmul.mubr.msk.bf16.vlgmr.msra.gmra.mrb[4].mxu0 %vm197_vm0, %v432_v41 }
 0x4f9   :  { %2873 = vmatpush3.bf16.msra.mxu0 %v3084_v40  ;;  %2876 = vmatprep.mubr.msk.bf16.mxu0 %vm3430_vm1, %v4527_v15 }
 0x4fa   :  { %2874 = vmatprep.subr.bf16.mxu0 %v4527_v15 }
 0x4fd   :  { %2875 = vmatpush3.bf16.msra.mxu0 %v3085_v42 }
 0x4fe   :  { %2888 = vmatprep.subr.bf16.mxu0 %v4527_v15 }
 0x500   :  { %2877 = vmatmul.mubr.msk.bf16.vlgmr.msra.gmra.mrb[8].mxu0 %vm197_vm0, %v432_v41 }
 0x501   :  { %2890 = vmatprep.mubr.msk.bf16.mxu0 %vm3430_vm1, %v4527_v15 }
 0x5c9   :  { %v619_v44 = vpop.f32.mrb[4].mxu1 }
 0x5ca   :  { %v620_v46 = vadd.f32 %v2718_v43, %v619_v44  ;;  %v2886_v47 = vpop.f32.mrb[5].mxu1 }
 0x5cb   :  { %v492_v48 = vpop.f32.mrb[4].mxu0  ;;  %v622_v49 = vpop.f32.mrb[6].mxu1 }
 0x5cc   :  { %v3767_v50 = vpack.c.bf16 %v620_v46, %v620_v46  ;;  %v493_v51 = vadd.f32 %v2710_v45, %v492_v48  ;;  %v3769_v52 = vadd.f32 %v2718_v43, %v622_v49  ;;  %v2870_v53 = vpop.f32.mrb[5].mxu0  ;;  %v2887_v54 = vpop.f32.mrb[7].mxu1 }
 0x5cd   :  { %v495_v55 = vpop.f32.mrb[6].mxu0 }
 0x5ce   :  { %v629_v56 = vpack.c.bf16 %v493_v51, %v493_v51  ;;  %v2871_v57 = vpop.f32.mrb[7].mxu0  ;;  %v702_v58 = vsel %vm700_vm3, %v3767_v50, 0  ;;  %v496_v8 = vadd.f32 %v2710_v45, %v495_v55 }
 0x5cf   :  { %2895 = vmatpush3.bf16.msra.mxu1 %v702_v58 }
 0x5d0   :  { %745 = vrot.lane.b32.xlu1 %v629_v56, %s3431_s0  ;;  %2906 = vmatprep.subr.bf16.mxu1 %v4527_v15  ;;  %v1098_v10 = vpack.c.bf16 %v496_v8, %v496_v8 }
 0x5d3   :  { %v554_v60 = vpop.f32.mrb[8].mxu0 }
 0x5d4   :  { %v555_v61 = vadd.f32 %v2714_v59, %v554_v60  ;;  %v2878_v62 = vpop.f32.mrb[9].mxu0 }
 0x5d5   :  { %v557_v63 = vpop.f32.mrb[10].mxu0 }
 0x5d6   :  { %v630_v3 = vpack.c.bf16 %v555_v61, %v555_v61  ;;  %v2879_v5 = vpop.f32.mrb[11].mxu0  ;;  %v558_v7 = vadd.f32 %v2714_v59, %v557_v63 }
 0x5d8   :  { %859 = vrot.lane.b32.xlu1 %v630_v3, %s3432_s24  ;;  %748 = vrot.lane.b32.xlu0 %v630_v3, %s3431_s0  ;;  %v642_v6 = vsel %vm637_vm4, %v630_v3, 0  ;;  %v1099_v9 = vpack.c.bf16 %v558_v7, %v558_v7 }
 0x5d9   :  { %2889 = vmatpush3.bf16.xpose.msra.mxu0 %v642_v6 }
 0x5da   :  { %2900 = vmatprep.subr.bf16.mxu0 %v4527_v15  ;;  %v1110_v19 = vsel %vm637_vm4, %v1099_v9, 0 }
 0x5dc   :  { %857 = vrot.lane.b32.xlu1 %v629_v56, %s3432_s24  ;;  %969 = vrot.lane.b32.xlu0 %v630_v3, %s3433_s7 }
 0x5e0   :  { %967 = vrot.lane.b32.xlu1 %v629_v56, %s3433_s7  ;;  %2891 = vmatmul.mubr.msk.bf16.vlgmr.msra.gmra.mrb[12].mxu0 %vm637_vm4, %v629_v56  ;;  %v1095_v56 = vld [vmem:[#allocation2 + $0x1] sm:$0x1] }
 0x5e1   :  { %1215 = vrot.lane.b32.xlu0 %v1099_v9, %s3431_s0  ;;  %2902 = vmatprep.mubr.msk.bf16.mxu0 %vm3430_vm1, %v4527_v15  ;;  %vm1096_vm6 = vcmp.gt.f32.partialorder %v1095_v56, 0.5 }
 0x5e2   :  { %v1097_v61 = vsel %vm1096_vm6, 0.0, %v3434_v33 }
 0x5e3   :  { %v1104_v3 = vrot.slane %v1097_v61, %v3832_v32 }
 0x5e4   :  { %1212 = vrot.lane.b32.xlu1 %v1098_v10, %s3431_s0 }
 0x5e5   :  { %1326 = vrot.lane.b32.xlu0 %v1099_v9, %s3432_s24 }
 0x5e8   :  { %1324 = vrot.lane.b32.xlu1 %v1098_v10, %s3432_s24 }
 0x5e9   :  { %1436 = vrot.lane.b32.xlu0 %v1099_v9, %s3433_s7 }
 0x5ec   :  { %1434 = vrot.lane.b32.xlu1 %v1098_v10, %s3433_s7 }
 0x642   :  { %v746_v12 = vpop.permute.xlu1 %745 }
 0x64a   :  { %v749_v11 = vpop.permute.xlu0 %748  ;;  %v860_v1 = vpop.permute.xlu1 %859 }
 0x64b   :  { %v754_v0 = vsel %vm637_vm4, %v749_v11, 0  ;;  %v865_v13 = vsel %vm637_vm4, %v860_v1, 0 }
 0x64c   :  { %2901 = vmatpush3.bf16.xpose.msra.mxu0 %v754_v0 }
 0x64d   :  { %2912 = vmatprep.subr.bf16.mxu0 %v4527_v15 }
 0x64e   :  { %v970_v14 = vpop.permute.xlu0 %969  ;;  %v858_v16 = vpop.permute.xlu1 %857 }
 0x64f   :  { %v975_v17 = vsel %vm637_vm4, %v970_v14, 0 }
 0x652   :  { %v968_v18 = vpop.permute.xlu1 %967 }
 0x653   :  { %2903 = vmatmul.mubr.msk.bf16.vlgmr.msra.gmra.mrb[16].mxu0 %vm637_vm4, %v746_v12  ;;  %v1216_v20 = vpop.permute.xlu0 %1215 }
 0x654   :  { %2913 = vmatpush3.bf16.xpose.msra.mxu0 %v865_v13  ;;  %2914 = vmatprep.mubr.msk.bf16.mxu0 %vm3430_vm1, %v4527_v15  ;;  %v1221_v21 = vsel %vm637_vm4, %v1216_v20, 0 }
 0x655   :  { %2924 = vmatprep.subr.bf16.mxu0 %v4527_v15 }
 0x656   :  { %v1213_v23 = vpop.permute.xlu1 %1212 }
 0x657   :  { %v1327_v22 = vpop.permute.xlu0 %1326 }
 0x658   :  { %v1332_v24 = vsel %vm637_vm4, %v1327_v22, 0 }
 0x65a   :  { %v1325_v26 = vpop.permute.xlu1 %1324 }
 0x65b   :  { %2915 = vmatmul.mubr.msk.bf16.vlgmr.msra.gmra.mrb[20].mxu0 %vm637_vm4, %v858_v16  ;;  %v1437_v25 = vpop.permute.xlu0 %1436 }
 0x65c   :  { %2925 = vmatpush3.bf16.xpose.msra.mxu0 %v975_v17  ;;  %2926 = vmatprep.mubr.msk.bf16.mxu0 %vm3430_vm1, %v4527_v15  ;;  %v1442_v27 = vsel %vm637_vm4, %v1437_v25, 0 }
 0x65d   :  { %2936 = vmatprep.subr.bf16.mxu0 %v4527_v15 }
 0x65e   :  { %v1435_v28 = vpop.permute.xlu1 %1434 }
 0x663   :  { %2927 = vmatmul.mubr.msk.bf16.vlgmr.msra.gmra.mrb[24].mxu0 %vm637_vm4, %v968_v18 }
 0x664   :  { %2937 = vmatpush3.bf16.xpose.msra.mxu0 %v1110_v19  ;;  %2938 = vmatprep.mubr.msk.bf16.mxu0 %vm3430_vm1, %v4527_v15 }
 0x665   :  { %2948 = vmatprep.subr.bf16.mxu0 %v4527_v15 }
 0x66b   :  { %2939 = vmatmul.mubr.msk.bf16.vlgmr.msra.gmra.mrb[28].mxu0 %vm637_vm4, %v1098_v10 }
 0x66c   :  { %2949 = vmatpush3.bf16.xpose.msra.mxu0 %v1221_v21  ;;  %2950 = vmatprep.mubr.msk.bf16.mxu0 %vm3430_vm1, %v4527_v15 }
 0x66d   :  { %2960 = vmatprep.subr.bf16.mxu0 %v4527_v15 }
 0x673   :  { %2951 = vmatmul.mubr.msk.bf16.vlgmr.msra.gmra.mrb[32].mxu0 %vm637_vm4, %v1213_v23 }
 0x674   :  { %2961 = vmatpush3.bf16.xpose.msra.mxu0 %v1332_v24  ;;  %2962 = vmatprep.mubr.msk.bf16.mxu0 %vm3430_vm1, %v4527_v15 }
 0x675   :  { %2972 = vmatprep.subr.bf16.mxu0 %v4527_v15 }
 0x67b   :  { %2963 = vmatmul.mubr.msk.bf16.vlgmr.msra.gmra.mrb[36].mxu0 %vm637_vm4, %v1325_v26 }
 0x67c   :  { %2973 = vmatpush3.bf16.xpose.msra.mxu0 %v1442_v27  ;;  %2974 = vmatprep.mubr.msk.bf16.mxu0 %vm3430_vm1, %v4527_v15 }
 0x67d   :  { %2984 = vmatprep.subr.bf16.mxu0 %v4527_v15 }
 0x683   :  { %2975 = vmatmul.mubr.msk.bf16.vlgmr.msra.gmra.mrb[40].mxu0 %vm637_vm4, %v1435_v28 }
 0x684   :  { %2988 = vmatprep.mubr.msk.bf16.mxu0 %vm3430_vm1, %v4527_v15 }
 0x6b3   :  { %v678_v36 = vpop.f32.mrb[12].mxu0 }
 0x6b4   :  { %v679_v37 = vadd.f32 %v678_v36, %v635_v35  ;;  %v2892_v38 = vpop.f32.mrb[13].mxu0 }
 0x6b5   :  { %v681_v39 = vpop.f32.mrb[14].mxu0 }
 0x6b6   :  { %v2893_v40 = vpop.f32.mrb[15].mxu0  ;;  %v684_v41 = vsel %vm637_vm4, %v679_v37, -inf }
 0x6b7   :  { %685 = vmax.xlane.f32.xlu0 %v684_v41 }
 0x726   :  { %v790_v42 = vpop.f32.mrb[16].mxu0 }
 0x727   :  { %v3836_v43 = vadd.f32 %v790_v42, %v635_v35  ;;  %v2904_v44 = vpop.f32.mrb[17].mxu0 }
 0x728   :  { %v793_v45 = vpop.f32.mrb[18].mxu0 }
 0x729   :  { %v2905_v46 = vpop.f32.mrb[19].mxu0  ;;  %v796_v47 = vsel %vm637_vm4, %v3836_v43, -inf }
 0x72a   :  { %797 = vmax.xlane.f32.xlu1 %v796_v47 }
 0x72e   :  { %v901_v48 = vpop.f32.mrb[20].mxu0 }
 0x72f   :  { %v902_v49 = vadd.f32 %v901_v48, %v635_v35  ;;  %v2916_v51 = vpop.f32.mrb[21].mxu0 }
 0x730   :  { %v904_v53 = vpop.f32.mrb[22].mxu0 }
 0x731   :  { %v2917_v54 = vpop.f32.mrb[23].mxu0  ;;  %v907_v55 = vsel %vm637_vm4, %v902_v49, -inf }
 0x732   :  { %908 = vmax.xlane.f32.xlu0 %v907_v55 }
 0x736   :  { %v1011_v57 = vpop.f32.mrb[24].mxu0 }
 0x737   :  { %v1012_v58 = vadd.f32 %v1011_v57, %v635_v35  ;;  %v2928_v59 = vpop.f32.mrb[25].mxu0 }
 0x738   :  { %v1014_v60 = vpop.f32.mrb[26].mxu0  ;;  %v3877_v59 = vpack.c.bf16 %v3769_v52, %v3769_v52 }
 0x739   :  { %v2929_v62 = vpop.f32.mrb[27].mxu0  ;;  %v1017_v63 = vsel %vm637_vm4, %v1012_v58, -inf }
 0x73a   :  { %1018 = vmax.xlane.f32.xlu0 %v1017_v63 }
 0x73e   :  { %v1146_v5 = vpop.f32.mrb[28].mxu0 }
 0x73f   :  { %v1147_v6 = vadd.f32 %v1146_v5, %v1104_v3  ;;  %v2940_v7 = vpop.f32.mrb[29].mxu0 }
 0x740   :  { %v1149_v8 = vpop.f32.mrb[30].mxu0 }
 0x741   :  { %v2941_v9 = vpop.f32.mrb[31].mxu0  ;;  %v1152_v10 = vsel %vm637_vm4, %v1147_v6, -inf }
 0x742   :  { %1153 = vmax.xlane.f32.xlu0 %v1152_v10 }
 0x744   :  { %v686_v11 = vpop.xlane.xlu0 %685 }
 0x745   :  { %v687_v0 = vsub.f32 %v679_v37, %v686_v11 }
 0x746   :  { %v1257_v12 = vpop.f32.mrb[32].mxu0 }
 0x747   :  { %v688_v1 = vmul.f32 1.442695, %v687_v0  ;;  %v3844_v13 = vadd.f32 %v1257_v12, %v1104_v3  ;;  %v2952_v14 = vpop.f32.mrb[33].mxu0 }
 0x748   :  { %v1260_v16 = vpop.f32.mrb[34].mxu0 }
 0x749   :  { %3116 = vpow2.f32 %v688_v1  ;;  %v2953_v17 = vpop.f32.mrb[35].mxu0  ;;  %v1263_v18 = vsel %vm637_vm4, %v3844_v13, -inf }
 0x74a   :  { %1264 = vmax.xlane.f32.xlu1 %v1263_v18 }
 0x74e   :  { %v1368_v19 = vpop.f32.mrb[36].mxu0 }
 0x74f   :  { %v3848_v20 = vadd.f32 %v1368_v19, %v1104_v3  ;;  %v2964_v21 = vpop.f32.mrb[37].mxu0 }
 0x750   :  { %v1371_v22 = vpop.f32.mrb[38].mxu0 }
 0x751   :  { %v2965_v23 = vpop.f32.mrb[39].mxu0  ;;  %v1374_v24 = vsel %vm637_vm4, %v3848_v20, -inf }
 0x752   :  { %1375 = vmax.xlane.f32.xlu0 %v1374_v24 }
 0x753   :  { %v3117_v25 = vpop.eup %3116 }
 0x754   :  { %v690_v26 = vsel %vm637_vm4, %v3117_v25, 0.0 }
 0x756   :  { %691 = vadd.xlane.f32.xlu0 %v690_v26  ;;  %v1478_v27 = vpop.f32.mrb[40].mxu0 }
 0x757   :  { %v1479_v28 = vadd.f32 %v1478_v27, %v1104_v3  ;;  %v2976_v29 = vpop.f32.mrb[41].mxu0 }
 0x758   :  { %v1481_v30 = vpop.f32.mrb[42].mxu0 }
 0x759   :  { %v2977_v33 = vpop.f32.mrb[43].mxu0  ;;  %v1484_v34 = vsel %vm637_vm4, %v1479_v28, -inf }
 0x75a   :  { %1485 = vmax.xlane.f32.xlu1 %v1484_v34 }
 0x76b   :  { %809 = vrot.lane.b32.xlu1 %v3767_v50, %s3431_s0 }
 0x76c   :  { %919 = vrot.lane.b32.xlu0 %v3767_v50, %s3432_s24 }
 0x7b7   :  { %v798_v35 = vpop.xlane.xlu1 %797 }
 0x7b8   :  { %v799_v36 = vsub.f32 %v3836_v43, %v798_v35  ;;  %v1169_v35 = vsel %vm700_vm3, %v3877_v59, 0 }
 0x7ba   :  { %v800_v37 = vmul.f32 1.442695, %v799_v36 }
 0x7bc   :  { %3118 = vpow2.f32 %v800_v37 }
 0x7bf   :  { %v909_v38 = vpop.xlane.xlu0 %908 }
 0x7c0   :  { %v910_v39 = vsub.f32 %v902_v49, %v909_v38 }
 0x7c2   :  { %v911_v40 = vmul.f32 1.442695, %v910_v39 }
 0x7c4   :  { %3120 = vpow2.f32 %v911_v40 }
 0x7c6   :  { %v3859_v41 = vpop.eup %3118 }
 0x7c7   :  { %v1019_v42 = vpop.xlane.xlu0 %1018  ;;  %v802_v44 = vsel %vm637_vm4, %v3859_v41, 0.0 }
 0x7c8   :  { %v1020_v45 = vsub.f32 %v1012_v58, %v1019_v42  ;;  %803 = vadd.xlane.f32.xlu1 %v802_v44 }
 0x7ca   :  { %v1021_v46 = vmul.f32 1.442695, %v1020_v45 }
 0x7cc   :  { %3122 = vpow2.f32 %v1021_v46 }
 0x7ce   :  { %v3863_v47 = vpop.eup %3120 }
 0x7cf   :  { %v1154_v48 = vpop.xlane.xlu0 %1153  ;;  %v913_v43 = vsel %vm637_vm4, %v3863_v47, 0.0 }
 0x7d0   :  { %v1155_v51 = vsub.f32 %v1147_v6, %v1154_v48  ;;  %914 = vadd.xlane.f32.xlu0 %v913_v43 }
 0x7d2   :  { %v1156_v49 = vmul.f32 1.442695, %v1155_v51 }
 0x7d4   :  { %3124 = vpow2.f32 %v1156_v49 }
 0x7d6   :  { %v3867_v53 = vpop.eup %3122 }
 0x7d7   :  { %v1023_v54 = vsel %vm637_vm4, %v3867_v53, 0.0  ;;  %v1265_v60 = vpop.xlane.xlu1 %1264 }
 0x7d8   :  { %1024 = vadd.xlane.f32.xlu1 %v1023_v54  ;;  %v1266_v8 = vsub.f32 %v3844_v13, %v1265_v60 }
 0x7da   :  { %v1267_v9 = vmul.f32 1.442695, %v1266_v8 }
 0x7de   :  { %v3871_v55 = vpop.eup %3124 }
 0x7df   :  { %v1376_v56 = vpop.xlane.xlu0 %1375  ;;  %v1158_v57 = vsel %vm637_vm4, %v3871_v55, 0.0 }
 0x7e0   :  { %1159 = vadd.xlane.f32.xlu0 %v1158_v57  ;;  %v1377_v52 = vsub.f32 %v3848_v20, %v1376_v56 }
 0x7e2   :  { %v1378_v7 = vmul.f32 1.442695, %v1377_v52 }
 0x7e3   :  { %v692_v58 = vpop.xlane.xlu0 %691 }
 0x7e4   :  { %3126 = vrcp.f32 %v692_v58 }
 0x7e5   :  { %3128 = vpow2.f32 %v1378_v7 }
 0x7e6   :  { %3130 = vpow2.f32 %v1267_v9 }
 0x7e7   :  { %v1486_v61 = vpop.xlane.xlu1 %1485  ;;  %v920_v17 = vpop.permute.xlu0 %919 }
 0x7e8   :  { %v1487_v10 = vsub.f32 %v1479_v28, %v1486_v61  ;;  %v925_v22 = vsel %vm700_vm3, %v920_v17, 0  ;;  %v3086_v17 = vld [vmem:[#allocation11] sm:$0xff]  }
 0x7e9   :  { %1276 = vrot.lane.b32.xlu1 %v3877_v59, %s3431_s0  ;;  %2985 = vmatpush3.bf16.msra.mxu0 %v3086_v17 }
 0x7ea   :  { %v1488_v11 = vmul.f32 1.442695, %v1487_v10  ;;  %2986 = vmatprep.subr.bf16.mxu0 %v4527_v15 }
 0x7eb   :  { %v810_v3 = vpop.permute.xlu1 %809 }
 0x7ec   :  { %v815_v6 = vsel %vm700_vm3, %v810_v3, 0  ;;  %3132 = vpow2.f32 %v1488_v11 }
 0x7ee   :  { %v3127_v62 = vpop.eup %3126 }
 0x7ef   :  { %v694_v63 = vmul.f32 %v3127_v62, %v3117_v25  ;;  %v3890_v0 = vpop.eup %3128 }
 0x7f0   :  { %v1380_v12 = vsel %vm637_vm4, %v3890_v0, 0.0 }
 0x7f1   :  { %v695_v5 = vpack.c.bf16 %v694_v63, %v694_v63 }
 0x7f3   :  { %2897 = vmatmul.mubr.msk.bf16.vlgmr.msra.gmra.mrb[8].mxu1 %vm637_vm4, %v695_v5 }
 0x7f4   :  { %2907 = vmatpush3.bf16.msra.mxu1 %v815_v6  ;;  %2908 = vmatprep.mubr.msk.bf16.mxu1 %vm3430_vm1, %v4527_v15 }
 0x7f5   :  { %2918 = vmatprep.subr.bf16.mxu1 %v4527_v15 }
 0x7f6   :  { %1029 = vrot.lane.b32.xlu0 %v3767_v50, %s3433_s7  ;;  %v3131_v50 = vpop.eup %3130 }
 0x7f7   :  { %v1269_v1 = vsel %vm637_vm4, %v3131_v50, 0.0  ;;  %v3895_v14 = vpop.eup %3132 }
 0x7f8   :  { %v1490_v13 = vsel %vm637_vm4, %v3895_v14, 0.0 }
 0x80d   :  { %1381 = vadd.xlane.f32.xlu1 %v1380_v12 }
 0x815   :  { %1270 = vadd.xlane.f32.xlu0 %v1269_v1 }
 0x819   :  { %1491 = vadd.xlane.f32.xlu0 %v1490_v13 }
 0x81e   :  { %1496 = vrot.lane.b32.xlu1 %v3877_v59, %s3433_s7 }
 0x82f   :  { %1386 = vrot.lane.b32.xlu0 %v3877_v59, %s3432_s24 }
 0x855   :  { %v804_v16 = vpop.xlane.xlu1 %803 }
 0x856   :  { %3134 = vrcp.f32 %v804_v16 }
 0x85d   :  { %v915_v18 = vpop.xlane.xlu0 %914 }
 0x85e   :  { %3136 = vrcp.f32 %v915_v18 }
 0x860   :  { %v3135_v19 = vpop.eup %3134 }
 0x861   :  { %v806_v20 = vmul.f32 %v3135_v19, %v3859_v41 }
 0x863   :  { %v807_v21 = vpack.c.bf16 %v806_v20, %v806_v20 }
 0x865   :  { %2909 = vmatmul.mubr.msk.bf16.vlgmr.msra.gmra.mrb[12].mxu1 %vm637_vm4, %v807_v21  ;;  %v1025_v23 = vpop.xlane.xlu1 %1024 }
 0x866   :  { %2919 = vmatpush3.bf16.msra.mxu1 %v925_v22  ;;  %3138 = vrcp.f32 %v1025_v23  ;;  %2920 = vmatprep.mubr.msk.bf16.mxu1 %vm3430_vm1, %v4527_v15  ;;  %v3087_v23 = vld [vmem:[#allocation11 + $0x8] sm:$0xff]  }
 0x867   :  { %2930 = vmatprep.subr.bf16.mxu1 %v4527_v15  ;;  %2987 = vmatpush3.bf16.msra.mxu0 %v3087_v23 }
 0x868   :  { %v3137_v24 = vpop.eup %3136  ;;  %3000 = vmatprep.subr.bf16.mxu0 %v4527_v15 }
 0x869   :  { %v917_v25 = vmul.f32 %v3137_v24, %v3863_v47  ;;  %v1277_v38 = vpop.permute.xlu1 %1276 }
 0x86a   :  { %v1282_v40 = vsel %vm700_vm3, %v1277_v38, 0 }
 0x86b   :  { %v918_v26 = vpack.c.bf16 %v917_v25, %v917_v25 }
 0x86d   :  { %v1160_v27 = vpop.xlane.xlu0 %1159  ;;  %2921 = vmatmul.mubr.msk.bf16.vlgmr.msra.gmra.mrb[16].mxu1 %vm637_vm4, %v918_v26 }
 0x86e   :  { %3140 = vrcp.f32 %v1160_v27  ;;  %2932 = vmatprep.mubr.msk.bf16.mxu1 %vm3430_vm1, %v4527_v15 }
 0x870   :  { %v3139_v28 = vpop.eup %3138 }
 0x871   :  { %v1027_v29 = vmul.f32 %v3139_v28, %v3867_v53  ;;  %v1030_v30 = vpop.permute.xlu0 %1029 }
 0x872   :  { %v1035_v33 = vsel %vm700_vm3, %v1030_v30, 0 }
 0x873   :  { %2931 = vmatpush3.bf16.msra.mxu1 %v1035_v33  ;;  %v1028_v34 = vpack.c.bf16 %v1027_v29, %v1027_v29 }
 0x874   :  { %2942 = vmatprep.subr.bf16.mxu1 %v4527_v15 }
 0x876   :  { %2933 = vmatmul.mubr.msk.bf16.vlgmr.msra.gmra.mrb[20].mxu1 %vm637_vm4, %v1028_v34 }
 0x877   :  { %2943 = vmatpush3.bf16.msra.mxu1 %v1169_v35  ;;  %2944 = vmatprep.mubr.msk.bf16.mxu1 %vm3430_vm1, %v4527_v15 }
 0x878   :  { %v3141_v36 = vpop.eup %3140  ;;  %2954 = vmatprep.subr.bf16.mxu1 %v4527_v15 }
 0x879   :  { %v1162_v37 = vmul.f32 %v3141_v36, %v3871_v55 }
 0x87b   :  { %v1163_v39 = vpack.c.bf16 %v1162_v37, %v1162_v37 }
 0x87e   :  { %2945 = vmatmul.mubr.msk.bf16.vlgmr.msra.gmra.mrb[24].mxu1 %vm637_vm4, %v1163_v39 }
 0x87f   :  { %2955 = vmatpush3.bf16.msra.mxu1 %v1282_v40  ;;  %2956 = vmatprep.mubr.msk.bf16.mxu1 %vm3430_vm1, %v4527_v15 }
 0x880   :  { %2966 = vmatprep.subr.bf16.mxu1 %v4527_v15 }
 0x89a   :  { %v1382_v42 = vpop.xlane.xlu1 %1381 }
 0x89e   :  { %v1497_v53 = vpop.permute.xlu1 %1496 }
 0x89f   :  { %v1502_v56 = vsel %vm700_vm3, %v1497_v53, 0  ;;  %v2738_v53 = vld [vmem:[%s4511_s3 + $0x8] ss:$0 sm:$0xff] }
 0x8a2   :  { %v1271_v41 = vpop.xlane.xlu0 %1270 }
 0x8a3   :  { %3142 = vrcp.f32 %v1271_v41 }
 0x8a4   :  { %3144 = vrcp.f32 %v1382_v42 }
 0x8a6   :  { %v1492_v44 = vpop.xlane.xlu0 %1491 }
 0x8a7   :  { %3146 = vrcp.f32 %v1492_v44 }
 0x8aa   :  { %v1387_v47 = vpop.permute.xlu0 %1386 }
 0x8ab   :  { %v1392_v51 = vsel %vm700_vm3, %v1387_v47, 0 }
 0x8ad   :  { %v3143_v45 = vpop.eup %3142 }
 0x8ae   :  { %v1273_v46 = vmul.f32 %v3143_v45, %v3131_v50  ;;  %v3145_v43 = vpop.eup %3144 }
 0x8af   :  { %v1384_v49 = vmul.f32 %v3145_v43, %v3890_v0 }
 0x8b0   :  { %v1274_v48 = vpack.c.bf16 %v1273_v46, %v1273_v46 }
 0x8b1   :  { %v1385_v54 = vpack.c.bf16 %v1384_v49, %v1384_v49  ;;  %v3147_v55 = vpop.eup %3146 }
 0x8b2   :  { %2957 = vmatmul.mubr.msk.bf16.vlgmr.msra.gmra.mrb[28].mxu1 %vm637_vm4, %v1274_v48  ;;  %v1494_v57 = vmul.f32 %v3147_v55, %v3895_v14 }
 0x8b3   :  { %2967 = vmatpush3.bf16.msra.mxu1 %v1392_v51  ;;  %2968 = vmatprep.mubr.msk.bf16.mxu1 %vm3430_vm1, %v4527_v15 }
 0x8b4   :  { %2978 = vmatprep.subr.bf16.mxu1 %v4527_v15  ;;  %v1495_v58 = vpack.c.bf16 %v1494_v57, %v1494_v57 }
 0x8ba   :  { %2969 = vmatmul.mubr.msk.bf16.vlgmr.msra.gmra.mrb[32].mxu1 %vm637_vm4, %v1385_v54 }
 0x8bb   :  { %2979 = vmatpush3.bf16.msra.mxu1 %v1502_v56  ;;  %2980 = vmatprep.mubr.msk.bf16.mxu1 %vm3430_vm1, %v4527_v15 }
 0x8bc   :  { %2992 = vmatprep.subr.bf16.mxu1 %v4527_v15 }
 0x8c2   :  { %2981 = vmatmul.mubr.msk.bf16.vlgmr.msra.gmra.mrb[36].mxu1 %vm637_vm4, %v1495_v58 }
 0x8c3   :  { %2996 = vmatprep.mubr.msk.bf16.mxu1 %vm3430_vm1, %v4527_v15 }
 0x8c6   :  { %v738_v59 = vpop.f32.mrb[8].mxu1 }
 0x8c7   :  { %v2898_v60 = vpop.f32.mrb[9].mxu1 }
 0x8c8   :  { %v741_v61 = vpop.f32.mrb[10].mxu1 }
 0x8c9   :  { %v2899_v62 = vpop.f32.mrb[11].mxu1 }
 0x938   :  { %v851_v63 = vpop.f32.mrb[12].mxu1 }
 0x939   :  { %v2910_v3 = vpop.f32.mrb[13].mxu1 }
 0x93a   :  { %v854_v5 = vpop.f32.mrb[14].mxu1 }
 0x93b   :  { %v2911_v6 = vpop.f32.mrb[15].mxu1 }
 0x940   :  { %v961_v52 = vpop.f32.mrb[16].mxu1 }
 0x941   :  { %v2922_v7 = vpop.f32.mrb[17].mxu1 }
 0x942   :  { %v964_v8 = vpop.f32.mrb[18].mxu1 }
 0x943   :  { %v2923_v9 = vpop.f32.mrb[19].mxu1 }
 0x949   :  { %v1071_v10 = vpop.f32.mrb[20].mxu1 }
 0x94a   :  { %v2934_v11 = vpop.f32.mrb[21].mxu1 }
 0x94b   :  { %v1074_v0 = vpop.f32.mrb[22].mxu1  ;;  %v3088_v11 = vld [vmem:[#allocation13] sm:$0xff]  }
 0x94c   :  { %v2935_v12 = vpop.f32.mrb[23].mxu1  ;;  %v3089_v0 = vld [vmem:[#allocation14] sm:$0xff]   ;;  %2993 = vmatpush3.bf16.msra.mxu1 %v3088_v11 }
 0x94d   :  { %v3090_v12 = vld [vmem:[#allocation13 + $0x8] sm:$0xff]   ;;  %2994 = vmatprep.subr.bf16.mxu1 %v4527_v15 }
 0x950   :  { %2995 = vmatpush3.bf16.msra.mxu1 %v3090_v12 }
 0x951   :  { %v1205_v50 = vpop.f32.mrb[24].mxu1  ;;  %3008 = vmatprep.subr.bf16.mxu1 %v4527_v15 }
 0x952   :  { %v2946_v1 = vpop.f32.mrb[25].mxu1 }
 0x953   :  { %v1208_v14 = vpop.f32.mrb[26].mxu1 }
 0x954   :  { %v2947_v13 = vpop.f32.mrb[27].mxu1 }
 0x985   :  { %v1318_v16 = vpop.f32.mrb[28].mxu1 }
 0x986   :  { %v3059_v18 = vpack.i.bf16 %v1318_v16, %v851_v63  ;;  %v2958_v19 = vpop.f32.mrb[29].mxu1 }
 0x987   :  { %v1321_v20 = vpop.f32.mrb[30].mxu1 }
 0x988   :  { %3060 = vrot.lane.b32.xlu1 %v3059_v18, %s3435_s22  ;;  %v2959_v21 = vpop.f32.mrb[31].mxu1 }
 0x989   :  { %v2742_v21 = vld [vmem:[%s4511_s3 + $0x9] ss:$0 sm:$0xff] }
 0x98d   :  { %v1428_v22 = vpop.f32.mrb[32].mxu1 }
 0x98e   :  { %v3064_v24 = vpack.i.bf16 %v1428_v22, %v961_v52  ;;  %v2970_v25 = vpop.f32.mrb[33].mxu1 }
 0x98f   :  { %v1431_v26 = vpop.f32.mrb[34].mxu1  ;;  %v2743_v25 = vld [vmem:[%s4511_s3 + $0xa] ss:$0 sm:$0xff] }
 0x990   :  { %3065 = vrot.lane.b32.xlu1 %v3064_v24, %s3423_s12  ;;  %v2971_v27 = vpop.f32.mrb[35].mxu1 }
 0x995   :  { %v1538_v28 = vpop.f32.mrb[36].mxu1 }
 0x996   :  { %v3069_v29 = vpack.i.bf16 %v1538_v28, %v1071_v10  ;;  %v2982_v30 = vpop.f32.mrb[37].mxu1 }
 0x997   :  { %v1541_v33 = vpop.f32.mrb[38].mxu1  ;;  %v3092_v30 = vld [vmem:[%s4522_s14] sm:$0xff]  }
 0x998   :  { %3070 = vrot.lane.b32.xlu1 %v3069_v29, %s3436_s18  ;;  %v2983_v34 = vpop.f32.mrb[39].mxu1  ;;  %v3093_v33 = vld [vmem:[%s4522_s14 + $0x8] sm:$0xff]  }
 0x9fa   :  { %v3061_v35 = vpop.permute.xlu1 %3060 }
 0x9fb   :  { %v3063_v37 = vunpack.i.h.bf16 %v3061_v35  ;;  %v3062_v38 = vunpack.i.l.bf16 %v3061_v35 }
 0x9fd   :  { %v1556_v42 = vsel %vm637_vm4, %v1205_v50, %v3063_v37  ;;  %v1089_v44 = vsel %vm637_vm4, %v738_v59, %v3062_v38  ;;  %v3091_v50 = vld [vmem:[#allocation14 + $0x8] sm:$0xff]  }
 0xa02   :  { %v3066_v36 = vpop.permute.xlu1 %3065 }
 0xa03   :  { %v3068_v39 = vunpack.i.h.bf16 %v3066_v36  ;;  %v3067_v40 = vunpack.i.l.bf16 %v3066_v36 }
 0xa05   :  { %v1091_v47 = vsel %vm1090_vm7, %v1089_v44, %v3067_v40  ;;  %v1557_v48 = vsel %vm1090_vm7, %v1556_v42, %v3068_v39 }
 0xa0a   :  { %v3071_v41 = vpop.permute.xlu1 %3070 }
 0xa0b   :  { %v3073_v45 = vunpack.i.h.bf16 %v3071_v41  ;;  %v3072_v46 = vunpack.i.l.bf16 %v3071_v41 }
 0xa0d   :  { %v1093_v43 = vsel %vm1092_vm8, %v1091_v47, %v3072_v46  ;;  %v1558_v51 = vsel %vm1092_vm8, %v1557_v48, %v3073_v45  ;;  %v3994_v48 = vsub.s32 1, %v3829_v31 }
 0xa0e   :  { %v1559_v49 = vpack.c.bf16 %v1558_v51, %v1093_v43  ;;  %v3997_v43 = vsub.s32 2, %v3829_v31  ;;  %v4000_v51 = vsub.s32 3, %v3829_v31 }
 0xa10   :  { %2989 = vmatmul.mubr.msk.bf16.vlgmr.msra.gmra.mrb[44].mxu0 %vm197_vm0, %v1559_v49  ;;  %4562 = vst [vmem:[#allocation26_spill] sm:$0xff] %v3997_v43  ;;  %4563 = vst [vmem:[#allocation27_spill] sm:$0xff] %v4000_v51  ;;  %v1799_v49 = vld [vmem:[%s4521_s13] sm:$0xff] }
 0xa11   :  { %3004 = vmatprep.mubr.msk.bf16.mxu0 %vm3430_vm1, %v4527_v15  ;;  %3001 = vmatpush3.bf16.msra.mxu0 %v3089_v0 }
 0xa12   :  { %3002 = vmatprep.subr.bf16.mxu0 %v4527_v15 }
 0xa15   :  { %3003 = vmatpush3.bf16.msra.mxu0 %v3091_v50 }
 0xa16   :  { %3016 = vmatprep.subr.bf16.mxu0 %v4527_v15 }
 0xae3   :  { %v1618_v54 = vpop.f32.mrb[44].mxu0 }
 0xae4   :  { %v1619_v55 = vadd.f32 %v2738_v53, %v1618_v54  ;;  %v2990_v56 = vpop.f32.mrb[45].mxu0  ;;  %v4006_v54 = vsub.s32 4, %v3829_v31 }
 0xae5   :  { %v1621_v57 = vpop.f32.mrb[46].mxu0  ;;  %v4012_v56 = vsub.s32 6, %v3829_v31 }
 0xae6   :  { %v3956_v58 = vadd.f32 %v1619_v55, %v3718_v2  ;;  %v1622_v59 = vadd.f32 %v2738_v53, %v1621_v57  ;;  %v2991_v60 = vpop.f32.mrb[47].mxu0  ;;  %4564 = vst [vmem:[#allocation28_spill] sm:$0xff] %v4006_v54  ;;  %v4009_v55 = vsub.s32 5, %v3829_v31  ;;  %v4015_v57 = vsub.s32 7, %v3829_v31  ;;  %v1800_v31 = vld [vmem:[%s4521_s13 + $0x8] sm:$0xff] }
 0xae7   :  { %4566 = vst [vmem:[#allocation30_spill] sm:$0xff] %v4012_v56  ;;  %v4021_v60 = vrot.slane %v1799_v49, %v3997_v43  ;;  %v4061_v11 = vrot.slane %v1800_v31, %v3832_v32 }
 0xae8   :  { %4560 = vst [vmem:[#allocation24_spill] sm:$0xff] %v3956_v58  ;;  %v3959_v61 = vadd.f32 %v1622_v59, %v3721_v4  ;;  %v1629_v62 = vsel %vm197_vm0, %v3956_v58, 0.0  ;;  %4565 = vst [vmem:[#allocation29_spill] sm:$0xff] %v4009_v55  ;;  %v4018_v59 = vrot.slane %v1799_v49, %v3994_v48 }
 0xae9   :  { %1630 = vadd.xlane.f32.xlu1 %v1629_v62  ;;  %v4024_v62 = vrot.slane %v1799_v49, %v4000_v51 }
 0xaea   :  { %4561 = vst [vmem:[#allocation25_spill] sm:$0xff] %v3959_v61  ;;  %v1632_v63 = vsel %vm197_vm0, %v3959_v61, 0.0 }
 0xaeb   :  { %1633 = vadd.xlane.f32.xlu0 %v1632_v63  ;;  %v4027_v63 = vrot.slane %v1799_v49, %v4006_v54 }
 0xb76   :  { %v1631_v3 = vpop.xlane.xlu1 %1630 }
 0xb77   :  { %v1635_v5 = vmul.f32 0.03125, %v1631_v3  ;;  %v4030_v3 = vrot.slane %v1799_v49, %v4009_v55 }
 0xb78   :  { %v1634_v6 = vpop.xlane.xlu0 %1633 }
 0xb79   :  { %v1637_v52 = vsub.f32 %v3956_v58, %v1635_v5  ;;  %v1636_v2 = vmul.f32 0.03125, %v1634_v6  ;;  %v1801_v5 = vld [vmem:[%s4521_s13 + $0x10] sm:$0xff]  ;;  %v1812_v6 = vrot.slane %v1799_v49, %v3832_v32 }
 0xb7a   :  { %v4064_v0 = vrot.slane %v1801_v5, %v3832_v32 }
 0xb7b   :  { %v1638_v7 = vsub.f32 %v3959_v61, %v1636_v2  ;;  %v1639_v8 = vmul.f32 %v1637_v52, %v1637_v52  ;;  %v4043_v2 = vrot.slane %v1799_v49, %v4015_v57  ;;  %v4066_v50 = vmul.f32 0.0, %v1812_v6 }
 0xb7c   :  { %v4140_v6 = vrot.slane %v1800_v31, %v4015_v57 }
 0xb7d   :  { %v1641_v4 = vsel %vm197_vm0, %v1639_v8, 0.0  ;;  %v1640_v9 = vmul.f32 %v1638_v7, %v1638_v7  ;;  %v4049_v8 = vmul.f32 0.0, %v4021_v60 }
 0xb7e   :  { %1642 = vadd.xlane.f32.xlu0 %v1641_v4  ;;  %v4052_v4 = vmul.f32 0.0, %v4024_v62 }
 0xb7f   :  { %v1644_v10 = vsel %vm197_vm0, %v1640_v9, 0.0  ;;  %v4055_v9 = vmul.f32 0.0, %v4027_v63 }
 0xb80   :  { %v4575_v61 = vrot.slane %v4052_v4, 3 }
 0xb82   :  { %1645 = vadd.xlane.f32.xlu0 %v1644_v10  ;;  %v4058_v10 = vmul.f32 0.0, %v4030_v3 }
 0xc0b   :  { %v1643_v1 = vpop.xlane.xlu0 %1642 }
 0xc0c   :  { %v1647_v14 = vmul.f32 0.03125, %v1643_v1 }
 0xc0e   :  { %v1649_v13 = vadd.f32 1e-05, %v1647_v14  ;;  %v4072_v14 = vmul.f32 0.0, %v4043_v2 }
 0xc0f   :  { %v1646_v16 = vpop.xlane.xlu0 %1645 }
 0xc10   :  { %3148 = vrsqrt.f32 %v1649_v13  ;;  %v1648_v17 = vmul.f32 0.03125, %v1646_v16 }
 0xc12   :  { %v1650_v18 = vadd.f32 1e-05, %v1648_v17  ;;  %v4531_v17 = vrot.slane %v4049_v8, 2 }
 0xc14   :  { %3150 = vrsqrt.f32 %v1650_v18  ;;  %v4079_v18 = vrot.slane %v1800_v31, %v3994_v48 }
 0xc1a   :  { %v3149_v19 = vpop.eup %3148 }
 0xc1b   :  { %v1653_v20 = vmul.f32 %v3149_v19, %v1637_v52  ;;  %v4040_v52 = vrot.slane %v1799_v49, %v4012_v56 }
 0xc1d   :  { %v1659_v23 = vmul.f32 %v2742_v21, %v1653_v20  ;;  %v4069_v1 = vmul.f32 0.0, %v4040_v52 }
 0xc1e   :  { %v3151_v22 = vpop.eup %3150 }
 0xc1f   :  { %v1654_v24 = vmul.f32 %v3151_v22, %v1638_v7  ;;  %v1665_v27 = vadd.f32 %v2743_v25, %v1659_v23  ;;  %v4046_v7 = vmul.f32 0.0, %v4018_v59 }
 0xc21   :  { %v1660_v26 = vmul.f32 %v2742_v21, %v1654_v24  ;;  %v4529_v16 = vrot.slane %v4046_v7, 1 }
 0xc23   :  { %v1666_v28 = vadd.f32 %v2743_v25, %v1660_v26  ;;  %v4088_v25 = vrot.slane %v1801_v5, %v3994_v48  ;;  %v4091_v26 = vrot.slane %v1801_v5, %v3997_v43 }
 0xc25   :  { %v1667_v29 = vpack.c.bf16 %v1666_v28, %v1665_v27 }
 0xc27   :  { %2997 = vmatmul.mubr.msk.bf16.vlgmr.msra.gmra.mrb[40].mxu1 %vm197_vm0, %v1667_v29  ;;  %3005 = vmatmul.mubr.msk.bf16.vlgmr.msra.gmra.mrb[48].mxu0 %vm197_vm0, %v1667_v29  ;;  %v4096_v29 = vrot.slane %v1800_v31, %v3997_v43 }
 0xc28   :  { %3012 = vmatprep.mubr.msk.bf16.mxu1 %vm3430_vm1, %v4527_v15  ;;  %3020 = vmatprep.mubr.msk.bf16.mxu0 %vm3430_vm1, %v4527_v15 }
 0xc29   :  { %3009 = vmatpush3.bf16.msra.mxu1 %v3092_v30  ;;  %v4099_v30 = vrot.slane %v1800_v31, %v4000_v51 }
 0xc2a   :  { %3010 = vmatprep.subr.bf16.mxu1 %v4527_v15 }
 0xc2d   :  { %3011 = vmatpush3.bf16.msra.mxu1 %v3093_v33 }
 0xc2e   :  { %3024 = vmatprep.subr.bf16.mxu1 %v4527_v15 }
 0xcfa   :  { %v1721_v34 = vpop.f32.mrb[40].mxu1  ;;  %v1778_v35 = vpop.f32.mrb[48].mxu0 }
 0xcfb   :  { %v2750_v36 = vmul.f32 -1.442695, %v1778_v35  ;;  %v2998_v37 = vpop.f32.mrb[41].mxu1  ;;  %v3006_v38 = vpop.f32.mrb[49].mxu0  ;;  %v4108_v35 = vrot.slane %v1801_v5, %v4000_v51 }
 0xcfc   :  { %v1724_v39 = vpop.f32.mrb[42].mxu1  ;;  %v1781_v40 = vpop.f32.mrb[50].mxu0 }
 0xcfd   :  { %3152 = vpow2.f32 %v2750_v36  ;;  %v2751_v41 = vmul.f32 -1.442695, %v1781_v40  ;;  %v2999_v42 = vpop.f32.mrb[43].mxu1  ;;  %v3007_v44 = vpop.f32.mrb[51].mxu0  ;;  %v4111_v36 = vrot.slane %v1801_v5, %v4006_v54  ;;  %v4120_v40 = vrot.slane %v1801_v5, %v4009_v55 }
 0xcfe   :  { %v4126_v42 = vrot.slane %v1800_v31, %v4012_v56  ;;  %v4129_v44 = vmul.f32 0.0, %v4088_v25 }
 0xcff   :  { %3154 = vpow2.f32 %v2751_v41  ;;  %v4123_v41 = vrot.slane %v1800_v31, %v4009_v55  ;;  %v4162_v28 = vmul.f32 0.0, %v4120_v40 }
 0xd00   :  { %4569 = vst [vmem:[#allocation33_spill] sm:$0xff] %v4126_v42 }
 0xd01   :  { %4568 = vst [vmem:[#allocation32_spill] sm:$0xff] %v4123_v41  ;;  %4572 = vst [vmem:[#allocation36_spill] sm:$0xff] %v4162_v28 }
 0xd07   :  { %v3153_v45 = vpop.eup %3152 }
 0xd08   :  { %v1791_v46 = vadd.f32 1.0, %v3153_v45  ;;  %v4132_v45 = vmul.f32 0.0, %v4091_v26 }
 0xd09   :  { %v3155_v47 = vpop.eup %3154 }
 0xd0a   :  { %3156 = vrcp.f32 %v1791_v46  ;;  %v1792_v53 = vadd.f32 1.0, %v3155_v47  ;;  %4570 = vst [vmem:[#allocation34_spill] sm:$0xff] %v4132_v45 }
 0xd0c   :  { %3158 = vrcp.f32 %v1792_v53  ;;  %v4137_v53 = vrot.slane %v1801_v5, %v4012_v56 }
 0xd0e   :  { %v4175_v21 = vmul.f32 0.0, %v4137_v53 }
 0xd10   :  { %4573 = vst [vmem:[#allocation37_spill] sm:$0xff] %v4175_v21 }
 0xd14   :  { %v3157_v12 = vpop.eup %3156 }
 0xd15   :  { %v4074_v13 = vmul.f32 %v3157_v12, %v1721_v34  ;;  %v4105_v34 = vrot.slane %v1800_v31, %v4006_v54  ;;  %v4143_v12 = vmul.f32 0.0, %v4108_v35 }
 0xd16   :  { %v3159_v19 = vpop.eup %3158 }
 0xd17   :  { %v1804_v23 = vrot.slane %v4074_v13, 1  ;;  %v4085_v24 = vmul.f32 %v3159_v19, %v1724_v39  ;;  %4567 = vst [vmem:[#allocation31_spill] sm:$0xff] %v4105_v34  ;;  %v4146_v13 = vmul.f32 0.0, %v4111_v36  ;;  %v4149_v19 = vrot.slane %v1801_v5, %v4015_v57 }
 0xd19   :  { %v4102_v33 = vsel %vm1806_vm9, 0.0, %v1804_v23 }
 0xd1a   :  { %v1820_v37 = vmul.f32 %v4018_v59, %v4102_v33  ;;  %v1833_v38 = vmul.f32 %v4021_v60, %v4102_v33  ;;  %v1847_v39 = vmul.f32 %v4024_v62, %v4102_v33  ;;  %v1861_v49 = vmul.f32 %v4027_v63, %v4102_v33 }
 0xd1b   :  { %v1874_v15 = vmul.f32 %v4030_v3, %v4102_v33  ;;  %v1888_v57 = vmul.f32 %v4040_v52, %v4102_v33 }
 0xd1c   :  { %v1824_v46 = vrot.slane %v1820_v37, 1  ;;  %v1838_v47 = vrot.slane %v1833_v38, 2  ;;  %v4154_v37 = vld [vmem:[%s4521_s13 + $0x18] sm:$0x7f]  ;;  %v1852_v31 = vrot.slane %v1847_v39, 3  ;;  %v1865_v39 = vrot.slane %v1861_v49, 4 }
 0xd1d   :  { %4571 = vst [vmem:[#allocation35_spill] sm:$0xff] %v4154_v37  ;;  %v2108_v5 = vrot.slane %v4154_v37, %v3832_v32  ;;  %v2114_v22 = vrot.slane %v4154_v37, %v3994_v48  ;;  %v1879_v49 = vrot.slane %v1874_v15, 5  ;;  %v1893_v55 = vrot.slane %v1888_v57, 6 }
 0xd1e   :  { %v1825_v38 = vsel %vm1806_vm9, %v4529_v16, %v1824_v46  ;;  %v1839_v46 = vsel %vm1836_vm10, %v4531_v17, %v1838_v47  ;;  %v1902_v16 = vmul.f32 %v4043_v2, %v4102_v33  ;;  %v1853_v47 = vsel %vm1850_vm11, %v4575_v61, %v1852_v31 }
 0xd1f   :  { %v1827_v27 = vadd.f32 %v1825_v38, %v4066_v50  ;;  %v4178_v38 = vmul.f32 0.0, %v4149_v19  ;;  %v4576_v32 = vrot.slane %v4055_v9, 4  ;;  %v4199_v58 = vmul.f32 0.0, %v2108_v5 }
 0xd20   :  { %v1907_v54 = vrot.slane %v1902_v16, 7  ;;  %v1921_v57 = vmul.f32 %v4079_v18, %v4102_v33 }
 0xd21   :  { %v1841_v20 = vadd.f32 %v1839_v46, %v1827_v27  ;;  %4574 = vst [vmem:[#allocation38_spill] sm:$0xff] %v4178_v38  ;;  %v4190_v27 = vsel %vm1806_vm9, %v1804_v23, 0.0  ;;  %v2172_v46 = vrot.slane %v4085_v24, 1  ;;  %v1866_v48 = vsel %vm700_vm3, %v4576_v32, %v1865_v39  ;;  %4577 = vst [vmem:[#allocation39_spill] sm:$0xff] %v4199_v58 }
 0xd22   :  { %v4201_v23 = vmul.f32 0.0, %v2114_v22  ;;  %v4579_v24 = vrot.slane %v4058_v10, 5  ;;  %v1922_v16 = vmul.f32 %v4079_v18, %v4190_v27  ;;  %v4580_v22 = vrot.slane %v4069_v1, 6 }
 0xd23   :  { %v1855_v56 = vadd.f32 %v1853_v47, %v1841_v20  ;;  %v4581_v32 = vrot.slane %v4072_v14, 7  ;;  %v1935_v31 = vmul.f32 %v4096_v29, %v4190_v27  ;;  %v1973_v39 = vmul.f32 %v4123_v41, %v4102_v33 }
 0xd24   :  { %4578 = vst [vmem:[#allocation40_spill] sm:$0xff] %v4201_v23  ;;  %v1880_v20 = vsel %vm1877_vm12, %v4579_v24, %v1879_v49  ;;  %v1894_v47 = vsel %vm1891_vm13, %v4580_v22, %v1893_v55  ;;  %v1934_v24 = vmul.f32 %v4096_v29, %v4102_v33  ;;  %v1948_v55 = vmul.f32 %v4099_v30, %v4190_v27 }
 0xd25   :  { %v1868_v61 = vadd.f32 %v1866_v48, %v1855_v56  ;;  %v4213_v56 = vsel %vm1806_vm9, 0.0, %v2172_v46  ;;  %v1908_v48 = vsel %vm1905_vm14, %v4581_v32, %v1907_v54  ;;  %v1960_v22 = vmul.f32 %v4105_v34, %v4102_v33 }
 0xd26   :  { %v1961_v49 = vmul.f32 %v4105_v34, %v4190_v27  ;;  %v1925_v54 = vrot.slane %v1921_v57, 1  ;;  %v1926_v32 = vrot.slane %v1922_v16, 1  ;;  %v1974_v15 = vmul.f32 %v4123_v41, %v4190_v27 }
 0xd27   :  { %v1882_v5 = vadd.f32 %v1880_v20, %v1868_v61  ;;  %v1947_v61 = vmul.f32 %v4099_v30, %v4102_v33  ;;  %v1987_v17 = vmul.f32 %v4126_v42, %v4190_v27  ;;  %v4246_v58 = vsel %vm1806_vm9, %v2172_v46, 0.0 }
 0xd28   :  { %v1938_v57 = vrot.slane %v1934_v24, 2  ;;  %v1939_v16 = vrot.slane %v1935_v31, 2  ;;  %v1952_v43 = vrot.slane %v1948_v55, 3  ;;  %v1964_v37 = vrot.slane %v1960_v22, 4 }
 0xd29   :  { %v1896_v20 = vadd.f32 %v1894_v47, %v1882_v5  ;;  %v1915_v5 = vmul.f32 %v4061_v11, %v4102_v33  ;;  %v1986_v47 = vmul.f32 %v4126_v42, %v4102_v33  ;;  %v1951_v51 = vrot.slane %v1947_v61, 3 }
 0xd2a   :  { %v1965_v23 = vrot.slane %v1961_v49, 4  ;;  %v1978_v21 = vrot.slane %v1974_v15, 5  ;;  %v1999_v41 = vmul.f32 %v4140_v6, %v4102_v33  ;;  %v1991_v42 = vrot.slane %v1987_v17, 6 }
 0xd2b   :  { %v1910_v45 = vadd.f32 %v1908_v48, %v1896_v20  ;;  %v1927_v48 = vsel %vm1806_vm9, %v1925_v54, %v1926_v32  ;;  %v1977_v20 = vrot.slane %v1973_v39, 5  ;;  %v1990_v34 = vrot.slane %v1986_v47, 6 }
 0xd2c   :  { %v2000_v46 = vmul.f32 %v4140_v6, %v4190_v27  ;;  %v1940_v31 = vsel %vm1836_vm10, %v1938_v57, %v1939_v16  ;;  %v2182_v49 = vmul.f32 %v4213_v56, %v4021_v60  ;;  %v2188_v15 = vmul.f32 %v4213_v56, %v4024_v62 }
 0xd2d   :  { %v1916_v38 = vadd.f32 %v1915_v5, %v1910_v45  ;;  %v2176_v45 = vmul.f32 %v4213_v56, %v4018_v59  ;;  %v1953_v33 = vsel %vm1850_vm11, %v1951_v51, %v1952_v43  ;;  %v2012_v17 = vmul.f32 %v4064_v0, %v4190_v27 }
 0xd2e   :  { %v1979_v24 = vsel %vm1877_vm12, %v1977_v20, %v1978_v21  ;;  %v2184_v55 = vrot.slane %v2182_v49, 2  ;;  %v2194_v59 = vmul.f32 %v4213_v56, %v4027_v63  ;;  %v1992_v60 = vsel %vm1891_vm13, %v1990_v34, %v1991_v42 }
 0xd2f   :  { %v1929_v28 = vadd.f32 %v1927_v48, %v1916_v38  ;;  %v1966_v38 = vsel %vm700_vm3, %v1964_v37, %v1965_v23  ;;  %v2178_v61 = vrot.slane %v2176_v45, 1  ;;  %v2003_v54 = vrot.slane %v1999_v41, 7 }
 0xd30   :  { %v2004_v62 = vrot.slane %v2000_v46, 7  ;;  %v2018_v43 = vmul.f32 %v4088_v25, %v4190_v27  ;;  %v4582_v51 = vrot.slane %v4046_v7, 1  ;;  %v2190_v37 = vrot.slane %v2188_v15, 3 }
 0xd31   :  { %v1942_v39 = vadd.f32 %v1940_v31, %v1929_v28  ;;  %v2200_v21 = vmul.f32 %v4213_v56, %v4030_v3  ;;  %v2031_v63 = vmul.f32 %v4091_v26, %v4190_v27  ;;  %v2044_v34 = vmul.f32 %v4108_v35, %v4190_v27 }
 0xd32   :  { %v2179_v28 = vsel %vm1806_vm9, %v4582_v51, %v2178_v61  ;;  %v2057_v42 = vmul.f32 %v4111_v36, %v4190_v27  ;;  %v4583_v7 = vrot.slane %v4049_v8, 2  ;;  %v2196_v5 = vrot.slane %v2194_v59, 4 }
 0xd33   :  { %v1955_v22 = vadd.f32 %v1953_v33, %v1942_v39  ;;  %v2181_v41 = vadd.f32 %v2179_v28, %v4066_v50  ;;  %v2206_v3 = vmul.f32 %v4213_v56, %v4040_v52  ;;  %v2005_v57 = vsel %vm1905_vm14, %v2003_v54, %v2004_v62 }
 0xd34   :  { %v2185_v32 = vsel %vm1836_vm10, %v4583_v7, %v2184_v55  ;;  %v2070_v16 = vmul.f32 %v4120_v40, %v4190_v27  ;;  %v2022_v20 = vrot.slane %v2018_v43, 1  ;;  %v4584_v50 = vrot.slane %v4052_v4, 3 }
 0xd35   :  { %v1968_v23 = vadd.f32 %v1966_v38, %v1955_v22  ;;  %v2187_v48 = vadd.f32 %v2185_v32, %v2181_v41  ;;  %v2202_v31 = vrot.slane %v2200_v21, 5  ;;  %v2212_v8 = vmul.f32 %v4213_v56, %v4043_v2  ;;  %v4588_v21 = vld [vmem:[#allocation34_spill] sm:$0xff] }
 0xd36   :  { %v2191_v46 = vsel %vm1850_vm11, %v4584_v50, %v2190_v37  ;;  %v2035_v49 = vrot.slane %v2031_v63, 2  ;;  %v2048_v15 = vrot.slane %v2044_v34, 3  ;;  %v2061_v39 = vrot.slane %v2057_v42, 4 }
 0xd37   :  { %v1981_v47 = vadd.f32 %v1979_v24, %v1968_v23  ;;  %v2193_v52 = vadd.f32 %v2191_v46, %v2187_v48  ;;  %v2083_v33 = vmul.f32 %v4137_v53, %v4190_v27  ;;  %v4585_v38 = vrot.slane %v4055_v9, 4 }
 0xd38   :  { %v2208_v61 = vrot.slane %v2206_v3, 6  ;;  %v2074_v55 = vrot.slane %v2070_v16, 5  ;;  %v2096_v59 = vmul.f32 %v4149_v19, %v4190_v27  ;;  %v4586_v2 = vrot.slane %v4058_v10, 5 }
 0xd39   :  { %v1994_v45 = vadd.f32 %v1992_v60, %v1981_v47  ;;  %v2197_v24 = vsel %vm700_vm3, %v4585_v38, %v2196_v5  ;;  %v2214_v54 = vrot.slane %v2212_v8, 7  ;;  %v2220_v62 = vmul.f32 %v4213_v56, %v4079_v18  ;;  %v4595_v38 = vld [vmem:[#allocation36_spill] sm:$0xff] }
 0xd3a   :  { %v2199_v22 = vadd.f32 %v2197_v24, %v2193_v52  ;;  %v2203_v60 = vsel %vm1877_vm12, %v4586_v2, %v2202_v31  ;;  %v2221_v9 = vmul.f32 %v4246_v58, %v4079_v18  ;;  %v2229_v28 = vmul.f32 %v4213_v56, %v4096_v29 }
 0xd3b   :  { %v2007_v4 = vadd.f32 %v2005_v57, %v1994_v45  ;;  %v2230_v27 = vmul.f32 %v4246_v58, %v4096_v29  ;;  %v4587_v37 = vrot.slane %v4129_v44, 1  ;;  %v4589_v23 = vrot.slane %v4588_v21, 2  ;;  %v4594_v45 = vld [vmem:[#allocation31_spill] sm:$0xff] }
 0xd3c   :  { %v2205_v51 = vadd.f32 %v2203_v60, %v2199_v22  ;;  %v4590_v34 = vrot.slane %v4143_v12, 3  ;;  %v2238_v29 = vmul.f32 %v4213_v56, %v4099_v30  ;;  %v2239_v32 = vmul.f32 %v4246_v58, %v4099_v30  ;;  %v4597_v22 = vld [vmem:[#allocation32_spill] sm:$0xff] }
 0xd3d   :  { %v2013_v43 = vadd.f32 %v2012_v17, %v2007_v4  ;;  %v2024_v10 = vsel %vm1806_vm9, %v2022_v20, %v4587_v37  ;;  %v2037_v63 = vsel %vm1836_vm10, %v2035_v49, %v4589_v23  ;;  %v4591_v17 = vrot.slane %v4069_v1, 6  ;;  %v4599_v37 = vld [vmem:[#allocation37_spill] sm:$0xff] }
 0xd3e   :  { %v2050_v18 = vsel %vm1850_vm11, %v2048_v15, %v4590_v34  ;;  %v4592_v5 = vrot.slane %v4072_v14, 7  ;;  %v2218_v47 = vmul.f32 %v4213_v56, %v4061_v11  ;;  %v2224_v57 = vrot.slane %v2220_v62, 1 }
 0xd3f   :  { %v2209_v41 = vsel %vm1891_vm13, %v4591_v17, %v2208_v61  ;;  %v2026_v42 = vadd.f32 %v2024_v10, %v2013_v43  ;;  %v2225_v16 = vrot.slane %v2221_v9, 1  ;;  %v2233_v20 = vrot.slane %v2229_v28, 2 }
 0xd40   :  { %v2211_v7 = vadd.f32 %v2209_v41, %v2205_v51  ;;  %v2215_v3 = vsel %vm1905_vm14, %v4592_v5, %v2214_v54  ;;  %v2234_v50 = vrot.slane %v2230_v27, 2  ;;  %v4593_v46 = vrot.slane %v4146_v13, 4  ;;  %v4598_v51 = vld [vmem:[#allocation33_spill] sm:$0xff]  ;;  %v4603_v5 = vld [vmem:[#allocation26_spill] sm:$0xff] }
 0xd41   :  { %v2039_v1 = vadd.f32 %v2037_v63, %v2026_v42  ;;  %v2087_v8 = vrot.slane %v2083_v33, 6  ;;  %v2247_v30 = vmul.f32 %v4213_v56, %v4594_v45  ;;  %v2248_v14 = vmul.f32 %v4246_v58, %v4594_v45  ;;  %v4609_v45 = vld [vmem:[#allocation28_spill] sm:$0xff] }
 0xd42   :  { %v2217_v48 = vadd.f32 %v2215_v3, %v2211_v7  ;;  %v2063_v31 = vsel %vm700_vm3, %v2061_v39, %v4593_v46  ;;  %v2242_v11 = vrot.slane %v2238_v29, 3  ;;  %v2243_v52 = vrot.slane %v2239_v32, 3  ;;  %v4601_v7 = vld [vmem:[#allocation40_spill] sm:$0xff]  ;;  %v4602_v32 = vld [vmem:[#allocation35_spill] sm:$0xff] }
 0xd43   :  { %v2052_v49 = vadd.f32 %v2050_v18, %v2039_v1  ;;  %v4596_v24 = vrot.slane %v4595_v38, 5  ;;  %v2226_v4 = vsel %vm1806_vm9, %v2224_v57, %v2225_v16  ;;  %v2256_v39 = vmul.f32 %v4213_v56, %v4597_v22  ;;  %v4605_v16 = vld [vmem:[#allocation38_spill] sm:$0xff] }
 0xd44   :  { %v2219_v15 = vadd.f32 %v2218_v47, %v2217_v48  ;;  %v2257_v33 = vmul.f32 %v4246_v58, %v4597_v22  ;;  %v2100_v60 = vrot.slane %v2096_v59, 7  ;;  %v2235_v62 = vsel %vm1836_vm10, %v2233_v20, %v2234_v50 }
 0xd45   :  { %v2076_v61 = vsel %vm1877_vm12, %v2074_v55, %v4596_v24  ;;  %v2065_v2 = vadd.f32 %v2063_v31, %v2052_v49  ;;  %v2251_v9 = vrot.slane %v2247_v30, 4  ;;  %v2252_v43 = vrot.slane %v2248_v14, 4  ;;  %v4610_v24 = vld [vmem:[#allocation39_spill] sm:$0xff] }
 0xd46   :  { %v2228_v54 = vadd.f32 %v2226_v4, %v2219_v15  ;;  %v2265_v28 = vmul.f32 %v4213_v56, %v4598_v51  ;;  %v2266_v55 = vmul.f32 %v4246_v58, %v4598_v51  ;;  %v4600_v10 = vrot.slane %v4599_v37, 6 }
 0xd47   :  { %v2078_v27 = vadd.f32 %v2076_v61, %v2065_v2  ;;  %v2244_v34 = vsel %vm1850_vm11, %v2242_v11, %v2243_v52  ;;  %v2260_v59 = vrot.slane %v2256_v39, 5  ;;  %v2261_v18 = vrot.slane %v2257_v33, 5 }
 0xd48   :  { %v2089_v23 = vsel %vm1891_vm13, %v2087_v8, %v4600_v10  ;;  %v2237_v63 = vadd.f32 %v2235_v62, %v2228_v54  ;;  %v2274_v17 = vmul.f32 %v4213_v56, %v4140_v6  ;;  %v2275_v41 = vmul.f32 %v4246_v58, %v4140_v6  ;;  %v4607_v6 = vld [vmem:[#allocation27_spill] sm:$0xff] }
 0xd49   :  { %v2091_v42 = vadd.f32 %v2089_v23, %v2078_v27  ;;  %v2117_v29 = vrot.slane %v4601_v7, 1  ;;  %v4604_v3 = vrot.slane %v4602_v32, %v4603_v5  ;;  %v4606_v1 = vrot.slane %v4605_v16, 7  ;;  %v4613_v5 = vld [vmem:[#allocation30_spill] sm:$0xff] }
 0xd4a   :  { %v2246_v57 = vadd.f32 %v2244_v34, %v2237_v63  ;;  %v2253_v20 = vsel %vm700_vm3, %v2251_v9, %v2252_v43  ;;  %v2269_v50 = vrot.slane %v2265_v28, 6  ;;  %v2270_v56 = vrot.slane %v2266_v55, 6  ;;  %v4611_v28 = vld [vmem:[#allocation29_spill] sm:$0xff] }
 0xd4b   :  { %v4366_v47 = vmul.f32 0.0, %v4604_v3  ;;  %v2102_v48 = vsel %vm1905_vm14, %v2100_v60, %v4606_v1  ;;  %v4608_v31 = vrot.slane %v4602_v32, %v4607_v6  ;;  %v2144_v30 = vrot.slane %v4602_v32, %v4609_v45 }
 0xd4c   :  { %v2104_v46 = vadd.f32 %v2102_v48, %v2091_v42  ;;  %v2255_v14 = vadd.f32 %v2253_v20, %v2246_v57  ;;  %v2262_v49 = vsel %vm1877_vm12, %v2260_v59, %v2261_v18  ;;  %v2278_v15 = vrot.slane %v2274_v17, 7 }
 0xd4d   :  { %v4375_v8 = vmul.f32 0.0, %v4608_v31  ;;  %v2279_v11 = vrot.slane %v2275_v41, 7  ;;  %v2285_v52 = vmul.f32 %v4246_v58, %v4088_v25  ;;  %v2127_v4 = vrot.slane %v4366_v47, 2 }
 0xd4e   :  { %v2110_v61 = vadd.f32 %v4610_v24, %v2104_v46  ;;  %v2264_v22 = vadd.f32 %v2262_v49, %v2255_v14  ;;  %v2271_v39 = vsel %vm1891_vm13, %v2269_v50, %v2270_v56  ;;  %v2291_v33 = vmul.f32 %v4246_v58, %v4091_v26 }
 0xd4f   :  { %v2137_v60 = vrot.slane %v4375_v8, 3  ;;  %v2145_v62 = vmul.f32 0.0, %v2144_v30  ;;  %v2280_v9 = vsel %vm1905_vm14, %v2278_v15, %v2279_v11  ;;  %v2287_v25 = vrot.slane %v2285_v52, 1 }
 0xd50   :  { %v2120_v2 = vadd.f32 %v2117_v29, %v2110_v61  ;;  %v2273_v54 = vadd.f32 %v2271_v39, %v2264_v22  ;;  %v2297_v43 = vmul.f32 %v4246_v58, %v4108_v35  ;;  %v2154_v55 = vrot.slane %v4602_v32, %v4611_v28 }
 0xd51   :  { %v2283_v26 = vmul.f32 %v4246_v58, %v4064_v0  ;;  %v2293_v10 = vrot.slane %v2291_v33, 2  ;;  %v2303_v23 = vmul.f32 %v4246_v58, %v4111_v36  ;;  %v2147_v34 = vrot.slane %v2145_v62, 4 }
 0xd52   :  { %v2130_v51 = vadd.f32 %v2127_v4, %v2120_v2  ;;  %v2282_v27 = vadd.f32 %v2280_v9, %v2273_v54  ;;  %v4612_v59 = vrot.slane %v4129_v44, 1  ;;  %v2299_v17 = vrot.slane %v2297_v43, 3 }
 0xd53   :  { %v2309_v35 = vmul.f32 %v4246_v58, %v4120_v40  ;;  %v2155_v42 = vmul.f32 0.0, %v2154_v55  ;;  %v2164_v3 = vrot.slane %v4602_v32, %v4613_v5  ;;  %v4614_v47 = vrot.slane %v4588_v21, 2 }
 0xd54   :  { %v2284_v63 = vadd.f32 %v2283_v26, %v2282_v27  ;;  %v2288_v18 = vsel %vm1806_vm9, %v2287_v25, %v4612_v59  ;;  %v2140_v41 = vadd.f32 %v2137_v60, %v2130_v51  ;;  %v2305_v57 = vrot.slane %v2303_v23, 4 }
 0xd55   :  { %v2294_v36 = vsel %vm1836_vm10, %v2293_v10, %v4614_v47  ;;  %v2315_v44 = vmul.f32 %v4246_v58, %v4137_v53  ;;  %v4615_v48 = vrot.slane %v4143_v12, 3  ;;  %v2311_v40 = vrot.slane %v2309_v35, 5 }
 0xd56   :  { %v2290_v0 = vadd.f32 %v2288_v18, %v2284_v63  ;;  %v2321_v50 = vmul.f32 %v4246_v58, %v4149_v19  ;;  %v2150_v56 = vadd.f32 %v2147_v34, %v2140_v41  ;;  %v2157_v32 = vrot.slane %v2155_v42, 5  ;;  %v4621_v18 = vld [vmem:[#allocation24_spill] sm:$0xff]  ;;  %v4622_v42 = vld [vmem:[#allocation25_spill] sm:$0xff] }
 0xd57   :  { %v2300_v20 = vsel %vm1850_vm11, %v2299_v17, %v4615_v48  ;;  %v2165_v46 = vmul.f32 0.0, %v2164_v3  ;;  %v4616_v21 = vrot.slane %v4146_v13, 4  ;;  %v2317_v8 = vrot.slane %v2315_v44, 6 }
 0xd58   :  { %v2296_v1 = vadd.f32 %v2294_v36, %v2290_v0  ;;  %v4617_v53 = vrot.slane %v4595_v38, 5  ;;  %v2323_v30 = vrot.slane %v2321_v50, 7  ;;  %v2160_v14 = vadd.f32 %v2157_v32, %v2150_v56  ;;  %v2752_v38 = vld [vmem:[%s4511_s3 + $0xb] ss:$0 sm:$0xff] }
 0xd59   :  { %v2306_v31 = vsel %vm700_vm3, %v2305_v57, %v4616_v21  ;;  %v2167_v49 = vrot.slane %v2165_v46, 6  ;;  %v4618_v58 = vrot.slane %v4599_v37, 6  ;;  %v4619_v52 = vrot.slane %v4605_v16, 7  ;;  %v2753_v37 = vld [vmem:[%s4511_s3 + $0xc] ss:$0 sm:$0xff]  ;;  %v3094_v46 = vld [vmem:[#allocation16] sm:$0xff]  }
 0xd5a   :  { %v2302_v6 = vadd.f32 %v2300_v20, %v2296_v1  ;;  %v2312_v12 = vsel %vm1877_vm12, %v2311_v40, %v4617_v53  ;;  %3017 = vmatpush3.bf16.msra.mxu0 %v3094_v46 }
 0xd5b   :  { %v2318_v19 = vsel %vm1891_vm13, %v2317_v8, %v4618_v58  ;;  %v2324_v13 = vsel %vm1905_vm14, %v2323_v30, %v4619_v52  ;;  %v2170_v61 = vadd.f32 %v2167_v49, %v2160_v14  ;;  %v2759_v14 = vld [vmem:[%s4511_s3 + $0xd] ss:$0 sm:$0xff] }
 0xd5c   :  { %v2308_v45 = vadd.f32 %v2306_v31, %v2302_v6  ;;  %v3095_v6 = vld [vmem:[#allocation16 + $0x8] sm:$0xff]  }
 0xd5d   :  { %v2339_v2 = vmul.f32 %v2752_v38, %v2170_v61 }
 0xd5e   :  { %v2314_v15 = vadd.f32 %v2312_v12, %v2308_v45 }
 0xd5f   :  { %v2346_v62 = vadd.f32 %v2753_v37, %v2339_v2  ;;  %v3099_v2 = vld [vmem:[%s4524_s16 + $0x18] sm:$0xff]  }
 0xd60   :  { %v2320_v11 = vadd.f32 %v2318_v19, %v2314_v15 }
 0xd61   :  { %v2754_v43 = vmul.f32 -1.442695, %v2346_v62 }
 0xd62   :  { %v2326_v22 = vadd.f32 %v2324_v13, %v2320_v11  ;;  %v2760_v11 = vld [vmem:[%s4511_s3 + $0xe] ss:$0 sm:$0xff] }
 0xd63   :  { %3160 = vpow2.f32 %v2754_v43 }
 0xd64   :  { %v2327_v39 = vadd.f32 %v2326_v22, %v4610_v24 }
 0xd66   :  { %v2328_v33 = vadd.f32 %v2327_v39, %v2117_v29  ;;  %v3097_v39 = vld [vmem:[%s4524_s16 + $0x8] sm:$0xff]  }
 0xd68   :  { %v2329_v54 = vadd.f32 %v2328_v33, %v2127_v4  ;;  %v3098_v33 = vld [vmem:[%s4524_s16 + $0x10] sm:$0xff]  }
 0xd6a   :  { %v2330_v16 = vadd.f32 %v2329_v54, %v2137_v60 }
 0xd6c   :  { %v2331_v9 = vadd.f32 %v2330_v16, %v2147_v34  ;;  %v4620_v34 = vmov 0.0  }
 0xd6d   :  { %v3161_v24 = vpop.eup %3160  ;;  %3018 = vmatprep.subr.bf16.mxu0 %v4620_v34 }
 0xd6e   :  { %v2332_v25 = vadd.f32 %v2331_v9, %v2157_v32  ;;  %v2354_v7 = vadd.f32 1.0, %v3161_v24  ;;  %3019 = vmatpush3.bf16.msra.mxu0 %v3095_v6 }
 0xd70   :  { %v2333_v51 = vadd.f32 %v2332_v25, %v2167_v49 }
 0xd72   :  { %v2340_v28 = vmul.f32 %v2752_v38, %v2333_v51  ;;  %v3096_v38 = vld [vmem:[%s4524_s16] sm:$0xff]  }
 0xd74   :  { %v2347_v55 = vadd.f32 %v2753_v37, %v2340_v28  ;;  %v2761_v37 = vld [vmem:[#allocation5 + $0x1] ss:$0 sm:$0xff] }
 0xd76   :  { %v2755_v27 = vmul.f32 -1.442695, %v2347_v55 }
 0xd78   :  { %3162 = vpow2.f32 %v2755_v27 }
 0xd79   :  { %3164 = vrcp.f32 %v2354_v7 }
 0xd82   :  { %v3163_v29 = vpop.eup %3162 }
 0xd83   :  { %v2355_v26 = vadd.f32 1.0, %v3163_v29  ;;  %v3165_v10 = vpop.eup %3164 }
 0xd84   :  { %v2360_v4 = vmul.f32 %v3165_v10, %v2346_v62 }
 0xd85   :  { %3166 = vrcp.f32 %v2355_v26 }
 0xd8f   :  { %v3167_v23 = vpop.eup %3166 }
 0xd90   :  { %v2361_v60 = vmul.f32 %v3167_v23, %v2347_v55 }
 0xd92   :  { %v2362_v63 = vpack.c.bf16 %v2361_v60, %v2360_v4  ;;  %v2767_v60 = vld [vmem:[%s4511_s3 + $0xf] ss:$0 sm:$0xff] }
 0xd94   :  { %3013 = vmatmul.mubr.msk.bf16.vlgmr.msra.gmra.mrb[44].mxu1 %vm197_vm0, %v2362_v63 }
 0xd95   :  { %3032 = vmatprep.mubr.msk.bf16.mxu1 %vm3430_vm1, %v4620_v34  ;;  %3025 = vmatpush3.bf16.msra.mxu1 %v3096_v38 }
 0xd96   :  { %3026 = vmatprep.subr.bf16.mxu1 %v4620_v34 }
 0xd99   :  { %3027 = vmatpush3.bf16.msra.mxu1 %v3097_v39 }
 0xd9a   :  { %3028 = vmatprep.subr.bf16.mxu1 %v4620_v34 }
 0xd9d   :  { %3029 = vmatpush3.bf16.msra.mxu1 %v3098_v33 }
 0xd9e   :  { %3030 = vmatprep.subr.bf16.mxu1 %v4620_v34 }
 0xda1   :  { %3031 = vmatpush3.bf16.msra.mxu1 %v3099_v2 }
 0xe67   :  { %v2416_v59 = vpop.f32.mrb[44].mxu1 }
 0xe68   :  { %v4441_v17 = vadd.f32 %v2416_v59, %v4621_v18  ;;  %v3014_v35 = vpop.f32.mrb[45].mxu1 }
 0xe69   :  { %v2419_v41 = vpop.f32.mrb[46].mxu1 }
 0xe6a   :  { %v4444_v5 = vadd.f32 %v2419_v41, %v4622_v42  ;;  %v3015_v3 = vpop.f32.mrb[47].mxu1  ;;  %v2441_v0 = vsel %vm197_vm0, %v4441_v17, 0.0 }
 0xe6b   :  { %2442 = vadd.xlane.f32.xlu1 %v2441_v0 }
 0xe6c   :  { %v2444_v47 = vsel %vm197_vm0, %v4444_v5, 0.0 }
 0xe6d   :  { %2445 = vadd.xlane.f32.xlu0 %v2444_v47 }
 0xef8   :  { %v2443_v36 = vpop.xlane.xlu1 %2442 }
 0xef9   :  { %v2447_v57 = vmul.f32 0.03125, %v2443_v36 }
 0xefa   :  { %v2446_v44 = vpop.xlane.xlu0 %2445 }
 0xefb   :  { %v2449_v1 = vsub.f32 %v4441_v17, %v2447_v57  ;;  %v2448_v48 = vmul.f32 0.03125, %v2446_v44 }
 0xefd   :  { %v2450_v20 = vsub.f32 %v4444_v5, %v2448_v48  ;;  %v2451_v40 = vmul.f32 %v2449_v1, %v2449_v1 }
 0xeff   :  { %v2453_v50 = vsel %vm197_vm0, %v2451_v40, 0.0  ;;  %v2452_v56 = vmul.f32 %v2450_v20, %v2450_v20 }
 0xf00   :  { %2454 = vadd.xlane.f32.xlu1 %v2453_v50 }
 0xf01   :  { %v2456_v32 = vsel %vm197_vm0, %v2452_v56, 0.0 }
 0xf02   :  { %2457 = vadd.xlane.f32.xlu0 %v2456_v32 }
 0xf8d   :  { %v2455_v21 = vpop.xlane.xlu1 %2454 }
 0xf8e   :  { %v2459_v31 = vmul.f32 0.03125, %v2455_v21 }
 0xf8f   :  { %v2458_v8 = vpop.xlane.xlu0 %2457 }
 0xf90   :  { %v2461_v45 = vadd.f32 1e-05, %v2459_v31  ;;  %v2460_v53 = vmul.f32 0.03125, %v2458_v8 }
 0xf92   :  { %3168 = vrsqrt.f32 %v2461_v45  ;;  %v2462_v12 = vadd.f32 1e-05, %v2460_v53 }
 0xf94   :  { %3170 = vrsqrt.f32 %v2462_v12  ;;  %v2773_v12 = vld [vmem:[%s4511_s3 + $0x10] ss:$0 sm:$0xff] }
 0xf9c   :  { %v3169_v30 = vpop.eup %3168 }
 0xf9d   :  { %v2465_v49 = vmul.f32 %v3169_v30, %v2449_v1 }
 0xf9e   :  { %v3171_v15 = vpop.eup %3170 }
 0xf9f   :  { %v2471_v58 = vmul.f32 %v2759_v14, %v2465_v49  ;;  %v2466_v19 = vmul.f32 %v3171_v15, %v2450_v20  ;;  %v2774_v49 = vld [vmem:[%s4511_s3 + $0x11] ss:$0 sm:$0xff] }
 0xfa1   :  { %v2472_v52 = vmul.f32 %v2759_v14, %v2466_v19  ;;  %v2477_v13 = vadd.f32 %v2760_v11, %v2471_v58 }
 0xfa3   :  { %v2478_v61 = vadd.f32 %v2760_v11, %v2472_v52 }
 0xfa5   :  { %v2479_v22 = vpack.c.bf16 %v2478_v61, %v2477_v13 }
 0xfa7   :  { %3021 = vmatmul.mubr.msk.bf16.vlgmr.msra.gmra.mrb[52].mxu0 %vm197_vm0, %v2479_v22 }
0x107a   :  { %v2533_v54 = vpop.f32.mrb[52].mxu0 }
0x107b   :  { %v2534_v16 = vadd.f32 %v2761_v37, %v2533_v54  ;;  %v3022_v62 = vpop.f32.mrb[53].mxu0 }
0x107c   :  { %v2536_v9 = vpop.f32.mrb[54].mxu0 }
0x107d   :  { %v2765_v25 = vmul.f32 -1.442695, %v2534_v16  ;;  %v2537_v43 = vadd.f32 %v2761_v37, %v2536_v9  ;;  %v3023_v51 = vpop.f32.mrb[55].mxu0 }
0x107f   :  { %3172 = vpow2.f32 %v2765_v25  ;;  %v2766_v28 = vmul.f32 -1.442695, %v2537_v43 }
0x1081   :  { %3174 = vpow2.f32 %v2766_v28 }
0x1089   :  { %v3173_v55 = vpop.eup %3172 }
0x108a   :  { %v2546_v27 = vadd.f32 1.0, %v3173_v55 }
0x108b   :  { %v3175_v24 = vpop.eup %3174 }
0x108c   :  { %3176 = vrcp.f32 %v2546_v27  ;;  %v2547_v7 = vadd.f32 1.0, %v3175_v24 }
0x108e   :  { %3178 = vrcp.f32 %v2547_v7 }
0x1096   :  { %v3177_v29 = vpop.eup %3176 }
0x1097   :  { %v2552_v10 = vmul.f32 %v3177_v29, %v2534_v16 }
0x1098   :  { %v3179_v26 = vpop.eup %3178 }
0x1099   :  { %v2553_v23 = vmul.f32 %v3179_v26, %v2537_v43 }
0x109b   :  { %v2554_v4 = vpack.c.bf16 %v2553_v23, %v2552_v10 }
0x109d   :  { %3033 = vmatmul.mubr.msk.bf16.vlgmr.msra.gmra.mrb[48].mxu1 %vm341_vm2, %v2554_v4 }
0x1170   :  { %v2620_v63 = vpop.f32.mrb[48].mxu1 }
0x1171   :  { %v2621_v34 = vadd.f32 %v2767_v60, %v2620_v63  ;;  %v3034_v59 = vpop.f32.mrb[49].mxu1 }
0x1172   :  { %v2623_v18 = vpop.f32.mrb[50].mxu1 }
0x1173   :  { %v2627_v35 = vmul.f32 0.5, %v2621_v34  ;;  %v2624_v41 = vadd.f32 %v2767_v60, %v2623_v18  ;;  %v3035_v42 = vpop.f32.mrb[51].mxu1 }
0x1175   :  { %v2628_v3 = vmul.f32 0.5, %v2624_v41  ;;  %v2629_v0 = vadd.f32 %v2627_v35, %v4441_v17 }
0x1177   :  { %v2633_v47 = vsel %vm197_vm0, %v2629_v0, 0.0  ;;  %v2630_v36 = vadd.f32 %v2628_v3, %v4444_v5 }
0x1178   :  { %2634 = vadd.xlane.f32.xlu1 %v2633_v47 }
0x1179   :  { %v2636_v57 = vsel %vm197_vm0, %v2630_v36, 0.0 }
0x117a   :  { %2637 = vadd.xlane.f32.xlu0 %v2636_v57 }
0x1205   :  { %v2635_v44 = vpop.xlane.xlu1 %2634 }
0x1206   :  { %v2639_v1 = vmul.f32 0.03125, %v2635_v44 }
0x1207   :  { %v2638_v48 = vpop.xlane.xlu0 %2637 }
0x1208   :  { %v2641_v20 = vsub.f32 %v2629_v0, %v2639_v1  ;;  %v2640_v40 = vmul.f32 0.03125, %v2638_v48 }
0x120a   :  { %v2642_v50 = vsub.f32 %v2630_v36, %v2640_v40  ;;  %v2643_v56 = vmul.f32 %v2641_v20, %v2641_v20 }
0x120c   :  { %v2645_v32 = vsel %vm197_vm0, %v2643_v56, 0.0  ;;  %v2644_v46 = vmul.f32 %v2642_v50, %v2642_v50 }
0x120d   :  { %2646 = vadd.xlane.f32.xlu1 %v2645_v32 }
0x120e   :  { %v2648_v17 = vsel %vm197_vm0, %v2644_v46, 0.0 }
0x120f   :  { %2649 = vadd.xlane.f32.xlu0 %v2648_v17 }
0x129a   :  { %v2647_v6 = vpop.xlane.xlu1 %2646 }
0x129b   :  { %v2651_v5 = vmul.f32 0.03125, %v2647_v6 }
0x129c   :  { %v2650_v21 = vpop.xlane.xlu0 %2649 }
0x129d   :  { %v2653_v31 = vadd.f32 1e-05, %v2651_v5  ;;  %v2652_v8 = vmul.f32 0.03125, %v2650_v21 }
0x129f   :  { %3180 = vrsqrt.f32 %v2653_v31  ;;  %v2654_v45 = vadd.f32 1e-05, %v2652_v8 }
0x12a1   :  { %3182 = vrsqrt.f32 %v2654_v45 }
0x12a9   :  { %v3181_v53 = vpop.eup %3180 }
0x12aa   :  { %v2657_v30 = vmul.f32 %v3181_v53, %v2641_v20 }
0x12ab   :  { %v3183_v14 = vpop.eup %3182 }
0x12ac   :  { %v2663_v15 = vmul.f32 %v2773_v12, %v2657_v30  ;;  %v2658_v58 = vmul.f32 %v3183_v14, %v2642_v50 }
0x12ae   :  { %v2664_v19 = vmul.f32 %v2773_v12, %v2658_v58  ;;  %v2669_v11 = vadd.f32 %v2774_v49, %v2663_v15 }
0x12b0   :  { %v2670_v52 = vadd.f32 %v2774_v49, %v2664_v19  ;;  %2671 = vst.msk [vmem:[#allocation17] sm:$0xff] %vm197_vm0, %v2669_v11 }
0x12b2   :  { %2672 = vst.msk [vmem:[#allocation17 + $0x8] sm:$0xff] %vm197_vm0, %v2670_v52 }
0x12b3   :  { %3393 = shalt.err (!%p3390_p6)
}
0x12b4   :  { %s3394_s15 = scalar_lea.hbm %s4525_s17, 256 }
0x12b5   :  { %p3395_p7 = scmp.ne.s32.totalorder %s4525_s17, %s3394_s15  ;;  %p3398_p8 = scmp.lt.u32.totalorder %s3394_s15, %s4525_s17 }
0x12b7   :  { %p3400_p9 = pnand %p3398_p8, %p3395_p7 }
0x12b9   :  { %3403 = shalt.err (!%p3400_p9)
}
0x12ba   :  { %s3438_s0 = smov 128  }
0x12bb   :  { %2684 = dma.vmem_to_hbm [thread:$0]  %s2679_s4, 256, %s4525_s17, [#allocation4], %s3438_s0, %s3438_s0, %s3435_s22  }
0x12bc   :  { %3414 = dma.done.wait [#allocation4], 256  }
0x12bd   :  { %3415 = vsyncadd [#allocation4], 4294967040 }
0x12be   :  { %2688 = vsyncpa [#allocation3], 1 }
0x12bf   :  { %2689 = vsyncpa [#allocation6], 1 }
0x12c0   :  { %2690 = vsyncpa [#allocation9], 1 }
0x12c1   :  { %2691 = vsyncpa [#allocation12], 1 }
0x12c2   :  { %2692 = vsyncpa [#allocation15], 1 }
0x12c3   :  { %2693 = vsyncpa [#allocation4], 1 }

</bundles_post_ra>
